<compile_context>
chip_gen: v5e
topology: v5e:2x2
jax: 0.10.0
libtpu: 0.0.40
codegen_flags: <defaults>
</compile_context>

<pallas_src>
import jax
import jax.numpy as jnp
from jax.experimental import pallas as pl
from jax.experimental.pallas import tpu as pltpu

IN_FEATURES = 120 * 120 * 3          # 43200
HIDDEN = 64
OUT = 3
OUT_PAD = 128                        # lane-dense output width
MAX_TB = 64                          # batch-tile cap (sized for v7x 64 MiB VMEM)


def ann_kernel(x_ref, w1_ref, b1_ref, w2_ref, b2_ref, o_ref):
    """Fused fc1 -> ReLU -> fc2 for one batch tile (W1 resident in VMEM)."""
    x = x_ref[...].astype(jnp.bfloat16)               # cast in-kernel (no extra HBM pass)
    # fc1 on the MXU: (TB, K) bf16 @ (K, HIDDEN) bf16 -> f32 accumulation
    h = jnp.dot(x, w1_ref[...], preferred_element_type=jnp.float32)
    h = jnp.maximum(h + b1_ref[...], 0.0)             # ReLU(fc1 + b1)
    # fc2: (TB, HIDDEN) f32 @ (HIDDEN, OUT_PAD) f32 -> lane-dense store
    o_ref[...] = (jnp.dot(h, w2_ref[...], preferred_element_type=jnp.float32)
                  + b2_ref[...]).astype(o_ref.dtype)


def prepare_params(w1, b1, w2, b2):
    """One-time parameter prep: bf16 cast of the big weight, lane-dense fc2 pad."""
    w1p = w1.astype(jnp.bfloat16)                                         # (43200, 64)
    b1p = b1.astype(jnp.float32).reshape(1, HIDDEN)                       # (1, 64)
    w2p = jnp.pad(w2.astype(jnp.float32), ((0, 0), (0, OUT_PAD - OUT)))   # (64, 128)
    b2p = jnp.pad(b2.astype(jnp.float32).reshape(1, OUT),
                  ((0, 0), (0, OUT_PAD - OUT)))                           # (1, 128)
    return w1p, b1p, w2p, b2p


def ann_forward(img, w1p, b1, w2p, b2p):
    B = img.shape[0]
    x = img.reshape(B, IN_FEATURES)                   # torch .view: free, stays f32

    # batch tile: next multiple of 8 >= B, capped at MAX_TB (static at trace time)
    tb = min(MAX_TB, ((B + 7) // 8) * 8)
    Bp = pl.cdiv(B, tb) * tb
    if Bp != B:                                       # pad only the (cheap) batch axis
        x = jnp.pad(x, ((0, Bp - B), (0, 0)))

    out = pl.pallas_call(
        ann_kernel,
        out_shape=jax.ShapeDtypeStruct((Bp, OUT_PAD), jnp.float32),
        grid_spec=pltpu.PrefetchScalarGridSpec(
            num_scalar_prefetch=0,
            grid=(Bp // tb,),                                             # batch tiles only
            in_specs=[
                pl.BlockSpec((tb, IN_FEATURES), lambda i: (i, 0)),        # x (f32, streamed)
                pl.BlockSpec((IN_FEATURES, HIDDEN), lambda i: (0, 0),
                             pipeline_mode=pl.Buffered(1)),               # W1: fetched once, single buffer
                pl.BlockSpec((1, HIDDEN), lambda i: (0, 0)),              # b1
                pl.BlockSpec((HIDDEN, OUT_PAD), lambda i: (0, 0)),        # W2 (lane-padded)
                pl.BlockSpec((1, OUT_PAD), lambda i: (0, 0)),             # b2 (lane-padded)
            ],
            out_specs=pl.BlockSpec((tb, OUT_PAD), lambda i: (i, 0)),      # lane-dense stores
        ),
        compiler_params=pltpu.CompilerParams(
            dimension_semantics=("parallel",),        # megacore/multi-TC over batch tiles
            vmem_limit_bytes=56 * 1024 * 1024,        # fits v7x's 64 MiB physical VMEM
        ),
    )(x, w1p, b1, w2p, b2p)
    return out[:B, :OUT]


def ann_reference_f32(img, w1, b1, w2, b2):
    x = img.reshape(img.shape[0], -1)
    h = jnp.maximum(x @ w1 + b1, 0.0)
    return h @ w2 + b2


def ann_reference_bf16(img, w1, b1, w2, b2):
    # Same math the kernel does: bf16 MXU inputs for fc1, f32 accumulation.
    x = img.reshape(img.shape[0], -1).astype(jnp.bfloat16)
    h = jnp.dot(x, w1.astype(jnp.bfloat16), preferred_element_type=jnp.float32) + b1
    h = jnp.maximum(h, 0.0)
    return jnp.dot(h, w2, preferred_element_type=jnp.float32) + b2


if __name__ == "__main__":
    key = jax.random.PRNGKey(0)
    k_img, k_w1, k_b1, k_w2, k_b2 = jax.random.split(key, 5)

    # deterministic synthetic parameters (shapes from nn.Linear in __init__)
    w1 = jax.random.normal(k_w1, (IN_FEATURES, HIDDEN), jnp.float32) / jnp.sqrt(IN_FEATURES)
    b1 = jax.random.normal(k_b1, (1, HIDDEN), jnp.float32) * 0.01
    w2 = jax.random.normal(k_w2, (HIDDEN, OUT), jnp.float32) / jnp.sqrt(HIDDEN)
    b2 = jax.random.normal(k_b2, (1, OUT), jnp.float32) * 0.01

    # small batch of NCHW images, as the PyTorch forward expects
    img = jax.random.normal(k_img, (2, 3, 120, 120), jnp.float32)

    params = prepare_params(w1, b1, w2, b2)      # one-time bf16 cast / lane pad
    fwd = jax.jit(ann_forward)
    out = jax.block_until_ready(fwd(img, *params))

    assert out.shape == (2, OUT)
    # kernel vs identical bf16-input / f32-accum math (tolerance loosened for
    # MXU accumulation-order differences over K=43200)
    ref_bf16 = ann_reference_bf16(img, w1, b1, w2, b2)
    assert jnp.allclose(out, ref_bf16, rtol=5e-3, atol=5e-3), "mismatch vs bf16 reference"
    # semantic check against the full-f32 PyTorch forward (bf16 MXU streaming is
    # an inference-precision choice; f32 accumulation keeps it within ~1e-2)
    ref_f32 = ann_reference_f32(img, w1, b1, w2, b2)
    assert jnp.allclose(out, ref_f32, rtol=2e-2, atol=2e-2), "mismatch vs f32 reference"
    print("KERNEL_OK")
</pallas_src>

<mosaic_0001>
module attributes {stable_mosaic.version = 11 : i64} {
  func.func @ann_kernel(%arg0: i32, %arg1: memref<8x43200xf32, #tpu.memory_space<vmem>>, %arg2: memref<43200x64xbf16, #tpu.memory_space<vmem>>, %arg3: memref<1x64xf32, #tpu.memory_space<vmem>>, %arg4: memref<64x128xf32, #tpu.memory_space<vmem>>, %arg5: memref<1x128xf32, #tpu.memory_space<vmem>>, %arg6: memref<8x128xf32, #tpu.memory_space<vmem>>) attributes {dimension_semantics = [#tpu.dimension_semantics<parallel>], iteration_bounds = array<i64: 1>, scalar_prefetch = 0 : i64, scratch_operands = 0 : i64, tpu.core_type = #tpu.core_type<tc>, window_params = [{transform_indices = @transform_0, window_bounds = array<i64: 8, 43200>}, {pipeline_mode = #tpu.pipeline_mode<synchronous>, transform_indices = @transform_1, window_bounds = array<i64: 43200, 64>}, {pipeline_mode = #tpu.pipeline_mode<synchronous>, transform_indices = @transform_2, window_bounds = array<i64: 1, 64>}, {pipeline_mode = #tpu.pipeline_mode<synchronous>, transform_indices = @transform_3, window_bounds = array<i64: 64, 128>}, {pipeline_mode = #tpu.pipeline_mode<synchronous>, transform_indices = @transform_4, window_bounds = array<i64: 1, 128>}, {transform_indices = @transform_5, window_bounds = array<i64: 8, 128>}]} {
    %c0 = arith.constant 0 : index
    %c0_0 = arith.constant 0 : index
    %0 = vector.load %arg1[%c0, %c0_0] : memref<8x43200xf32, #tpu.memory_space<vmem>>, vector<8x43200xf32>
    %1 = arith.truncf %0 : vector<8x43200xf32> to vector<8x43200xbf16>
    %c0_1 = arith.constant 0 : index
    %c0_2 = arith.constant 0 : index
    %2 = vector.load %arg2[%c0_1, %c0_2] : memref<43200x64xbf16, #tpu.memory_space<vmem>>, vector<43200x64xbf16>
    %cst = arith.constant dense<0.000000e+00> : vector<8x64xf32>
    %3 = tpu.matmul %1, %2, %cst {dimension_numbers = #tpu.dot_dimension_numbers<[1], [0], [0], [1], [0, 0, 1, 1], [], []>} : vector<8x43200xbf16>, vector<43200x64xbf16>, vector<8x64xf32> -> vector<8x64xf32>
    %c0_3 = arith.constant 0 : index
    %c0_4 = arith.constant 0 : index
    %4 = vector.load %arg3[%c0_3, %c0_4] : memref<1x64xf32, #tpu.memory_space<vmem>>, vector<1x64xf32>
    %5 = vector.broadcast %4 : vector<1x64xf32> to vector<8x64xf32>
    %6 = arith.addf %3, %5 : vector<8x64xf32>
    %cst_5 = arith.constant 0.000000e+00 : f32
    %7 = vector.broadcast %cst_5 : f32 to vector<8x64xf32>
    %8 = arith.maximumf %6, %7 : vector<8x64xf32>
    %c0_6 = arith.constant 0 : index
    %c0_7 = arith.constant 0 : index
    %9 = vector.load %arg4[%c0_6, %c0_7] : memref<64x128xf32, #tpu.memory_space<vmem>>, vector<64x128xf32>
    %cst_8 = arith.constant dense<0.000000e+00> : vector<8x128xf32>
    %10 = tpu.matmul %8, %9, %cst_8 {dimension_numbers = #tpu.dot_dimension_numbers<[1], [0], [0], [1], [0, 0, 1, 1], [], []>} : vector<8x64xf32>, vector<64x128xf32>, vector<8x128xf32> -> vector<8x128xf32>
    %c0_9 = arith.constant 0 : index
    %c0_10 = arith.constant 0 : index
    %11 = vector.load %arg5[%c0_9, %c0_10] : memref<1x128xf32, #tpu.memory_space<vmem>>, vector<1x128xf32>
    %12 = vector.broadcast %11 : vector<1x128xf32> to vector<8x128xf32>
    %13 = arith.addf %10, %12 : vector<8x128xf32>
    %c0_11 = arith.constant 0 : index
    %c0_12 = arith.constant 0 : index
    %14 = vector.load %arg6[%c0_11, %c0_12] : memref<8x128xf32, #tpu.memory_space<vmem>>, vector<8x128xf32>
    tpu.vector_store %arg6[%c0_11, %c0_12], %13 {strides = array<i32>} : memref<8x128xf32, #tpu.memory_space<vmem>>, vector<8x128xf32>,
    return
  }
  func.func @transform_0(%arg0: i32) -> (i32, i32) {
    %c0_i32 = arith.constant 0 : i32
    %c0_i32_0 = arith.constant 0 : i32
    return %arg0, %c0_i32 : i32, i32
  }
  func.func @transform_1(%arg0: i32) -> (i32, i32) {
    %c0_i32 = arith.constant 0 : i32
    %c0_i32_0 = arith.constant 0 : i32
    %c0_i32_1 = arith.constant 0 : i32
    return %c0_i32, %c0_i32_0 : i32, i32
  }
  func.func @transform_2(%arg0: i32) -> (i32, i32) {
    %c0_i32 = arith.constant 0 : i32
    %c0_i32_0 = arith.constant 0 : i32
    %c0_i32_1 = arith.constant 0 : i32
    return %c0_i32, %c0_i32_0 : i32, i32
  }
  func.func @transform_3(%arg0: i32) -> (i32, i32) {
    %c0_i32 = arith.constant 0 : i32
    %c0_i32_0 = arith.constant 0 : i32
    %c0_i32_1 = arith.constant 0 : i32
    return %c0_i32, %c0_i32_0 : i32, i32
  }
  func.func @transform_4(%arg0: i32) -> (i32, i32) {
    %c0_i32 = arith.constant 0 : i32
    %c0_i32_0 = arith.constant 0 : i32
    %c0_i32_1 = arith.constant 0 : i32
    return %c0_i32, %c0_i32_0 : i32, i32
  }
  func.func @transform_5(%arg0: i32) -> (i32, i32) {
    %c0_i32 = arith.constant 0 : i32
    %c0_i32_0 = arith.constant 0 : i32
    return %arg0, %c0_i32 : i32, i32
  }
}

</mosaic_0001>

<bundles_post_ra>
// kernel: ann_forward.1
= control target key start
LH: loop header
LB: loop body
LE: loop exit
PB: predicated region body
PF: predicated region fallthrough
CT: control target
= control target key end

     0   :  { %vm22301_vm0 = vcmask 523264   ;;  %s49651_s1 = inlined_call_operand.vmem [shape: bf16[43200,64], index: 1, kind: input, shape index: {}]   ;;  %s49652_s0 = inlined_call_operand.vmem [shape: f32[8,43200], index: 0, kind: input, shape index: {}]   ;;  %s49653_s2 = inlined_call_operand.vmem [shape: f32[1,64], index: 2, kind: input, shape index: {}]   ;;  %s49654_s4 = inlined_call_operand.vmem [shape: f32[1,128], index: 4, kind: input, shape index: {}]   ;;  %s49655_s3 = inlined_call_operand.vmem [shape: f32[64,128], index: 3, kind: input, shape index: {}]   ;;  %s49656_s5 = inlined_call_operand.vmem [shape: f32[8,128], index: 5, kind: output, shape index: {}]  }
   0x1   :  { %v37549_v0 = vld [vmem:[%s49651_s1 + $0x38] sm:$0xff]  ;;  %v37548_v4 = vld [vmem:[%s49651_s1 + $0x30] sm:$0xff]  ;;  %v37547_v8 = vld [vmem:[%s49651_s1 + $0x28] sm:$0xff] }
   0x2   :  { %v37565_v1 = vld [vmem:[%s49651_s1 + $0xb8] sm:$0xff]  ;;  %22305 = vmatpush.bf16.msra.mxu0 %v37549_v0  ;;  %v37564_v5 = vld [vmem:[%s49651_s1 + $0xb0] sm:$0xff]  ;;  %v37563_v9 = vld [vmem:[%s49651_s1 + $0xa8] sm:$0xff] }
   0x3   :  { %v37557_v2 = vld [vmem:[%s49651_s1 + $0x78] sm:$0xff]  ;;  %22331 = vmatpush.bf16.msra.mxu2 %v37565_v1  ;;  %v37556_v6 = vld [vmem:[%s49651_s1 + $0x70] sm:$0xff]  ;;  %v37555_v10 = vld [vmem:[%s49651_s1 + $0x68] sm:$0xff] }
   0x4   :  { %v37573_v3 = vld [vmem:[%s49651_s1 + $0xf8] sm:$0xff]  ;;  %22318 = vmatpush.bf16.msra.mxu1 %v37557_v2  ;;  %v37572_v7 = vld [vmem:[%s49651_s1 + $0xf0] sm:$0xff]  ;;  %v37571_v11 = vld [vmem:[%s49651_s1 + $0xe8] sm:$0xff] }
   0x5   :  { %22344 = vmatpush.bf16.msra.mxu3 %v37573_v3  ;;  %v37546_v12 = vld [vmem:[%s49651_s1 + $0x20] sm:$0xff]  ;;  %v37545_v16 = vld [vmem:[%s49651_s1 + $0x18] sm:$0xff]  ;;  %v37544_v20 = vld [vmem:[%s49651_s1 + $0x10] sm:$0xff] }
   0x6   :  { %22306 = vmatpush.bf16.msra.mxu0 %v37548_v4  ;;  %v37562_v13 = vld [vmem:[%s49651_s1 + $0xa0] sm:$0xff]  ;;  %v37561_v17 = vld [vmem:[%s49651_s1 + $0x98] sm:$0xff]  ;;  %v37560_v21 = vld [vmem:[%s49651_s1 + $0x90] sm:$0xff] }
   0x7   :  { %22332 = vmatpush.bf16.msra.mxu2 %v37564_v5  ;;  %v37554_v14 = vld [vmem:[%s49651_s1 + $0x60] sm:$0xff]  ;;  %v37553_v18 = vld [vmem:[%s49651_s1 + $0x58] sm:$0xff]  ;;  %v37552_v22 = vld [vmem:[%s49651_s1 + $0x50] sm:$0xff] }
   0x8   :  { %22319 = vmatpush.bf16.msra.mxu1 %v37556_v6  ;;  %v37570_v15 = vld [vmem:[%s49651_s1 + $0xe0] sm:$0xff]  ;;  %v37569_v19 = vld [vmem:[%s49651_s1 + $0xd8] sm:$0xff]  ;;  %v37568_v23 = vld [vmem:[%s49651_s1 + $0xd0] sm:$0xff] }
   0x9   :  { %22345 = vmatpush.bf16.msra.mxu3 %v37572_v7  ;;  %v37543_v24 = vld [vmem:[%s49651_s1 + $0x8] sm:$0xff]  ;;  %v37542_v28 = vld [vmem:[%s49651_s1] sm:$0xff]  ;;  %v37581_v30 = vld [vmem:[%s49651_s1 + $0x138] sm:$0xff] }
   0xa   :  { %22307 = vmatpush.bf16.msra.mxu0 %v37547_v8  ;;  %v37559_v25 = vld [vmem:[%s49651_s1 + $0x88] sm:$0xff]  ;;  %v37558_v29 = vld [vmem:[%s49651_s1 + $0x80] sm:$0xff]  ;;  %v37597_v31 = vld [vmem:[%s49651_s1 + $0x1b8] sm:$0xff] }
   0xb   :  { %22333 = vmatpush.bf16.msra.mxu2 %v37563_v9  ;;  %v37551_v26 = vld [vmem:[%s49651_s1 + $0x48] sm:$0xff]  ;;  %v23_v32 = vld [vmem:[%s49652_s0 + $0x10] sm:$0xff]  ;;  %v21_v33 = vld [vmem:[%s49652_s0] sm:$0xff] }
   0xc   :  { %22320 = vmatpush.bf16.msra.mxu1 %v37555_v10  ;;  %v37567_v27 = vld [vmem:[%s49651_s1 + $0xc8] sm:$0xff]  ;;  %v37550_v34 = vld [vmem:[%s49651_s1 + $0x40] sm:$0xff]  ;;  %v37589_v36 = vld [vmem:[%s49651_s1 + $0x178] sm:$0xff]  ;;  %v361_v40 = vpack.c.bf16 %v23_v32, %v23_v32  ;;  %v359_v41 = vpack.c.bf16 %v21_v33, %v21_v33 }
   0xd   :  { %22346 = vmatpush.bf16.msra.mxu3 %v37571_v11  ;;  %v37566_v35 = vld [vmem:[%s49651_s1 + $0xc0] sm:$0xff]  ;;  %v37605_v37 = vld [vmem:[%s49651_s1 + $0x1f8] sm:$0xff]  ;;  %v22_v39 = vld [vmem:[%s49652_s0 + $0x8] sm:$0xff] }
   0xe   :  { %22308 = vmatpush.bf16.msra.mxu0 %v37546_v12  ;;  %v24_v38 = vld [vmem:[%s49652_s0 + $0x18] sm:$0xff]  ;;  %v37580_v42 = vld [vmem:[%s49651_s1 + $0x130] sm:$0xff]  ;;  %v360_v45 = vpack.c.bf16 %v22_v39, %v22_v39  ;;  %v37579_v48 = vld [vmem:[%s49651_s1 + $0x128] sm:$0xff] }
   0xf   :  { %22334 = vmatpush.bf16.msra.mxu2 %v37562_v13  ;;  %v37596_v43 = vld [vmem:[%s49651_s1 + $0x1b0] sm:$0xff]  ;;  %v362_v44 = vpack.c.bf16 %v24_v38, %v24_v38  ;;  %v37595_v49 = vld [vmem:[%s49651_s1 + $0x1a8] sm:$0xff]  ;;  %v37578_v52 = vld [vmem:[%s49651_s1 + $0x120] sm:$0xff] }
  0x10   :  { %22321 = vmatpush.bf16.msra.mxu1 %v37554_v14  ;;  %v37588_v46 = vld [vmem:[%s49651_s1 + $0x170] sm:$0xff]  ;;  %v37587_v50 = vld [vmem:[%s49651_s1 + $0x168] sm:$0xff]  ;;  %v37594_v53 = vld [vmem:[%s49651_s1 + $0x1a0] sm:$0xff] }
  0x11   :  { %22347 = vmatpush.bf16.msra.mxu3 %v37570_v15  ;;  %v37604_v47 = vld [vmem:[%s49651_s1 + $0x1f0] sm:$0xff]  ;;  %v37603_v51 = vld [vmem:[%s49651_s1 + $0x1e8] sm:$0xff]  ;;  %v37586_v54 = vld [vmem:[%s49651_s1 + $0x160] sm:$0xff] }
  0x12   :  { %22309 = vmatpush.bf16.msra.mxu0 %v37545_v16  ;;  %v37602_v55 = vld [vmem:[%s49651_s1 + $0x1e0] sm:$0xff]  ;;  %v37577_v56 = vld [vmem:[%s49651_s1 + $0x118] sm:$0xff]  ;;  %v37576_v60 = vld [vmem:[%s49651_s1 + $0x110] sm:$0xff] }
  0x13   :  { %22335 = vmatpush.bf16.msra.mxu2 %v37561_v17  ;;  %v37593_v57 = vld [vmem:[%s49651_s1 + $0x198] sm:$0xff]  ;;  %v37592_v61 = vld [vmem:[%s49651_s1 + $0x190] sm:$0xff]  ;;  %v37575_v0 = vld [vmem:[%s49651_s1 + $0x108] sm:$0xff] }
  0x14   :  { %22322 = vmatpush.bf16.msra.mxu1 %v37553_v18  ;;  %v37585_v58 = vld [vmem:[%s49651_s1 + $0x158] sm:$0xff]  ;;  %v37584_v62 = vld [vmem:[%s49651_s1 + $0x150] sm:$0xff]  ;;  %v37591_v1 = vld [vmem:[%s49651_s1 + $0x188] sm:$0xff] }
  0x15   :  { %22348 = vmatpush.bf16.msra.mxu3 %v37569_v19  ;;  %v37601_v59 = vld [vmem:[%s49651_s1 + $0x1d8] sm:$0xff]  ;;  %v37600_v63 = vld [vmem:[%s49651_s1 + $0x1d0] sm:$0xff]  ;;  %v37583_v2 = vld [vmem:[%s49651_s1 + $0x148] sm:$0xff] }
  0x16   :  { %22310 = vmatpush.bf16.msra.mxu0 %v37544_v20  ;;  %v37599_v3 = vld [vmem:[%s49651_s1 + $0x1c8] sm:$0xff]  ;;  %v37574_v4 = vld [vmem:[%s49651_s1 + $0x100] sm:$0xff]  ;;  %v37613_v6 = vld [vmem:[%s49651_s1 + $0x238] sm:$0xff] }
  0x17   :  { %22336 = vmatpush.bf16.msra.mxu2 %v37560_v21  ;;  %v37590_v5 = vld [vmem:[%s49651_s1 + $0x180] sm:$0xff]  ;;  %v37629_v7 = vld [vmem:[%s49651_s1 + $0x2b8] sm:$0xff]  ;;  %v27_v8 = vld [vmem:[%s49652_s0 + $0x30] sm:$0xff] }
  0x18   :  { %22323 = vmatpush.bf16.msra.mxu1 %v37552_v22  ;;  %v25_v9 = vld [vmem:[%s49652_s0 + $0x20] sm:$0xff]  ;;  %v37621_v12 = vld [vmem:[%s49651_s1 + $0x278] sm:$0xff]  ;;  %v26_v15 = vld [vmem:[%s49652_s0 + $0x28] sm:$0xff]  ;;  %v365_v16 = vpack.c.bf16 %v27_v8, %v27_v8 }
  0x19   :  { %22349 = vmatpush.bf16.msra.mxu3 %v37568_v23  ;;  %v37582_v10 = vld [vmem:[%s49651_s1 + $0x140] sm:$0xff]  ;;  %v37637_v13 = vld [vmem:[%s49651_s1 + $0x2f8] sm:$0xff]  ;;  %v363_v17 = vpack.c.bf16 %v25_v9, %v25_v9  ;;  %v37612_v18 = vld [vmem:[%s49651_s1 + $0x230] sm:$0xff]  ;;  %v364_v21 = vpack.c.bf16 %v26_v15, %v26_v15 }
  0x1a   :  { %22311 = vmatpush.bf16.msra.mxu0 %v37543_v24  ;;  %v37598_v11 = vld [vmem:[%s49651_s1 + $0x1c0] sm:$0xff]  ;;  %v28_v14 = vld [vmem:[%s49652_s0 + $0x38] sm:$0xff]  ;;  %v37628_v19 = vld [vmem:[%s49651_s1 + $0x2b0] sm:$0xff] }
  0x1b   :  { %22337 = vmatpush.bf16.msra.mxu2 %v37559_v25  ;;  %v366_v20 = vpack.c.bf16 %v28_v14, %v28_v14  ;;  %v37620_v22 = vld [vmem:[%s49651_s1 + $0x270] sm:$0xff]  ;;  %v37611_v24 = vld [vmem:[%s49651_s1 + $0x228] sm:$0xff]  ;;  %v37609_v32 = vld [vmem:[%s49651_s1 + $0x218] sm:$0xff] }
  0x1c   :  { %22324 = vmatpush.bf16.msra.mxu1 %v37551_v26  ;;  %v37636_v23 = vld [vmem:[%s49651_s1 + $0x2f0] sm:$0xff]  ;;  %v37627_v25 = vld [vmem:[%s49651_s1 + $0x2a8] sm:$0xff]  ;;  %v37625_v33 = vld [vmem:[%s49651_s1 + $0x298] sm:$0xff] }
  0x1d   :  { %22350 = vmatpush.bf16.msra.mxu3 %v37567_v27  ;;  %v37619_v26 = vld [vmem:[%s49651_s1 + $0x268] sm:$0xff]  ;;  %v37616_v38 = vld [vmem:[%s49651_s1 + $0x250] sm:$0xff]  ;;  %v37641_v8 = vld [vmem:[%s49651_s1 + $0x318] sm:$0xff] }
  0x1e   :  { %22312 = vmatpush.bf16.msra.mxu0 %v37542_v28  ;;  %v37635_v27 = vld [vmem:[%s49651_s1 + $0x2e8] sm:$0xff]  ;;  %v37610_v28 = vld [vmem:[%s49651_s1 + $0x220] sm:$0xff]  ;;  %v37632_v39 = vld [vmem:[%s49651_s1 + $0x2d0] sm:$0xff] }
  0x1f   :  { %22338 = vmatpush.bf16.msra.mxu2 %v37558_v29  ;;  %v37626_v29 = vld [vmem:[%s49651_s1 + $0x2a0] sm:$0xff]  ;;  %v37657_v9 = vld [vmem:[%s49651_s1 + $0x398] sm:$0xff]  ;;  %v37648_v14 = vld [vmem:[%s49651_s1 + $0x350] sm:$0xff] }
  0x20   :  { %22325 = vmatpush.bf16.msra.mxu1 %v37550_v34  ;;  %v37617_v34 = vld [vmem:[%s49651_s1 + $0x258] sm:$0xff]  ;;  %v37664_v15 = vld [vmem:[%s49651_s1 + $0x3d0] sm:$0xff] }
  0x21   :  { %22351 = vmatpush.bf16.msra.mxu3 %v37566_v35  ;;  %22313 = vmatmul.bf16.vlgmr.msra.gmra.mxu0 %v359_v41  ;;  %v37633_v35 = vld [vmem:[%s49651_s1 + $0x2d8] sm:$0xff]  ;;  %v37623_v41 = vld [vmem:[%s49651_s1 + $0x288] sm:$0xff] }
  0x22   :  { %22357 = vmatpush.bf16.msrb.mxu0 %v37581_v30  ;;  %22339 = vmatmul.bf16.vlgmr.msra.gmra.mxu2 %v361_v40  ;;  %v37618_v30 = vld [vmem:[%s49651_s1 + $0x260] sm:$0xff]  ;;  %v37607_v40 = vld [vmem:[%s49651_s1 + $0x208] sm:$0xff] }
  0x23   :  { %22383 = vmatpush.bf16.msrb.mxu2 %v37597_v31  ;;  %22326 = vmatmul.bf16.vlgmr.msra.gmra.mxu1 %v360_v45  ;;  %v37634_v31 = vld [vmem:[%s49651_s1 + $0x2e0] sm:$0xff] }
  0x24   :  { %22370 = vmatpush.bf16.msrb.mxu1 %v37589_v36  ;;  %22352 = vmatmul.bf16.vlgmr.msra.gmra.mxu3 %v362_v44  ;;  %v37608_v36 = vld [vmem:[%s49651_s1 + $0x210] sm:$0xff]  ;;  %v37606_v44 = vld [vmem:[%s49651_s1 + $0x200] sm:$0xff] }
  0x25   :  { %22396 = vmatpush.bf16.msrb.mxu3 %v37605_v37  ;;  %v37624_v37 = vld [vmem:[%s49651_s1 + $0x290] sm:$0xff]  ;;  %v37622_v45 = vld [vmem:[%s49651_s1 + $0x280] sm:$0xff] }
  0x26   :  { %22358 = vmatpush.bf16.msrb.mxu0 %v37580_v42  ;;  %v37615_v42 = vld [vmem:[%s49651_s1 + $0x248] sm:$0xff] }
  0x27   :  { %22384 = vmatpush.bf16.msrb.mxu2 %v37596_v43  ;;  %v37631_v43 = vld [vmem:[%s49651_s1 + $0x2c8] sm:$0xff] }
  0x28   :  { %22371 = vmatpush.bf16.msrb.mxu1 %v37588_v46  ;;  %v29_v46 = vld [vmem:[%s49652_s0 + $0x40] sm:$0xff] }
  0x29   :  { %22397 = vmatpush.bf16.msrb.mxu3 %v37604_v47  ;;  %v31_v47 = vld [vmem:[%s49652_s0 + $0x50] sm:$0xff] }
  0x2a   :  { %22359 = vmatpush.bf16.msrb.mxu0 %v37579_v48  ;;  %v37645_v48 = vld [vmem:[%s49651_s1 + $0x338] sm:$0xff] }
  0x2b   :  { %22385 = vmatpush.bf16.msrb.mxu2 %v37595_v49  ;;  %v37661_v49 = vld [vmem:[%s49651_s1 + $0x3b8] sm:$0xff] }
  0x2c   :  { %22372 = vmatpush.bf16.msrb.mxu1 %v37587_v50  ;;  %v37614_v50 = vld [vmem:[%s49651_s1 + $0x240] sm:$0xff] }
  0x2d   :  { %22398 = vmatpush.bf16.msrb.mxu3 %v37603_v51  ;;  %v37630_v51 = vld [vmem:[%s49651_s1 + $0x2c0] sm:$0xff] }
  0x2e   :  { %22360 = vmatpush.bf16.msrb.mxu0 %v37578_v52  ;;  %v30_v52 = vld [vmem:[%s49652_s0 + $0x48] sm:$0xff] }
  0x2f   :  { %22386 = vmatpush.bf16.msrb.mxu2 %v37594_v53  ;;  %v32_v53 = vld [vmem:[%s49652_s0 + $0x58] sm:$0xff] }
  0x30   :  { %22373 = vmatpush.bf16.msrb.mxu1 %v37586_v54  ;;  %v367_v54 = vpack.c.bf16 %v29_v46, %v29_v46  ;;  %v37682_v46 = vld [vmem:[%s49651_s1 + $0x460] sm:$0xff] }
  0x31   :  { %22399 = vmatpush.bf16.msrb.mxu3 %v37602_v55  ;;  %v369_v55 = vpack.c.bf16 %v31_v47, %v31_v47  ;;  %v37698_v47 = vld [vmem:[%s49651_s1 + $0x4e0] sm:$0xff] }
  0x32   :  { %22361 = vmatpush.bf16.msrb.mxu0 %v37577_v56  ;;  %v37653_v56 = vld [vmem:[%s49651_s1 + $0x378] sm:$0xff] }
  0x33   :  { %22387 = vmatpush.bf16.msrb.mxu2 %v37593_v57  ;;  %v37669_v57 = vld [vmem:[%s49651_s1 + $0x3f8] sm:$0xff] }
  0x34   :  { %22374 = vmatpush.bf16.msrb.mxu1 %v37585_v58  ;;  %v368_v58 = vpack.c.bf16 %v30_v52, %v30_v52  ;;  %v37672_v52 = vld [vmem:[%s49651_s1 + $0x410] sm:$0xff] }
  0x35   :  { %22400 = vmatpush.bf16.msrb.mxu3 %v37601_v59  ;;  %v370_v59 = vpack.c.bf16 %v32_v53, %v32_v53  ;;  %v37688_v53 = vld [vmem:[%s49651_s1 + $0x490] sm:$0xff] }
  0x36   :  { %22362 = vmatpush.bf16.msrb.mxu0 %v37576_v60  ;;  %v37644_v60 = vld [vmem:[%s49651_s1 + $0x330] sm:$0xff] }
  0x37   :  { %22388 = vmatpush.bf16.msrb.mxu2 %v37592_v61  ;;  %v37660_v61 = vld [vmem:[%s49651_s1 + $0x3b0] sm:$0xff] }
  0x38   :  { %22375 = vmatpush.bf16.msrb.mxu1 %v37584_v62  ;;  %v37652_v62 = vld [vmem:[%s49651_s1 + $0x370] sm:$0xff] }
  0x39   :  { %22401 = vmatpush.bf16.msrb.mxu3 %v37600_v63  ;;  %v37668_v63 = vld [vmem:[%s49651_s1 + $0x3f0] sm:$0xff] }
  0x3a   :  { %22363 = vmatpush.bf16.msrb.mxu0 %v37575_v0  ;;  %v37643_v0 = vld [vmem:[%s49651_s1 + $0x328] sm:$0xff] }
  0x3b   :  { %22389 = vmatpush.bf16.msrb.mxu2 %v37591_v1  ;;  %v37659_v1 = vld [vmem:[%s49651_s1 + $0x3a8] sm:$0xff] }
  0x3c   :  { %22376 = vmatpush.bf16.msrb.mxu1 %v37583_v2  ;;  %v37651_v2 = vld [vmem:[%s49651_s1 + $0x368] sm:$0xff] }
  0x3d   :  { %22402 = vmatpush.bf16.msrb.mxu3 %v37599_v3  ;;  %v37667_v3 = vld [vmem:[%s49651_s1 + $0x3e8] sm:$0xff] }
  0x3e   :  { %22364 = vmatpush.bf16.msrb.mxu0 %v37574_v4  ;;  %v37642_v4 = vld [vmem:[%s49651_s1 + $0x320] sm:$0xff] }
  0x3f   :  { %22390 = vmatpush.bf16.msrb.mxu2 %v37590_v5  ;;  %v37658_v5 = vld [vmem:[%s49651_s1 + $0x3a0] sm:$0xff] }
  0x40   :  { %22377 = vmatpush.bf16.msrb.mxu1 %v37582_v10  ;;  %v37649_v10 = vld [vmem:[%s49651_s1 + $0x358] sm:$0xff] }
  0x41   :  { %22403 = vmatpush.bf16.msrb.mxu3 %v37598_v11  ;;  %22365 = vmatmul.bf16.vlgmr.msrb.gmra.mxu0 %v363_v17  ;;  %v37665_v11 = vld [vmem:[%s49651_s1 + $0x3d8] sm:$0xff]  ;;  %v37655_v17 = vld [vmem:[%s49651_s1 + $0x388] sm:$0xff] }
  0x42   :  { %22409 = vmatpush.bf16.msra.mxu0 %v37613_v6  ;;  %22391 = vmatmul.bf16.vlgmr.msrb.gmra.mxu2 %v365_v16  ;;  %v37650_v6 = vld [vmem:[%s49651_s1 + $0x360] sm:$0xff]  ;;  %v37639_v16 = vld [vmem:[%s49651_s1 + $0x308] sm:$0xff] }
  0x43   :  { %22435 = vmatpush.bf16.msra.mxu2 %v37629_v7  ;;  %22378 = vmatmul.bf16.vlgmr.msrb.gmra.mxu1 %v364_v21  ;;  %v37666_v7 = vld [vmem:[%s49651_s1 + $0x3e0] sm:$0xff] }
  0x44   :  { %22422 = vmatpush.bf16.msra.mxu1 %v37621_v12  ;;  %22404 = vmatmul.bf16.vlgmr.msrb.gmra.mxu3 %v366_v20  ;;  %v37640_v12 = vld [vmem:[%s49651_s1 + $0x310] sm:$0xff]  ;;  %v37638_v20 = vld [vmem:[%s49651_s1 + $0x300] sm:$0xff] }
  0x45   :  { %22448 = vmatpush.bf16.msra.mxu3 %v37637_v13  ;;  %v37656_v13 = vld [vmem:[%s49651_s1 + $0x390] sm:$0xff]  ;;  %v37654_v21 = vld [vmem:[%s49651_s1 + $0x380] sm:$0xff] }
  0x46   :  { %22410 = vmatpush.bf16.msra.mxu0 %v37612_v18  ;;  %v37647_v18 = vld [vmem:[%s49651_s1 + $0x348] sm:$0xff] }
  0x47   :  { %22436 = vmatpush.bf16.msra.mxu2 %v37628_v19  ;;  %v37663_v19 = vld [vmem:[%s49651_s1 + $0x3c8] sm:$0xff] }
  0x48   :  { %22423 = vmatpush.bf16.msra.mxu1 %v37620_v22  ;;  %v33_v22 = vld [vmem:[%s49652_s0 + $0x60] sm:$0xff] }
  0x49   :  { %22449 = vmatpush.bf16.msra.mxu3 %v37636_v23  ;;  %v35_v23 = vld [vmem:[%s49652_s0 + $0x70] sm:$0xff] }
  0x4a   :  { %22411 = vmatpush.bf16.msra.mxu0 %v37611_v24  ;;  %v37677_v24 = vld [vmem:[%s49651_s1 + $0x438] sm:$0xff] }
  0x4b   :  { %22437 = vmatpush.bf16.msra.mxu2 %v37627_v25  ;;  %v37693_v25 = vld [vmem:[%s49651_s1 + $0x4b8] sm:$0xff] }
  0x4c   :  { %22424 = vmatpush.bf16.msra.mxu1 %v37619_v26  ;;  %v37646_v26 = vld [vmem:[%s49651_s1 + $0x340] sm:$0xff] }
  0x4d   :  { %22450 = vmatpush.bf16.msra.mxu3 %v37635_v27  ;;  %v37662_v27 = vld [vmem:[%s49651_s1 + $0x3c0] sm:$0xff] }
  0x4e   :  { %22412 = vmatpush.bf16.msra.mxu0 %v37610_v28  ;;  %v34_v28 = vld [vmem:[%s49652_s0 + $0x68] sm:$0xff] }
  0x4f   :  { %22438 = vmatpush.bf16.msra.mxu2 %v37626_v29  ;;  %v36_v29 = vld [vmem:[%s49652_s0 + $0x78] sm:$0xff] }
  0x50   :  { %22425 = vmatpush.bf16.msra.mxu1 %v37618_v30  ;;  %v371_v30 = vpack.c.bf16 %v33_v22, %v33_v22  ;;  %v37722_v22 = vld [vmem:[%s49651_s1 + $0x5a0] sm:$0xff] }
  0x51   :  { %22451 = vmatpush.bf16.msra.mxu3 %v37634_v31  ;;  %v373_v31 = vpack.c.bf16 %v35_v23, %v35_v23 }
  0x52   :  { %22413 = vmatpush.bf16.msra.mxu0 %v37609_v32  ;;  %v37685_v32 = vld [vmem:[%s49651_s1 + $0x478] sm:$0xff] }
  0x53   :  { %22439 = vmatpush.bf16.msra.mxu2 %v37625_v33  ;;  %v37701_v33 = vld [vmem:[%s49651_s1 + $0x4f8] sm:$0xff] }
  0x54   :  { %22426 = vmatpush.bf16.msra.mxu1 %v37617_v34  ;;  %v372_v34 = vpack.c.bf16 %v34_v28, %v34_v28  ;;  %v37705_v28 = vld [vmem:[%s49651_s1 + $0x518] sm:$0xff] }
  0x55   :  { %22452 = vmatpush.bf16.msra.mxu3 %v37633_v35  ;;  %v374_v35 = vpack.c.bf16 %v36_v29, %v36_v29  ;;  %v37721_v29 = vld [vmem:[%s49651_s1 + $0x598] sm:$0xff] }
  0x56   :  { %22414 = vmatpush.bf16.msra.mxu0 %v37608_v36  ;;  %v37676_v36 = vld [vmem:[%s49651_s1 + $0x430] sm:$0xff] }
  0x57   :  { %22440 = vmatpush.bf16.msra.mxu2 %v37624_v37  ;;  %v37692_v37 = vld [vmem:[%s49651_s1 + $0x4b0] sm:$0xff] }
  0x58   :  { %22427 = vmatpush.bf16.msra.mxu1 %v37616_v38  ;;  %v37684_v38 = vld [vmem:[%s49651_s1 + $0x470] sm:$0xff] }
  0x59   :  { %22453 = vmatpush.bf16.msra.mxu3 %v37632_v39  ;;  %v37700_v39 = vld [vmem:[%s49651_s1 + $0x4f0] sm:$0xff] }
  0x5a   :  { %22415 = vmatpush.bf16.msra.mxu0 %v37607_v40  ;;  %v37675_v40 = vld [vmem:[%s49651_s1 + $0x428] sm:$0xff] }
  0x5b   :  { %22441 = vmatpush.bf16.msra.mxu2 %v37623_v41  ;;  %v37691_v41 = vld [vmem:[%s49651_s1 + $0x4a8] sm:$0xff] }
  0x5c   :  { %22428 = vmatpush.bf16.msra.mxu1 %v37615_v42  ;;  %v37683_v42 = vld [vmem:[%s49651_s1 + $0x468] sm:$0xff] }
  0x5d   :  { %22454 = vmatpush.bf16.msra.mxu3 %v37631_v43  ;;  %v37699_v43 = vld [vmem:[%s49651_s1 + $0x4e8] sm:$0xff] }
  0x5e   :  { %22416 = vmatpush.bf16.msra.mxu0 %v37606_v44  ;;  %v37674_v44 = vld [vmem:[%s49651_s1 + $0x420] sm:$0xff] }
  0x5f   :  { %22442 = vmatpush.bf16.msra.mxu2 %v37622_v45  ;;  %v37690_v45 = vld [vmem:[%s49651_s1 + $0x4a0] sm:$0xff] }
  0x60   :  { %22429 = vmatpush.bf16.msra.mxu1 %v37614_v50  ;;  %v37681_v50 = vld [vmem:[%s49651_s1 + $0x458] sm:$0xff] }
  0x61   :  { %22455 = vmatpush.bf16.msra.mxu3 %v37630_v51  ;;  %22417 = vmatmul.bf16.vlgmr.msra.gmra.mxu0 %v367_v54  ;;  %v37697_v51 = vld [vmem:[%s49651_s1 + $0x4d8] sm:$0xff]  ;;  %v37680_v54 = vld [vmem:[%s49651_s1 + $0x450] sm:$0xff] }
  0x62   :  { %22461 = vmatpush.bf16.msrb.mxu0 %v37645_v48  ;;  %22443 = vmatmul.bf16.vlgmr.msra.gmra.mxu2 %v369_v55  ;;  %v37673_v48 = vld [vmem:[%s49651_s1 + $0x418] sm:$0xff]  ;;  %v37696_v55 = vld [vmem:[%s49651_s1 + $0x4d0] sm:$0xff] }
  0x63   :  { %22487 = vmatpush.bf16.msrb.mxu2 %v37661_v49  ;;  %22430 = vmatmul.bf16.vlgmr.msra.gmra.mxu1 %v368_v58  ;;  %v37689_v49 = vld [vmem:[%s49651_s1 + $0x498] sm:$0xff]  ;;  %v37679_v58 = vld [vmem:[%s49651_s1 + $0x448] sm:$0xff] }
  0x64   :  { %22474 = vmatpush.bf16.msrb.mxu1 %v37653_v56  ;;  %22456 = vmatmul.bf16.vlgmr.msra.gmra.mxu3 %v370_v59  ;;  %v37671_v56 = vld [vmem:[%s49651_s1 + $0x408] sm:$0xff] }
  0x65   :  { %22500 = vmatpush.bf16.msrb.mxu3 %v37669_v57  ;;  %v37687_v57 = vld [vmem:[%s49651_s1 + $0x488] sm:$0xff] }
  0x66   :  { %22462 = vmatpush.bf16.msrb.mxu0 %v37644_v60  ;;  %v37695_v59 = vld [vmem:[%s49651_s1 + $0x4c8] sm:$0xff]  ;;  %v37670_v60 = vld [vmem:[%s49651_s1 + $0x400] sm:$0xff] }
  0x67   :  { %22488 = vmatpush.bf16.msrb.mxu2 %v37660_v61  ;;  %v37686_v61 = vld [vmem:[%s49651_s1 + $0x480] sm:$0xff] }
  0x68   :  { %22475 = vmatpush.bf16.msrb.mxu1 %v37652_v62  ;;  %v37_v62 = vld [vmem:[%s49652_s0 + $0x80] sm:$0xff] }
  0x69   :  { %22501 = vmatpush.bf16.msrb.mxu3 %v37668_v63  ;;  %v39_v63 = vld [vmem:[%s49652_s0 + $0x90] sm:$0xff] }
  0x6a   :  { %22463 = vmatpush.bf16.msrb.mxu0 %v37643_v0  ;;  %v37709_v0 = vld [vmem:[%s49651_s1 + $0x538] sm:$0xff] }
  0x6b   :  { %22489 = vmatpush.bf16.msrb.mxu2 %v37659_v1  ;;  %v37725_v1 = vld [vmem:[%s49651_s1 + $0x5b8] sm:$0xff] }
  0x6c   :  { %22476 = vmatpush.bf16.msrb.mxu1 %v37651_v2  ;;  %v37678_v2 = vld [vmem:[%s49651_s1 + $0x440] sm:$0xff] }
  0x6d   :  { %22502 = vmatpush.bf16.msrb.mxu3 %v37667_v3  ;;  %v37694_v3 = vld [vmem:[%s49651_s1 + $0x4c0] sm:$0xff] }
  0x6e   :  { %22464 = vmatpush.bf16.msrb.mxu0 %v37642_v4  ;;  %v38_v4 = vld [vmem:[%s49652_s0 + $0x88] sm:$0xff] }
  0x6f   :  { %22490 = vmatpush.bf16.msrb.mxu2 %v37658_v5  ;;  %v40_v5 = vld [vmem:[%s49652_s0 + $0x98] sm:$0xff] }
  0x70   :  { %22477 = vmatpush.bf16.msrb.mxu1 %v37650_v6  ;;  %v375_v6 = vpack.c.bf16 %v37_v62, %v37_v62  ;;  %v37765_v62 = vld [vmem:[%s49651_s1 + $0x6f8] sm:$0xff] }
  0x71   :  { %22503 = vmatpush.bf16.msrb.mxu3 %v37666_v7  ;;  %v377_v7 = vpack.c.bf16 %v39_v63, %v39_v63 }
  0x72   :  { %22465 = vmatpush.bf16.msrb.mxu0 %v37641_v8  ;;  %v37717_v8 = vld [vmem:[%s49651_s1 + $0x578] sm:$0xff] }
  0x73   :  { %22491 = vmatpush.bf16.msrb.mxu2 %v37657_v9  ;;  %v37733_v9 = vld [vmem:[%s49651_s1 + $0x5f8] sm:$0xff] }
  0x74   :  { %22478 = vmatpush.bf16.msrb.mxu1 %v37649_v10  ;;  %v376_v10 = vpack.c.bf16 %v38_v4, %v38_v4  ;;  %v37764_v4 = vld [vmem:[%s49651_s1 + $0x6f0] sm:$0xff] }
  0x75   :  { %22504 = vmatpush.bf16.msrb.mxu3 %v37665_v11  ;;  %v378_v11 = vpack.c.bf16 %v40_v5, %v40_v5  ;;  %v37739_v5 = vld [vmem:[%s49651_s1 + $0x628] sm:$0xff] }
  0x76   :  { %22466 = vmatpush.bf16.msrb.mxu0 %v37640_v12  ;;  %v37708_v12 = vld [vmem:[%s49651_s1 + $0x530] sm:$0xff] }
  0x77   :  { %22492 = vmatpush.bf16.msrb.mxu2 %v37656_v13  ;;  %v37724_v13 = vld [vmem:[%s49651_s1 + $0x5b0] sm:$0xff] }
  0x78   :  { %22479 = vmatpush.bf16.msrb.mxu1 %v37648_v14  ;;  %v37716_v14 = vld [vmem:[%s49651_s1 + $0x570] sm:$0xff] }
  0x79   :  { %22505 = vmatpush.bf16.msrb.mxu3 %v37664_v15  ;;  %v37732_v15 = vld [vmem:[%s49651_s1 + $0x5f0] sm:$0xff] }
  0x7a   :  { %22467 = vmatpush.bf16.msrb.mxu0 %v37639_v16  ;;  %v37707_v16 = vld [vmem:[%s49651_s1 + $0x528] sm:$0xff] }
  0x7b   :  { %22493 = vmatpush.bf16.msrb.mxu2 %v37655_v17  ;;  %v37723_v17 = vld [vmem:[%s49651_s1 + $0x5a8] sm:$0xff] }
  0x7c   :  { %22480 = vmatpush.bf16.msrb.mxu1 %v37647_v18  ;;  %v37715_v18 = vld [vmem:[%s49651_s1 + $0x568] sm:$0xff] }
  0x7d   :  { %22506 = vmatpush.bf16.msrb.mxu3 %v37663_v19  ;;  %v37731_v19 = vld [vmem:[%s49651_s1 + $0x5e8] sm:$0xff] }
  0x7e   :  { %22468 = vmatpush.bf16.msrb.mxu0 %v37638_v20  ;;  %v40242_v20 = vld [vmem:[%s49653_s2] ss:$0 sm:$0xff] }
  0x7f   :  { %22494 = vmatpush.bf16.msrb.mxu2 %v37654_v21  ;;  %v37706_v21 = vld [vmem:[%s49651_s1 + $0x520] sm:$0xff] }
  0x80   :  { %22481 = vmatpush.bf16.msrb.mxu1 %v37646_v26 }
  0x81   :  { %22507 = vmatpush.bf16.msrb.mxu3 %v37662_v27  ;;  %22469 = vmatmul.bf16.vlgmr.msrb.gmra.mxu0 %v371_v30 }
  0x82   :  { %22513 = vmatpush.bf16.msra.mxu0 %v37677_v24  ;;  %22495 = vmatmul.bf16.vlgmr.msrb.gmra.mxu2 %v373_v31  ;;  %v37714_v24 = vld [vmem:[%s49651_s1 + $0x560] sm:$0xff]  ;;  %v37713_v31 = vld [vmem:[%s49651_s1 + $0x558] sm:$0xff] }
  0x83   :  { %22539 = vmatpush.bf16.msra.mxu2 %v37693_v25  ;;  %22482 = vmatmul.bf16.vlgmr.msrb.gmra.mxu1 %v372_v34  ;;  %v37730_v25 = vld [vmem:[%s49651_s1 + $0x5e0] sm:$0xff]  ;;  %v37704_v34 = vld [vmem:[%s49651_s1 + $0x510] sm:$0xff] }
  0x84   :  { %22526 = vmatpush.bf16.msra.mxu1 %v37685_v32  ;;  %22508 = vmatmul.bf16.vlgmr.msrb.gmra.mxu3 %v374_v35  ;;  %v37729_v32 = vld [vmem:[%s49651_s1 + $0x5d8] sm:$0xff]  ;;  %v37720_v35 = vld [vmem:[%s49651_s1 + $0x590] sm:$0xff] }
  0x85   :  { %22552 = vmatpush.bf16.msra.mxu3 %v37701_v33 }
  0x86   :  { %22514 = vmatpush.bf16.msra.mxu0 %v37676_v36 }
  0x87   :  { %22540 = vmatpush.bf16.msra.mxu2 %v37692_v37 }
  0x88   :  { %22527 = vmatpush.bf16.msra.mxu1 %v37684_v38 }
  0x89   :  { %22553 = vmatpush.bf16.msra.mxu3 %v37700_v39  ;;  %v37712_v39 = vld [vmem:[%s49651_s1 + $0x550] sm:$0xff] }
  0x8a   :  { %22515 = vmatpush.bf16.msra.mxu0 %v37675_v40  ;;  %v37728_v40 = vld [vmem:[%s49651_s1 + $0x5d0] sm:$0xff] }
  0x8b   :  { %22541 = vmatpush.bf16.msra.mxu2 %v37691_v41 }
  0x8c   :  { %22528 = vmatpush.bf16.msra.mxu1 %v37683_v42 }
  0x8d   :  { %22554 = vmatpush.bf16.msra.mxu3 %v37699_v43  ;;  %v37703_v43 = vld [vmem:[%s49651_s1 + $0x508] sm:$0xff] }
  0x8e   :  { %22516 = vmatpush.bf16.msra.mxu0 %v37674_v44  ;;  %v37719_v44 = vld [vmem:[%s49651_s1 + $0x588] sm:$0xff] }
  0x8f   :  { %22542 = vmatpush.bf16.msra.mxu2 %v37690_v45  ;;  %v37711_v45 = vld [vmem:[%s49651_s1 + $0x548] sm:$0xff] }
  0x90   :  { %22529 = vmatpush.bf16.msra.mxu1 %v37682_v46  ;;  %v37727_v46 = vld [vmem:[%s49651_s1 + $0x5c8] sm:$0xff] }
  0x91   :  { %22555 = vmatpush.bf16.msra.mxu3 %v37698_v47  ;;  %v37702_v47 = vld [vmem:[%s49651_s1 + $0x500] sm:$0xff] }
  0x92   :  { %22517 = vmatpush.bf16.msra.mxu0 %v37673_v48 }
  0x93   :  { %22543 = vmatpush.bf16.msra.mxu2 %v37689_v49  ;;  %v37718_v49 = vld [vmem:[%s49651_s1 + $0x580] sm:$0xff] }
  0x94   :  { %22530 = vmatpush.bf16.msra.mxu1 %v37681_v50  ;;  %v41_v50 = vld [vmem:[%s49652_s0 + $0xa0] sm:$0xff] }
  0x95   :  { %22556 = vmatpush.bf16.msra.mxu3 %v37697_v51  ;;  %v43_v51 = vld [vmem:[%s49652_s0 + $0xb0] sm:$0xff] }
  0x96   :  { %22518 = vmatpush.bf16.msra.mxu0 %v37672_v52  ;;  %v37741_v52 = vld [vmem:[%s49651_s1 + $0x638] sm:$0xff] }
  0x97   :  { %22544 = vmatpush.bf16.msra.mxu2 %v37688_v53  ;;  %v37757_v53 = vld [vmem:[%s49651_s1 + $0x6b8] sm:$0xff] }
  0x98   :  { %22531 = vmatpush.bf16.msra.mxu1 %v37680_v54  ;;  %v37710_v54 = vld [vmem:[%s49651_s1 + $0x540] sm:$0xff] }
  0x99   :  { %22557 = vmatpush.bf16.msra.mxu3 %v37696_v55 }
  0x9a   :  { %22519 = vmatpush.bf16.msra.mxu0 %v37671_v56  ;;  %v37726_v56 = vld [vmem:[%s49651_s1 + $0x5c0] sm:$0xff] }
  0x9b   :  { %22545 = vmatpush.bf16.msra.mxu2 %v37687_v57  ;;  %v42_v57 = vld [vmem:[%s49652_s0 + $0xa8] sm:$0xff] }
  0x9c   :  { %22532 = vmatpush.bf16.msra.mxu1 %v37679_v58  ;;  %v44_v58 = vld [vmem:[%s49652_s0 + $0xb8] sm:$0xff]  ;;  %v380_v63 = vpack.c.bf16 %v42_v57, %v42_v57  ;;  %v37771_v57 = vld [vmem:[%s49651_s1 + $0x728] sm:$0xff] }
  0x9d   :  { %22558 = vmatpush.bf16.msra.mxu3 %v37695_v59  ;;  %v379_v59 = vpack.c.bf16 %v41_v50, %v41_v50  ;;  %v37797_v50 = vld [vmem:[%s49651_s1 + $0x7f8] sm:$0xff] }
  0x9e   :  { %22520 = vmatpush.bf16.msra.mxu0 %v37670_v60  ;;  %v22314_v23 = vpop.f32.mrf.mxu0  ;;  %v381_v60 = vpack.c.bf16 %v43_v51, %v43_v51 }
  0x9f   :  { %22546 = vmatpush.bf16.msra.mxu2 %v37686_v61  ;;  %v22315_v26 = vadd.f32 %v40242_v20, %v22314_v23  ;;  %v37749_v61 = vld [vmem:[%s49651_s1 + $0x678] sm:$0xff]  ;;  %v37736_v23 = vld [vmem:[%s49651_s1 + $0x610] sm:$0xff] }
  0xa0   :  { %22533 = vmatpush.bf16.msra.mxu1 %v37678_v2  ;;  %v22327_v27 = vpop.f32.mrf.mxu1  ;;  %v37756_v2 = vld [vmem:[%s49651_s1 + $0x6b0] sm:$0xff]  ;;  %v37761_v20 = vld [vmem:[%s49651_s1 + $0x6d8] sm:$0xff] }
  0xa1   :  { %22559 = vmatpush.bf16.msra.mxu3 %v37694_v3  ;;  %22521 = vmatmul.bf16.vlgmr.msra.gmra.mxu0 %v375_v6  ;;  %v22328_v30 = vadd.f32 %v22327_v27, %v22315_v26  ;;  %v37748_v3 = vld [vmem:[%s49651_s1 + $0x670] sm:$0xff]  ;;  %v37755_v6 = vld [vmem:[%s49651_s1 + $0x6a8] sm:$0xff] }
  0xa2   :  { %22565 = vmatpush.bf16.msrb.mxu0 %v37709_v0  ;;  %22547 = vmatmul.bf16.vlgmr.msra.gmra.mxu2 %v377_v7  ;;  %v382_v0 = vpack.c.bf16 %v44_v58, %v44_v58  ;;  %v37747_v7 = vld [vmem:[%s49651_s1 + $0x668] sm:$0xff] }
  0xa3   :  { %22591 = vmatpush.bf16.msrb.mxu2 %v37725_v1  ;;  %22534 = vmatmul.bf16.vlgmr.msra.gmra.mxu1 %v376_v10  ;;  %v37740_v1 = vld [vmem:[%s49651_s1 + $0x630] sm:$0xff]  ;;  %v37754_v10 = vld [vmem:[%s49651_s1 + $0x6a0] sm:$0xff]  ;;  %v37787_v58 = vld [vmem:[%s49651_s1 + $0x7a8] sm:$0xff] }
  0xa4   :  { %22578 = vmatpush.bf16.msrb.mxu1 %v37717_v8  ;;  %22560 = vmatmul.bf16.vlgmr.msra.gmra.mxu3 %v378_v11  ;;  %v37763_v8 = vld [vmem:[%s49651_s1 + $0x6e8] sm:$0xff] }
  0xa5   :  { %22604 = vmatpush.bf16.msrb.mxu3 %v37733_v9  ;;  %v22340_v33 = vpop.f32.mrf.mxu2  ;;  %v37738_v9 = vld [vmem:[%s49651_s1 + $0x620] sm:$0xff] }
  0xa6   :  { %22566 = vmatpush.bf16.msrb.mxu0 %v37708_v12  ;;  %v22341_v36 = vadd.f32 %v22340_v33, %v22328_v30  ;;  %v22316_v38 = vpop.f32.mrf.mxu0  ;;  %v37743_v33 = vld [vmem:[%s49651_s1 + $0x648] sm:$0xff] }
  0xa7   :  { %22592 = vmatpush.bf16.msrb.mxu2 %v37724_v13  ;;  %v22353_v37 = vpop.f32.mrf.mxu3  ;;  %v37746_v13 = vld [vmem:[%s49651_s1 + $0x660] sm:$0xff] }
  0xa8   :  { %22579 = vmatpush.bf16.msrb.mxu1 %v37716_v14  ;;  %v22354_v41 = vadd.f32 %v22353_v37, %v22341_v36  ;;  %v22329_v42 = vpop.f32.mrf.mxu1  ;;  %v37762_v14 = vld [vmem:[%s49651_s1 + $0x6e0] sm:$0xff] }
  0xa9   :  { %22605 = vmatpush.bf16.msrb.mxu3 %v37732_v15  ;;  %v37734_v36 = vld [vmem:[%s49651_s1 + $0x600] sm:$0xff]  ;;  %v37789_v42 = vld [vmem:[%s49651_s1 + $0x7b8] sm:$0xff] }
  0xaa   :  { %22567 = vmatpush.bf16.msrb.mxu0 %v37707_v16  ;;  %v37750_v37 = vld [vmem:[%s49651_s1 + $0x680] sm:$0xff] }
  0xab   :  { %22593 = vmatpush.bf16.msrb.mxu2 %v37723_v17  ;;  %v37737_v17 = vld [vmem:[%s49651_s1 + $0x618] sm:$0xff]  ;;  %v45_v38 = vld [vmem:[%s49652_s0 + $0xc0] sm:$0xff] }
  0xac   :  { %22580 = vmatpush.bf16.msrb.mxu1 %v37715_v18  ;;  %v37753_v18 = vld [vmem:[%s49651_s1 + $0x698] sm:$0xff] }
  0xad   :  { %22606 = vmatpush.bf16.msrb.mxu3 %v37731_v19  ;;  %v22342_v48 = vpop.f32.mrf.mxu2  ;;  %v37745_v19 = vld [vmem:[%s49651_s1 + $0x658] sm:$0xff] }
  0xae   :  { %22568 = vmatpush.bf16.msrb.mxu0 %v37706_v21 }
  0xaf   :  { %22594 = vmatpush.bf16.msrb.mxu2 %v37722_v22  ;;  %v22355_v55 = vpop.f32.mrf.mxu3 }
  0xb0   :  { %22581 = vmatpush.bf16.msrb.mxu1 %v37714_v24  ;;  %v37752_v24 = vld [vmem:[%s49651_s1 + $0x690] sm:$0xff] }
  0xb1   :  { %22607 = vmatpush.bf16.msrb.mxu3 %v37730_v25  ;;  %v37780_v55 = vld [vmem:[%s49651_s1 + $0x770] sm:$0xff] }
  0xb2   :  { %22569 = vmatpush.bf16.msrb.mxu0 %v37705_v28  ;;  %v37744_v28 = vld [vmem:[%s49651_s1 + $0x650] sm:$0xff] }
  0xb3   :  { %22595 = vmatpush.bf16.msrb.mxu2 %v37721_v29  ;;  %v37760_v29 = vld [vmem:[%s49651_s1 + $0x6d0] sm:$0xff] }
  0xb4   :  { %22582 = vmatpush.bf16.msrb.mxu1 %v37713_v31  ;;  %v37735_v31 = vld [vmem:[%s49651_s1 + $0x608] sm:$0xff] }
  0xb5   :  { %22608 = vmatpush.bf16.msrb.mxu3 %v37729_v32  ;;  %v37751_v32 = vld [vmem:[%s49651_s1 + $0x688] sm:$0xff] }
  0xb6   :  { %22570 = vmatpush.bf16.msrb.mxu0 %v37704_v34  ;;  %v37759_v34 = vld [vmem:[%s49651_s1 + $0x6c8] sm:$0xff] }
  0xb7   :  { %22596 = vmatpush.bf16.msrb.mxu2 %v37720_v35 }
  0xb8   :  { %22583 = vmatpush.bf16.msrb.mxu1 %v37712_v39  ;;  %v47_v39 = vld [vmem:[%s49652_s0 + $0xd0] sm:$0xff] }
  0xb9   :  { %22609 = vmatpush.bf16.msrb.mxu3 %v37728_v40  ;;  %v385_v48 = vpack.c.bf16 %v47_v39, %v47_v39 }
  0xba   :  { %22571 = vmatpush.bf16.msrb.mxu0 %v37703_v43  ;;  %v37742_v43 = vld [vmem:[%s49651_s1 + $0x640] sm:$0xff] }
  0xbb   :  { %22597 = vmatpush.bf16.msrb.mxu2 %v37719_v44  ;;  %v37758_v44 = vld [vmem:[%s49651_s1 + $0x6c0] sm:$0xff] }
  0xbc   :  { %22584 = vmatpush.bf16.msrb.mxu1 %v37711_v45  ;;  %v46_v45 = vld [vmem:[%s49652_s0 + $0xc8] sm:$0xff] }
  0xbd   :  { %22610 = vmatpush.bf16.msrb.mxu3 %v37727_v46  ;;  %v48_v46 = vld [vmem:[%s49652_s0 + $0xd8] sm:$0xff]  ;;  %v384_v51 = vpack.c.bf16 %v46_v45, %v46_v45  ;;  %v37803_v45 = vld [vmem:[%s49651_s1 + $0x828] sm:$0xff] }
  0xbe   :  { %22572 = vmatpush.bf16.msrb.mxu0 %v37702_v47  ;;  %v22366_v11 = vpop.f32.mrf.mxu0  ;;  %v383_v47 = vpack.c.bf16 %v45_v38, %v45_v38  ;;  %v37829_v38 = vld [vmem:[%s49651_s1 + $0x8f8] sm:$0xff] }
  0xbf   :  { %22598 = vmatpush.bf16.msrb.mxu2 %v37718_v49  ;;  %v22367_v12 = vadd.f32 %v22366_v11, %v22354_v41  ;;  %v37773_v41 = vld [vmem:[%s49651_s1 + $0x738] sm:$0xff] }
  0xc0   :  { %22585 = vmatpush.bf16.msrb.mxu1 %v37710_v54  ;;  %v22379_v15 = vpop.f32.mrf.mxu1  ;;  %v37781_v49 = vld [vmem:[%s49651_s1 + $0x778] sm:$0xff]  ;;  %v37788_v54 = vld [vmem:[%s49651_s1 + $0x7b0] sm:$0xff] }
  0xc1   :  { %22611 = vmatpush.bf16.msrb.mxu3 %v37726_v56  ;;  %22573 = vmatmul.bf16.vlgmr.msrb.gmra.mxu0 %v379_v59  ;;  %v22380_v16 = vadd.f32 %v22379_v15, %v22367_v12  ;;  %v37796_v56 = vld [vmem:[%s49651_s1 + $0x7f0] sm:$0xff]  ;;  %v37779_v59 = vld [vmem:[%s49651_s1 + $0x768] sm:$0xff] }
  0xc2   :  { %22617 = vmatpush.bf16.msra.mxu0 %v37741_v52  ;;  %22599 = vmatmul.bf16.vlgmr.msrb.gmra.mxu2 %v381_v60  ;;  %v386_v52 = vpack.c.bf16 %v48_v46, %v48_v46  ;;  %v37795_v60 = vld [vmem:[%s49651_s1 + $0x7e8] sm:$0xff]  ;;  %v37784_v15 = vld [vmem:[%s49651_s1 + $0x790] sm:$0xff] }
  0xc3   :  { %22643 = vmatpush.bf16.msra.mxu2 %v37757_v53  ;;  %22586 = vmatmul.bf16.vlgmr.msrb.gmra.mxu1 %v380_v63  ;;  %v37772_v53 = vld [vmem:[%s49651_s1 + $0x730] sm:$0xff]  ;;  %v37770_v63 = vld [vmem:[%s49651_s1 + $0x720] sm:$0xff]  ;;  %v37819_v46 = vld [vmem:[%s49651_s1 + $0x8a8] sm:$0xff] }
  0xc4   :  { %22630 = vmatpush.bf16.msra.mxu1 %v37749_v61  ;;  %22612 = vmatmul.bf16.vlgmr.msrb.gmra.mxu3 %v382_v0  ;;  %v37786_v0 = vld [vmem:[%s49651_s1 + $0x7a0] sm:$0xff] }
  0xc5   :  { %22656 = vmatpush.bf16.msra.mxu3 %v37765_v62  ;;  %v22392_v21 = vpop.f32.mrf.mxu2 }
  0xc6   :  { %22618 = vmatpush.bf16.msra.mxu0 %v37740_v1  ;;  %v22393_v22 = vadd.f32 %v22392_v21, %v22380_v16  ;;  %v22368_v26 = vpop.f32.mrf.mxu0 }
  0xc7   :  { %22644 = vmatpush.bf16.msra.mxu2 %v37756_v2  ;;  %v22405_v25 = vpop.f32.mrf.mxu3  ;;  %v37782_v26 = vld [vmem:[%s49651_s1 + $0x780] sm:$0xff] }
  0xc8   :  { %22631 = vmatpush.bf16.msra.mxu1 %v37748_v3  ;;  %v22406_v27 = vadd.f32 %v22405_v25, %v22393_v22  ;;  %v22381_v30 = vpop.f32.mrf.mxu1  ;;  %v37778_v3 = vld [vmem:[%s49651_s1 + $0x760] sm:$0xff]  ;;  %v37775_v22 = vld [vmem:[%s49651_s1 + $0x748] sm:$0xff] }
  0xc9   :  { %22657 = vmatpush.bf16.msra.mxu3 %v37764_v4  ;;  %v37794_v4 = vld [vmem:[%s49651_s1 + $0x7e0] sm:$0xff]  ;;  %v37821_v30 = vld [vmem:[%s49651_s1 + $0x8b8] sm:$0xff] }
  0xca   :  { %22619 = vmatpush.bf16.msra.mxu0 %v37739_v5  ;;  %v37769_v5 = vld [vmem:[%s49651_s1 + $0x718] sm:$0xff]  ;;  %v37766_v25 = vld [vmem:[%s49651_s1 + $0x700] sm:$0xff] }
  0xcb   :  { %22645 = vmatpush.bf16.msra.mxu2 %v37755_v6  ;;  %v37785_v6 = vld [vmem:[%s49651_s1 + $0x798] sm:$0xff] }
  0xcc   :  { %22632 = vmatpush.bf16.msra.mxu1 %v37747_v7 }
  0xcd   :  { %22658 = vmatpush.bf16.msra.mxu3 %v37763_v8  ;;  %v22394_v35 = vpop.f32.mrf.mxu2 }
  0xce   :  { %22620 = vmatpush.bf16.msra.mxu0 %v37738_v9  ;;  %v37777_v9 = vld [vmem:[%s49651_s1 + $0x758] sm:$0xff] }
  0xcf   :  { %22646 = vmatpush.bf16.msra.mxu2 %v37754_v10  ;;  %v22407_v40 = vpop.f32.mrf.mxu3  ;;  %v37793_v10 = vld [vmem:[%s49651_s1 + $0x7d8] sm:$0xff] }
  0xd0   :  { %22633 = vmatpush.bf16.msra.mxu1 %v37746_v13 }
  0xd1   :  { %22659 = vmatpush.bf16.msra.mxu3 %v37762_v14  ;;  %v37768_v14 = vld [vmem:[%s49651_s1 + $0x710] sm:$0xff] }
  0xd2   :  { %22621 = vmatpush.bf16.msra.mxu0 %v37737_v17  ;;  %v37776_v17 = vld [vmem:[%s49651_s1 + $0x750] sm:$0xff] }
  0xd3   :  { %22647 = vmatpush.bf16.msra.mxu2 %v37753_v18  ;;  %v37792_v18 = vld [vmem:[%s49651_s1 + $0x7d0] sm:$0xff] }
  0xd4   :  { %22634 = vmatpush.bf16.msra.mxu1 %v37745_v19  ;;  %v37767_v19 = vld [vmem:[%s49651_s1 + $0x708] sm:$0xff] }
  0xd5   :  { %22660 = vmatpush.bf16.msra.mxu3 %v37761_v20  ;;  %v37783_v20 = vld [vmem:[%s49651_s1 + $0x788] sm:$0xff] }
  0xd6   :  { %22622 = vmatpush.bf16.msra.mxu0 %v37736_v23  ;;  %v37791_v23 = vld [vmem:[%s49651_s1 + $0x7c8] sm:$0xff] }
  0xd7   :  { %22648 = vmatpush.bf16.msra.mxu2 %v37752_v24 }
  0xd8   :  { %22635 = vmatpush.bf16.msra.mxu1 %v37744_v28  ;;  %v51_v28 = vld [vmem:[%s49652_s0 + $0xf0] sm:$0xff] }
  0xd9   :  { %22661 = vmatpush.bf16.msra.mxu3 %v37760_v29  ;;  %v37805_v29 = vld [vmem:[%s49651_s1 + $0x838] sm:$0xff] }
  0xda   :  { %22623 = vmatpush.bf16.msra.mxu0 %v37735_v31  ;;  %v37774_v31 = vld [vmem:[%s49651_s1 + $0x740] sm:$0xff] }
  0xdb   :  { %22649 = vmatpush.bf16.msra.mxu2 %v37751_v32  ;;  %v37790_v32 = vld [vmem:[%s49651_s1 + $0x7c0] sm:$0xff] }
  0xdc   :  { %22636 = vmatpush.bf16.msra.mxu1 %v37743_v33  ;;  %v50_v33 = vld [vmem:[%s49652_s0 + $0xe8] sm:$0xff] }
  0xdd   :  { %22662 = vmatpush.bf16.msra.mxu3 %v37759_v34  ;;  %v52_v34 = vld [vmem:[%s49652_s0 + $0xf8] sm:$0xff]  ;;  %v388_v39 = vpack.c.bf16 %v50_v33, %v50_v33  ;;  %v37835_v33 = vld [vmem:[%s49651_s1 + $0x928] sm:$0xff] }
  0xde   :  { %22624 = vmatpush.bf16.msra.mxu0 %v37734_v36  ;;  %v22418_v61 = vpop.f32.mrf.mxu0  ;;  %v389_v36 = vpack.c.bf16 %v51_v28, %v51_v28  ;;  %v390_v40 = vpack.c.bf16 %v52_v34, %v52_v34  ;;  %v37851_v34 = vld [vmem:[%s49651_s1 + $0x9a8] sm:$0xff] }
  0xdf   :  { %22650 = vmatpush.bf16.msra.mxu2 %v37750_v37  ;;  %v22419_v62 = vadd.f32 %v22418_v61, %v22406_v27  ;;  %v49_v27 = vld [vmem:[%s49652_s0 + $0xe0] sm:$0xff]  ;;  %v37813_v37 = vld [vmem:[%s49651_s1 + $0x878] sm:$0xff] }
  0xe0   :  { %22637 = vmatpush.bf16.msra.mxu1 %v37742_v43  ;;  %v22431_v1 = vpop.f32.mrf.mxu1  ;;  %v387_v35 = vpack.c.bf16 %v49_v27, %v49_v27  ;;  %v37812_v43 = vld [vmem:[%s49651_s1 + $0x870] sm:$0xff]  ;;  %v37809_v61 = vld [vmem:[%s49651_s1 + $0x858] sm:$0xff] }
  0xe1   :  { %22663 = vmatpush.bf16.msra.mxu3 %v37758_v44  ;;  %22625 = vmatmul.bf16.vlgmr.msra.gmra.mxu0 %v383_v47  ;;  %v22432_v2 = vadd.f32 %v22431_v1, %v22419_v62  ;;  %v37828_v44 = vld [vmem:[%s49651_s1 + $0x8f0] sm:$0xff]  ;;  %v37811_v47 = vld [vmem:[%s49651_s1 + $0x868] sm:$0xff]  ;;  %v37825_v62 = vld [vmem:[%s49651_s1 + $0x8d8] sm:$0xff] }
  0xe2   :  { %22669 = vmatpush.bf16.msrb.mxu0 %v37773_v41  ;;  %22651 = vmatmul.bf16.vlgmr.msra.gmra.mxu2 %v385_v48  ;;  %v37804_v41 = vld [vmem:[%s49651_s1 + $0x830] sm:$0xff]  ;;  %v37827_v48 = vld [vmem:[%s49651_s1 + $0x8e8] sm:$0xff] }
  0xe3   :  { %22695 = vmatpush.bf16.msrb.mxu2 %v37789_v42  ;;  %22638 = vmatmul.bf16.vlgmr.msra.gmra.mxu1 %v384_v51  ;;  %v37820_v42 = vld [vmem:[%s49651_s1 + $0x8b0] sm:$0xff]  ;;  %v37802_v51 = vld [vmem:[%s49651_s1 + $0x820] sm:$0xff] }
  0xe4   :  { %22682 = vmatpush.bf16.msrb.mxu1 %v37781_v49  ;;  %22664 = vmatmul.bf16.vlgmr.msra.gmra.mxu3 %v386_v52  ;;  %v37818_v52 = vld [vmem:[%s49651_s1 + $0x8a0] sm:$0xff] }
  0xe5   :  { %22708 = vmatpush.bf16.msrb.mxu3 %v37797_v50  ;;  %v22444_v7 = vpop.f32.mrf.mxu2 }
  0xe6   :  { %22670 = vmatpush.bf16.msrb.mxu0 %v37772_v53  ;;  %v22445_v8 = vadd.f32 %v22444_v7, %v22432_v2  ;;  %v22420_v12 = vpop.f32.mrf.mxu0  ;;  %v37800_v2 = vld [vmem:[%s49651_s1 + $0x810] sm:$0xff]  ;;  %v37799_v7 = vld [vmem:[%s49651_s1 + $0x808] sm:$0xff] }
  0xe7   :  { %22696 = vmatpush.bf16.msrb.mxu2 %v37788_v54  ;;  %v22457_v11 = vpop.f32.mrf.mxu3 }
  0xe8   :  { %22683 = vmatpush.bf16.msrb.mxu1 %v37780_v55  ;;  %v41093_v13 = vadd.f32 %v22457_v11, %v22445_v8  ;;  %v22433_v16 = vpop.f32.mrf.mxu1  ;;  %v37810_v55 = vld [vmem:[%s49651_s1 + $0x860] sm:$0xff]  ;;  %v37815_v8 = vld [vmem:[%s49651_s1 + $0x888] sm:$0xff] }
  0xe9   :  { %22709 = vmatpush.bf16.msrb.mxu3 %v37796_v56  ;;  %v37826_v56 = vld [vmem:[%s49651_s1 + $0x8e0] sm:$0xff]  ;;  %v37823_v11 = vld [vmem:[%s49651_s1 + $0x8c8] sm:$0xff]  ;;  %v55_v16 = vld [vmem:[%s49652_s0 + $0x110] sm:$0xff] }
  0xea   :  { %22671 = vmatpush.bf16.msrb.mxu0 %v37771_v57  ;;  %v37801_v57 = vld [vmem:[%s49651_s1 + $0x818] sm:$0xff] }
  0xeb   :  { %22697 = vmatpush.bf16.msrb.mxu2 %v37787_v58  ;;  %v37817_v58 = vld [vmem:[%s49651_s1 + $0x898] sm:$0xff] }
  0xec   :  { %22684 = vmatpush.bf16.msrb.mxu1 %v37779_v59 }
  0xed   :  { %22710 = vmatpush.bf16.msrb.mxu3 %v37795_v60  ;;  %v22446_v21 = vpop.f32.mrf.mxu2 }
  0xee   :  { %22672 = vmatpush.bf16.msrb.mxu0 %v37770_v63  ;;  %v54_v21 = vld [vmem:[%s49652_s0 + $0x108] sm:$0xff] }
  0xef   :  { %22698 = vmatpush.bf16.msrb.mxu2 %v37786_v0  ;;  %v22459_v24 = vpop.f32.mrf.mxu3  ;;  %v392_v27 = vpack.c.bf16 %v54_v21, %v54_v21  ;;  %v37867_v21 = vld [vmem:[%s49651_s1 + $0xa28] sm:$0xff] }
  0xf0   :  { %22685 = vmatpush.bf16.msrb.mxu1 %v37778_v3  ;;  %v37816_v3 = vld [vmem:[%s49651_s1 + $0x890] sm:$0xff]  ;;  %v393_v24 = vpack.c.bf16 %v55_v16, %v55_v16 }
  0xf1   :  { %22711 = vmatpush.bf16.msrb.mxu3 %v37794_v4 }
  0xf2   :  { %22673 = vmatpush.bf16.msrb.mxu0 %v37769_v5  ;;  %v37808_v5 = vld [vmem:[%s49651_s1 + $0x850] sm:$0xff] }
  0xf3   :  { %22699 = vmatpush.bf16.msrb.mxu2 %v37785_v6  ;;  %v37824_v6 = vld [vmem:[%s49651_s1 + $0x8d0] sm:$0xff] }
  0xf4   :  { %22686 = vmatpush.bf16.msrb.mxu1 %v37777_v9 }
  0xf5   :  { %22712 = vmatpush.bf16.msrb.mxu3 %v37793_v10  ;;  %v37807_v10 = vld [vmem:[%s49651_s1 + $0x848] sm:$0xff] }
  0xf6   :  { %22674 = vmatpush.bf16.msrb.mxu0 %v37768_v14  ;;  %v37814_v14 = vld [vmem:[%s49651_s1 + $0x880] sm:$0xff] }
  0xf7   :  { %22700 = vmatpush.bf16.msrb.mxu2 %v37784_v15  ;;  %v53_v15 = vld [vmem:[%s49652_s0 + $0x100] sm:$0xff] }
  0xf8   :  { %22687 = vmatpush.bf16.msrb.mxu1 %v37776_v17  ;;  %v37837_v17 = vld [vmem:[%s49651_s1 + $0x938] sm:$0xff] }
  0xf9   :  { %22713 = vmatpush.bf16.msrb.mxu3 %v37792_v18  ;;  %v37853_v18 = vld [vmem:[%s49651_s1 + $0x9b8] sm:$0xff] }
  0xfa   :  { %22675 = vmatpush.bf16.msrb.mxu0 %v37767_v19  ;;  %v37806_v19 = vld [vmem:[%s49651_s1 + $0x840] sm:$0xff] }
  0xfb   :  { %22701 = vmatpush.bf16.msrb.mxu2 %v37783_v20  ;;  %v37822_v20 = vld [vmem:[%s49651_s1 + $0x8c0] sm:$0xff] }
  0xfc   :  { %22688 = vmatpush.bf16.msrb.mxu1 %v37775_v22  ;;  %v56_v22 = vld [vmem:[%s49652_s0 + $0x118] sm:$0xff] }
  0xfd   :  { %22714 = vmatpush.bf16.msrb.mxu3 %v37791_v23  ;;  %v391_v23 = vpack.c.bf16 %v53_v15, %v53_v15  ;;  %v394_v28 = vpack.c.bf16 %v56_v22, %v56_v22  ;;  %v37883_v22 = vld [vmem:[%s49651_s1 + $0xaa8] sm:$0xff] }
  0xfe   :  { %22676 = vmatpush.bf16.msrb.mxu0 %v37766_v25  ;;  %v22470_v49 = vpop.f32.mrf.mxu0  ;;  %v37845_v25 = vld [vmem:[%s49651_s1 + $0x978] sm:$0xff] }
  0xff   :  { %22702 = vmatpush.bf16.msrb.mxu2 %v37782_v26  ;;  %v22471_v50 = vadd.f32 %v22470_v49, %v41093_v13  ;;  %v37798_v13 = vld [vmem:[%s49651_s1 + $0x800] sm:$0xff]  ;;  %v37861_v26 = vld [vmem:[%s49651_s1 + $0x9f8] sm:$0xff] }
 0x100   :  { %22689 = vmatpush.bf16.msrb.mxu1 %v37774_v31  ;;  %v22483_v53 = vpop.f32.mrf.mxu1  ;;  %v37844_v31 = vld [vmem:[%s49651_s1 + $0x970] sm:$0xff]  ;;  %v37841_v49 = vld [vmem:[%s49651_s1 + $0x958] sm:$0xff] }
 0x101   :  { %22715 = vmatpush.bf16.msrb.mxu3 %v37790_v32  ;;  %22677 = vmatmul.bf16.vlgmr.msrb.gmra.mxu0 %v387_v35  ;;  %v22484_v54 = vadd.f32 %v22483_v53, %v22471_v50  ;;  %v37860_v32 = vld [vmem:[%s49651_s1 + $0x9f0] sm:$0xff]  ;;  %v37843_v35 = vld [vmem:[%s49651_s1 + $0x968] sm:$0xff]  ;;  %v37857_v50 = vld [vmem:[%s49651_s1 + $0x9d8] sm:$0xff] }
 0x102   :  { %22721 = vmatpush.bf16.msra.mxu0 %v37805_v29  ;;  %22703 = vmatmul.bf16.vlgmr.msrb.gmra.mxu2 %v389_v36  ;;  %v37836_v29 = vld [vmem:[%s49651_s1 + $0x930] sm:$0xff]  ;;  %v37859_v36 = vld [vmem:[%s49651_s1 + $0x9e8] sm:$0xff] }
 0x103   :  { %22747 = vmatpush.bf16.msra.mxu2 %v37821_v30  ;;  %22690 = vmatmul.bf16.vlgmr.msrb.gmra.mxu1 %v388_v39  ;;  %v37852_v30 = vld [vmem:[%s49651_s1 + $0x9b0] sm:$0xff]  ;;  %v37834_v39 = vld [vmem:[%s49651_s1 + $0x920] sm:$0xff] }
 0x104   :  { %22734 = vmatpush.bf16.msra.mxu1 %v37813_v37  ;;  %22716 = vmatmul.bf16.vlgmr.msrb.gmra.mxu3 %v390_v40  ;;  %v37850_v40 = vld [vmem:[%s49651_s1 + $0x9a0] sm:$0xff] }
 0x105   :  { %22760 = vmatpush.bf16.msra.mxu3 %v37829_v38  ;;  %v22496_v59 = vpop.f32.mrf.mxu2 }
 0x106   :  { %22722 = vmatpush.bf16.msra.mxu0 %v37804_v41  ;;  %v22497_v60 = vadd.f32 %v22496_v59, %v22484_v54  ;;  %v22472_v0 = vpop.f32.mrf.mxu0  ;;  %v37832_v54 = vld [vmem:[%s49651_s1 + $0x910] sm:$0xff]  ;;  %v37831_v59 = vld [vmem:[%s49651_s1 + $0x908] sm:$0xff] }
 0x107   :  { %22748 = vmatpush.bf16.msra.mxu2 %v37820_v42  ;;  %v22509_v63 = vpop.f32.mrf.mxu3 }
 0x108   :  { %22735 = vmatpush.bf16.msra.mxu1 %v37812_v43  ;;  %v41204_v1 = vadd.f32 %v22509_v63, %v22497_v60  ;;  %v22485_v4 = vpop.f32.mrf.mxu1  ;;  %v37842_v43 = vld [vmem:[%s49651_s1 + $0x960] sm:$0xff]  ;;  %v37847_v60 = vld [vmem:[%s49651_s1 + $0x988] sm:$0xff] }
 0x109   :  { %22761 = vmatpush.bf16.msra.mxu3 %v37828_v44  ;;  %v37858_v44 = vld [vmem:[%s49651_s1 + $0x9e0] sm:$0xff]  ;;  %v37855_v63 = vld [vmem:[%s49651_s1 + $0x9c8] sm:$0xff]  ;;  %v59_v4 = vld [vmem:[%s49652_s0 + $0x130] sm:$0xff] }
 0x10a   :  { %22723 = vmatpush.bf16.msra.mxu0 %v37803_v45  ;;  %v37833_v45 = vld [vmem:[%s49651_s1 + $0x918] sm:$0xff] }
 0x10b   :  { %22749 = vmatpush.bf16.msra.mxu2 %v37819_v46  ;;  %v37849_v46 = vld [vmem:[%s49651_s1 + $0x998] sm:$0xff] }
 0x10c   :  { %22736 = vmatpush.bf16.msra.mxu1 %v37811_v47 }
 0x10d   :  { %22762 = vmatpush.bf16.msra.mxu3 %v37827_v48  ;;  %v22498_v9 = vpop.f32.mrf.mxu2 }
 0x10e   :  { %22724 = vmatpush.bf16.msra.mxu0 %v37802_v51  ;;  %v58_v9 = vld [vmem:[%s49652_s0 + $0x128] sm:$0xff] }
 0x10f   :  { %22750 = vmatpush.bf16.msra.mxu2 %v37818_v52  ;;  %v22511_v12 = vpop.f32.mrf.mxu3  ;;  %v396_v15 = vpack.c.bf16 %v58_v9, %v58_v9  ;;  %v37899_v9 = vld [vmem:[%s49651_s1 + $0xb28] sm:$0xff] }
 0x110   :  { %22737 = vmatpush.bf16.msra.mxu1 %v37810_v55  ;;  %v37848_v55 = vld [vmem:[%s49651_s1 + $0x990] sm:$0xff]  ;;  %v397_v12 = vpack.c.bf16 %v59_v4, %v59_v4 }
 0x111   :  { %22763 = vmatpush.bf16.msra.mxu3 %v37826_v56 }
 0x112   :  { %22725 = vmatpush.bf16.msra.mxu0 %v37801_v57  ;;  %v37840_v57 = vld [vmem:[%s49651_s1 + $0x950] sm:$0xff] }
 0x113   :  { %22751 = vmatpush.bf16.msra.mxu2 %v37817_v58  ;;  %v37856_v58 = vld [vmem:[%s49651_s1 + $0x9d0] sm:$0xff] }
 0x114   :  { %22738 = vmatpush.bf16.msra.mxu1 %v37809_v61 }
 0x115   :  { %22764 = vmatpush.bf16.msra.mxu3 %v37825_v62  ;;  %v37839_v62 = vld [vmem:[%s49651_s1 + $0x948] sm:$0xff] }
 0x116   :  { %22726 = vmatpush.bf16.msra.mxu0 %v37800_v2  ;;  %v37846_v2 = vld [vmem:[%s49651_s1 + $0x980] sm:$0xff] }
 0x117   :  { %22752 = vmatpush.bf16.msra.mxu2 %v37816_v3  ;;  %v57_v3 = vld [vmem:[%s49652_s0 + $0x120] sm:$0xff] }
 0x118   :  { %22739 = vmatpush.bf16.msra.mxu1 %v37808_v5  ;;  %v37869_v5 = vld [vmem:[%s49651_s1 + $0xa38] sm:$0xff] }
 0x119   :  { %22765 = vmatpush.bf16.msra.mxu3 %v37824_v6  ;;  %v37885_v6 = vld [vmem:[%s49651_s1 + $0xab8] sm:$0xff] }
 0x11a   :  { %22727 = vmatpush.bf16.msra.mxu0 %v37799_v7  ;;  %v37838_v7 = vld [vmem:[%s49651_s1 + $0x940] sm:$0xff] }
 0x11b   :  { %22753 = vmatpush.bf16.msra.mxu2 %v37815_v8  ;;  %v37854_v8 = vld [vmem:[%s49651_s1 + $0x9c0] sm:$0xff] }
 0x11c   :  { %22740 = vmatpush.bf16.msra.mxu1 %v37807_v10  ;;  %v60_v10 = vld [vmem:[%s49652_s0 + $0x138] sm:$0xff] }
 0x11d   :  { %22766 = vmatpush.bf16.msra.mxu3 %v37823_v11  ;;  %v395_v11 = vpack.c.bf16 %v57_v3, %v57_v3  ;;  %v398_v16 = vpack.c.bf16 %v60_v10, %v60_v10  ;;  %v37915_v10 = vld [vmem:[%s49651_s1 + $0xba8] sm:$0xff] }
 0x11e   :  { %22728 = vmatpush.bf16.msra.mxu0 %v37798_v13  ;;  %v22522_v37 = vpop.f32.mrf.mxu0  ;;  %v37877_v13 = vld [vmem:[%s49651_s1 + $0xa78] sm:$0xff] }
 0x11f   :  { %22754 = vmatpush.bf16.msra.mxu2 %v37814_v14  ;;  %v22523_v38 = vadd.f32 %v22522_v37, %v41204_v1  ;;  %v37830_v1 = vld [vmem:[%s49651_s1 + $0x900] sm:$0xff]  ;;  %v37893_v14 = vld [vmem:[%s49651_s1 + $0xaf8] sm:$0xff] }
 0x120   :  { %22741 = vmatpush.bf16.msra.mxu1 %v37806_v19  ;;  %v22535_v41 = vpop.f32.mrf.mxu1  ;;  %v37876_v19 = vld [vmem:[%s49651_s1 + $0xa70] sm:$0xff]  ;;  %v37873_v37 = vld [vmem:[%s49651_s1 + $0xa58] sm:$0xff] }
 0x121   :  { %22767 = vmatpush.bf16.msra.mxu3 %v37822_v20  ;;  %22729 = vmatmul.bf16.vlgmr.msra.gmra.mxu0 %v391_v23  ;;  %v22536_v42 = vadd.f32 %v22535_v41, %v22523_v38  ;;  %v37892_v20 = vld [vmem:[%s49651_s1 + $0xaf0] sm:$0xff]  ;;  %v37875_v23 = vld [vmem:[%s49651_s1 + $0xa68] sm:$0xff]  ;;  %v37889_v38 = vld [vmem:[%s49651_s1 + $0xad8] sm:$0xff] }
 0x122   :  { %22773 = vmatpush.bf16.msrb.mxu0 %v37837_v17  ;;  %22755 = vmatmul.bf16.vlgmr.msra.gmra.mxu2 %v393_v24  ;;  %v37868_v17 = vld [vmem:[%s49651_s1 + $0xa30] sm:$0xff]  ;;  %v37891_v24 = vld [vmem:[%s49651_s1 + $0xae8] sm:$0xff] }
 0x123   :  { %22799 = vmatpush.bf16.msrb.mxu2 %v37853_v18  ;;  %22742 = vmatmul.bf16.vlgmr.msra.gmra.mxu1 %v392_v27  ;;  %v37884_v18 = vld [vmem:[%s49651_s1 + $0xab0] sm:$0xff]  ;;  %v37866_v27 = vld [vmem:[%s49651_s1 + $0xa20] sm:$0xff] }
 0x124   :  { %22786 = vmatpush.bf16.msrb.mxu1 %v37845_v25  ;;  %22768 = vmatmul.bf16.vlgmr.msra.gmra.mxu3 %v394_v28  ;;  %v37882_v28 = vld [vmem:[%s49651_s1 + $0xaa0] sm:$0xff] }
 0x125   :  { %22812 = vmatpush.bf16.msrb.mxu3 %v37861_v26  ;;  %v22548_v47 = vpop.f32.mrf.mxu2 }
 0x126   :  { %22774 = vmatpush.bf16.msrb.mxu0 %v37836_v29  ;;  %v22549_v48 = vadd.f32 %v22548_v47, %v22536_v42  ;;  %v22524_v52 = vpop.f32.mrf.mxu0  ;;  %v37864_v42 = vld [vmem:[%s49651_s1 + $0xa10] sm:$0xff]  ;;  %v37863_v47 = vld [vmem:[%s49651_s1 + $0xa08] sm:$0xff] }
 0x127   :  { %22800 = vmatpush.bf16.msrb.mxu2 %v37852_v30  ;;  %v22561_v51 = vpop.f32.mrf.mxu3 }
 0x128   :  { %22787 = vmatpush.bf16.msrb.mxu1 %v37844_v31  ;;  %v41315_v53 = vadd.f32 %v22561_v51, %v22549_v48  ;;  %v22537_v56 = vpop.f32.mrf.mxu1  ;;  %v37874_v31 = vld [vmem:[%s49651_s1 + $0xa60] sm:$0xff]  ;;  %v37879_v48 = vld [vmem:[%s49651_s1 + $0xa88] sm:$0xff] }
 0x129   :  { %22813 = vmatpush.bf16.msrb.mxu3 %v37860_v32  ;;  %v37890_v32 = vld [vmem:[%s49651_s1 + $0xae0] sm:$0xff]  ;;  %v37887_v51 = vld [vmem:[%s49651_s1 + $0xac8] sm:$0xff]  ;;  %v63_v56 = vld [vmem:[%s49652_s0 + $0x150] sm:$0xff] }
 0x12a   :  { %22775 = vmatpush.bf16.msrb.mxu0 %v37835_v33  ;;  %v37865_v33 = vld [vmem:[%s49651_s1 + $0xa18] sm:$0xff] }
 0x12b   :  { %22801 = vmatpush.bf16.msrb.mxu2 %v37851_v34  ;;  %v37881_v34 = vld [vmem:[%s49651_s1 + $0xa98] sm:$0xff] }
 0x12c   :  { %22788 = vmatpush.bf16.msrb.mxu1 %v37843_v35 }
 0x12d   :  { %22814 = vmatpush.bf16.msrb.mxu3 %v37859_v36  ;;  %v22550_v61 = vpop.f32.mrf.mxu2 }
 0x12e   :  { %22776 = vmatpush.bf16.msrb.mxu0 %v37834_v39  ;;  %v62_v61 = vld [vmem:[%s49652_s0 + $0x148] sm:$0xff] }
 0x12f   :  { %22802 = vmatpush.bf16.msrb.mxu2 %v37850_v40  ;;  %v22563_v0 = vpop.f32.mrf.mxu3  ;;  %v400_v3 = vpack.c.bf16 %v62_v61, %v62_v61  ;;  %v37931_v61 = vld [vmem:[%s49651_s1 + $0xc28] sm:$0xff] }
 0x130   :  { %22789 = vmatpush.bf16.msrb.mxu1 %v37842_v43  ;;  %v37880_v43 = vld [vmem:[%s49651_s1 + $0xa90] sm:$0xff]  ;;  %v401_v0 = vpack.c.bf16 %v63_v56, %v63_v56 }
 0x131   :  { %22815 = vmatpush.bf16.msrb.mxu3 %v37858_v44 }
 0x132   :  { %22777 = vmatpush.bf16.msrb.mxu0 %v37833_v45  ;;  %v37872_v45 = vld [vmem:[%s49651_s1 + $0xa50] sm:$0xff] }
 0x133   :  { %22803 = vmatpush.bf16.msrb.mxu2 %v37849_v46  ;;  %v37888_v46 = vld [vmem:[%s49651_s1 + $0xad0] sm:$0xff] }
 0x134   :  { %22790 = vmatpush.bf16.msrb.mxu1 %v37841_v49 }
 0x135   :  { %22816 = vmatpush.bf16.msrb.mxu3 %v37857_v50  ;;  %v37871_v50 = vld [vmem:[%s49651_s1 + $0xa48] sm:$0xff] }
 0x136   :  { %22778 = vmatpush.bf16.msrb.mxu0 %v37832_v54  ;;  %v37878_v54 = vld [vmem:[%s49651_s1 + $0xa80] sm:$0xff] }
 0x137   :  { %22804 = vmatpush.bf16.msrb.mxu2 %v37848_v55  ;;  %v61_v55 = vld [vmem:[%s49652_s0 + $0x140] sm:$0xff] }
 0x138   :  { %22791 = vmatpush.bf16.msrb.mxu1 %v37840_v57  ;;  %v37901_v57 = vld [vmem:[%s49651_s1 + $0xb38] sm:$0xff] }
 0x139   :  { %22817 = vmatpush.bf16.msrb.mxu3 %v37856_v58  ;;  %v37917_v58 = vld [vmem:[%s49651_s1 + $0xbb8] sm:$0xff] }
 0x13a   :  { %22779 = vmatpush.bf16.msrb.mxu0 %v37831_v59  ;;  %v37870_v59 = vld [vmem:[%s49651_s1 + $0xa40] sm:$0xff] }
 0x13b   :  { %22805 = vmatpush.bf16.msrb.mxu2 %v37847_v60  ;;  %v37886_v60 = vld [vmem:[%s49651_s1 + $0xac0] sm:$0xff] }
 0x13c   :  { %22792 = vmatpush.bf16.msrb.mxu1 %v37839_v62  ;;  %v64_v62 = vld [vmem:[%s49652_s0 + $0x158] sm:$0xff] }
 0x13d   :  { %22818 = vmatpush.bf16.msrb.mxu3 %v37855_v63  ;;  %v399_v63 = vpack.c.bf16 %v61_v55, %v61_v55  ;;  %v402_v4 = vpack.c.bf16 %v64_v62, %v64_v62  ;;  %v37947_v62 = vld [vmem:[%s49651_s1 + $0xca8] sm:$0xff] }
 0x13e   :  { %22780 = vmatpush.bf16.msrb.mxu0 %v37830_v1  ;;  %v22574_v25 = vpop.f32.mrf.mxu0  ;;  %v37909_v1 = vld [vmem:[%s49651_s1 + $0xb78] sm:$0xff] }
 0x13f   :  { %22806 = vmatpush.bf16.msrb.mxu2 %v37846_v2  ;;  %v22575_v26 = vadd.f32 %v22574_v25, %v41315_v53  ;;  %v37862_v53 = vld [vmem:[%s49651_s1 + $0xa00] sm:$0xff]  ;;  %v37925_v2 = vld [vmem:[%s49651_s1 + $0xbf8] sm:$0xff] }
 0x140   :  { %22793 = vmatpush.bf16.msrb.mxu1 %v37838_v7  ;;  %v22587_v29 = vpop.f32.mrf.mxu1  ;;  %v37908_v7 = vld [vmem:[%s49651_s1 + $0xb70] sm:$0xff]  ;;  %v37905_v25 = vld [vmem:[%s49651_s1 + $0xb58] sm:$0xff] }
 0x141   :  { %22819 = vmatpush.bf16.msrb.mxu3 %v37854_v8  ;;  %22781 = vmatmul.bf16.vlgmr.msrb.gmra.mxu0 %v395_v11  ;;  %v22588_v30 = vadd.f32 %v22587_v29, %v22575_v26  ;;  %v37924_v8 = vld [vmem:[%s49651_s1 + $0xbf0] sm:$0xff]  ;;  %v37907_v11 = vld [vmem:[%s49651_s1 + $0xb68] sm:$0xff]  ;;  %v37921_v26 = vld [vmem:[%s49651_s1 + $0xbd8] sm:$0xff] }
 0x142   :  { %22825 = vmatpush.bf16.msra.mxu0 %v37869_v5  ;;  %22807 = vmatmul.bf16.vlgmr.msrb.gmra.mxu2 %v397_v12  ;;  %v37900_v5 = vld [vmem:[%s49651_s1 + $0xb30] sm:$0xff]  ;;  %v37923_v12 = vld [vmem:[%s49651_s1 + $0xbe8] sm:$0xff] }
 0x143   :  { %22851 = vmatpush.bf16.msra.mxu2 %v37885_v6  ;;  %22794 = vmatmul.bf16.vlgmr.msrb.gmra.mxu1 %v396_v15  ;;  %v37916_v6 = vld [vmem:[%s49651_s1 + $0xbb0] sm:$0xff]  ;;  %v37898_v15 = vld [vmem:[%s49651_s1 + $0xb20] sm:$0xff] }
 0x144   :  { %22838 = vmatpush.bf16.msra.mxu1 %v37877_v13  ;;  %22820 = vmatmul.bf16.vlgmr.msrb.gmra.mxu3 %v398_v16  ;;  %v37914_v16 = vld [vmem:[%s49651_s1 + $0xba0] sm:$0xff] }
 0x145   :  { %22864 = vmatpush.bf16.msra.mxu3 %v37893_v14  ;;  %v22600_v35 = vpop.f32.mrf.mxu2 }
 0x146   :  { %22826 = vmatpush.bf16.msra.mxu0 %v37868_v17  ;;  %v22601_v36 = vadd.f32 %v22600_v35, %v22588_v30  ;;  %v22576_v40 = vpop.f32.mrf.mxu0  ;;  %v37896_v30 = vld [vmem:[%s49651_s1 + $0xb10] sm:$0xff]  ;;  %v37895_v35 = vld [vmem:[%s49651_s1 + $0xb08] sm:$0xff] }
 0x147   :  { %22852 = vmatpush.bf16.msra.mxu2 %v37884_v18  ;;  %v22613_v39 = vpop.f32.mrf.mxu3 }
 0x148   :  { %22839 = vmatpush.bf16.msra.mxu1 %v37876_v19  ;;  %v41426_v41 = vadd.f32 %v22613_v39, %v22601_v36  ;;  %v22589_v44 = vpop.f32.mrf.mxu1  ;;  %v37906_v19 = vld [vmem:[%s49651_s1 + $0xb60] sm:$0xff]  ;;  %v37911_v36 = vld [vmem:[%s49651_s1 + $0xb88] sm:$0xff] }
 0x149   :  { %22865 = vmatpush.bf16.msra.mxu3 %v37892_v20  ;;  %v37922_v20 = vld [vmem:[%s49651_s1 + $0xbe0] sm:$0xff]  ;;  %v37919_v39 = vld [vmem:[%s49651_s1 + $0xbc8] sm:$0xff]  ;;  %v67_v44 = vld [vmem:[%s49652_s0 + $0x170] sm:$0xff] }
 0x14a   :  { %22827 = vmatpush.bf16.msra.mxu0 %v37867_v21  ;;  %v37897_v21 = vld [vmem:[%s49651_s1 + $0xb18] sm:$0xff] }
 0x14b   :  { %22853 = vmatpush.bf16.msra.mxu2 %v37883_v22  ;;  %v37913_v22 = vld [vmem:[%s49651_s1 + $0xb98] sm:$0xff] }
 0x14c   :  { %22840 = vmatpush.bf16.msra.mxu1 %v37875_v23 }
 0x14d   :  { %22866 = vmatpush.bf16.msra.mxu3 %v37891_v24  ;;  %v22602_v49 = vpop.f32.mrf.mxu2 }
 0x14e   :  { %22828 = vmatpush.bf16.msra.mxu0 %v37866_v27  ;;  %v66_v49 = vld [vmem:[%s49652_s0 + $0x168] sm:$0xff] }
 0x14f   :  { %22854 = vmatpush.bf16.msra.mxu2 %v37882_v28  ;;  %v22615_v52 = vpop.f32.mrf.mxu3  ;;  %v404_v55 = vpack.c.bf16 %v66_v49, %v66_v49  ;;  %v37963_v49 = vld [vmem:[%s49651_s1 + $0xd28] sm:$0xff] }
 0x150   :  { %22841 = vmatpush.bf16.msra.mxu1 %v37874_v31  ;;  %v37912_v31 = vld [vmem:[%s49651_s1 + $0xb90] sm:$0xff]  ;;  %v405_v52 = vpack.c.bf16 %v67_v44, %v67_v44 }
 0x151   :  { %22867 = vmatpush.bf16.msra.mxu3 %v37890_v32 }
 0x152   :  { %22829 = vmatpush.bf16.msra.mxu0 %v37865_v33  ;;  %v37904_v33 = vld [vmem:[%s49651_s1 + $0xb50] sm:$0xff] }
 0x153   :  { %22855 = vmatpush.bf16.msra.mxu2 %v37881_v34  ;;  %v37920_v34 = vld [vmem:[%s49651_s1 + $0xbd0] sm:$0xff] }
 0x154   :  { %22842 = vmatpush.bf16.msra.mxu1 %v37873_v37 }
 0x155   :  { %22868 = vmatpush.bf16.msra.mxu3 %v37889_v38  ;;  %v37903_v38 = vld [vmem:[%s49651_s1 + $0xb48] sm:$0xff] }
 0x156   :  { %22830 = vmatpush.bf16.msra.mxu0 %v37864_v42  ;;  %v37910_v42 = vld [vmem:[%s49651_s1 + $0xb80] sm:$0xff] }
 0x157   :  { %22856 = vmatpush.bf16.msra.mxu2 %v37880_v43  ;;  %v65_v43 = vld [vmem:[%s49652_s0 + $0x160] sm:$0xff] }
 0x158   :  { %22843 = vmatpush.bf16.msra.mxu1 %v37872_v45  ;;  %v37933_v45 = vld [vmem:[%s49651_s1 + $0xc38] sm:$0xff] }
 0x159   :  { %22869 = vmatpush.bf16.msra.mxu3 %v37888_v46  ;;  %v37949_v46 = vld [vmem:[%s49651_s1 + $0xcb8] sm:$0xff] }
 0x15a   :  { %22831 = vmatpush.bf16.msra.mxu0 %v37863_v47  ;;  %v37902_v47 = vld [vmem:[%s49651_s1 + $0xb40] sm:$0xff] }
 0x15b   :  { %22857 = vmatpush.bf16.msra.mxu2 %v37879_v48  ;;  %v37918_v48 = vld [vmem:[%s49651_s1 + $0xbc0] sm:$0xff] }
 0x15c   :  { %22844 = vmatpush.bf16.msra.mxu1 %v37871_v50  ;;  %v68_v50 = vld [vmem:[%s49652_s0 + $0x178] sm:$0xff] }
 0x15d   :  { %22870 = vmatpush.bf16.msra.mxu3 %v37887_v51  ;;  %v403_v51 = vpack.c.bf16 %v65_v43, %v65_v43  ;;  %v406_v56 = vpack.c.bf16 %v68_v50, %v68_v50  ;;  %v37979_v50 = vld [vmem:[%s49651_s1 + $0xda8] sm:$0xff] }
 0x15e   :  { %22832 = vmatpush.bf16.msra.mxu0 %v37862_v53  ;;  %v22626_v13 = vpop.f32.mrf.mxu0  ;;  %v37941_v53 = vld [vmem:[%s49651_s1 + $0xc78] sm:$0xff] }
 0x15f   :  { %22858 = vmatpush.bf16.msra.mxu2 %v37878_v54  ;;  %v22627_v14 = vadd.f32 %v22626_v13, %v41426_v41  ;;  %v37894_v41 = vld [vmem:[%s49651_s1 + $0xb00] sm:$0xff]  ;;  %v37957_v54 = vld [vmem:[%s49651_s1 + $0xcf8] sm:$0xff] }
 0x160   :  { %22845 = vmatpush.bf16.msra.mxu1 %v37870_v59  ;;  %v22639_v17 = vpop.f32.mrf.mxu1  ;;  %v37940_v59 = vld [vmem:[%s49651_s1 + $0xc70] sm:$0xff]  ;;  %v37937_v13 = vld [vmem:[%s49651_s1 + $0xc58] sm:$0xff] }
 0x161   :  { %22871 = vmatpush.bf16.msra.mxu3 %v37886_v60  ;;  %22833 = vmatmul.bf16.vlgmr.msra.gmra.mxu0 %v399_v63  ;;  %v22640_v18 = vadd.f32 %v22639_v17, %v22627_v14  ;;  %v37956_v60 = vld [vmem:[%s49651_s1 + $0xcf0] sm:$0xff]  ;;  %v37939_v63 = vld [vmem:[%s49651_s1 + $0xc68] sm:$0xff]  ;;  %v37953_v14 = vld [vmem:[%s49651_s1 + $0xcd8] sm:$0xff] }
 0x162   :  { %22877 = vmatpush.bf16.msrb.mxu0 %v37901_v57  ;;  %22859 = vmatmul.bf16.vlgmr.msra.gmra.mxu2 %v401_v0  ;;  %v37932_v57 = vld [vmem:[%s49651_s1 + $0xc30] sm:$0xff]  ;;  %v37955_v0 = vld [vmem:[%s49651_s1 + $0xce8] sm:$0xff] }
 0x163   :  { %22903 = vmatpush.bf16.msrb.mxu2 %v37917_v58  ;;  %22846 = vmatmul.bf16.vlgmr.msra.gmra.mxu1 %v400_v3  ;;  %v37948_v58 = vld [vmem:[%s49651_s1 + $0xcb0] sm:$0xff]  ;;  %v37930_v3 = vld [vmem:[%s49651_s1 + $0xc20] sm:$0xff] }
 0x164   :  { %22890 = vmatpush.bf16.msrb.mxu1 %v37909_v1  ;;  %22872 = vmatmul.bf16.vlgmr.msra.gmra.mxu3 %v402_v4  ;;  %v37946_v4 = vld [vmem:[%s49651_s1 + $0xca0] sm:$0xff] }
 0x165   :  { %22916 = vmatpush.bf16.msrb.mxu3 %v37925_v2  ;;  %v22652_v23 = vpop.f32.mrf.mxu2 }
 0x166   :  { %22878 = vmatpush.bf16.msrb.mxu0 %v37900_v5  ;;  %v22653_v24 = vadd.f32 %v22652_v23, %v22640_v18  ;;  %v22628_v28 = vpop.f32.mrf.mxu0  ;;  %v37928_v18 = vld [vmem:[%s49651_s1 + $0xc10] sm:$0xff]  ;;  %v37927_v23 = vld [vmem:[%s49651_s1 + $0xc08] sm:$0xff] }
 0x167   :  { %22904 = vmatpush.bf16.msrb.mxu2 %v37916_v6  ;;  %v22665_v27 = vpop.f32.mrf.mxu3 }
 0x168   :  { %22891 = vmatpush.bf16.msrb.mxu1 %v37908_v7  ;;  %v41537_v29 = vadd.f32 %v22665_v27, %v22653_v24  ;;  %v22641_v32 = vpop.f32.mrf.mxu1  ;;  %v37938_v7 = vld [vmem:[%s49651_s1 + $0xc60] sm:$0xff]  ;;  %v37943_v24 = vld [vmem:[%s49651_s1 + $0xc88] sm:$0xff] }
 0x169   :  { %22917 = vmatpush.bf16.msrb.mxu3 %v37924_v8  ;;  %v37954_v8 = vld [vmem:[%s49651_s1 + $0xce0] sm:$0xff]  ;;  %v37951_v27 = vld [vmem:[%s49651_s1 + $0xcc8] sm:$0xff]  ;;  %v71_v32 = vld [vmem:[%s49652_s0 + $0x190] sm:$0xff] }
 0x16a   :  { %22879 = vmatpush.bf16.msrb.mxu0 %v37899_v9  ;;  %v37929_v9 = vld [vmem:[%s49651_s1 + $0xc18] sm:$0xff] }
 0x16b   :  { %22905 = vmatpush.bf16.msrb.mxu2 %v37915_v10  ;;  %v37945_v10 = vld [vmem:[%s49651_s1 + $0xc98] sm:$0xff] }
 0x16c   :  { %22892 = vmatpush.bf16.msrb.mxu1 %v37907_v11 }
 0x16d   :  { %22918 = vmatpush.bf16.msrb.mxu3 %v37923_v12  ;;  %v22654_v37 = vpop.f32.mrf.mxu2 }
 0x16e   :  { %22880 = vmatpush.bf16.msrb.mxu0 %v37898_v15  ;;  %v70_v37 = vld [vmem:[%s49652_s0 + $0x188] sm:$0xff] }
 0x16f   :  { %22906 = vmatpush.bf16.msrb.mxu2 %v37914_v16  ;;  %v22667_v40 = vpop.f32.mrf.mxu3  ;;  %v408_v43 = vpack.c.bf16 %v70_v37, %v70_v37  ;;  %v37995_v37 = vld [vmem:[%s49651_s1 + $0xe28] sm:$0xff] }
 0x170   :  { %22893 = vmatpush.bf16.msrb.mxu1 %v37906_v19  ;;  %v37944_v19 = vld [vmem:[%s49651_s1 + $0xc90] sm:$0xff]  ;;  %v409_v40 = vpack.c.bf16 %v71_v32, %v71_v32 }
 0x171   :  { %22919 = vmatpush.bf16.msrb.mxu3 %v37922_v20 }
 0x172   :  { %22881 = vmatpush.bf16.msrb.mxu0 %v37897_v21  ;;  %v37936_v21 = vld [vmem:[%s49651_s1 + $0xc50] sm:$0xff] }
 0x173   :  { %22907 = vmatpush.bf16.msrb.mxu2 %v37913_v22  ;;  %v37952_v22 = vld [vmem:[%s49651_s1 + $0xcd0] sm:$0xff] }
 0x174   :  { %22894 = vmatpush.bf16.msrb.mxu1 %v37905_v25 }
 0x175   :  { %22920 = vmatpush.bf16.msrb.mxu3 %v37921_v26  ;;  %v37935_v26 = vld [vmem:[%s49651_s1 + $0xc48] sm:$0xff] }
 0x176   :  { %22882 = vmatpush.bf16.msrb.mxu0 %v37896_v30  ;;  %v37942_v30 = vld [vmem:[%s49651_s1 + $0xc80] sm:$0xff] }
 0x177   :  { %22908 = vmatpush.bf16.msrb.mxu2 %v37912_v31  ;;  %v69_v31 = vld [vmem:[%s49652_s0 + $0x180] sm:$0xff] }
 0x178   :  { %22895 = vmatpush.bf16.msrb.mxu1 %v37904_v33  ;;  %v37965_v33 = vld [vmem:[%s49651_s1 + $0xd38] sm:$0xff] }
 0x179   :  { %22921 = vmatpush.bf16.msrb.mxu3 %v37920_v34  ;;  %v37981_v34 = vld [vmem:[%s49651_s1 + $0xdb8] sm:$0xff] }
 0x17a   :  { %22883 = vmatpush.bf16.msrb.mxu0 %v37895_v35  ;;  %v37934_v35 = vld [vmem:[%s49651_s1 + $0xc40] sm:$0xff] }
 0x17b   :  { %22909 = vmatpush.bf16.msrb.mxu2 %v37911_v36  ;;  %v37950_v36 = vld [vmem:[%s49651_s1 + $0xcc0] sm:$0xff] }
 0x17c   :  { %22896 = vmatpush.bf16.msrb.mxu1 %v37903_v38  ;;  %v72_v38 = vld [vmem:[%s49652_s0 + $0x198] sm:$0xff] }
 0x17d   :  { %22922 = vmatpush.bf16.msrb.mxu3 %v37919_v39  ;;  %v407_v39 = vpack.c.bf16 %v69_v31, %v69_v31  ;;  %v410_v44 = vpack.c.bf16 %v72_v38, %v72_v38  ;;  %v38011_v38 = vld [vmem:[%s49651_s1 + $0xea8] sm:$0xff] }
 0x17e   :  { %22884 = vmatpush.bf16.msrb.mxu0 %v37894_v41  ;;  %v22678_v1 = vpop.f32.mrf.mxu0  ;;  %v37973_v41 = vld [vmem:[%s49651_s1 + $0xd78] sm:$0xff] }
 0x17f   :  { %22910 = vmatpush.bf16.msrb.mxu2 %v37910_v42  ;;  %v22679_v2 = vadd.f32 %v22678_v1, %v41537_v29  ;;  %v37926_v29 = vld [vmem:[%s49651_s1 + $0xc00] sm:$0xff]  ;;  %v37989_v42 = vld [vmem:[%s49651_s1 + $0xdf8] sm:$0xff] }
 0x180   :  { %22897 = vmatpush.bf16.msrb.mxu1 %v37902_v47  ;;  %v22691_v5 = vpop.f32.mrf.mxu1  ;;  %v37972_v47 = vld [vmem:[%s49651_s1 + $0xd70] sm:$0xff]  ;;  %v37969_v1 = vld [vmem:[%s49651_s1 + $0xd58] sm:$0xff] }
 0x181   :  { %22923 = vmatpush.bf16.msrb.mxu3 %v37918_v48  ;;  %22885 = vmatmul.bf16.vlgmr.msrb.gmra.mxu0 %v403_v51  ;;  %v22692_v6 = vadd.f32 %v22691_v5, %v22679_v2  ;;  %v37988_v48 = vld [vmem:[%s49651_s1 + $0xdf0] sm:$0xff]  ;;  %v37971_v51 = vld [vmem:[%s49651_s1 + $0xd68] sm:$0xff]  ;;  %v37985_v2 = vld [vmem:[%s49651_s1 + $0xdd8] sm:$0xff] }
 0x182   :  { %22929 = vmatpush.bf16.msra.mxu0 %v37933_v45  ;;  %22911 = vmatmul.bf16.vlgmr.msrb.gmra.mxu2 %v405_v52  ;;  %v37964_v45 = vld [vmem:[%s49651_s1 + $0xd30] sm:$0xff]  ;;  %v37987_v52 = vld [vmem:[%s49651_s1 + $0xde8] sm:$0xff] }
 0x183   :  { %22955 = vmatpush.bf16.msra.mxu2 %v37949_v46  ;;  %22898 = vmatmul.bf16.vlgmr.msrb.gmra.mxu1 %v404_v55  ;;  %v37980_v46 = vld [vmem:[%s49651_s1 + $0xdb0] sm:$0xff]  ;;  %v37962_v55 = vld [vmem:[%s49651_s1 + $0xd20] sm:$0xff] }
 0x184   :  { %22942 = vmatpush.bf16.msra.mxu1 %v37941_v53  ;;  %22924 = vmatmul.bf16.vlgmr.msrb.gmra.mxu3 %v406_v56  ;;  %v37978_v56 = vld [vmem:[%s49651_s1 + $0xda0] sm:$0xff] }
 0x185   :  { %22968 = vmatpush.bf16.msra.mxu3 %v37957_v54  ;;  %v22704_v11 = vpop.f32.mrf.mxu2 }
 0x186   :  { %22930 = vmatpush.bf16.msra.mxu0 %v37932_v57  ;;  %v22705_v12 = vadd.f32 %v22704_v11, %v22692_v6  ;;  %v22680_v16 = vpop.f32.mrf.mxu0  ;;  %v37960_v6 = vld [vmem:[%s49651_s1 + $0xd10] sm:$0xff]  ;;  %v37959_v11 = vld [vmem:[%s49651_s1 + $0xd08] sm:$0xff] }
 0x187   :  { %22956 = vmatpush.bf16.msra.mxu2 %v37948_v58  ;;  %v22717_v15 = vpop.f32.mrf.mxu3 }
 0x188   :  { %22943 = vmatpush.bf16.msra.mxu1 %v37940_v59  ;;  %v41648_v17 = vadd.f32 %v22717_v15, %v22705_v12  ;;  %v22693_v20 = vpop.f32.mrf.mxu1  ;;  %v37970_v59 = vld [vmem:[%s49651_s1 + $0xd60] sm:$0xff]  ;;  %v37975_v12 = vld [vmem:[%s49651_s1 + $0xd88] sm:$0xff] }
 0x189   :  { %22969 = vmatpush.bf16.msra.mxu3 %v37956_v60  ;;  %v37986_v60 = vld [vmem:[%s49651_s1 + $0xde0] sm:$0xff]  ;;  %v37983_v15 = vld [vmem:[%s49651_s1 + $0xdc8] sm:$0xff]  ;;  %v75_v20 = vld [vmem:[%s49652_s0 + $0x1b0] sm:$0xff] }
 0x18a   :  { %22931 = vmatpush.bf16.msra.mxu0 %v37931_v61  ;;  %v37961_v61 = vld [vmem:[%s49651_s1 + $0xd18] sm:$0xff] }
 0x18b   :  { %22957 = vmatpush.bf16.msra.mxu2 %v37947_v62  ;;  %v37977_v62 = vld [vmem:[%s49651_s1 + $0xd98] sm:$0xff] }
 0x18c   :  { %22944 = vmatpush.bf16.msra.mxu1 %v37939_v63 }
 0x18d   :  { %22970 = vmatpush.bf16.msra.mxu3 %v37955_v0  ;;  %v22706_v25 = vpop.f32.mrf.mxu2 }
 0x18e   :  { %22932 = vmatpush.bf16.msra.mxu0 %v37930_v3  ;;  %v74_v25 = vld [vmem:[%s49652_s0 + $0x1a8] sm:$0xff] }
 0x18f   :  { %22958 = vmatpush.bf16.msra.mxu2 %v37946_v4  ;;  %v22719_v28 = vpop.f32.mrf.mxu3  ;;  %v412_v31 = vpack.c.bf16 %v74_v25, %v74_v25  ;;  %v38027_v25 = vld [vmem:[%s49651_s1 + $0xf28] sm:$0xff] }
 0x190   :  { %22945 = vmatpush.bf16.msra.mxu1 %v37938_v7  ;;  %v37976_v7 = vld [vmem:[%s49651_s1 + $0xd90] sm:$0xff]  ;;  %v413_v28 = vpack.c.bf16 %v75_v20, %v75_v20 }
 0x191   :  { %22971 = vmatpush.bf16.msra.mxu3 %v37954_v8 }
 0x192   :  { %22933 = vmatpush.bf16.msra.mxu0 %v37929_v9  ;;  %v37968_v9 = vld [vmem:[%s49651_s1 + $0xd50] sm:$0xff] }
 0x193   :  { %22959 = vmatpush.bf16.msra.mxu2 %v37945_v10  ;;  %v37984_v10 = vld [vmem:[%s49651_s1 + $0xdd0] sm:$0xff] }
 0x194   :  { %22946 = vmatpush.bf16.msra.mxu1 %v37937_v13 }
 0x195   :  { %22972 = vmatpush.bf16.msra.mxu3 %v37953_v14  ;;  %v37967_v14 = vld [vmem:[%s49651_s1 + $0xd48] sm:$0xff] }
 0x196   :  { %22934 = vmatpush.bf16.msra.mxu0 %v37928_v18  ;;  %v37974_v18 = vld [vmem:[%s49651_s1 + $0xd80] sm:$0xff] }
 0x197   :  { %22960 = vmatpush.bf16.msra.mxu2 %v37944_v19  ;;  %v73_v19 = vld [vmem:[%s49652_s0 + $0x1a0] sm:$0xff] }
 0x198   :  { %22947 = vmatpush.bf16.msra.mxu1 %v37936_v21  ;;  %v37997_v21 = vld [vmem:[%s49651_s1 + $0xe38] sm:$0xff] }
 0x199   :  { %22973 = vmatpush.bf16.msra.mxu3 %v37952_v22  ;;  %v38013_v22 = vld [vmem:[%s49651_s1 + $0xeb8] sm:$0xff] }
 0x19a   :  { %22935 = vmatpush.bf16.msra.mxu0 %v37927_v23  ;;  %v37966_v23 = vld [vmem:[%s49651_s1 + $0xd40] sm:$0xff] }
 0x19b   :  { %22961 = vmatpush.bf16.msra.mxu2 %v37943_v24  ;;  %v37982_v24 = vld [vmem:[%s49651_s1 + $0xdc0] sm:$0xff] }
 0x19c   :  { %22948 = vmatpush.bf16.msra.mxu1 %v37935_v26  ;;  %v76_v26 = vld [vmem:[%s49652_s0 + $0x1b8] sm:$0xff] }
 0x19d   :  { %22974 = vmatpush.bf16.msra.mxu3 %v37951_v27  ;;  %v411_v27 = vpack.c.bf16 %v73_v19, %v73_v19  ;;  %v414_v32 = vpack.c.bf16 %v76_v26, %v76_v26  ;;  %v38043_v26 = vld [vmem:[%s49651_s1 + $0xfa8] sm:$0xff] }
 0x19e   :  { %22936 = vmatpush.bf16.msra.mxu0 %v37926_v29  ;;  %v22730_v53 = vpop.f32.mrf.mxu0  ;;  %v38005_v29 = vld [vmem:[%s49651_s1 + $0xe78] sm:$0xff] }
 0x19f   :  { %22962 = vmatpush.bf16.msra.mxu2 %v37942_v30  ;;  %v22731_v54 = vadd.f32 %v22730_v53, %v41648_v17  ;;  %v37958_v17 = vld [vmem:[%s49651_s1 + $0xd00] sm:$0xff]  ;;  %v38021_v30 = vld [vmem:[%s49651_s1 + $0xef8] sm:$0xff] }
 0x1a0   :  { %22949 = vmatpush.bf16.msra.mxu1 %v37934_v35  ;;  %v22743_v57 = vpop.f32.mrf.mxu1  ;;  %v38004_v35 = vld [vmem:[%s49651_s1 + $0xe70] sm:$0xff]  ;;  %v38001_v53 = vld [vmem:[%s49651_s1 + $0xe58] sm:$0xff] }
 0x1a1   :  { %22975 = vmatpush.bf16.msra.mxu3 %v37950_v36  ;;  %22937 = vmatmul.bf16.vlgmr.msra.gmra.mxu0 %v407_v39  ;;  %v22744_v58 = vadd.f32 %v22743_v57, %v22731_v54  ;;  %v38020_v36 = vld [vmem:[%s49651_s1 + $0xef0] sm:$0xff]  ;;  %v38003_v39 = vld [vmem:[%s49651_s1 + $0xe68] sm:$0xff]  ;;  %v38017_v54 = vld [vmem:[%s49651_s1 + $0xed8] sm:$0xff] }
 0x1a2   :  { %22981 = vmatpush.bf16.msrb.mxu0 %v37965_v33  ;;  %22963 = vmatmul.bf16.vlgmr.msra.gmra.mxu2 %v409_v40  ;;  %v37996_v33 = vld [vmem:[%s49651_s1 + $0xe30] sm:$0xff]  ;;  %v38019_v40 = vld [vmem:[%s49651_s1 + $0xee8] sm:$0xff] }
 0x1a3   :  { %23007 = vmatpush.bf16.msrb.mxu2 %v37981_v34  ;;  %22950 = vmatmul.bf16.vlgmr.msra.gmra.mxu1 %v408_v43  ;;  %v38012_v34 = vld [vmem:[%s49651_s1 + $0xeb0] sm:$0xff]  ;;  %v37994_v43 = vld [vmem:[%s49651_s1 + $0xe20] sm:$0xff] }
 0x1a4   :  { %22994 = vmatpush.bf16.msrb.mxu1 %v37973_v41  ;;  %22976 = vmatmul.bf16.vlgmr.msra.gmra.mxu3 %v410_v44  ;;  %v38010_v44 = vld [vmem:[%s49651_s1 + $0xea0] sm:$0xff] }
 0x1a5   :  { %23020 = vmatpush.bf16.msrb.mxu3 %v37989_v42  ;;  %v22756_v63 = vpop.f32.mrf.mxu2 }
 0x1a6   :  { %22982 = vmatpush.bf16.msrb.mxu0 %v37964_v45  ;;  %v22757_v0 = vadd.f32 %v22756_v63, %v22744_v58  ;;  %v22732_v4 = vpop.f32.mrf.mxu0  ;;  %v37992_v58 = vld [vmem:[%s49651_s1 + $0xe10] sm:$0xff]  ;;  %v37991_v63 = vld [vmem:[%s49651_s1 + $0xe08] sm:$0xff] }
 0x1a7   :  { %23008 = vmatpush.bf16.msrb.mxu2 %v37980_v46  ;;  %v22769_v3 = vpop.f32.mrf.mxu3 }
 0x1a8   :  { %22995 = vmatpush.bf16.msrb.mxu1 %v37972_v47  ;;  %v41759_v5 = vadd.f32 %v22769_v3, %v22757_v0  ;;  %v22745_v8 = vpop.f32.mrf.mxu1  ;;  %v38002_v47 = vld [vmem:[%s49651_s1 + $0xe60] sm:$0xff]  ;;  %v38007_v0 = vld [vmem:[%s49651_s1 + $0xe88] sm:$0xff] }
 0x1a9   :  { %23021 = vmatpush.bf16.msrb.mxu3 %v37988_v48  ;;  %v38018_v48 = vld [vmem:[%s49651_s1 + $0xee0] sm:$0xff]  ;;  %v38015_v3 = vld [vmem:[%s49651_s1 + $0xec8] sm:$0xff]  ;;  %v79_v8 = vld [vmem:[%s49652_s0 + $0x1d0] sm:$0xff] }
 0x1aa   :  { %22983 = vmatpush.bf16.msrb.mxu0 %v37963_v49  ;;  %v37993_v49 = vld [vmem:[%s49651_s1 + $0xe18] sm:$0xff] }
 0x1ab   :  { %23009 = vmatpush.bf16.msrb.mxu2 %v37979_v50  ;;  %v38009_v50 = vld [vmem:[%s49651_s1 + $0xe98] sm:$0xff] }
 0x1ac   :  { %22996 = vmatpush.bf16.msrb.mxu1 %v37971_v51 }
 0x1ad   :  { %23022 = vmatpush.bf16.msrb.mxu3 %v37987_v52  ;;  %v22758_v13 = vpop.f32.mrf.mxu2 }
 0x1ae   :  { %22984 = vmatpush.bf16.msrb.mxu0 %v37962_v55  ;;  %v78_v13 = vld [vmem:[%s49652_s0 + $0x1c8] sm:$0xff] }
 0x1af   :  { %23010 = vmatpush.bf16.msrb.mxu2 %v37978_v56  ;;  %v22771_v16 = vpop.f32.mrf.mxu3  ;;  %v416_v19 = vpack.c.bf16 %v78_v13, %v78_v13  ;;  %v38059_v13 = vld [vmem:[%s49651_s1 + $0x1028] sm:$0xff] }
 0x1b0   :  { %22997 = vmatpush.bf16.msrb.mxu1 %v37970_v59  ;;  %v38008_v59 = vld [vmem:[%s49651_s1 + $0xe90] sm:$0xff]  ;;  %v417_v16 = vpack.c.bf16 %v79_v8, %v79_v8 }
 0x1b1   :  { %23023 = vmatpush.bf16.msrb.mxu3 %v37986_v60 }
 0x1b2   :  { %22985 = vmatpush.bf16.msrb.mxu0 %v37961_v61  ;;  %v38000_v61 = vld [vmem:[%s49651_s1 + $0xe50] sm:$0xff] }
 0x1b3   :  { %23011 = vmatpush.bf16.msrb.mxu2 %v37977_v62  ;;  %v38016_v62 = vld [vmem:[%s49651_s1 + $0xed0] sm:$0xff] }
 0x1b4   :  { %22998 = vmatpush.bf16.msrb.mxu1 %v37969_v1 }
 0x1b5   :  { %23024 = vmatpush.bf16.msrb.mxu3 %v37985_v2  ;;  %v37999_v2 = vld [vmem:[%s49651_s1 + $0xe48] sm:$0xff] }
 0x1b6   :  { %22986 = vmatpush.bf16.msrb.mxu0 %v37960_v6  ;;  %v38006_v6 = vld [vmem:[%s49651_s1 + $0xe80] sm:$0xff] }
 0x1b7   :  { %23012 = vmatpush.bf16.msrb.mxu2 %v37976_v7  ;;  %v77_v7 = vld [vmem:[%s49652_s0 + $0x1c0] sm:$0xff] }
 0x1b8   :  { %22999 = vmatpush.bf16.msrb.mxu1 %v37968_v9  ;;  %v38029_v9 = vld [vmem:[%s49651_s1 + $0xf38] sm:$0xff] }
 0x1b9   :  { %23025 = vmatpush.bf16.msrb.mxu3 %v37984_v10  ;;  %v38045_v10 = vld [vmem:[%s49651_s1 + $0xfb8] sm:$0xff] }
 0x1ba   :  { %22987 = vmatpush.bf16.msrb.mxu0 %v37959_v11  ;;  %v37998_v11 = vld [vmem:[%s49651_s1 + $0xe40] sm:$0xff] }
 0x1bb   :  { %23013 = vmatpush.bf16.msrb.mxu2 %v37975_v12  ;;  %v38014_v12 = vld [vmem:[%s49651_s1 + $0xec0] sm:$0xff] }
 0x1bc   :  { %23000 = vmatpush.bf16.msrb.mxu1 %v37967_v14  ;;  %v80_v14 = vld [vmem:[%s49652_s0 + $0x1d8] sm:$0xff] }
 0x1bd   :  { %23026 = vmatpush.bf16.msrb.mxu3 %v37983_v15  ;;  %v415_v15 = vpack.c.bf16 %v77_v7, %v77_v7  ;;  %v418_v20 = vpack.c.bf16 %v80_v14, %v80_v14  ;;  %v38075_v14 = vld [vmem:[%s49651_s1 + $0x10a8] sm:$0xff] }
 0x1be   :  { %22988 = vmatpush.bf16.msrb.mxu0 %v37958_v17  ;;  %v22782_v41 = vpop.f32.mrf.mxu0  ;;  %v38037_v17 = vld [vmem:[%s49651_s1 + $0xf78] sm:$0xff] }
 0x1bf   :  { %23014 = vmatpush.bf16.msrb.mxu2 %v37974_v18  ;;  %v22783_v42 = vadd.f32 %v22782_v41, %v41759_v5  ;;  %v37990_v5 = vld [vmem:[%s49651_s1 + $0xe00] sm:$0xff]  ;;  %v38053_v18 = vld [vmem:[%s49651_s1 + $0xff8] sm:$0xff] }
 0x1c0   :  { %23001 = vmatpush.bf16.msrb.mxu1 %v37966_v23  ;;  %v22795_v45 = vpop.f32.mrf.mxu1  ;;  %v38036_v23 = vld [vmem:[%s49651_s1 + $0xf70] sm:$0xff]  ;;  %v38033_v41 = vld [vmem:[%s49651_s1 + $0xf58] sm:$0xff] }
 0x1c1   :  { %23027 = vmatpush.bf16.msrb.mxu3 %v37982_v24  ;;  %22989 = vmatmul.bf16.vlgmr.msrb.gmra.mxu0 %v411_v27  ;;  %v22796_v46 = vadd.f32 %v22795_v45, %v22783_v42  ;;  %v38052_v24 = vld [vmem:[%s49651_s1 + $0xff0] sm:$0xff]  ;;  %v38035_v27 = vld [vmem:[%s49651_s1 + $0xf68] sm:$0xff]  ;;  %v38049_v42 = vld [vmem:[%s49651_s1 + $0xfd8] sm:$0xff] }
 0x1c2   :  { %23033 = vmatpush.bf16.msra.mxu0 %v37997_v21  ;;  %23015 = vmatmul.bf16.vlgmr.msrb.gmra.mxu2 %v413_v28  ;;  %v38028_v21 = vld [vmem:[%s49651_s1 + $0xf30] sm:$0xff]  ;;  %v38051_v28 = vld [vmem:[%s49651_s1 + $0xfe8] sm:$0xff] }
 0x1c3   :  { %23059 = vmatpush.bf16.msra.mxu2 %v38013_v22  ;;  %23002 = vmatmul.bf16.vlgmr.msrb.gmra.mxu1 %v412_v31  ;;  %v38044_v22 = vld [vmem:[%s49651_s1 + $0xfb0] sm:$0xff]  ;;  %v38026_v31 = vld [vmem:[%s49651_s1 + $0xf20] sm:$0xff] }
 0x1c4   :  { %23046 = vmatpush.bf16.msra.mxu1 %v38005_v29  ;;  %23028 = vmatmul.bf16.vlgmr.msrb.gmra.mxu3 %v414_v32  ;;  %v38042_v32 = vld [vmem:[%s49651_s1 + $0xfa0] sm:$0xff] }
 0x1c5   :  { %23072 = vmatpush.bf16.msra.mxu3 %v38021_v30  ;;  %v22808_v51 = vpop.f32.mrf.mxu2 }
 0x1c6   :  { %23034 = vmatpush.bf16.msra.mxu0 %v37996_v33  ;;  %v22809_v52 = vadd.f32 %v22808_v51, %v22796_v46  ;;  %v22784_v56 = vpop.f32.mrf.mxu0  ;;  %v38024_v46 = vld [vmem:[%s49651_s1 + $0xf10] sm:$0xff]  ;;  %v38023_v51 = vld [vmem:[%s49651_s1 + $0xf08] sm:$0xff] }
 0x1c7   :  { %23060 = vmatpush.bf16.msra.mxu2 %v38012_v34  ;;  %v22821_v55 = vpop.f32.mrf.mxu3 }
 0x1c8   :  { %23047 = vmatpush.bf16.msra.mxu1 %v38004_v35  ;;  %v41870_v57 = vadd.f32 %v22821_v55, %v22809_v52  ;;  %v22797_v60 = vpop.f32.mrf.mxu1  ;;  %v38034_v35 = vld [vmem:[%s49651_s1 + $0xf60] sm:$0xff]  ;;  %v38039_v52 = vld [vmem:[%s49651_s1 + $0xf88] sm:$0xff] }
 0x1c9   :  { %23073 = vmatpush.bf16.msra.mxu3 %v38020_v36  ;;  %v38050_v36 = vld [vmem:[%s49651_s1 + $0xfe0] sm:$0xff]  ;;  %v38047_v55 = vld [vmem:[%s49651_s1 + $0xfc8] sm:$0xff]  ;;  %v83_v60 = vld [vmem:[%s49652_s0 + $0x1f0] sm:$0xff] }
 0x1ca   :  { %23035 = vmatpush.bf16.msra.mxu0 %v37995_v37  ;;  %v38025_v37 = vld [vmem:[%s49651_s1 + $0xf18] sm:$0xff] }
 0x1cb   :  { %23061 = vmatpush.bf16.msra.mxu2 %v38011_v38  ;;  %v38041_v38 = vld [vmem:[%s49651_s1 + $0xf98] sm:$0xff] }
 0x1cc   :  { %23048 = vmatpush.bf16.msra.mxu1 %v38003_v39 }
 0x1cd   :  { %23074 = vmatpush.bf16.msra.mxu3 %v38019_v40  ;;  %v22810_v1 = vpop.f32.mrf.mxu2 }
 0x1ce   :  { %23036 = vmatpush.bf16.msra.mxu0 %v37994_v43  ;;  %v82_v1 = vld [vmem:[%s49652_s0 + $0x1e8] sm:$0xff] }
 0x1cf   :  { %23062 = vmatpush.bf16.msra.mxu2 %v38010_v44  ;;  %v22823_v4 = vpop.f32.mrf.mxu3  ;;  %v420_v7 = vpack.c.bf16 %v82_v1, %v82_v1  ;;  %v38091_v1 = vld [vmem:[%s49651_s1 + $0x1128] sm:$0xff] }
 0x1d0   :  { %23049 = vmatpush.bf16.msra.mxu1 %v38002_v47  ;;  %v38040_v47 = vld [vmem:[%s49651_s1 + $0xf90] sm:$0xff]  ;;  %v421_v4 = vpack.c.bf16 %v83_v60, %v83_v60 }
 0x1d1   :  { %23075 = vmatpush.bf16.msra.mxu3 %v38018_v48 }
 0x1d2   :  { %23037 = vmatpush.bf16.msra.mxu0 %v37993_v49  ;;  %v38032_v49 = vld [vmem:[%s49651_s1 + $0xf50] sm:$0xff] }
 0x1d3   :  { %23063 = vmatpush.bf16.msra.mxu2 %v38009_v50  ;;  %v38048_v50 = vld [vmem:[%s49651_s1 + $0xfd0] sm:$0xff] }
 0x1d4   :  { %23050 = vmatpush.bf16.msra.mxu1 %v38001_v53 }
 0x1d5   :  { %23076 = vmatpush.bf16.msra.mxu3 %v38017_v54  ;;  %v38031_v54 = vld [vmem:[%s49651_s1 + $0xf48] sm:$0xff] }
 0x1d6   :  { %23038 = vmatpush.bf16.msra.mxu0 %v37992_v58  ;;  %v38038_v58 = vld [vmem:[%s49651_s1 + $0xf80] sm:$0xff] }
 0x1d7   :  { %23064 = vmatpush.bf16.msra.mxu2 %v38008_v59  ;;  %v81_v59 = vld [vmem:[%s49652_s0 + $0x1e0] sm:$0xff] }
 0x1d8   :  { %23051 = vmatpush.bf16.msra.mxu1 %v38000_v61  ;;  %v38061_v61 = vld [vmem:[%s49651_s1 + $0x1038] sm:$0xff] }
 0x1d9   :  { %23077 = vmatpush.bf16.msra.mxu3 %v38016_v62  ;;  %v38077_v62 = vld [vmem:[%s49651_s1 + $0x10b8] sm:$0xff] }
 0x1da   :  { %23039 = vmatpush.bf16.msra.mxu0 %v37991_v63  ;;  %v38030_v63 = vld [vmem:[%s49651_s1 + $0xf40] sm:$0xff] }
 0x1db   :  { %23065 = vmatpush.bf16.msra.mxu2 %v38007_v0  ;;  %v38046_v0 = vld [vmem:[%s49651_s1 + $0xfc0] sm:$0xff] }
 0x1dc   :  { %23052 = vmatpush.bf16.msra.mxu1 %v37999_v2  ;;  %v84_v2 = vld [vmem:[%s49652_s0 + $0x1f8] sm:$0xff] }
 0x1dd   :  { %23078 = vmatpush.bf16.msra.mxu3 %v38015_v3  ;;  %v419_v3 = vpack.c.bf16 %v81_v59, %v81_v59  ;;  %v422_v8 = vpack.c.bf16 %v84_v2, %v84_v2  ;;  %v38107_v2 = vld [vmem:[%s49651_s1 + $0x11a8] sm:$0xff] }
 0x1de   :  { %23040 = vmatpush.bf16.msra.mxu0 %v37990_v5  ;;  %v22834_v29 = vpop.f32.mrf.mxu0  ;;  %v38069_v5 = vld [vmem:[%s49651_s1 + $0x1078] sm:$0xff] }
 0x1df   :  { %23066 = vmatpush.bf16.msra.mxu2 %v38006_v6  ;;  %v22835_v30 = vadd.f32 %v22834_v29, %v41870_v57  ;;  %v38022_v57 = vld [vmem:[%s49651_s1 + $0xf00] sm:$0xff]  ;;  %v38085_v6 = vld [vmem:[%s49651_s1 + $0x10f8] sm:$0xff] }
 0x1e0   :  { %23053 = vmatpush.bf16.msra.mxu1 %v37998_v11  ;;  %v22847_v33 = vpop.f32.mrf.mxu1  ;;  %v38068_v11 = vld [vmem:[%s49651_s1 + $0x1070] sm:$0xff]  ;;  %v38065_v29 = vld [vmem:[%s49651_s1 + $0x1058] sm:$0xff] }
 0x1e1   :  { %23079 = vmatpush.bf16.msra.mxu3 %v38014_v12  ;;  %23041 = vmatmul.bf16.vlgmr.msra.gmra.mxu0 %v415_v15  ;;  %v22848_v34 = vadd.f32 %v22847_v33, %v22835_v30  ;;  %v38084_v12 = vld [vmem:[%s49651_s1 + $0x10f0] sm:$0xff]  ;;  %v38067_v15 = vld [vmem:[%s49651_s1 + $0x1068] sm:$0xff]  ;;  %v38081_v30 = vld [vmem:[%s49651_s1 + $0x10d8] sm:$0xff] }
 0x1e2   :  { %23085 = vmatpush.bf16.msrb.mxu0 %v38029_v9  ;;  %23067 = vmatmul.bf16.vlgmr.msra.gmra.mxu2 %v417_v16  ;;  %v38060_v9 = vld [vmem:[%s49651_s1 + $0x1030] sm:$0xff]  ;;  %v38083_v16 = vld [vmem:[%s49651_s1 + $0x10e8] sm:$0xff] }
 0x1e3   :  { %23111 = vmatpush.bf16.msrb.mxu2 %v38045_v10  ;;  %23054 = vmatmul.bf16.vlgmr.msra.gmra.mxu1 %v416_v19  ;;  %v38076_v10 = vld [vmem:[%s49651_s1 + $0x10b0] sm:$0xff]  ;;  %v38058_v19 = vld [vmem:[%s49651_s1 + $0x1020] sm:$0xff] }
 0x1e4   :  { %23098 = vmatpush.bf16.msrb.mxu1 %v38037_v17  ;;  %23080 = vmatmul.bf16.vlgmr.msra.gmra.mxu3 %v418_v20  ;;  %v38074_v20 = vld [vmem:[%s49651_s1 + $0x10a0] sm:$0xff] }
 0x1e5   :  { %23124 = vmatpush.bf16.msrb.mxu3 %v38053_v18  ;;  %v22860_v39 = vpop.f32.mrf.mxu2 }
 0x1e6   :  { %23086 = vmatpush.bf16.msrb.mxu0 %v38028_v21  ;;  %v22861_v40 = vadd.f32 %v22860_v39, %v22848_v34  ;;  %v22836_v44 = vpop.f32.mrf.mxu0  ;;  %v38056_v34 = vld [vmem:[%s49651_s1 + $0x1010] sm:$0xff]  ;;  %v38055_v39 = vld [vmem:[%s49651_s1 + $0x1008] sm:$0xff] }
 0x1e7   :  { %23112 = vmatpush.bf16.msrb.mxu2 %v38044_v22  ;;  %v22873_v43 = vpop.f32.mrf.mxu3 }
 0x1e8   :  { %23099 = vmatpush.bf16.msrb.mxu1 %v38036_v23  ;;  %v41981_v45 = vadd.f32 %v22873_v43, %v22861_v40  ;;  %v22849_v48 = vpop.f32.mrf.mxu1  ;;  %v38066_v23 = vld [vmem:[%s49651_s1 + $0x1060] sm:$0xff]  ;;  %v38071_v40 = vld [vmem:[%s49651_s1 + $0x1088] sm:$0xff] }
 0x1e9   :  { %23125 = vmatpush.bf16.msrb.mxu3 %v38052_v24  ;;  %v38082_v24 = vld [vmem:[%s49651_s1 + $0x10e0] sm:$0xff]  ;;  %v38079_v43 = vld [vmem:[%s49651_s1 + $0x10c8] sm:$0xff]  ;;  %v87_v48 = vld [vmem:[%s49652_s0 + $0x210] sm:$0xff] }
 0x1ea   :  { %23087 = vmatpush.bf16.msrb.mxu0 %v38027_v25  ;;  %v38057_v25 = vld [vmem:[%s49651_s1 + $0x1018] sm:$0xff] }
 0x1eb   :  { %23113 = vmatpush.bf16.msrb.mxu2 %v38043_v26  ;;  %v38073_v26 = vld [vmem:[%s49651_s1 + $0x1098] sm:$0xff] }
 0x1ec   :  { %23100 = vmatpush.bf16.msrb.mxu1 %v38035_v27 }
 0x1ed   :  { %23126 = vmatpush.bf16.msrb.mxu3 %v38051_v28  ;;  %v22862_v53 = vpop.f32.mrf.mxu2 }
 0x1ee   :  { %23088 = vmatpush.bf16.msrb.mxu0 %v38026_v31  ;;  %v86_v53 = vld [vmem:[%s49652_s0 + $0x208] sm:$0xff] }
 0x1ef   :  { %23114 = vmatpush.bf16.msrb.mxu2 %v38042_v32  ;;  %v22875_v56 = vpop.f32.mrf.mxu3  ;;  %v424_v59 = vpack.c.bf16 %v86_v53, %v86_v53  ;;  %v38123_v53 = vld [vmem:[%s49651_s1 + $0x1228] sm:$0xff] }
 0x1f0   :  { %23101 = vmatpush.bf16.msrb.mxu1 %v38034_v35  ;;  %v38072_v35 = vld [vmem:[%s49651_s1 + $0x1090] sm:$0xff]  ;;  %v425_v56 = vpack.c.bf16 %v87_v48, %v87_v48 }
 0x1f1   :  { %23127 = vmatpush.bf16.msrb.mxu3 %v38050_v36 }
 0x1f2   :  { %23089 = vmatpush.bf16.msrb.mxu0 %v38025_v37  ;;  %v38064_v37 = vld [vmem:[%s49651_s1 + $0x1050] sm:$0xff] }
 0x1f3   :  { %23115 = vmatpush.bf16.msrb.mxu2 %v38041_v38  ;;  %v38080_v38 = vld [vmem:[%s49651_s1 + $0x10d0] sm:$0xff] }
 0x1f4   :  { %23102 = vmatpush.bf16.msrb.mxu1 %v38033_v41 }
 0x1f5   :  { %23128 = vmatpush.bf16.msrb.mxu3 %v38049_v42  ;;  %v38063_v42 = vld [vmem:[%s49651_s1 + $0x1048] sm:$0xff] }
 0x1f6   :  { %23090 = vmatpush.bf16.msrb.mxu0 %v38024_v46  ;;  %v38070_v46 = vld [vmem:[%s49651_s1 + $0x1080] sm:$0xff] }
 0x1f7   :  { %23116 = vmatpush.bf16.msrb.mxu2 %v38040_v47  ;;  %v85_v47 = vld [vmem:[%s49652_s0 + $0x200] sm:$0xff] }
 0x1f8   :  { %23103 = vmatpush.bf16.msrb.mxu1 %v38032_v49  ;;  %v38093_v49 = vld [vmem:[%s49651_s1 + $0x1138] sm:$0xff] }
 0x1f9   :  { %23129 = vmatpush.bf16.msrb.mxu3 %v38048_v50  ;;  %v38109_v50 = vld [vmem:[%s49651_s1 + $0x11b8] sm:$0xff] }
 0x1fa   :  { %23091 = vmatpush.bf16.msrb.mxu0 %v38023_v51  ;;  %v38062_v51 = vld [vmem:[%s49651_s1 + $0x1040] sm:$0xff] }
 0x1fb   :  { %23117 = vmatpush.bf16.msrb.mxu2 %v38039_v52  ;;  %v38078_v52 = vld [vmem:[%s49651_s1 + $0x10c0] sm:$0xff] }
 0x1fc   :  { %23104 = vmatpush.bf16.msrb.mxu1 %v38031_v54  ;;  %v88_v54 = vld [vmem:[%s49652_s0 + $0x218] sm:$0xff] }
 0x1fd   :  { %23130 = vmatpush.bf16.msrb.mxu3 %v38047_v55  ;;  %v423_v55 = vpack.c.bf16 %v85_v47, %v85_v47  ;;  %v426_v60 = vpack.c.bf16 %v88_v54, %v88_v54  ;;  %v38139_v54 = vld [vmem:[%s49651_s1 + $0x12a8] sm:$0xff] }
 0x1fe   :  { %23092 = vmatpush.bf16.msrb.mxu0 %v38022_v57  ;;  %v22886_v17 = vpop.f32.mrf.mxu0  ;;  %v38101_v57 = vld [vmem:[%s49651_s1 + $0x1178] sm:$0xff] }
 0x1ff   :  { %23118 = vmatpush.bf16.msrb.mxu2 %v38038_v58  ;;  %v22887_v18 = vadd.f32 %v22886_v17, %v41981_v45  ;;  %v38054_v45 = vld [vmem:[%s49651_s1 + $0x1000] sm:$0xff]  ;;  %v38117_v58 = vld [vmem:[%s49651_s1 + $0x11f8] sm:$0xff] }
 0x200   :  { %23105 = vmatpush.bf16.msrb.mxu1 %v38030_v63  ;;  %v22899_v21 = vpop.f32.mrf.mxu1  ;;  %v38100_v63 = vld [vmem:[%s49651_s1 + $0x1170] sm:$0xff]  ;;  %v38097_v17 = vld [vmem:[%s49651_s1 + $0x1158] sm:$0xff] }
 0x201   :  { %23131 = vmatpush.bf16.msrb.mxu3 %v38046_v0  ;;  %23093 = vmatmul.bf16.vlgmr.msrb.gmra.mxu0 %v419_v3  ;;  %v22900_v22 = vadd.f32 %v22899_v21, %v22887_v18  ;;  %v38116_v0 = vld [vmem:[%s49651_s1 + $0x11f0] sm:$0xff]  ;;  %v38099_v3 = vld [vmem:[%s49651_s1 + $0x1168] sm:$0xff]  ;;  %v38113_v18 = vld [vmem:[%s49651_s1 + $0x11d8] sm:$0xff] }
 0x202   :  { %23137 = vmatpush.bf16.msra.mxu0 %v38061_v61  ;;  %23119 = vmatmul.bf16.vlgmr.msrb.gmra.mxu2 %v421_v4  ;;  %v38092_v61 = vld [vmem:[%s49651_s1 + $0x1130] sm:$0xff]  ;;  %v38115_v4 = vld [vmem:[%s49651_s1 + $0x11e8] sm:$0xff] }
 0x203   :  { %23163 = vmatpush.bf16.msra.mxu2 %v38077_v62  ;;  %23106 = vmatmul.bf16.vlgmr.msrb.gmra.mxu1 %v420_v7  ;;  %v38108_v62 = vld [vmem:[%s49651_s1 + $0x11b0] sm:$0xff]  ;;  %v38090_v7 = vld [vmem:[%s49651_s1 + $0x1120] sm:$0xff] }
 0x204   :  { %23150 = vmatpush.bf16.msra.mxu1 %v38069_v5  ;;  %23132 = vmatmul.bf16.vlgmr.msrb.gmra.mxu3 %v422_v8  ;;  %v38106_v8 = vld [vmem:[%s49651_s1 + $0x11a0] sm:$0xff] }
 0x205   :  { %23176 = vmatpush.bf16.msra.mxu3 %v38085_v6  ;;  %v22912_v27 = vpop.f32.mrf.mxu2 }
 0x206   :  { %23138 = vmatpush.bf16.msra.mxu0 %v38060_v9  ;;  %v22913_v28 = vadd.f32 %v22912_v27, %v22900_v22  ;;  %v22888_v32 = vpop.f32.mrf.mxu0  ;;  %v38088_v22 = vld [vmem:[%s49651_s1 + $0x1110] sm:$0xff]  ;;  %v38087_v27 = vld [vmem:[%s49651_s1 + $0x1108] sm:$0xff] }
 0x207   :  { %23164 = vmatpush.bf16.msra.mxu2 %v38076_v10  ;;  %v22925_v31 = vpop.f32.mrf.mxu3 }
 0x208   :  { %23151 = vmatpush.bf16.msra.mxu1 %v38068_v11  ;;  %v42092_v33 = vadd.f32 %v22925_v31, %v22913_v28  ;;  %v22901_v36 = vpop.f32.mrf.mxu1  ;;  %v38098_v11 = vld [vmem:[%s49651_s1 + $0x1160] sm:$0xff]  ;;  %v38103_v28 = vld [vmem:[%s49651_s1 + $0x1188] sm:$0xff] }
 0x209   :  { %23177 = vmatpush.bf16.msra.mxu3 %v38084_v12  ;;  %v38114_v12 = vld [vmem:[%s49651_s1 + $0x11e0] sm:$0xff]  ;;  %v38111_v31 = vld [vmem:[%s49651_s1 + $0x11c8] sm:$0xff]  ;;  %v91_v36 = vld [vmem:[%s49652_s0 + $0x230] sm:$0xff] }
 0x20a   :  { %23139 = vmatpush.bf16.msra.mxu0 %v38059_v13  ;;  %v38089_v13 = vld [vmem:[%s49651_s1 + $0x1118] sm:$0xff] }
 0x20b   :  { %23165 = vmatpush.bf16.msra.mxu2 %v38075_v14  ;;  %v38105_v14 = vld [vmem:[%s49651_s1 + $0x1198] sm:$0xff] }
 0x20c   :  { %23152 = vmatpush.bf16.msra.mxu1 %v38067_v15 }
 0x20d   :  { %23178 = vmatpush.bf16.msra.mxu3 %v38083_v16  ;;  %v22914_v41 = vpop.f32.mrf.mxu2 }
 0x20e   :  { %23140 = vmatpush.bf16.msra.mxu0 %v38058_v19  ;;  %v90_v41 = vld [vmem:[%s49652_s0 + $0x228] sm:$0xff] }
 0x20f   :  { %23166 = vmatpush.bf16.msra.mxu2 %v38074_v20  ;;  %v22927_v44 = vpop.f32.mrf.mxu3  ;;  %v428_v47 = vpack.c.bf16 %v90_v41, %v90_v41  ;;  %v38155_v41 = vld [vmem:[%s49651_s1 + $0x1328] sm:$0xff] }
 0x210   :  { %23153 = vmatpush.bf16.msra.mxu1 %v38066_v23  ;;  %v38104_v23 = vld [vmem:[%s49651_s1 + $0x1190] sm:$0xff]  ;;  %v429_v44 = vpack.c.bf16 %v91_v36, %v91_v36 }
 0x211   :  { %23179 = vmatpush.bf16.msra.mxu3 %v38082_v24 }
 0x212   :  { %23141 = vmatpush.bf16.msra.mxu0 %v38057_v25  ;;  %v38096_v25 = vld [vmem:[%s49651_s1 + $0x1150] sm:$0xff] }
 0x213   :  { %23167 = vmatpush.bf16.msra.mxu2 %v38073_v26  ;;  %v38112_v26 = vld [vmem:[%s49651_s1 + $0x11d0] sm:$0xff] }
 0x214   :  { %23154 = vmatpush.bf16.msra.mxu1 %v38065_v29 }
 0x215   :  { %23180 = vmatpush.bf16.msra.mxu3 %v38081_v30  ;;  %v38095_v30 = vld [vmem:[%s49651_s1 + $0x1148] sm:$0xff] }
 0x216   :  { %23142 = vmatpush.bf16.msra.mxu0 %v38056_v34  ;;  %v38102_v34 = vld [vmem:[%s49651_s1 + $0x1180] sm:$0xff] }
 0x217   :  { %23168 = vmatpush.bf16.msra.mxu2 %v38072_v35  ;;  %v89_v35 = vld [vmem:[%s49652_s0 + $0x220] sm:$0xff] }
 0x218   :  { %23155 = vmatpush.bf16.msra.mxu1 %v38064_v37  ;;  %v38125_v37 = vld [vmem:[%s49651_s1 + $0x1238] sm:$0xff] }
 0x219   :  { %23181 = vmatpush.bf16.msra.mxu3 %v38080_v38  ;;  %v38141_v38 = vld [vmem:[%s49651_s1 + $0x12b8] sm:$0xff] }
 0x21a   :  { %23143 = vmatpush.bf16.msra.mxu0 %v38055_v39  ;;  %v38094_v39 = vld [vmem:[%s49651_s1 + $0x1140] sm:$0xff] }
 0x21b   :  { %23169 = vmatpush.bf16.msra.mxu2 %v38071_v40  ;;  %v38110_v40 = vld [vmem:[%s49651_s1 + $0x11c0] sm:$0xff] }
 0x21c   :  { %23156 = vmatpush.bf16.msra.mxu1 %v38063_v42  ;;  %v92_v42 = vld [vmem:[%s49652_s0 + $0x238] sm:$0xff] }
 0x21d   :  { %23182 = vmatpush.bf16.msra.mxu3 %v38079_v43  ;;  %v427_v43 = vpack.c.bf16 %v89_v35, %v89_v35  ;;  %v430_v48 = vpack.c.bf16 %v92_v42, %v92_v42  ;;  %v38171_v42 = vld [vmem:[%s49651_s1 + $0x13a8] sm:$0xff] }
 0x21e   :  { %23144 = vmatpush.bf16.msra.mxu0 %v38054_v45  ;;  %v22938_v5 = vpop.f32.mrf.mxu0  ;;  %v38133_v45 = vld [vmem:[%s49651_s1 + $0x1278] sm:$0xff] }
 0x21f   :  { %23170 = vmatpush.bf16.msra.mxu2 %v38070_v46  ;;  %v22939_v6 = vadd.f32 %v22938_v5, %v42092_v33  ;;  %v38086_v33 = vld [vmem:[%s49651_s1 + $0x1100] sm:$0xff]  ;;  %v38149_v46 = vld [vmem:[%s49651_s1 + $0x12f8] sm:$0xff] }
 0x220   :  { %23157 = vmatpush.bf16.msra.mxu1 %v38062_v51  ;;  %v22951_v9 = vpop.f32.mrf.mxu1  ;;  %v38132_v51 = vld [vmem:[%s49651_s1 + $0x1270] sm:$0xff]  ;;  %v38129_v5 = vld [vmem:[%s49651_s1 + $0x1258] sm:$0xff] }
 0x221   :  { %23183 = vmatpush.bf16.msra.mxu3 %v38078_v52  ;;  %23145 = vmatmul.bf16.vlgmr.msra.gmra.mxu0 %v423_v55  ;;  %v22952_v10 = vadd.f32 %v22951_v9, %v22939_v6  ;;  %v38148_v52 = vld [vmem:[%s49651_s1 + $0x12f0] sm:$0xff]  ;;  %v38131_v55 = vld [vmem:[%s49651_s1 + $0x1268] sm:$0xff]  ;;  %v38145_v6 = vld [vmem:[%s49651_s1 + $0x12d8] sm:$0xff] }
 0x222   :  { %23189 = vmatpush.bf16.msrb.mxu0 %v38093_v49  ;;  %23171 = vmatmul.bf16.vlgmr.msra.gmra.mxu2 %v425_v56  ;;  %v38124_v49 = vld [vmem:[%s49651_s1 + $0x1230] sm:$0xff]  ;;  %v38147_v56 = vld [vmem:[%s49651_s1 + $0x12e8] sm:$0xff] }
 0x223   :  { %23215 = vmatpush.bf16.msrb.mxu2 %v38109_v50  ;;  %23158 = vmatmul.bf16.vlgmr.msra.gmra.mxu1 %v424_v59  ;;  %v38140_v50 = vld [vmem:[%s49651_s1 + $0x12b0] sm:$0xff]  ;;  %v38122_v59 = vld [vmem:[%s49651_s1 + $0x1220] sm:$0xff] }
 0x224   :  { %23202 = vmatpush.bf16.msrb.mxu1 %v38101_v57  ;;  %23184 = vmatmul.bf16.vlgmr.msra.gmra.mxu3 %v426_v60  ;;  %v38138_v60 = vld [vmem:[%s49651_s1 + $0x12a0] sm:$0xff] }
 0x225   :  { %23228 = vmatpush.bf16.msrb.mxu3 %v38117_v58  ;;  %v22964_v15 = vpop.f32.mrf.mxu2 }
 0x226   :  { %23190 = vmatpush.bf16.msrb.mxu0 %v38092_v61  ;;  %v22965_v16 = vadd.f32 %v22964_v15, %v22952_v10  ;;  %v22940_v20 = vpop.f32.mrf.mxu0  ;;  %v38120_v10 = vld [vmem:[%s49651_s1 + $0x1210] sm:$0xff]  ;;  %v38119_v15 = vld [vmem:[%s49651_s1 + $0x1208] sm:$0xff] }
 0x227   :  { %23216 = vmatpush.bf16.msrb.mxu2 %v38108_v62  ;;  %v22977_v19 = vpop.f32.mrf.mxu3 }
 0x228   :  { %23203 = vmatpush.bf16.msrb.mxu1 %v38100_v63  ;;  %v42203_v21 = vadd.f32 %v22977_v19, %v22965_v16  ;;  %v22953_v24 = vpop.f32.mrf.mxu1  ;;  %v38130_v63 = vld [vmem:[%s49651_s1 + $0x1260] sm:$0xff]  ;;  %v38135_v16 = vld [vmem:[%s49651_s1 + $0x1288] sm:$0xff] }
 0x229   :  { %23229 = vmatpush.bf16.msrb.mxu3 %v38116_v0  ;;  %v38146_v0 = vld [vmem:[%s49651_s1 + $0x12e0] sm:$0xff]  ;;  %v38143_v19 = vld [vmem:[%s49651_s1 + $0x12c8] sm:$0xff]  ;;  %v95_v24 = vld [vmem:[%s49652_s0 + $0x250] sm:$0xff] }
 0x22a   :  { %23191 = vmatpush.bf16.msrb.mxu0 %v38091_v1  ;;  %v38121_v1 = vld [vmem:[%s49651_s1 + $0x1218] sm:$0xff] }
 0x22b   :  { %23217 = vmatpush.bf16.msrb.mxu2 %v38107_v2  ;;  %v38137_v2 = vld [vmem:[%s49651_s1 + $0x1298] sm:$0xff] }
 0x22c   :  { %23204 = vmatpush.bf16.msrb.mxu1 %v38099_v3 }
 0x22d   :  { %23230 = vmatpush.bf16.msrb.mxu3 %v38115_v4  ;;  %v22966_v29 = vpop.f32.mrf.mxu2 }
 0x22e   :  { %23192 = vmatpush.bf16.msrb.mxu0 %v38090_v7  ;;  %v94_v29 = vld [vmem:[%s49652_s0 + $0x248] sm:$0xff] }
 0x22f   :  { %23218 = vmatpush.bf16.msrb.mxu2 %v38106_v8  ;;  %v22979_v32 = vpop.f32.mrf.mxu3  ;;  %v432_v35 = vpack.c.bf16 %v94_v29, %v94_v29  ;;  %v38187_v29 = vld [vmem:[%s49651_s1 + $0x1428] sm:$0xff] }
 0x230   :  { %23205 = vmatpush.bf16.msrb.mxu1 %v38098_v11  ;;  %v38136_v11 = vld [vmem:[%s49651_s1 + $0x1290] sm:$0xff]  ;;  %v433_v32 = vpack.c.bf16 %v95_v24, %v95_v24 }
 0x231   :  { %23231 = vmatpush.bf16.msrb.mxu3 %v38114_v12 }
 0x232   :  { %23193 = vmatpush.bf16.msrb.mxu0 %v38089_v13  ;;  %v38128_v13 = vld [vmem:[%s49651_s1 + $0x1250] sm:$0xff] }
 0x233   :  { %23219 = vmatpush.bf16.msrb.mxu2 %v38105_v14  ;;  %v38144_v14 = vld [vmem:[%s49651_s1 + $0x12d0] sm:$0xff] }
 0x234   :  { %23206 = vmatpush.bf16.msrb.mxu1 %v38097_v17 }
 0x235   :  { %23232 = vmatpush.bf16.msrb.mxu3 %v38113_v18  ;;  %v38127_v18 = vld [vmem:[%s49651_s1 + $0x1248] sm:$0xff] }
 0x236   :  { %23194 = vmatpush.bf16.msrb.mxu0 %v38088_v22  ;;  %v38134_v22 = vld [vmem:[%s49651_s1 + $0x1280] sm:$0xff] }
 0x237   :  { %23220 = vmatpush.bf16.msrb.mxu2 %v38104_v23  ;;  %v93_v23 = vld [vmem:[%s49652_s0 + $0x240] sm:$0xff] }
 0x238   :  { %23207 = vmatpush.bf16.msrb.mxu1 %v38096_v25  ;;  %v38157_v25 = vld [vmem:[%s49651_s1 + $0x1338] sm:$0xff] }
 0x239   :  { %23233 = vmatpush.bf16.msrb.mxu3 %v38112_v26  ;;  %v38173_v26 = vld [vmem:[%s49651_s1 + $0x13b8] sm:$0xff] }
 0x23a   :  { %23195 = vmatpush.bf16.msrb.mxu0 %v38087_v27  ;;  %v38126_v27 = vld [vmem:[%s49651_s1 + $0x1240] sm:$0xff] }
 0x23b   :  { %23221 = vmatpush.bf16.msrb.mxu2 %v38103_v28  ;;  %v38142_v28 = vld [vmem:[%s49651_s1 + $0x12c0] sm:$0xff] }
 0x23c   :  { %23208 = vmatpush.bf16.msrb.mxu1 %v38095_v30  ;;  %v96_v30 = vld [vmem:[%s49652_s0 + $0x258] sm:$0xff] }
 0x23d   :  { %23234 = vmatpush.bf16.msrb.mxu3 %v38111_v31  ;;  %v431_v31 = vpack.c.bf16 %v93_v23, %v93_v23  ;;  %v434_v36 = vpack.c.bf16 %v96_v30, %v96_v30  ;;  %v38203_v30 = vld [vmem:[%s49651_s1 + $0x14a8] sm:$0xff] }
 0x23e   :  { %23196 = vmatpush.bf16.msrb.mxu0 %v38086_v33  ;;  %v22990_v57 = vpop.f32.mrf.mxu0  ;;  %v38165_v33 = vld [vmem:[%s49651_s1 + $0x1378] sm:$0xff] }
 0x23f   :  { %23222 = vmatpush.bf16.msrb.mxu2 %v38102_v34  ;;  %v22991_v58 = vadd.f32 %v22990_v57, %v42203_v21  ;;  %v38118_v21 = vld [vmem:[%s49651_s1 + $0x1200] sm:$0xff]  ;;  %v38181_v34 = vld [vmem:[%s49651_s1 + $0x13f8] sm:$0xff] }
 0x240   :  { %23209 = vmatpush.bf16.msrb.mxu1 %v38094_v39  ;;  %v23003_v61 = vpop.f32.mrf.mxu1  ;;  %v38164_v39 = vld [vmem:[%s49651_s1 + $0x1370] sm:$0xff]  ;;  %v38161_v57 = vld [vmem:[%s49651_s1 + $0x1358] sm:$0xff] }
 0x241   :  { %23235 = vmatpush.bf16.msrb.mxu3 %v38110_v40  ;;  %23197 = vmatmul.bf16.vlgmr.msrb.gmra.mxu0 %v427_v43  ;;  %v23004_v62 = vadd.f32 %v23003_v61, %v22991_v58  ;;  %v38180_v40 = vld [vmem:[%s49651_s1 + $0x13f0] sm:$0xff]  ;;  %v38163_v43 = vld [vmem:[%s49651_s1 + $0x1368] sm:$0xff]  ;;  %v38177_v58 = vld [vmem:[%s49651_s1 + $0x13d8] sm:$0xff] }
 0x242   :  { %23241 = vmatpush.bf16.msra.mxu0 %v38125_v37  ;;  %23223 = vmatmul.bf16.vlgmr.msrb.gmra.mxu2 %v429_v44  ;;  %v38156_v37 = vld [vmem:[%s49651_s1 + $0x1330] sm:$0xff]  ;;  %v38179_v44 = vld [vmem:[%s49651_s1 + $0x13e8] sm:$0xff] }
 0x243   :  { %23267 = vmatpush.bf16.msra.mxu2 %v38141_v38  ;;  %23210 = vmatmul.bf16.vlgmr.msrb.gmra.mxu1 %v428_v47  ;;  %v38172_v38 = vld [vmem:[%s49651_s1 + $0x13b0] sm:$0xff]  ;;  %v38154_v47 = vld [vmem:[%s49651_s1 + $0x1320] sm:$0xff] }
 0x244   :  { %23254 = vmatpush.bf16.msra.mxu1 %v38133_v45  ;;  %23236 = vmatmul.bf16.vlgmr.msrb.gmra.mxu3 %v430_v48  ;;  %v38170_v48 = vld [vmem:[%s49651_s1 + $0x13a0] sm:$0xff] }
 0x245   :  { %23280 = vmatpush.bf16.msra.mxu3 %v38149_v46  ;;  %v23016_v3 = vpop.f32.mrf.mxu2 }
 0x246   :  { %23242 = vmatpush.bf16.msra.mxu0 %v38124_v49  ;;  %v23017_v4 = vadd.f32 %v23016_v3, %v23004_v62  ;;  %v22992_v8 = vpop.f32.mrf.mxu0  ;;  %v38152_v62 = vld [vmem:[%s49651_s1 + $0x1310] sm:$0xff]  ;;  %v38151_v3 = vld [vmem:[%s49651_s1 + $0x1308] sm:$0xff] }
 0x247   :  { %23268 = vmatpush.bf16.msra.mxu2 %v38140_v50  ;;  %v23029_v7 = vpop.f32.mrf.mxu3 }
 0x248   :  { %23255 = vmatpush.bf16.msra.mxu1 %v38132_v51  ;;  %v42314_v9 = vadd.f32 %v23029_v7, %v23017_v4  ;;  %v23005_v12 = vpop.f32.mrf.mxu1  ;;  %v38162_v51 = vld [vmem:[%s49651_s1 + $0x1360] sm:$0xff]  ;;  %v38167_v4 = vld [vmem:[%s49651_s1 + $0x1388] sm:$0xff] }
 0x249   :  { %23281 = vmatpush.bf16.msra.mxu3 %v38148_v52  ;;  %v38178_v52 = vld [vmem:[%s49651_s1 + $0x13e0] sm:$0xff]  ;;  %v38175_v7 = vld [vmem:[%s49651_s1 + $0x13c8] sm:$0xff]  ;;  %v99_v12 = vld [vmem:[%s49652_s0 + $0x270] sm:$0xff] }
 0x24a   :  { %23243 = vmatpush.bf16.msra.mxu0 %v38123_v53  ;;  %v38153_v53 = vld [vmem:[%s49651_s1 + $0x1318] sm:$0xff] }
 0x24b   :  { %23269 = vmatpush.bf16.msra.mxu2 %v38139_v54  ;;  %v38169_v54 = vld [vmem:[%s49651_s1 + $0x1398] sm:$0xff] }
 0x24c   :  { %23256 = vmatpush.bf16.msra.mxu1 %v38131_v55 }
 0x24d   :  { %23282 = vmatpush.bf16.msra.mxu3 %v38147_v56  ;;  %v23018_v17 = vpop.f32.mrf.mxu2 }
 0x24e   :  { %23244 = vmatpush.bf16.msra.mxu0 %v38122_v59  ;;  %v98_v17 = vld [vmem:[%s49652_s0 + $0x268] sm:$0xff] }
 0x24f   :  { %23270 = vmatpush.bf16.msra.mxu2 %v38138_v60  ;;  %v23031_v20 = vpop.f32.mrf.mxu3  ;;  %v436_v23 = vpack.c.bf16 %v98_v17, %v98_v17  ;;  %v38219_v17 = vld [vmem:[%s49651_s1 + $0x1528] sm:$0xff] }
 0x250   :  { %23257 = vmatpush.bf16.msra.mxu1 %v38130_v63  ;;  %v38168_v63 = vld [vmem:[%s49651_s1 + $0x1390] sm:$0xff]  ;;  %v437_v20 = vpack.c.bf16 %v99_v12, %v99_v12 }
 0x251   :  { %23283 = vmatpush.bf16.msra.mxu3 %v38146_v0 }
 0x252   :  { %23245 = vmatpush.bf16.msra.mxu0 %v38121_v1  ;;  %v38160_v1 = vld [vmem:[%s49651_s1 + $0x1350] sm:$0xff] }
 0x253   :  { %23271 = vmatpush.bf16.msra.mxu2 %v38137_v2  ;;  %v38176_v2 = vld [vmem:[%s49651_s1 + $0x13d0] sm:$0xff] }
 0x254   :  { %23258 = vmatpush.bf16.msra.mxu1 %v38129_v5 }
 0x255   :  { %23284 = vmatpush.bf16.msra.mxu3 %v38145_v6  ;;  %v38159_v6 = vld [vmem:[%s49651_s1 + $0x1348] sm:$0xff] }
 0x256   :  { %23246 = vmatpush.bf16.msra.mxu0 %v38120_v10  ;;  %v38166_v10 = vld [vmem:[%s49651_s1 + $0x1380] sm:$0xff] }
 0x257   :  { %23272 = vmatpush.bf16.msra.mxu2 %v38136_v11  ;;  %v97_v11 = vld [vmem:[%s49652_s0 + $0x260] sm:$0xff] }
 0x258   :  { %23259 = vmatpush.bf16.msra.mxu1 %v38128_v13  ;;  %v38189_v13 = vld [vmem:[%s49651_s1 + $0x1438] sm:$0xff] }
 0x259   :  { %23285 = vmatpush.bf16.msra.mxu3 %v38144_v14  ;;  %v38205_v14 = vld [vmem:[%s49651_s1 + $0x14b8] sm:$0xff] }
 0x25a   :  { %23247 = vmatpush.bf16.msra.mxu0 %v38119_v15  ;;  %v38158_v15 = vld [vmem:[%s49651_s1 + $0x1340] sm:$0xff] }
 0x25b   :  { %23273 = vmatpush.bf16.msra.mxu2 %v38135_v16  ;;  %v38174_v16 = vld [vmem:[%s49651_s1 + $0x13c0] sm:$0xff] }
 0x25c   :  { %23260 = vmatpush.bf16.msra.mxu1 %v38127_v18  ;;  %v100_v18 = vld [vmem:[%s49652_s0 + $0x278] sm:$0xff] }
 0x25d   :  { %23286 = vmatpush.bf16.msra.mxu3 %v38143_v19  ;;  %v435_v19 = vpack.c.bf16 %v97_v11, %v97_v11  ;;  %v438_v24 = vpack.c.bf16 %v100_v18, %v100_v18  ;;  %v38235_v18 = vld [vmem:[%s49651_s1 + $0x15a8] sm:$0xff] }
 0x25e   :  { %23248 = vmatpush.bf16.msra.mxu0 %v38118_v21  ;;  %v23042_v45 = vpop.f32.mrf.mxu0  ;;  %v38197_v21 = vld [vmem:[%s49651_s1 + $0x1478] sm:$0xff] }
 0x25f   :  { %23274 = vmatpush.bf16.msra.mxu2 %v38134_v22  ;;  %v23043_v46 = vadd.f32 %v23042_v45, %v42314_v9  ;;  %v38150_v9 = vld [vmem:[%s49651_s1 + $0x1300] sm:$0xff]  ;;  %v38213_v22 = vld [vmem:[%s49651_s1 + $0x14f8] sm:$0xff] }
 0x260   :  { %23261 = vmatpush.bf16.msra.mxu1 %v38126_v27  ;;  %v23055_v49 = vpop.f32.mrf.mxu1  ;;  %v38196_v27 = vld [vmem:[%s49651_s1 + $0x1470] sm:$0xff]  ;;  %v38193_v45 = vld [vmem:[%s49651_s1 + $0x1458] sm:$0xff] }
 0x261   :  { %23287 = vmatpush.bf16.msra.mxu3 %v38142_v28  ;;  %23249 = vmatmul.bf16.vlgmr.msra.gmra.mxu0 %v431_v31  ;;  %v23056_v50 = vadd.f32 %v23055_v49, %v23043_v46  ;;  %v38212_v28 = vld [vmem:[%s49651_s1 + $0x14f0] sm:$0xff]  ;;  %v38195_v31 = vld [vmem:[%s49651_s1 + $0x1468] sm:$0xff]  ;;  %v38209_v46 = vld [vmem:[%s49651_s1 + $0x14d8] sm:$0xff] }
 0x262   :  { %23293 = vmatpush.bf16.msrb.mxu0 %v38157_v25  ;;  %23275 = vmatmul.bf16.vlgmr.msra.gmra.mxu2 %v433_v32  ;;  %v38188_v25 = vld [vmem:[%s49651_s1 + $0x1430] sm:$0xff]  ;;  %v38211_v32 = vld [vmem:[%s49651_s1 + $0x14e8] sm:$0xff] }
 0x263   :  { %23319 = vmatpush.bf16.msrb.mxu2 %v38173_v26  ;;  %23262 = vmatmul.bf16.vlgmr.msra.gmra.mxu1 %v432_v35  ;;  %v38204_v26 = vld [vmem:[%s49651_s1 + $0x14b0] sm:$0xff]  ;;  %v38186_v35 = vld [vmem:[%s49651_s1 + $0x1420] sm:$0xff] }
 0x264   :  { %23306 = vmatpush.bf16.msrb.mxu1 %v38165_v33  ;;  %23288 = vmatmul.bf16.vlgmr.msra.gmra.mxu3 %v434_v36  ;;  %v38202_v36 = vld [vmem:[%s49651_s1 + $0x14a0] sm:$0xff] }
 0x265   :  { %23332 = vmatpush.bf16.msrb.mxu3 %v38181_v34  ;;  %v23068_v55 = vpop.f32.mrf.mxu2 }
 0x266   :  { %23294 = vmatpush.bf16.msrb.mxu0 %v38156_v37  ;;  %v23069_v56 = vadd.f32 %v23068_v55, %v23056_v50  ;;  %v23044_v60 = vpop.f32.mrf.mxu0  ;;  %v38184_v50 = vld [vmem:[%s49651_s1 + $0x1410] sm:$0xff]  ;;  %v38183_v55 = vld [vmem:[%s49651_s1 + $0x1408] sm:$0xff] }
 0x267   :  { %23320 = vmatpush.bf16.msrb.mxu2 %v38172_v38  ;;  %v23081_v59 = vpop.f32.mrf.mxu3 }
 0x268   :  { %23307 = vmatpush.bf16.msrb.mxu1 %v38164_v39  ;;  %v42425_v61 = vadd.f32 %v23081_v59, %v23069_v56  ;;  %v23057_v0 = vpop.f32.mrf.mxu1  ;;  %v38194_v39 = vld [vmem:[%s49651_s1 + $0x1460] sm:$0xff]  ;;  %v38199_v56 = vld [vmem:[%s49651_s1 + $0x1488] sm:$0xff] }
 0x269   :  { %23333 = vmatpush.bf16.msrb.mxu3 %v38180_v40  ;;  %v38210_v40 = vld [vmem:[%s49651_s1 + $0x14e0] sm:$0xff]  ;;  %v38207_v59 = vld [vmem:[%s49651_s1 + $0x14c8] sm:$0xff]  ;;  %v103_v0 = vld [vmem:[%s49652_s0 + $0x290] sm:$0xff] }
 0x26a   :  { %23295 = vmatpush.bf16.msrb.mxu0 %v38155_v41  ;;  %v38185_v41 = vld [vmem:[%s49651_s1 + $0x1418] sm:$0xff] }
 0x26b   :  { %23321 = vmatpush.bf16.msrb.mxu2 %v38171_v42  ;;  %v38201_v42 = vld [vmem:[%s49651_s1 + $0x1498] sm:$0xff] }
 0x26c   :  { %23308 = vmatpush.bf16.msrb.mxu1 %v38163_v43 }
 0x26d   :  { %23334 = vmatpush.bf16.msrb.mxu3 %v38179_v44  ;;  %v23070_v5 = vpop.f32.mrf.mxu2 }
 0x26e   :  { %23296 = vmatpush.bf16.msrb.mxu0 %v38154_v47  ;;  %v102_v5 = vld [vmem:[%s49652_s0 + $0x288] sm:$0xff] }
 0x26f   :  { %23322 = vmatpush.bf16.msrb.mxu2 %v38170_v48  ;;  %v23083_v8 = vpop.f32.mrf.mxu3  ;;  %v440_v11 = vpack.c.bf16 %v102_v5, %v102_v5  ;;  %v38251_v5 = vld [vmem:[%s49651_s1 + $0x1628] sm:$0xff] }
 0x270   :  { %23309 = vmatpush.bf16.msrb.mxu1 %v38162_v51  ;;  %v38200_v51 = vld [vmem:[%s49651_s1 + $0x1490] sm:$0xff]  ;;  %v441_v8 = vpack.c.bf16 %v103_v0, %v103_v0 }
 0x271   :  { %23335 = vmatpush.bf16.msrb.mxu3 %v38178_v52 }
 0x272   :  { %23297 = vmatpush.bf16.msrb.mxu0 %v38153_v53  ;;  %v38192_v53 = vld [vmem:[%s49651_s1 + $0x1450] sm:$0xff] }
 0x273   :  { %23323 = vmatpush.bf16.msrb.mxu2 %v38169_v54  ;;  %v38208_v54 = vld [vmem:[%s49651_s1 + $0x14d0] sm:$0xff] }
 0x274   :  { %23310 = vmatpush.bf16.msrb.mxu1 %v38161_v57 }
 0x275   :  { %23336 = vmatpush.bf16.msrb.mxu3 %v38177_v58  ;;  %v38191_v58 = vld [vmem:[%s49651_s1 + $0x1448] sm:$0xff] }
 0x276   :  { %23298 = vmatpush.bf16.msrb.mxu0 %v38152_v62  ;;  %v38198_v62 = vld [vmem:[%s49651_s1 + $0x1480] sm:$0xff] }
 0x277   :  { %23324 = vmatpush.bf16.msrb.mxu2 %v38168_v63  ;;  %v101_v63 = vld [vmem:[%s49652_s0 + $0x280] sm:$0xff] }
 0x278   :  { %23311 = vmatpush.bf16.msrb.mxu1 %v38160_v1  ;;  %v38221_v1 = vld [vmem:[%s49651_s1 + $0x1538] sm:$0xff] }
 0x279   :  { %23337 = vmatpush.bf16.msrb.mxu3 %v38176_v2  ;;  %v38237_v2 = vld [vmem:[%s49651_s1 + $0x15b8] sm:$0xff] }
 0x27a   :  { %23299 = vmatpush.bf16.msrb.mxu0 %v38151_v3  ;;  %v38190_v3 = vld [vmem:[%s49651_s1 + $0x1440] sm:$0xff] }
 0x27b   :  { %23325 = vmatpush.bf16.msrb.mxu2 %v38167_v4  ;;  %v38206_v4 = vld [vmem:[%s49651_s1 + $0x14c0] sm:$0xff] }
 0x27c   :  { %23312 = vmatpush.bf16.msrb.mxu1 %v38159_v6  ;;  %v104_v6 = vld [vmem:[%s49652_s0 + $0x298] sm:$0xff] }
 0x27d   :  { %23338 = vmatpush.bf16.msrb.mxu3 %v38175_v7  ;;  %v439_v7 = vpack.c.bf16 %v101_v63, %v101_v63  ;;  %v442_v12 = vpack.c.bf16 %v104_v6, %v104_v6  ;;  %v38267_v6 = vld [vmem:[%s49651_s1 + $0x16a8] sm:$0xff] }
 0x27e   :  { %23300 = vmatpush.bf16.msrb.mxu0 %v38150_v9  ;;  %v23094_v33 = vpop.f32.mrf.mxu0  ;;  %v38229_v9 = vld [vmem:[%s49651_s1 + $0x1578] sm:$0xff] }
 0x27f   :  { %23326 = vmatpush.bf16.msrb.mxu2 %v38166_v10  ;;  %v23095_v34 = vadd.f32 %v23094_v33, %v42425_v61  ;;  %v38182_v61 = vld [vmem:[%s49651_s1 + $0x1400] sm:$0xff]  ;;  %v38245_v10 = vld [vmem:[%s49651_s1 + $0x15f8] sm:$0xff] }
 0x280   :  { %23313 = vmatpush.bf16.msrb.mxu1 %v38158_v15  ;;  %v23107_v37 = vpop.f32.mrf.mxu1  ;;  %v38228_v15 = vld [vmem:[%s49651_s1 + $0x1570] sm:$0xff]  ;;  %v38225_v33 = vld [vmem:[%s49651_s1 + $0x1558] sm:$0xff] }
 0x281   :  { %23339 = vmatpush.bf16.msrb.mxu3 %v38174_v16  ;;  %23301 = vmatmul.bf16.vlgmr.msrb.gmra.mxu0 %v435_v19  ;;  %v23108_v38 = vadd.f32 %v23107_v37, %v23095_v34  ;;  %v38244_v16 = vld [vmem:[%s49651_s1 + $0x15f0] sm:$0xff]  ;;  %v38227_v19 = vld [vmem:[%s49651_s1 + $0x1568] sm:$0xff]  ;;  %v38241_v34 = vld [vmem:[%s49651_s1 + $0x15d8] sm:$0xff] }
 0x282   :  { %23345 = vmatpush.bf16.msra.mxu0 %v38189_v13  ;;  %23327 = vmatmul.bf16.vlgmr.msrb.gmra.mxu2 %v437_v20  ;;  %v38220_v13 = vld [vmem:[%s49651_s1 + $0x1530] sm:$0xff]  ;;  %v38243_v20 = vld [vmem:[%s49651_s1 + $0x15e8] sm:$0xff] }
 0x283   :  { %23371 = vmatpush.bf16.msra.mxu2 %v38205_v14  ;;  %23314 = vmatmul.bf16.vlgmr.msrb.gmra.mxu1 %v436_v23  ;;  %v38236_v14 = vld [vmem:[%s49651_s1 + $0x15b0] sm:$0xff]  ;;  %v38218_v23 = vld [vmem:[%s49651_s1 + $0x1520] sm:$0xff] }
 0x284   :  { %23358 = vmatpush.bf16.msra.mxu1 %v38197_v21  ;;  %23340 = vmatmul.bf16.vlgmr.msrb.gmra.mxu3 %v438_v24  ;;  %v38234_v24 = vld [vmem:[%s49651_s1 + $0x15a0] sm:$0xff] }
 0x285   :  { %23384 = vmatpush.bf16.msra.mxu3 %v38213_v22  ;;  %v23120_v43 = vpop.f32.mrf.mxu2 }
 0x286   :  { %23346 = vmatpush.bf16.msra.mxu0 %v38188_v25  ;;  %v23121_v44 = vadd.f32 %v23120_v43, %v23108_v38  ;;  %v23096_v48 = vpop.f32.mrf.mxu0  ;;  %v38216_v38 = vld [vmem:[%s49651_s1 + $0x1510] sm:$0xff]  ;;  %v38215_v43 = vld [vmem:[%s49651_s1 + $0x1508] sm:$0xff] }
 0x287   :  { %23372 = vmatpush.bf16.msra.mxu2 %v38204_v26  ;;  %v23133_v47 = vpop.f32.mrf.mxu3 }
 0x288   :  { %23359 = vmatpush.bf16.msra.mxu1 %v38196_v27  ;;  %v42536_v49 = vadd.f32 %v23133_v47, %v23121_v44  ;;  %v23109_v52 = vpop.f32.mrf.mxu1  ;;  %v38226_v27 = vld [vmem:[%s49651_s1 + $0x1560] sm:$0xff]  ;;  %v38231_v44 = vld [vmem:[%s49651_s1 + $0x1588] sm:$0xff] }
 0x289   :  { %23385 = vmatpush.bf16.msra.mxu3 %v38212_v28  ;;  %v38242_v28 = vld [vmem:[%s49651_s1 + $0x15e0] sm:$0xff]  ;;  %v38239_v47 = vld [vmem:[%s49651_s1 + $0x15c8] sm:$0xff]  ;;  %v107_v52 = vld [vmem:[%s49652_s0 + $0x2b0] sm:$0xff] }
 0x28a   :  { %23347 = vmatpush.bf16.msra.mxu0 %v38187_v29  ;;  %v38217_v29 = vld [vmem:[%s49651_s1 + $0x1518] sm:$0xff] }
 0x28b   :  { %23373 = vmatpush.bf16.msra.mxu2 %v38203_v30  ;;  %v38233_v30 = vld [vmem:[%s49651_s1 + $0x1598] sm:$0xff] }
 0x28c   :  { %23360 = vmatpush.bf16.msra.mxu1 %v38195_v31 }
 0x28d   :  { %23386 = vmatpush.bf16.msra.mxu3 %v38211_v32  ;;  %v23122_v57 = vpop.f32.mrf.mxu2 }
 0x28e   :  { %23348 = vmatpush.bf16.msra.mxu0 %v38186_v35  ;;  %v106_v57 = vld [vmem:[%s49652_s0 + $0x2a8] sm:$0xff] }
 0x28f   :  { %23374 = vmatpush.bf16.msra.mxu2 %v38202_v36  ;;  %v23135_v60 = vpop.f32.mrf.mxu3  ;;  %v444_v63 = vpack.c.bf16 %v106_v57, %v106_v57  ;;  %v38283_v57 = vld [vmem:[%s49651_s1 + $0x1728] sm:$0xff] }
 0x290   :  { %23361 = vmatpush.bf16.msra.mxu1 %v38194_v39  ;;  %v38232_v39 = vld [vmem:[%s49651_s1 + $0x1590] sm:$0xff]  ;;  %v445_v60 = vpack.c.bf16 %v107_v52, %v107_v52 }
 0x291   :  { %23387 = vmatpush.bf16.msra.mxu3 %v38210_v40 }
 0x292   :  { %23349 = vmatpush.bf16.msra.mxu0 %v38185_v41  ;;  %v38224_v41 = vld [vmem:[%s49651_s1 + $0x1550] sm:$0xff] }
 0x293   :  { %23375 = vmatpush.bf16.msra.mxu2 %v38201_v42  ;;  %v38240_v42 = vld [vmem:[%s49651_s1 + $0x15d0] sm:$0xff] }
 0x294   :  { %23362 = vmatpush.bf16.msra.mxu1 %v38193_v45 }
 0x295   :  { %23388 = vmatpush.bf16.msra.mxu3 %v38209_v46  ;;  %v38223_v46 = vld [vmem:[%s49651_s1 + $0x1548] sm:$0xff] }
 0x296   :  { %23350 = vmatpush.bf16.msra.mxu0 %v38184_v50  ;;  %v38230_v50 = vld [vmem:[%s49651_s1 + $0x1580] sm:$0xff] }
 0x297   :  { %23376 = vmatpush.bf16.msra.mxu2 %v38200_v51  ;;  %v105_v51 = vld [vmem:[%s49652_s0 + $0x2a0] sm:$0xff] }
 0x298   :  { %23363 = vmatpush.bf16.msra.mxu1 %v38192_v53  ;;  %v38253_v53 = vld [vmem:[%s49651_s1 + $0x1638] sm:$0xff] }
 0x299   :  { %23389 = vmatpush.bf16.msra.mxu3 %v38208_v54  ;;  %v38269_v54 = vld [vmem:[%s49651_s1 + $0x16b8] sm:$0xff] }
 0x29a   :  { %23351 = vmatpush.bf16.msra.mxu0 %v38183_v55  ;;  %v38222_v55 = vld [vmem:[%s49651_s1 + $0x1540] sm:$0xff] }
 0x29b   :  { %23377 = vmatpush.bf16.msra.mxu2 %v38199_v56  ;;  %v38238_v56 = vld [vmem:[%s49651_s1 + $0x15c0] sm:$0xff] }
 0x29c   :  { %23364 = vmatpush.bf16.msra.mxu1 %v38191_v58  ;;  %v108_v58 = vld [vmem:[%s49652_s0 + $0x2b8] sm:$0xff] }
 0x29d   :  { %23390 = vmatpush.bf16.msra.mxu3 %v38207_v59  ;;  %v443_v59 = vpack.c.bf16 %v105_v51, %v105_v51  ;;  %v446_v0 = vpack.c.bf16 %v108_v58, %v108_v58  ;;  %v38299_v58 = vld [vmem:[%s49651_s1 + $0x17a8] sm:$0xff] }
 0x29e   :  { %23352 = vmatpush.bf16.msra.mxu0 %v38182_v61  ;;  %v23146_v21 = vpop.f32.mrf.mxu0  ;;  %v38261_v61 = vld [vmem:[%s49651_s1 + $0x1678] sm:$0xff] }
 0x29f   :  { %23378 = vmatpush.bf16.msra.mxu2 %v38198_v62  ;;  %v23147_v22 = vadd.f32 %v23146_v21, %v42536_v49  ;;  %v38214_v49 = vld [vmem:[%s49651_s1 + $0x1500] sm:$0xff]  ;;  %v38277_v62 = vld [vmem:[%s49651_s1 + $0x16f8] sm:$0xff] }
 0x2a0   :  { %23365 = vmatpush.bf16.msra.mxu1 %v38190_v3  ;;  %v23159_v25 = vpop.f32.mrf.mxu1  ;;  %v38260_v3 = vld [vmem:[%s49651_s1 + $0x1670] sm:$0xff]  ;;  %v38257_v21 = vld [vmem:[%s49651_s1 + $0x1658] sm:$0xff] }
 0x2a1   :  { %23391 = vmatpush.bf16.msra.mxu3 %v38206_v4  ;;  %23353 = vmatmul.bf16.vlgmr.msra.gmra.mxu0 %v439_v7  ;;  %v23160_v26 = vadd.f32 %v23159_v25, %v23147_v22  ;;  %v38276_v4 = vld [vmem:[%s49651_s1 + $0x16f0] sm:$0xff]  ;;  %v38259_v7 = vld [vmem:[%s49651_s1 + $0x1668] sm:$0xff]  ;;  %v38273_v22 = vld [vmem:[%s49651_s1 + $0x16d8] sm:$0xff] }
 0x2a2   :  { %23397 = vmatpush.bf16.msrb.mxu0 %v38221_v1  ;;  %23379 = vmatmul.bf16.vlgmr.msra.gmra.mxu2 %v441_v8  ;;  %v38252_v1 = vld [vmem:[%s49651_s1 + $0x1630] sm:$0xff]  ;;  %v38275_v8 = vld [vmem:[%s49651_s1 + $0x16e8] sm:$0xff] }
 0x2a3   :  { %23423 = vmatpush.bf16.msrb.mxu2 %v38237_v2  ;;  %23366 = vmatmul.bf16.vlgmr.msra.gmra.mxu1 %v440_v11  ;;  %v38268_v2 = vld [vmem:[%s49651_s1 + $0x16b0] sm:$0xff]  ;;  %v38250_v11 = vld [vmem:[%s49651_s1 + $0x1620] sm:$0xff] }
 0x2a4   :  { %23410 = vmatpush.bf16.msrb.mxu1 %v38229_v9  ;;  %23392 = vmatmul.bf16.vlgmr.msra.gmra.mxu3 %v442_v12  ;;  %v38266_v12 = vld [vmem:[%s49651_s1 + $0x16a0] sm:$0xff] }
 0x2a5   :  { %23436 = vmatpush.bf16.msrb.mxu3 %v38245_v10  ;;  %v23172_v31 = vpop.f32.mrf.mxu2 }
 0x2a6   :  { %23398 = vmatpush.bf16.msrb.mxu0 %v38220_v13  ;;  %v23173_v32 = vadd.f32 %v23172_v31, %v23160_v26  ;;  %v23148_v36 = vpop.f32.mrf.mxu0  ;;  %v38248_v26 = vld [vmem:[%s49651_s1 + $0x1610] sm:$0xff]  ;;  %v38247_v31 = vld [vmem:[%s49651_s1 + $0x1608] sm:$0xff] }
 0x2a7   :  { %23424 = vmatpush.bf16.msrb.mxu2 %v38236_v14  ;;  %v23185_v35 = vpop.f32.mrf.mxu3 }
 0x2a8   :  { %23411 = vmatpush.bf16.msrb.mxu1 %v38228_v15  ;;  %v42647_v37 = vadd.f32 %v23185_v35, %v23173_v32  ;;  %v23161_v40 = vpop.f32.mrf.mxu1  ;;  %v38258_v15 = vld [vmem:[%s49651_s1 + $0x1660] sm:$0xff]  ;;  %v38263_v32 = vld [vmem:[%s49651_s1 + $0x1688] sm:$0xff] }
 0x2a9   :  { %23437 = vmatpush.bf16.msrb.mxu3 %v38244_v16  ;;  %v38274_v16 = vld [vmem:[%s49651_s1 + $0x16e0] sm:$0xff]  ;;  %v38271_v35 = vld [vmem:[%s49651_s1 + $0x16c8] sm:$0xff]  ;;  %v111_v40 = vld [vmem:[%s49652_s0 + $0x2d0] sm:$0xff] }
 0x2aa   :  { %23399 = vmatpush.bf16.msrb.mxu0 %v38219_v17  ;;  %v38249_v17 = vld [vmem:[%s49651_s1 + $0x1618] sm:$0xff] }
 0x2ab   :  { %23425 = vmatpush.bf16.msrb.mxu2 %v38235_v18  ;;  %v38265_v18 = vld [vmem:[%s49651_s1 + $0x1698] sm:$0xff] }
 0x2ac   :  { %23412 = vmatpush.bf16.msrb.mxu1 %v38227_v19 }
 0x2ad   :  { %23438 = vmatpush.bf16.msrb.mxu3 %v38243_v20  ;;  %v23174_v45 = vpop.f32.mrf.mxu2 }
 0x2ae   :  { %23400 = vmatpush.bf16.msrb.mxu0 %v38218_v23  ;;  %v110_v45 = vld [vmem:[%s49652_s0 + $0x2c8] sm:$0xff] }
 0x2af   :  { %23426 = vmatpush.bf16.msrb.mxu2 %v38234_v24  ;;  %v23187_v48 = vpop.f32.mrf.mxu3  ;;  %v448_v51 = vpack.c.bf16 %v110_v45, %v110_v45  ;;  %v38315_v45 = vld [vmem:[%s49651_s1 + $0x1828] sm:$0xff] }
 0x2b0   :  { %23413 = vmatpush.bf16.msrb.mxu1 %v38226_v27  ;;  %v38264_v27 = vld [vmem:[%s49651_s1 + $0x1690] sm:$0xff]  ;;  %v449_v48 = vpack.c.bf16 %v111_v40, %v111_v40 }
 0x2b1   :  { %23439 = vmatpush.bf16.msrb.mxu3 %v38242_v28 }
 0x2b2   :  { %23401 = vmatpush.bf16.msrb.mxu0 %v38217_v29  ;;  %v38256_v29 = vld [vmem:[%s49651_s1 + $0x1650] sm:$0xff] }
 0x2b3   :  { %23427 = vmatpush.bf16.msrb.mxu2 %v38233_v30  ;;  %v38272_v30 = vld [vmem:[%s49651_s1 + $0x16d0] sm:$0xff] }
 0x2b4   :  { %23414 = vmatpush.bf16.msrb.mxu1 %v38225_v33 }
 0x2b5   :  { %23440 = vmatpush.bf16.msrb.mxu3 %v38241_v34  ;;  %v38255_v34 = vld [vmem:[%s49651_s1 + $0x1648] sm:$0xff] }
 0x2b6   :  { %23402 = vmatpush.bf16.msrb.mxu0 %v38216_v38  ;;  %v38262_v38 = vld [vmem:[%s49651_s1 + $0x1680] sm:$0xff] }
 0x2b7   :  { %23428 = vmatpush.bf16.msrb.mxu2 %v38232_v39  ;;  %v109_v39 = vld [vmem:[%s49652_s0 + $0x2c0] sm:$0xff] }
 0x2b8   :  { %23415 = vmatpush.bf16.msrb.mxu1 %v38224_v41  ;;  %v38285_v41 = vld [vmem:[%s49651_s1 + $0x1738] sm:$0xff] }
 0x2b9   :  { %23441 = vmatpush.bf16.msrb.mxu3 %v38240_v42  ;;  %v38301_v42 = vld [vmem:[%s49651_s1 + $0x17b8] sm:$0xff] }
 0x2ba   :  { %23403 = vmatpush.bf16.msrb.mxu0 %v38215_v43  ;;  %v38254_v43 = vld [vmem:[%s49651_s1 + $0x1640] sm:$0xff] }
 0x2bb   :  { %23429 = vmatpush.bf16.msrb.mxu2 %v38231_v44  ;;  %v38270_v44 = vld [vmem:[%s49651_s1 + $0x16c0] sm:$0xff] }
 0x2bc   :  { %23416 = vmatpush.bf16.msrb.mxu1 %v38223_v46  ;;  %v112_v46 = vld [vmem:[%s49652_s0 + $0x2d8] sm:$0xff] }
 0x2bd   :  { %23442 = vmatpush.bf16.msrb.mxu3 %v38239_v47  ;;  %v447_v47 = vpack.c.bf16 %v109_v39, %v109_v39  ;;  %v450_v52 = vpack.c.bf16 %v112_v46, %v112_v46  ;;  %v38331_v46 = vld [vmem:[%s49651_s1 + $0x18a8] sm:$0xff] }
 0x2be   :  { %23404 = vmatpush.bf16.msrb.mxu0 %v38214_v49  ;;  %v23198_v9 = vpop.f32.mrf.mxu0  ;;  %v38293_v49 = vld [vmem:[%s49651_s1 + $0x1778] sm:$0xff] }
 0x2bf   :  { %23430 = vmatpush.bf16.msrb.mxu2 %v38230_v50  ;;  %v23199_v10 = vadd.f32 %v23198_v9, %v42647_v37  ;;  %v38246_v37 = vld [vmem:[%s49651_s1 + $0x1600] sm:$0xff]  ;;  %v38309_v50 = vld [vmem:[%s49651_s1 + $0x17f8] sm:$0xff] }
 0x2c0   :  { %23417 = vmatpush.bf16.msrb.mxu1 %v38222_v55  ;;  %v23211_v13 = vpop.f32.mrf.mxu1  ;;  %v38292_v55 = vld [vmem:[%s49651_s1 + $0x1770] sm:$0xff]  ;;  %v38289_v9 = vld [vmem:[%s49651_s1 + $0x1758] sm:$0xff] }
 0x2c1   :  { %23443 = vmatpush.bf16.msrb.mxu3 %v38238_v56  ;;  %23405 = vmatmul.bf16.vlgmr.msrb.gmra.mxu0 %v443_v59  ;;  %v23212_v14 = vadd.f32 %v23211_v13, %v23199_v10  ;;  %v38308_v56 = vld [vmem:[%s49651_s1 + $0x17f0] sm:$0xff]  ;;  %v38291_v59 = vld [vmem:[%s49651_s1 + $0x1768] sm:$0xff]  ;;  %v38305_v10 = vld [vmem:[%s49651_s1 + $0x17d8] sm:$0xff] }
 0x2c2   :  { %23449 = vmatpush.bf16.msra.mxu0 %v38253_v53  ;;  %23431 = vmatmul.bf16.vlgmr.msrb.gmra.mxu2 %v445_v60  ;;  %v38284_v53 = vld [vmem:[%s49651_s1 + $0x1730] sm:$0xff]  ;;  %v38307_v60 = vld [vmem:[%s49651_s1 + $0x17e8] sm:$0xff] }
 0x2c3   :  { %23475 = vmatpush.bf16.msra.mxu2 %v38269_v54  ;;  %23418 = vmatmul.bf16.vlgmr.msrb.gmra.mxu1 %v444_v63  ;;  %v38300_v54 = vld [vmem:[%s49651_s1 + $0x17b0] sm:$0xff]  ;;  %v38282_v63 = vld [vmem:[%s49651_s1 + $0x1720] sm:$0xff] }
 0x2c4   :  { %23462 = vmatpush.bf16.msra.mxu1 %v38261_v61  ;;  %23444 = vmatmul.bf16.vlgmr.msrb.gmra.mxu3 %v446_v0  ;;  %v38298_v0 = vld [vmem:[%s49651_s1 + $0x17a0] sm:$0xff] }
 0x2c5   :  { %23488 = vmatpush.bf16.msra.mxu3 %v38277_v62  ;;  %v23224_v19 = vpop.f32.mrf.mxu2 }
 0x2c6   :  { %23450 = vmatpush.bf16.msra.mxu0 %v38252_v1  ;;  %v23225_v20 = vadd.f32 %v23224_v19, %v23212_v14  ;;  %v23200_v24 = vpop.f32.mrf.mxu0  ;;  %v38280_v14 = vld [vmem:[%s49651_s1 + $0x1710] sm:$0xff]  ;;  %v38279_v19 = vld [vmem:[%s49651_s1 + $0x1708] sm:$0xff] }
 0x2c7   :  { %23476 = vmatpush.bf16.msra.mxu2 %v38268_v2  ;;  %v23237_v23 = vpop.f32.mrf.mxu3 }
 0x2c8   :  { %23463 = vmatpush.bf16.msra.mxu1 %v38260_v3  ;;  %v42758_v25 = vadd.f32 %v23237_v23, %v23225_v20  ;;  %v23213_v28 = vpop.f32.mrf.mxu1  ;;  %v38290_v3 = vld [vmem:[%s49651_s1 + $0x1760] sm:$0xff]  ;;  %v38295_v20 = vld [vmem:[%s49651_s1 + $0x1788] sm:$0xff] }
 0x2c9   :  { %23489 = vmatpush.bf16.msra.mxu3 %v38276_v4  ;;  %v38306_v4 = vld [vmem:[%s49651_s1 + $0x17e0] sm:$0xff]  ;;  %v38303_v23 = vld [vmem:[%s49651_s1 + $0x17c8] sm:$0xff]  ;;  %v115_v28 = vld [vmem:[%s49652_s0 + $0x2f0] sm:$0xff] }
 0x2ca   :  { %23451 = vmatpush.bf16.msra.mxu0 %v38251_v5  ;;  %v38281_v5 = vld [vmem:[%s49651_s1 + $0x1718] sm:$0xff] }
 0x2cb   :  { %23477 = vmatpush.bf16.msra.mxu2 %v38267_v6  ;;  %v38297_v6 = vld [vmem:[%s49651_s1 + $0x1798] sm:$0xff] }
 0x2cc   :  { %23464 = vmatpush.bf16.msra.mxu1 %v38259_v7 }
 0x2cd   :  { %23490 = vmatpush.bf16.msra.mxu3 %v38275_v8  ;;  %v23226_v33 = vpop.f32.mrf.mxu2 }
 0x2ce   :  { %23452 = vmatpush.bf16.msra.mxu0 %v38250_v11  ;;  %v114_v33 = vld [vmem:[%s49652_s0 + $0x2e8] sm:$0xff] }
 0x2cf   :  { %23478 = vmatpush.bf16.msra.mxu2 %v38266_v12  ;;  %v23239_v36 = vpop.f32.mrf.mxu3  ;;  %v452_v39 = vpack.c.bf16 %v114_v33, %v114_v33  ;;  %v38347_v33 = vld [vmem:[%s49651_s1 + $0x1928] sm:$0xff] }
 0x2d0   :  { %23465 = vmatpush.bf16.msra.mxu1 %v38258_v15  ;;  %v38296_v15 = vld [vmem:[%s49651_s1 + $0x1790] sm:$0xff]  ;;  %v453_v36 = vpack.c.bf16 %v115_v28, %v115_v28 }
 0x2d1   :  { %23491 = vmatpush.bf16.msra.mxu3 %v38274_v16 }
 0x2d2   :  { %23453 = vmatpush.bf16.msra.mxu0 %v38249_v17  ;;  %v38288_v17 = vld [vmem:[%s49651_s1 + $0x1750] sm:$0xff] }
 0x2d3   :  { %23479 = vmatpush.bf16.msra.mxu2 %v38265_v18  ;;  %v38304_v18 = vld [vmem:[%s49651_s1 + $0x17d0] sm:$0xff] }
 0x2d4   :  { %23466 = vmatpush.bf16.msra.mxu1 %v38257_v21 }
 0x2d5   :  { %23492 = vmatpush.bf16.msra.mxu3 %v38273_v22  ;;  %v38287_v22 = vld [vmem:[%s49651_s1 + $0x1748] sm:$0xff] }
 0x2d6   :  { %23454 = vmatpush.bf16.msra.mxu0 %v38248_v26  ;;  %v38294_v26 = vld [vmem:[%s49651_s1 + $0x1780] sm:$0xff] }
 0x2d7   :  { %23480 = vmatpush.bf16.msra.mxu2 %v38264_v27  ;;  %v113_v27 = vld [vmem:[%s49652_s0 + $0x2e0] sm:$0xff] }
 0x2d8   :  { %23467 = vmatpush.bf16.msra.mxu1 %v38256_v29  ;;  %v38317_v29 = vld [vmem:[%s49651_s1 + $0x1838] sm:$0xff] }
 0x2d9   :  { %23493 = vmatpush.bf16.msra.mxu3 %v38272_v30  ;;  %v38333_v30 = vld [vmem:[%s49651_s1 + $0x18b8] sm:$0xff] }
 0x2da   :  { %23455 = vmatpush.bf16.msra.mxu0 %v38247_v31  ;;  %v38286_v31 = vld [vmem:[%s49651_s1 + $0x1740] sm:$0xff] }
 0x2db   :  { %23481 = vmatpush.bf16.msra.mxu2 %v38263_v32  ;;  %v38302_v32 = vld [vmem:[%s49651_s1 + $0x17c0] sm:$0xff] }
 0x2dc   :  { %23468 = vmatpush.bf16.msra.mxu1 %v38255_v34  ;;  %v116_v34 = vld [vmem:[%s49652_s0 + $0x2f8] sm:$0xff] }
 0x2dd   :  { %23494 = vmatpush.bf16.msra.mxu3 %v38271_v35  ;;  %v451_v35 = vpack.c.bf16 %v113_v27, %v113_v27  ;;  %v454_v40 = vpack.c.bf16 %v116_v34, %v116_v34  ;;  %v38363_v34 = vld [vmem:[%s49651_s1 + $0x19a8] sm:$0xff] }
 0x2de   :  { %23456 = vmatpush.bf16.msra.mxu0 %v38246_v37  ;;  %v23250_v61 = vpop.f32.mrf.mxu0  ;;  %v38325_v37 = vld [vmem:[%s49651_s1 + $0x1878] sm:$0xff] }
 0x2df   :  { %23482 = vmatpush.bf16.msra.mxu2 %v38262_v38  ;;  %v23251_v62 = vadd.f32 %v23250_v61, %v42758_v25  ;;  %v38278_v25 = vld [vmem:[%s49651_s1 + $0x1700] sm:$0xff]  ;;  %v38341_v38 = vld [vmem:[%s49651_s1 + $0x18f8] sm:$0xff] }
 0x2e0   :  { %23469 = vmatpush.bf16.msra.mxu1 %v38254_v43  ;;  %v23263_v1 = vpop.f32.mrf.mxu1  ;;  %v38324_v43 = vld [vmem:[%s49651_s1 + $0x1870] sm:$0xff]  ;;  %v38321_v61 = vld [vmem:[%s49651_s1 + $0x1858] sm:$0xff] }
 0x2e1   :  { %23495 = vmatpush.bf16.msra.mxu3 %v38270_v44  ;;  %23457 = vmatmul.bf16.vlgmr.msra.gmra.mxu0 %v447_v47  ;;  %v23264_v2 = vadd.f32 %v23263_v1, %v23251_v62  ;;  %v38340_v44 = vld [vmem:[%s49651_s1 + $0x18f0] sm:$0xff]  ;;  %v38323_v47 = vld [vmem:[%s49651_s1 + $0x1868] sm:$0xff]  ;;  %v38337_v62 = vld [vmem:[%s49651_s1 + $0x18d8] sm:$0xff] }
 0x2e2   :  { %23501 = vmatpush.bf16.msrb.mxu0 %v38285_v41  ;;  %23483 = vmatmul.bf16.vlgmr.msra.gmra.mxu2 %v449_v48  ;;  %v38316_v41 = vld [vmem:[%s49651_s1 + $0x1830] sm:$0xff]  ;;  %v38339_v48 = vld [vmem:[%s49651_s1 + $0x18e8] sm:$0xff] }
 0x2e3   :  { %23527 = vmatpush.bf16.msrb.mxu2 %v38301_v42  ;;  %23470 = vmatmul.bf16.vlgmr.msra.gmra.mxu1 %v448_v51  ;;  %v38332_v42 = vld [vmem:[%s49651_s1 + $0x18b0] sm:$0xff]  ;;  %v38314_v51 = vld [vmem:[%s49651_s1 + $0x1820] sm:$0xff] }
 0x2e4   :  { %23514 = vmatpush.bf16.msrb.mxu1 %v38293_v49  ;;  %23496 = vmatmul.bf16.vlgmr.msra.gmra.mxu3 %v450_v52  ;;  %v38330_v52 = vld [vmem:[%s49651_s1 + $0x18a0] sm:$0xff] }
 0x2e5   :  { %23540 = vmatpush.bf16.msrb.mxu3 %v38309_v50  ;;  %v23276_v7 = vpop.f32.mrf.mxu2 }
 0x2e6   :  { %23502 = vmatpush.bf16.msrb.mxu0 %v38284_v53  ;;  %v23277_v8 = vadd.f32 %v23276_v7, %v23264_v2  ;;  %v23252_v12 = vpop.f32.mrf.mxu0  ;;  %v38312_v2 = vld [vmem:[%s49651_s1 + $0x1810] sm:$0xff]  ;;  %v38311_v7 = vld [vmem:[%s49651_s1 + $0x1808] sm:$0xff] }
 0x2e7   :  { %23528 = vmatpush.bf16.msrb.mxu2 %v38300_v54  ;;  %v23289_v11 = vpop.f32.mrf.mxu3 }
 0x2e8   :  { %23515 = vmatpush.bf16.msrb.mxu1 %v38292_v55  ;;  %v42869_v13 = vadd.f32 %v23289_v11, %v23277_v8  ;;  %v23265_v16 = vpop.f32.mrf.mxu1  ;;  %v38322_v55 = vld [vmem:[%s49651_s1 + $0x1860] sm:$0xff]  ;;  %v38327_v8 = vld [vmem:[%s49651_s1 + $0x1888] sm:$0xff] }
 0x2e9   :  { %23541 = vmatpush.bf16.msrb.mxu3 %v38308_v56  ;;  %v38338_v56 = vld [vmem:[%s49651_s1 + $0x18e0] sm:$0xff]  ;;  %v38335_v11 = vld [vmem:[%s49651_s1 + $0x18c8] sm:$0xff]  ;;  %v119_v16 = vld [vmem:[%s49652_s0 + $0x310] sm:$0xff] }
 0x2ea   :  { %23503 = vmatpush.bf16.msrb.mxu0 %v38283_v57  ;;  %v38313_v57 = vld [vmem:[%s49651_s1 + $0x1818] sm:$0xff] }
 0x2eb   :  { %23529 = vmatpush.bf16.msrb.mxu2 %v38299_v58  ;;  %v38329_v58 = vld [vmem:[%s49651_s1 + $0x1898] sm:$0xff] }
 0x2ec   :  { %23516 = vmatpush.bf16.msrb.mxu1 %v38291_v59 }
 0x2ed   :  { %23542 = vmatpush.bf16.msrb.mxu3 %v38307_v60  ;;  %v23278_v21 = vpop.f32.mrf.mxu2 }
 0x2ee   :  { %23504 = vmatpush.bf16.msrb.mxu0 %v38282_v63  ;;  %v118_v21 = vld [vmem:[%s49652_s0 + $0x308] sm:$0xff] }
 0x2ef   :  { %23530 = vmatpush.bf16.msrb.mxu2 %v38298_v0  ;;  %v23291_v24 = vpop.f32.mrf.mxu3  ;;  %v456_v27 = vpack.c.bf16 %v118_v21, %v118_v21  ;;  %v38379_v21 = vld [vmem:[%s49651_s1 + $0x1a28] sm:$0xff] }
 0x2f0   :  { %23517 = vmatpush.bf16.msrb.mxu1 %v38290_v3  ;;  %v38328_v3 = vld [vmem:[%s49651_s1 + $0x1890] sm:$0xff]  ;;  %v457_v24 = vpack.c.bf16 %v119_v16, %v119_v16 }
 0x2f1   :  { %23543 = vmatpush.bf16.msrb.mxu3 %v38306_v4 }
 0x2f2   :  { %23505 = vmatpush.bf16.msrb.mxu0 %v38281_v5  ;;  %v38320_v5 = vld [vmem:[%s49651_s1 + $0x1850] sm:$0xff] }
 0x2f3   :  { %23531 = vmatpush.bf16.msrb.mxu2 %v38297_v6  ;;  %v38336_v6 = vld [vmem:[%s49651_s1 + $0x18d0] sm:$0xff] }
 0x2f4   :  { %23518 = vmatpush.bf16.msrb.mxu1 %v38289_v9 }
 0x2f5   :  { %23544 = vmatpush.bf16.msrb.mxu3 %v38305_v10  ;;  %v38319_v10 = vld [vmem:[%s49651_s1 + $0x1848] sm:$0xff] }
 0x2f6   :  { %23506 = vmatpush.bf16.msrb.mxu0 %v38280_v14  ;;  %v38326_v14 = vld [vmem:[%s49651_s1 + $0x1880] sm:$0xff] }
 0x2f7   :  { %23532 = vmatpush.bf16.msrb.mxu2 %v38296_v15  ;;  %v117_v15 = vld [vmem:[%s49652_s0 + $0x300] sm:$0xff] }
 0x2f8   :  { %23519 = vmatpush.bf16.msrb.mxu1 %v38288_v17  ;;  %v38349_v17 = vld [vmem:[%s49651_s1 + $0x1938] sm:$0xff] }
 0x2f9   :  { %23545 = vmatpush.bf16.msrb.mxu3 %v38304_v18  ;;  %v38365_v18 = vld [vmem:[%s49651_s1 + $0x19b8] sm:$0xff] }
 0x2fa   :  { %23507 = vmatpush.bf16.msrb.mxu0 %v38279_v19  ;;  %v38318_v19 = vld [vmem:[%s49651_s1 + $0x1840] sm:$0xff] }
 0x2fb   :  { %23533 = vmatpush.bf16.msrb.mxu2 %v38295_v20  ;;  %v38334_v20 = vld [vmem:[%s49651_s1 + $0x18c0] sm:$0xff] }
 0x2fc   :  { %23520 = vmatpush.bf16.msrb.mxu1 %v38287_v22  ;;  %v120_v22 = vld [vmem:[%s49652_s0 + $0x318] sm:$0xff] }
 0x2fd   :  { %23546 = vmatpush.bf16.msrb.mxu3 %v38303_v23  ;;  %v455_v23 = vpack.c.bf16 %v117_v15, %v117_v15  ;;  %v458_v28 = vpack.c.bf16 %v120_v22, %v120_v22  ;;  %v38395_v22 = vld [vmem:[%s49651_s1 + $0x1aa8] sm:$0xff] }
 0x2fe   :  { %23508 = vmatpush.bf16.msrb.mxu0 %v38278_v25  ;;  %v23302_v49 = vpop.f32.mrf.mxu0  ;;  %v38357_v25 = vld [vmem:[%s49651_s1 + $0x1978] sm:$0xff] }
 0x2ff   :  { %23534 = vmatpush.bf16.msrb.mxu2 %v38294_v26  ;;  %v23303_v50 = vadd.f32 %v23302_v49, %v42869_v13  ;;  %v38310_v13 = vld [vmem:[%s49651_s1 + $0x1800] sm:$0xff]  ;;  %v38373_v26 = vld [vmem:[%s49651_s1 + $0x19f8] sm:$0xff] }
 0x300   :  { %23521 = vmatpush.bf16.msrb.mxu1 %v38286_v31  ;;  %v23315_v53 = vpop.f32.mrf.mxu1  ;;  %v38356_v31 = vld [vmem:[%s49651_s1 + $0x1970] sm:$0xff]  ;;  %v38353_v49 = vld [vmem:[%s49651_s1 + $0x1958] sm:$0xff] }
 0x301   :  { %23547 = vmatpush.bf16.msrb.mxu3 %v38302_v32  ;;  %23509 = vmatmul.bf16.vlgmr.msrb.gmra.mxu0 %v451_v35  ;;  %v23316_v54 = vadd.f32 %v23315_v53, %v23303_v50  ;;  %v38372_v32 = vld [vmem:[%s49651_s1 + $0x19f0] sm:$0xff]  ;;  %v38355_v35 = vld [vmem:[%s49651_s1 + $0x1968] sm:$0xff]  ;;  %v38369_v50 = vld [vmem:[%s49651_s1 + $0x19d8] sm:$0xff] }
 0x302   :  { %23553 = vmatpush.bf16.msra.mxu0 %v38317_v29  ;;  %23535 = vmatmul.bf16.vlgmr.msrb.gmra.mxu2 %v453_v36  ;;  %v38348_v29 = vld [vmem:[%s49651_s1 + $0x1930] sm:$0xff]  ;;  %v38371_v36 = vld [vmem:[%s49651_s1 + $0x19e8] sm:$0xff] }
 0x303   :  { %23579 = vmatpush.bf16.msra.mxu2 %v38333_v30  ;;  %23522 = vmatmul.bf16.vlgmr.msrb.gmra.mxu1 %v452_v39  ;;  %v38364_v30 = vld [vmem:[%s49651_s1 + $0x19b0] sm:$0xff]  ;;  %v38346_v39 = vld [vmem:[%s49651_s1 + $0x1920] sm:$0xff] }
 0x304   :  { %23566 = vmatpush.bf16.msra.mxu1 %v38325_v37  ;;  %23548 = vmatmul.bf16.vlgmr.msrb.gmra.mxu3 %v454_v40  ;;  %v38362_v40 = vld [vmem:[%s49651_s1 + $0x19a0] sm:$0xff] }
 0x305   :  { %23592 = vmatpush.bf16.msra.mxu3 %v38341_v38  ;;  %v23328_v59 = vpop.f32.mrf.mxu2 }
 0x306   :  { %23554 = vmatpush.bf16.msra.mxu0 %v38316_v41  ;;  %v23329_v60 = vadd.f32 %v23328_v59, %v23316_v54  ;;  %v23304_v0 = vpop.f32.mrf.mxu0  ;;  %v38344_v54 = vld [vmem:[%s49651_s1 + $0x1910] sm:$0xff]  ;;  %v38343_v59 = vld [vmem:[%s49651_s1 + $0x1908] sm:$0xff] }
 0x307   :  { %23580 = vmatpush.bf16.msra.mxu2 %v38332_v42  ;;  %v23341_v63 = vpop.f32.mrf.mxu3 }
 0x308   :  { %23567 = vmatpush.bf16.msra.mxu1 %v38324_v43  ;;  %v42980_v1 = vadd.f32 %v23341_v63, %v23329_v60  ;;  %v23317_v4 = vpop.f32.mrf.mxu1  ;;  %v38354_v43 = vld [vmem:[%s49651_s1 + $0x1960] sm:$0xff]  ;;  %v38359_v60 = vld [vmem:[%s49651_s1 + $0x1988] sm:$0xff] }
 0x309   :  { %23593 = vmatpush.bf16.msra.mxu3 %v38340_v44  ;;  %v38370_v44 = vld [vmem:[%s49651_s1 + $0x19e0] sm:$0xff]  ;;  %v38367_v63 = vld [vmem:[%s49651_s1 + $0x19c8] sm:$0xff]  ;;  %v123_v4 = vld [vmem:[%s49652_s0 + $0x330] sm:$0xff] }
 0x30a   :  { %23555 = vmatpush.bf16.msra.mxu0 %v38315_v45  ;;  %v38345_v45 = vld [vmem:[%s49651_s1 + $0x1918] sm:$0xff] }
 0x30b   :  { %23581 = vmatpush.bf16.msra.mxu2 %v38331_v46  ;;  %v38361_v46 = vld [vmem:[%s49651_s1 + $0x1998] sm:$0xff] }
 0x30c   :  { %23568 = vmatpush.bf16.msra.mxu1 %v38323_v47 }
 0x30d   :  { %23594 = vmatpush.bf16.msra.mxu3 %v38339_v48  ;;  %v23330_v9 = vpop.f32.mrf.mxu2 }
 0x30e   :  { %23556 = vmatpush.bf16.msra.mxu0 %v38314_v51  ;;  %v122_v9 = vld [vmem:[%s49652_s0 + $0x328] sm:$0xff] }
 0x30f   :  { %23582 = vmatpush.bf16.msra.mxu2 %v38330_v52  ;;  %v23343_v12 = vpop.f32.mrf.mxu3  ;;  %v460_v15 = vpack.c.bf16 %v122_v9, %v122_v9  ;;  %v38411_v9 = vld [vmem:[%s49651_s1 + $0x1b28] sm:$0xff] }
 0x310   :  { %23569 = vmatpush.bf16.msra.mxu1 %v38322_v55  ;;  %v38360_v55 = vld [vmem:[%s49651_s1 + $0x1990] sm:$0xff]  ;;  %v461_v12 = vpack.c.bf16 %v123_v4, %v123_v4 }
 0x311   :  { %23595 = vmatpush.bf16.msra.mxu3 %v38338_v56 }
 0x312   :  { %23557 = vmatpush.bf16.msra.mxu0 %v38313_v57  ;;  %v38352_v57 = vld [vmem:[%s49651_s1 + $0x1950] sm:$0xff] }
 0x313   :  { %23583 = vmatpush.bf16.msra.mxu2 %v38329_v58  ;;  %v38368_v58 = vld [vmem:[%s49651_s1 + $0x19d0] sm:$0xff] }
 0x314   :  { %23570 = vmatpush.bf16.msra.mxu1 %v38321_v61 }
 0x315   :  { %23596 = vmatpush.bf16.msra.mxu3 %v38337_v62  ;;  %v38351_v62 = vld [vmem:[%s49651_s1 + $0x1948] sm:$0xff] }
 0x316   :  { %23558 = vmatpush.bf16.msra.mxu0 %v38312_v2  ;;  %v38358_v2 = vld [vmem:[%s49651_s1 + $0x1980] sm:$0xff] }
 0x317   :  { %23584 = vmatpush.bf16.msra.mxu2 %v38328_v3  ;;  %v121_v3 = vld [vmem:[%s49652_s0 + $0x320] sm:$0xff] }
 0x318   :  { %23571 = vmatpush.bf16.msra.mxu1 %v38320_v5  ;;  %v38381_v5 = vld [vmem:[%s49651_s1 + $0x1a38] sm:$0xff] }
 0x319   :  { %23597 = vmatpush.bf16.msra.mxu3 %v38336_v6  ;;  %v38397_v6 = vld [vmem:[%s49651_s1 + $0x1ab8] sm:$0xff] }
 0x31a   :  { %23559 = vmatpush.bf16.msra.mxu0 %v38311_v7  ;;  %v38350_v7 = vld [vmem:[%s49651_s1 + $0x1940] sm:$0xff] }
 0x31b   :  { %23585 = vmatpush.bf16.msra.mxu2 %v38327_v8  ;;  %v38366_v8 = vld [vmem:[%s49651_s1 + $0x19c0] sm:$0xff] }
 0x31c   :  { %23572 = vmatpush.bf16.msra.mxu1 %v38319_v10  ;;  %v124_v10 = vld [vmem:[%s49652_s0 + $0x338] sm:$0xff] }
 0x31d   :  { %23598 = vmatpush.bf16.msra.mxu3 %v38335_v11  ;;  %v459_v11 = vpack.c.bf16 %v121_v3, %v121_v3  ;;  %v462_v16 = vpack.c.bf16 %v124_v10, %v124_v10  ;;  %v38427_v10 = vld [vmem:[%s49651_s1 + $0x1ba8] sm:$0xff] }
 0x31e   :  { %23560 = vmatpush.bf16.msra.mxu0 %v38310_v13  ;;  %v23354_v37 = vpop.f32.mrf.mxu0  ;;  %v38389_v13 = vld [vmem:[%s49651_s1 + $0x1a78] sm:$0xff] }
 0x31f   :  { %23586 = vmatpush.bf16.msra.mxu2 %v38326_v14  ;;  %v23355_v38 = vadd.f32 %v23354_v37, %v42980_v1  ;;  %v38342_v1 = vld [vmem:[%s49651_s1 + $0x1900] sm:$0xff]  ;;  %v38405_v14 = vld [vmem:[%s49651_s1 + $0x1af8] sm:$0xff] }
 0x320   :  { %23573 = vmatpush.bf16.msra.mxu1 %v38318_v19  ;;  %v23367_v41 = vpop.f32.mrf.mxu1  ;;  %v38388_v19 = vld [vmem:[%s49651_s1 + $0x1a70] sm:$0xff]  ;;  %v38385_v37 = vld [vmem:[%s49651_s1 + $0x1a58] sm:$0xff] }
 0x321   :  { %23599 = vmatpush.bf16.msra.mxu3 %v38334_v20  ;;  %23561 = vmatmul.bf16.vlgmr.msra.gmra.mxu0 %v455_v23  ;;  %v23368_v42 = vadd.f32 %v23367_v41, %v23355_v38  ;;  %v38404_v20 = vld [vmem:[%s49651_s1 + $0x1af0] sm:$0xff]  ;;  %v38387_v23 = vld [vmem:[%s49651_s1 + $0x1a68] sm:$0xff]  ;;  %v38401_v38 = vld [vmem:[%s49651_s1 + $0x1ad8] sm:$0xff] }
 0x322   :  { %23605 = vmatpush.bf16.msrb.mxu0 %v38349_v17  ;;  %23587 = vmatmul.bf16.vlgmr.msra.gmra.mxu2 %v457_v24  ;;  %v38380_v17 = vld [vmem:[%s49651_s1 + $0x1a30] sm:$0xff]  ;;  %v38403_v24 = vld [vmem:[%s49651_s1 + $0x1ae8] sm:$0xff] }
 0x323   :  { %23631 = vmatpush.bf16.msrb.mxu2 %v38365_v18  ;;  %23574 = vmatmul.bf16.vlgmr.msra.gmra.mxu1 %v456_v27  ;;  %v38396_v18 = vld [vmem:[%s49651_s1 + $0x1ab0] sm:$0xff]  ;;  %v38378_v27 = vld [vmem:[%s49651_s1 + $0x1a20] sm:$0xff] }
 0x324   :  { %23618 = vmatpush.bf16.msrb.mxu1 %v38357_v25  ;;  %23600 = vmatmul.bf16.vlgmr.msra.gmra.mxu3 %v458_v28  ;;  %v38394_v28 = vld [vmem:[%s49651_s1 + $0x1aa0] sm:$0xff] }
 0x325   :  { %23644 = vmatpush.bf16.msrb.mxu3 %v38373_v26  ;;  %v23380_v47 = vpop.f32.mrf.mxu2 }
 0x326   :  { %23606 = vmatpush.bf16.msrb.mxu0 %v38348_v29  ;;  %v23381_v48 = vadd.f32 %v23380_v47, %v23368_v42  ;;  %v23356_v52 = vpop.f32.mrf.mxu0  ;;  %v38376_v42 = vld [vmem:[%s49651_s1 + $0x1a10] sm:$0xff]  ;;  %v38375_v47 = vld [vmem:[%s49651_s1 + $0x1a08] sm:$0xff] }
 0x327   :  { %23632 = vmatpush.bf16.msrb.mxu2 %v38364_v30  ;;  %v23393_v51 = vpop.f32.mrf.mxu3 }
 0x328   :  { %23619 = vmatpush.bf16.msrb.mxu1 %v38356_v31  ;;  %v43091_v53 = vadd.f32 %v23393_v51, %v23381_v48  ;;  %v23369_v56 = vpop.f32.mrf.mxu1  ;;  %v38386_v31 = vld [vmem:[%s49651_s1 + $0x1a60] sm:$0xff]  ;;  %v38391_v48 = vld [vmem:[%s49651_s1 + $0x1a88] sm:$0xff] }
 0x329   :  { %23645 = vmatpush.bf16.msrb.mxu3 %v38372_v32  ;;  %v38402_v32 = vld [vmem:[%s49651_s1 + $0x1ae0] sm:$0xff]  ;;  %v38399_v51 = vld [vmem:[%s49651_s1 + $0x1ac8] sm:$0xff]  ;;  %v127_v56 = vld [vmem:[%s49652_s0 + $0x350] sm:$0xff] }
 0x32a   :  { %23607 = vmatpush.bf16.msrb.mxu0 %v38347_v33  ;;  %v38377_v33 = vld [vmem:[%s49651_s1 + $0x1a18] sm:$0xff] }
 0x32b   :  { %23633 = vmatpush.bf16.msrb.mxu2 %v38363_v34  ;;  %v38393_v34 = vld [vmem:[%s49651_s1 + $0x1a98] sm:$0xff] }
 0x32c   :  { %23620 = vmatpush.bf16.msrb.mxu1 %v38355_v35 }
 0x32d   :  { %23646 = vmatpush.bf16.msrb.mxu3 %v38371_v36  ;;  %v23382_v61 = vpop.f32.mrf.mxu2 }
 0x32e   :  { %23608 = vmatpush.bf16.msrb.mxu0 %v38346_v39  ;;  %v126_v61 = vld [vmem:[%s49652_s0 + $0x348] sm:$0xff] }
 0x32f   :  { %23634 = vmatpush.bf16.msrb.mxu2 %v38362_v40  ;;  %v23395_v0 = vpop.f32.mrf.mxu3  ;;  %v464_v3 = vpack.c.bf16 %v126_v61, %v126_v61  ;;  %v38443_v61 = vld [vmem:[%s49651_s1 + $0x1c28] sm:$0xff] }
 0x330   :  { %23621 = vmatpush.bf16.msrb.mxu1 %v38354_v43  ;;  %v38392_v43 = vld [vmem:[%s49651_s1 + $0x1a90] sm:$0xff]  ;;  %v465_v0 = vpack.c.bf16 %v127_v56, %v127_v56 }
 0x331   :  { %23647 = vmatpush.bf16.msrb.mxu3 %v38370_v44 }
 0x332   :  { %23609 = vmatpush.bf16.msrb.mxu0 %v38345_v45  ;;  %v38384_v45 = vld [vmem:[%s49651_s1 + $0x1a50] sm:$0xff] }
 0x333   :  { %23635 = vmatpush.bf16.msrb.mxu2 %v38361_v46  ;;  %v38400_v46 = vld [vmem:[%s49651_s1 + $0x1ad0] sm:$0xff] }
 0x334   :  { %23622 = vmatpush.bf16.msrb.mxu1 %v38353_v49 }
 0x335   :  { %23648 = vmatpush.bf16.msrb.mxu3 %v38369_v50  ;;  %v38383_v50 = vld [vmem:[%s49651_s1 + $0x1a48] sm:$0xff] }
 0x336   :  { %23610 = vmatpush.bf16.msrb.mxu0 %v38344_v54  ;;  %v38390_v54 = vld [vmem:[%s49651_s1 + $0x1a80] sm:$0xff] }
 0x337   :  { %23636 = vmatpush.bf16.msrb.mxu2 %v38360_v55  ;;  %v125_v55 = vld [vmem:[%s49652_s0 + $0x340] sm:$0xff] }
 0x338   :  { %23623 = vmatpush.bf16.msrb.mxu1 %v38352_v57  ;;  %v38413_v57 = vld [vmem:[%s49651_s1 + $0x1b38] sm:$0xff] }
 0x339   :  { %23649 = vmatpush.bf16.msrb.mxu3 %v38368_v58  ;;  %v38429_v58 = vld [vmem:[%s49651_s1 + $0x1bb8] sm:$0xff] }
 0x33a   :  { %23611 = vmatpush.bf16.msrb.mxu0 %v38343_v59  ;;  %v38382_v59 = vld [vmem:[%s49651_s1 + $0x1a40] sm:$0xff] }
 0x33b   :  { %23637 = vmatpush.bf16.msrb.mxu2 %v38359_v60  ;;  %v38398_v60 = vld [vmem:[%s49651_s1 + $0x1ac0] sm:$0xff] }
 0x33c   :  { %23624 = vmatpush.bf16.msrb.mxu1 %v38351_v62  ;;  %v128_v62 = vld [vmem:[%s49652_s0 + $0x358] sm:$0xff] }
 0x33d   :  { %23650 = vmatpush.bf16.msrb.mxu3 %v38367_v63  ;;  %v463_v63 = vpack.c.bf16 %v125_v55, %v125_v55  ;;  %v466_v4 = vpack.c.bf16 %v128_v62, %v128_v62  ;;  %v38459_v62 = vld [vmem:[%s49651_s1 + $0x1ca8] sm:$0xff] }
 0x33e   :  { %23612 = vmatpush.bf16.msrb.mxu0 %v38342_v1  ;;  %v23406_v25 = vpop.f32.mrf.mxu0  ;;  %v38421_v1 = vld [vmem:[%s49651_s1 + $0x1b78] sm:$0xff] }
 0x33f   :  { %23638 = vmatpush.bf16.msrb.mxu2 %v38358_v2  ;;  %v23407_v26 = vadd.f32 %v23406_v25, %v43091_v53  ;;  %v38374_v53 = vld [vmem:[%s49651_s1 + $0x1a00] sm:$0xff]  ;;  %v38437_v2 = vld [vmem:[%s49651_s1 + $0x1bf8] sm:$0xff] }
 0x340   :  { %23625 = vmatpush.bf16.msrb.mxu1 %v38350_v7  ;;  %v23419_v29 = vpop.f32.mrf.mxu1  ;;  %v38420_v7 = vld [vmem:[%s49651_s1 + $0x1b70] sm:$0xff]  ;;  %v38417_v25 = vld [vmem:[%s49651_s1 + $0x1b58] sm:$0xff] }
 0x341   :  { %23651 = vmatpush.bf16.msrb.mxu3 %v38366_v8  ;;  %23613 = vmatmul.bf16.vlgmr.msrb.gmra.mxu0 %v459_v11  ;;  %v23420_v30 = vadd.f32 %v23419_v29, %v23407_v26  ;;  %v38436_v8 = vld [vmem:[%s49651_s1 + $0x1bf0] sm:$0xff]  ;;  %v38419_v11 = vld [vmem:[%s49651_s1 + $0x1b68] sm:$0xff]  ;;  %v38433_v26 = vld [vmem:[%s49651_s1 + $0x1bd8] sm:$0xff] }
 0x342   :  { %23657 = vmatpush.bf16.msra.mxu0 %v38381_v5  ;;  %23639 = vmatmul.bf16.vlgmr.msrb.gmra.mxu2 %v461_v12  ;;  %v38412_v5 = vld [vmem:[%s49651_s1 + $0x1b30] sm:$0xff]  ;;  %v38435_v12 = vld [vmem:[%s49651_s1 + $0x1be8] sm:$0xff] }
 0x343   :  { %23683 = vmatpush.bf16.msra.mxu2 %v38397_v6  ;;  %23626 = vmatmul.bf16.vlgmr.msrb.gmra.mxu1 %v460_v15  ;;  %v38428_v6 = vld [vmem:[%s49651_s1 + $0x1bb0] sm:$0xff]  ;;  %v38410_v15 = vld [vmem:[%s49651_s1 + $0x1b20] sm:$0xff] }
 0x344   :  { %23670 = vmatpush.bf16.msra.mxu1 %v38389_v13  ;;  %23652 = vmatmul.bf16.vlgmr.msrb.gmra.mxu3 %v462_v16  ;;  %v38426_v16 = vld [vmem:[%s49651_s1 + $0x1ba0] sm:$0xff] }
 0x345   :  { %23696 = vmatpush.bf16.msra.mxu3 %v38405_v14  ;;  %v23432_v35 = vpop.f32.mrf.mxu2 }
 0x346   :  { %23658 = vmatpush.bf16.msra.mxu0 %v38380_v17  ;;  %v23433_v36 = vadd.f32 %v23432_v35, %v23420_v30  ;;  %v23408_v40 = vpop.f32.mrf.mxu0  ;;  %v38408_v30 = vld [vmem:[%s49651_s1 + $0x1b10] sm:$0xff]  ;;  %v38407_v35 = vld [vmem:[%s49651_s1 + $0x1b08] sm:$0xff] }
 0x347   :  { %23684 = vmatpush.bf16.msra.mxu2 %v38396_v18  ;;  %v23445_v39 = vpop.f32.mrf.mxu3 }
 0x348   :  { %23671 = vmatpush.bf16.msra.mxu1 %v38388_v19  ;;  %v43202_v41 = vadd.f32 %v23445_v39, %v23433_v36  ;;  %v23421_v44 = vpop.f32.mrf.mxu1  ;;  %v38418_v19 = vld [vmem:[%s49651_s1 + $0x1b60] sm:$0xff]  ;;  %v38423_v36 = vld [vmem:[%s49651_s1 + $0x1b88] sm:$0xff] }
 0x349   :  { %23697 = vmatpush.bf16.msra.mxu3 %v38404_v20  ;;  %v38434_v20 = vld [vmem:[%s49651_s1 + $0x1be0] sm:$0xff]  ;;  %v38431_v39 = vld [vmem:[%s49651_s1 + $0x1bc8] sm:$0xff]  ;;  %v131_v44 = vld [vmem:[%s49652_s0 + $0x370] sm:$0xff] }
 0x34a   :  { %23659 = vmatpush.bf16.msra.mxu0 %v38379_v21  ;;  %v38409_v21 = vld [vmem:[%s49651_s1 + $0x1b18] sm:$0xff] }
 0x34b   :  { %23685 = vmatpush.bf16.msra.mxu2 %v38395_v22  ;;  %v38425_v22 = vld [vmem:[%s49651_s1 + $0x1b98] sm:$0xff] }
 0x34c   :  { %23672 = vmatpush.bf16.msra.mxu1 %v38387_v23 }
 0x34d   :  { %23698 = vmatpush.bf16.msra.mxu3 %v38403_v24  ;;  %v23434_v49 = vpop.f32.mrf.mxu2 }
 0x34e   :  { %23660 = vmatpush.bf16.msra.mxu0 %v38378_v27  ;;  %v130_v49 = vld [vmem:[%s49652_s0 + $0x368] sm:$0xff] }
 0x34f   :  { %23686 = vmatpush.bf16.msra.mxu2 %v38394_v28  ;;  %v23447_v52 = vpop.f32.mrf.mxu3  ;;  %v468_v55 = vpack.c.bf16 %v130_v49, %v130_v49  ;;  %v38475_v49 = vld [vmem:[%s49651_s1 + $0x1d28] sm:$0xff] }
 0x350   :  { %23673 = vmatpush.bf16.msra.mxu1 %v38386_v31  ;;  %v38424_v31 = vld [vmem:[%s49651_s1 + $0x1b90] sm:$0xff]  ;;  %v469_v52 = vpack.c.bf16 %v131_v44, %v131_v44 }
 0x351   :  { %23699 = vmatpush.bf16.msra.mxu3 %v38402_v32 }
 0x352   :  { %23661 = vmatpush.bf16.msra.mxu0 %v38377_v33  ;;  %v38416_v33 = vld [vmem:[%s49651_s1 + $0x1b50] sm:$0xff] }
 0x353   :  { %23687 = vmatpush.bf16.msra.mxu2 %v38393_v34  ;;  %v38432_v34 = vld [vmem:[%s49651_s1 + $0x1bd0] sm:$0xff] }
 0x354   :  { %23674 = vmatpush.bf16.msra.mxu1 %v38385_v37 }
 0x355   :  { %23700 = vmatpush.bf16.msra.mxu3 %v38401_v38  ;;  %v38415_v38 = vld [vmem:[%s49651_s1 + $0x1b48] sm:$0xff] }
 0x356   :  { %23662 = vmatpush.bf16.msra.mxu0 %v38376_v42  ;;  %v38422_v42 = vld [vmem:[%s49651_s1 + $0x1b80] sm:$0xff] }
 0x357   :  { %23688 = vmatpush.bf16.msra.mxu2 %v38392_v43  ;;  %v129_v43 = vld [vmem:[%s49652_s0 + $0x360] sm:$0xff] }
 0x358   :  { %23675 = vmatpush.bf16.msra.mxu1 %v38384_v45  ;;  %v38445_v45 = vld [vmem:[%s49651_s1 + $0x1c38] sm:$0xff] }
 0x359   :  { %23701 = vmatpush.bf16.msra.mxu3 %v38400_v46  ;;  %v38461_v46 = vld [vmem:[%s49651_s1 + $0x1cb8] sm:$0xff] }
 0x35a   :  { %23663 = vmatpush.bf16.msra.mxu0 %v38375_v47  ;;  %v38414_v47 = vld [vmem:[%s49651_s1 + $0x1b40] sm:$0xff] }
 0x35b   :  { %23689 = vmatpush.bf16.msra.mxu2 %v38391_v48  ;;  %v38430_v48 = vld [vmem:[%s49651_s1 + $0x1bc0] sm:$0xff] }
 0x35c   :  { %23676 = vmatpush.bf16.msra.mxu1 %v38383_v50  ;;  %v132_v50 = vld [vmem:[%s49652_s0 + $0x378] sm:$0xff] }
 0x35d   :  { %23702 = vmatpush.bf16.msra.mxu3 %v38399_v51  ;;  %v467_v51 = vpack.c.bf16 %v129_v43, %v129_v43  ;;  %v470_v56 = vpack.c.bf16 %v132_v50, %v132_v50  ;;  %v38491_v50 = vld [vmem:[%s49651_s1 + $0x1da8] sm:$0xff] }
 0x35e   :  { %23664 = vmatpush.bf16.msra.mxu0 %v38374_v53  ;;  %v23458_v13 = vpop.f32.mrf.mxu0  ;;  %v38453_v53 = vld [vmem:[%s49651_s1 + $0x1c78] sm:$0xff] }
 0x35f   :  { %23690 = vmatpush.bf16.msra.mxu2 %v38390_v54  ;;  %v23459_v14 = vadd.f32 %v23458_v13, %v43202_v41  ;;  %v38406_v41 = vld [vmem:[%s49651_s1 + $0x1b00] sm:$0xff]  ;;  %v38469_v54 = vld [vmem:[%s49651_s1 + $0x1cf8] sm:$0xff] }
 0x360   :  { %23677 = vmatpush.bf16.msra.mxu1 %v38382_v59  ;;  %v23471_v17 = vpop.f32.mrf.mxu1  ;;  %v38452_v59 = vld [vmem:[%s49651_s1 + $0x1c70] sm:$0xff]  ;;  %v38449_v13 = vld [vmem:[%s49651_s1 + $0x1c58] sm:$0xff] }
 0x361   :  { %23703 = vmatpush.bf16.msra.mxu3 %v38398_v60  ;;  %23665 = vmatmul.bf16.vlgmr.msra.gmra.mxu0 %v463_v63  ;;  %v23472_v18 = vadd.f32 %v23471_v17, %v23459_v14  ;;  %v38468_v60 = vld [vmem:[%s49651_s1 + $0x1cf0] sm:$0xff]  ;;  %v38451_v63 = vld [vmem:[%s49651_s1 + $0x1c68] sm:$0xff]  ;;  %v38465_v14 = vld [vmem:[%s49651_s1 + $0x1cd8] sm:$0xff] }
 0x362   :  { %23709 = vmatpush.bf16.msrb.mxu0 %v38413_v57  ;;  %23691 = vmatmul.bf16.vlgmr.msra.gmra.mxu2 %v465_v0  ;;  %v38444_v57 = vld [vmem:[%s49651_s1 + $0x1c30] sm:$0xff]  ;;  %v38467_v0 = vld [vmem:[%s49651_s1 + $0x1ce8] sm:$0xff] }
 0x363   :  { %23735 = vmatpush.bf16.msrb.mxu2 %v38429_v58  ;;  %23678 = vmatmul.bf16.vlgmr.msra.gmra.mxu1 %v464_v3  ;;  %v38460_v58 = vld [vmem:[%s49651_s1 + $0x1cb0] sm:$0xff]  ;;  %v38442_v3 = vld [vmem:[%s49651_s1 + $0x1c20] sm:$0xff] }
 0x364   :  { %23722 = vmatpush.bf16.msrb.mxu1 %v38421_v1  ;;  %23704 = vmatmul.bf16.vlgmr.msra.gmra.mxu3 %v466_v4  ;;  %v38458_v4 = vld [vmem:[%s49651_s1 + $0x1ca0] sm:$0xff] }
 0x365   :  { %23748 = vmatpush.bf16.msrb.mxu3 %v38437_v2  ;;  %v23484_v23 = vpop.f32.mrf.mxu2 }
 0x366   :  { %23710 = vmatpush.bf16.msrb.mxu0 %v38412_v5  ;;  %v23485_v24 = vadd.f32 %v23484_v23, %v23472_v18  ;;  %v23460_v28 = vpop.f32.mrf.mxu0  ;;  %v38440_v18 = vld [vmem:[%s49651_s1 + $0x1c10] sm:$0xff]  ;;  %v38439_v23 = vld [vmem:[%s49651_s1 + $0x1c08] sm:$0xff] }
 0x367   :  { %23736 = vmatpush.bf16.msrb.mxu2 %v38428_v6  ;;  %v23497_v27 = vpop.f32.mrf.mxu3 }
 0x368   :  { %23723 = vmatpush.bf16.msrb.mxu1 %v38420_v7  ;;  %v43313_v29 = vadd.f32 %v23497_v27, %v23485_v24  ;;  %v23473_v32 = vpop.f32.mrf.mxu1  ;;  %v38450_v7 = vld [vmem:[%s49651_s1 + $0x1c60] sm:$0xff]  ;;  %v38455_v24 = vld [vmem:[%s49651_s1 + $0x1c88] sm:$0xff] }
 0x369   :  { %23749 = vmatpush.bf16.msrb.mxu3 %v38436_v8  ;;  %v38466_v8 = vld [vmem:[%s49651_s1 + $0x1ce0] sm:$0xff]  ;;  %v38463_v27 = vld [vmem:[%s49651_s1 + $0x1cc8] sm:$0xff]  ;;  %v135_v32 = vld [vmem:[%s49652_s0 + $0x390] sm:$0xff] }
 0x36a   :  { %23711 = vmatpush.bf16.msrb.mxu0 %v38411_v9  ;;  %v38441_v9 = vld [vmem:[%s49651_s1 + $0x1c18] sm:$0xff] }
 0x36b   :  { %23737 = vmatpush.bf16.msrb.mxu2 %v38427_v10  ;;  %v38457_v10 = vld [vmem:[%s49651_s1 + $0x1c98] sm:$0xff] }
 0x36c   :  { %23724 = vmatpush.bf16.msrb.mxu1 %v38419_v11 }
 0x36d   :  { %23750 = vmatpush.bf16.msrb.mxu3 %v38435_v12  ;;  %v23486_v37 = vpop.f32.mrf.mxu2 }
 0x36e   :  { %23712 = vmatpush.bf16.msrb.mxu0 %v38410_v15  ;;  %v134_v37 = vld [vmem:[%s49652_s0 + $0x388] sm:$0xff] }
 0x36f   :  { %23738 = vmatpush.bf16.msrb.mxu2 %v38426_v16  ;;  %v23499_v40 = vpop.f32.mrf.mxu3  ;;  %v472_v43 = vpack.c.bf16 %v134_v37, %v134_v37  ;;  %v38507_v37 = vld [vmem:[%s49651_s1 + $0x1e28] sm:$0xff] }
 0x370   :  { %23725 = vmatpush.bf16.msrb.mxu1 %v38418_v19  ;;  %v38456_v19 = vld [vmem:[%s49651_s1 + $0x1c90] sm:$0xff]  ;;  %v473_v40 = vpack.c.bf16 %v135_v32, %v135_v32 }
 0x371   :  { %23751 = vmatpush.bf16.msrb.mxu3 %v38434_v20 }
 0x372   :  { %23713 = vmatpush.bf16.msrb.mxu0 %v38409_v21  ;;  %v38448_v21 = vld [vmem:[%s49651_s1 + $0x1c50] sm:$0xff] }
 0x373   :  { %23739 = vmatpush.bf16.msrb.mxu2 %v38425_v22  ;;  %v38464_v22 = vld [vmem:[%s49651_s1 + $0x1cd0] sm:$0xff] }
 0x374   :  { %23726 = vmatpush.bf16.msrb.mxu1 %v38417_v25 }
 0x375   :  { %23752 = vmatpush.bf16.msrb.mxu3 %v38433_v26  ;;  %v38447_v26 = vld [vmem:[%s49651_s1 + $0x1c48] sm:$0xff] }
 0x376   :  { %23714 = vmatpush.bf16.msrb.mxu0 %v38408_v30  ;;  %v38454_v30 = vld [vmem:[%s49651_s1 + $0x1c80] sm:$0xff] }
 0x377   :  { %23740 = vmatpush.bf16.msrb.mxu2 %v38424_v31  ;;  %v133_v31 = vld [vmem:[%s49652_s0 + $0x380] sm:$0xff] }
 0x378   :  { %23727 = vmatpush.bf16.msrb.mxu1 %v38416_v33  ;;  %v38477_v33 = vld [vmem:[%s49651_s1 + $0x1d38] sm:$0xff] }
 0x379   :  { %23753 = vmatpush.bf16.msrb.mxu3 %v38432_v34  ;;  %v38493_v34 = vld [vmem:[%s49651_s1 + $0x1db8] sm:$0xff] }
 0x37a   :  { %23715 = vmatpush.bf16.msrb.mxu0 %v38407_v35  ;;  %v38446_v35 = vld [vmem:[%s49651_s1 + $0x1c40] sm:$0xff] }
 0x37b   :  { %23741 = vmatpush.bf16.msrb.mxu2 %v38423_v36  ;;  %v38462_v36 = vld [vmem:[%s49651_s1 + $0x1cc0] sm:$0xff] }
 0x37c   :  { %23728 = vmatpush.bf16.msrb.mxu1 %v38415_v38  ;;  %v136_v38 = vld [vmem:[%s49652_s0 + $0x398] sm:$0xff] }
 0x37d   :  { %23754 = vmatpush.bf16.msrb.mxu3 %v38431_v39  ;;  %v471_v39 = vpack.c.bf16 %v133_v31, %v133_v31  ;;  %v474_v44 = vpack.c.bf16 %v136_v38, %v136_v38  ;;  %v38523_v38 = vld [vmem:[%s49651_s1 + $0x1ea8] sm:$0xff] }
 0x37e   :  { %23716 = vmatpush.bf16.msrb.mxu0 %v38406_v41  ;;  %v23510_v1 = vpop.f32.mrf.mxu0  ;;  %v38485_v41 = vld [vmem:[%s49651_s1 + $0x1d78] sm:$0xff] }
 0x37f   :  { %23742 = vmatpush.bf16.msrb.mxu2 %v38422_v42  ;;  %v23511_v2 = vadd.f32 %v23510_v1, %v43313_v29  ;;  %v38438_v29 = vld [vmem:[%s49651_s1 + $0x1c00] sm:$0xff]  ;;  %v38501_v42 = vld [vmem:[%s49651_s1 + $0x1df8] sm:$0xff] }
 0x380   :  { %23729 = vmatpush.bf16.msrb.mxu1 %v38414_v47  ;;  %v23523_v5 = vpop.f32.mrf.mxu1  ;;  %v38484_v47 = vld [vmem:[%s49651_s1 + $0x1d70] sm:$0xff]  ;;  %v38481_v1 = vld [vmem:[%s49651_s1 + $0x1d58] sm:$0xff] }
 0x381   :  { %23755 = vmatpush.bf16.msrb.mxu3 %v38430_v48  ;;  %23717 = vmatmul.bf16.vlgmr.msrb.gmra.mxu0 %v467_v51  ;;  %v23524_v6 = vadd.f32 %v23523_v5, %v23511_v2  ;;  %v38500_v48 = vld [vmem:[%s49651_s1 + $0x1df0] sm:$0xff]  ;;  %v38483_v51 = vld [vmem:[%s49651_s1 + $0x1d68] sm:$0xff]  ;;  %v38497_v2 = vld [vmem:[%s49651_s1 + $0x1dd8] sm:$0xff] }
 0x382   :  { %23761 = vmatpush.bf16.msra.mxu0 %v38445_v45  ;;  %23743 = vmatmul.bf16.vlgmr.msrb.gmra.mxu2 %v469_v52  ;;  %v38476_v45 = vld [vmem:[%s49651_s1 + $0x1d30] sm:$0xff]  ;;  %v38499_v52 = vld [vmem:[%s49651_s1 + $0x1de8] sm:$0xff] }
 0x383   :  { %23787 = vmatpush.bf16.msra.mxu2 %v38461_v46  ;;  %23730 = vmatmul.bf16.vlgmr.msrb.gmra.mxu1 %v468_v55  ;;  %v38492_v46 = vld [vmem:[%s49651_s1 + $0x1db0] sm:$0xff]  ;;  %v38474_v55 = vld [vmem:[%s49651_s1 + $0x1d20] sm:$0xff] }
 0x384   :  { %23774 = vmatpush.bf16.msra.mxu1 %v38453_v53  ;;  %23756 = vmatmul.bf16.vlgmr.msrb.gmra.mxu3 %v470_v56  ;;  %v38490_v56 = vld [vmem:[%s49651_s1 + $0x1da0] sm:$0xff] }
 0x385   :  { %23800 = vmatpush.bf16.msra.mxu3 %v38469_v54  ;;  %v23536_v11 = vpop.f32.mrf.mxu2 }
 0x386   :  { %23762 = vmatpush.bf16.msra.mxu0 %v38444_v57  ;;  %v23537_v12 = vadd.f32 %v23536_v11, %v23524_v6  ;;  %v23512_v16 = vpop.f32.mrf.mxu0  ;;  %v38472_v6 = vld [vmem:[%s49651_s1 + $0x1d10] sm:$0xff]  ;;  %v38471_v11 = vld [vmem:[%s49651_s1 + $0x1d08] sm:$0xff] }
 0x387   :  { %23788 = vmatpush.bf16.msra.mxu2 %v38460_v58  ;;  %v23549_v15 = vpop.f32.mrf.mxu3 }
 0x388   :  { %23775 = vmatpush.bf16.msra.mxu1 %v38452_v59  ;;  %v43424_v17 = vadd.f32 %v23549_v15, %v23537_v12  ;;  %v23525_v20 = vpop.f32.mrf.mxu1  ;;  %v38482_v59 = vld [vmem:[%s49651_s1 + $0x1d60] sm:$0xff]  ;;  %v38487_v12 = vld [vmem:[%s49651_s1 + $0x1d88] sm:$0xff] }
 0x389   :  { %23801 = vmatpush.bf16.msra.mxu3 %v38468_v60  ;;  %v38498_v60 = vld [vmem:[%s49651_s1 + $0x1de0] sm:$0xff]  ;;  %v38495_v15 = vld [vmem:[%s49651_s1 + $0x1dc8] sm:$0xff]  ;;  %v139_v20 = vld [vmem:[%s49652_s0 + $0x3b0] sm:$0xff] }
 0x38a   :  { %23763 = vmatpush.bf16.msra.mxu0 %v38443_v61  ;;  %v38473_v61 = vld [vmem:[%s49651_s1 + $0x1d18] sm:$0xff] }
 0x38b   :  { %23789 = vmatpush.bf16.msra.mxu2 %v38459_v62  ;;  %v38489_v62 = vld [vmem:[%s49651_s1 + $0x1d98] sm:$0xff] }
 0x38c   :  { %23776 = vmatpush.bf16.msra.mxu1 %v38451_v63 }
 0x38d   :  { %23802 = vmatpush.bf16.msra.mxu3 %v38467_v0  ;;  %v23538_v25 = vpop.f32.mrf.mxu2 }
 0x38e   :  { %23764 = vmatpush.bf16.msra.mxu0 %v38442_v3  ;;  %v138_v25 = vld [vmem:[%s49652_s0 + $0x3a8] sm:$0xff] }
 0x38f   :  { %23790 = vmatpush.bf16.msra.mxu2 %v38458_v4  ;;  %v23551_v28 = vpop.f32.mrf.mxu3  ;;  %v476_v31 = vpack.c.bf16 %v138_v25, %v138_v25  ;;  %v38539_v25 = vld [vmem:[%s49651_s1 + $0x1f28] sm:$0xff] }
 0x390   :  { %23777 = vmatpush.bf16.msra.mxu1 %v38450_v7  ;;  %v38488_v7 = vld [vmem:[%s49651_s1 + $0x1d90] sm:$0xff]  ;;  %v477_v28 = vpack.c.bf16 %v139_v20, %v139_v20 }
 0x391   :  { %23803 = vmatpush.bf16.msra.mxu3 %v38466_v8 }
 0x392   :  { %23765 = vmatpush.bf16.msra.mxu0 %v38441_v9  ;;  %v38480_v9 = vld [vmem:[%s49651_s1 + $0x1d50] sm:$0xff] }
 0x393   :  { %23791 = vmatpush.bf16.msra.mxu2 %v38457_v10  ;;  %v38496_v10 = vld [vmem:[%s49651_s1 + $0x1dd0] sm:$0xff] }
 0x394   :  { %23778 = vmatpush.bf16.msra.mxu1 %v38449_v13 }
 0x395   :  { %23804 = vmatpush.bf16.msra.mxu3 %v38465_v14  ;;  %v38479_v14 = vld [vmem:[%s49651_s1 + $0x1d48] sm:$0xff] }
 0x396   :  { %23766 = vmatpush.bf16.msra.mxu0 %v38440_v18  ;;  %v38486_v18 = vld [vmem:[%s49651_s1 + $0x1d80] sm:$0xff] }
 0x397   :  { %23792 = vmatpush.bf16.msra.mxu2 %v38456_v19  ;;  %v137_v19 = vld [vmem:[%s49652_s0 + $0x3a0] sm:$0xff] }
 0x398   :  { %23779 = vmatpush.bf16.msra.mxu1 %v38448_v21  ;;  %v38509_v21 = vld [vmem:[%s49651_s1 + $0x1e38] sm:$0xff] }
 0x399   :  { %23805 = vmatpush.bf16.msra.mxu3 %v38464_v22  ;;  %v38525_v22 = vld [vmem:[%s49651_s1 + $0x1eb8] sm:$0xff] }
 0x39a   :  { %23767 = vmatpush.bf16.msra.mxu0 %v38439_v23  ;;  %v38478_v23 = vld [vmem:[%s49651_s1 + $0x1d40] sm:$0xff] }
 0x39b   :  { %23793 = vmatpush.bf16.msra.mxu2 %v38455_v24  ;;  %v38494_v24 = vld [vmem:[%s49651_s1 + $0x1dc0] sm:$0xff] }
 0x39c   :  { %23780 = vmatpush.bf16.msra.mxu1 %v38447_v26  ;;  %v140_v26 = vld [vmem:[%s49652_s0 + $0x3b8] sm:$0xff] }
 0x39d   :  { %23806 = vmatpush.bf16.msra.mxu3 %v38463_v27  ;;  %v475_v27 = vpack.c.bf16 %v137_v19, %v137_v19  ;;  %v478_v32 = vpack.c.bf16 %v140_v26, %v140_v26  ;;  %v38555_v26 = vld [vmem:[%s49651_s1 + $0x1fa8] sm:$0xff] }
 0x39e   :  { %23768 = vmatpush.bf16.msra.mxu0 %v38438_v29  ;;  %v23562_v53 = vpop.f32.mrf.mxu0  ;;  %v38517_v29 = vld [vmem:[%s49651_s1 + $0x1e78] sm:$0xff] }
 0x39f   :  { %23794 = vmatpush.bf16.msra.mxu2 %v38454_v30  ;;  %v23563_v54 = vadd.f32 %v23562_v53, %v43424_v17  ;;  %v38470_v17 = vld [vmem:[%s49651_s1 + $0x1d00] sm:$0xff]  ;;  %v38533_v30 = vld [vmem:[%s49651_s1 + $0x1ef8] sm:$0xff] }
 0x3a0   :  { %23781 = vmatpush.bf16.msra.mxu1 %v38446_v35  ;;  %v23575_v57 = vpop.f32.mrf.mxu1  ;;  %v38516_v35 = vld [vmem:[%s49651_s1 + $0x1e70] sm:$0xff]  ;;  %v38513_v53 = vld [vmem:[%s49651_s1 + $0x1e58] sm:$0xff] }
 0x3a1   :  { %23807 = vmatpush.bf16.msra.mxu3 %v38462_v36  ;;  %23769 = vmatmul.bf16.vlgmr.msra.gmra.mxu0 %v471_v39  ;;  %v23576_v58 = vadd.f32 %v23575_v57, %v23563_v54  ;;  %v38532_v36 = vld [vmem:[%s49651_s1 + $0x1ef0] sm:$0xff]  ;;  %v38515_v39 = vld [vmem:[%s49651_s1 + $0x1e68] sm:$0xff]  ;;  %v38529_v54 = vld [vmem:[%s49651_s1 + $0x1ed8] sm:$0xff] }
 0x3a2   :  { %23813 = vmatpush.bf16.msrb.mxu0 %v38477_v33  ;;  %23795 = vmatmul.bf16.vlgmr.msra.gmra.mxu2 %v473_v40  ;;  %v38508_v33 = vld [vmem:[%s49651_s1 + $0x1e30] sm:$0xff]  ;;  %v38531_v40 = vld [vmem:[%s49651_s1 + $0x1ee8] sm:$0xff] }
 0x3a3   :  { %23839 = vmatpush.bf16.msrb.mxu2 %v38493_v34  ;;  %23782 = vmatmul.bf16.vlgmr.msra.gmra.mxu1 %v472_v43  ;;  %v38524_v34 = vld [vmem:[%s49651_s1 + $0x1eb0] sm:$0xff]  ;;  %v38506_v43 = vld [vmem:[%s49651_s1 + $0x1e20] sm:$0xff] }
 0x3a4   :  { %23826 = vmatpush.bf16.msrb.mxu1 %v38485_v41  ;;  %23808 = vmatmul.bf16.vlgmr.msra.gmra.mxu3 %v474_v44  ;;  %v38522_v44 = vld [vmem:[%s49651_s1 + $0x1ea0] sm:$0xff] }
 0x3a5   :  { %23852 = vmatpush.bf16.msrb.mxu3 %v38501_v42  ;;  %v23588_v63 = vpop.f32.mrf.mxu2 }
 0x3a6   :  { %23814 = vmatpush.bf16.msrb.mxu0 %v38476_v45  ;;  %v23589_v0 = vadd.f32 %v23588_v63, %v23576_v58  ;;  %v23564_v4 = vpop.f32.mrf.mxu0  ;;  %v38504_v58 = vld [vmem:[%s49651_s1 + $0x1e10] sm:$0xff]  ;;  %v38503_v63 = vld [vmem:[%s49651_s1 + $0x1e08] sm:$0xff] }
 0x3a7   :  { %23840 = vmatpush.bf16.msrb.mxu2 %v38492_v46  ;;  %v23601_v3 = vpop.f32.mrf.mxu3 }
 0x3a8   :  { %23827 = vmatpush.bf16.msrb.mxu1 %v38484_v47  ;;  %v43535_v5 = vadd.f32 %v23601_v3, %v23589_v0  ;;  %v23577_v8 = vpop.f32.mrf.mxu1  ;;  %v38514_v47 = vld [vmem:[%s49651_s1 + $0x1e60] sm:$0xff]  ;;  %v38519_v0 = vld [vmem:[%s49651_s1 + $0x1e88] sm:$0xff] }
 0x3a9   :  { %23853 = vmatpush.bf16.msrb.mxu3 %v38500_v48  ;;  %v38530_v48 = vld [vmem:[%s49651_s1 + $0x1ee0] sm:$0xff]  ;;  %v38527_v3 = vld [vmem:[%s49651_s1 + $0x1ec8] sm:$0xff]  ;;  %v143_v8 = vld [vmem:[%s49652_s0 + $0x3d0] sm:$0xff] }
 0x3aa   :  { %23815 = vmatpush.bf16.msrb.mxu0 %v38475_v49  ;;  %v38505_v49 = vld [vmem:[%s49651_s1 + $0x1e18] sm:$0xff] }
 0x3ab   :  { %23841 = vmatpush.bf16.msrb.mxu2 %v38491_v50  ;;  %v38521_v50 = vld [vmem:[%s49651_s1 + $0x1e98] sm:$0xff] }
 0x3ac   :  { %23828 = vmatpush.bf16.msrb.mxu1 %v38483_v51 }
 0x3ad   :  { %23854 = vmatpush.bf16.msrb.mxu3 %v38499_v52  ;;  %v23590_v13 = vpop.f32.mrf.mxu2 }
 0x3ae   :  { %23816 = vmatpush.bf16.msrb.mxu0 %v38474_v55  ;;  %v142_v13 = vld [vmem:[%s49652_s0 + $0x3c8] sm:$0xff] }
 0x3af   :  { %23842 = vmatpush.bf16.msrb.mxu2 %v38490_v56  ;;  %v23603_v16 = vpop.f32.mrf.mxu3  ;;  %v480_v19 = vpack.c.bf16 %v142_v13, %v142_v13  ;;  %v38571_v13 = vld [vmem:[%s49651_s1 + $0x2028] sm:$0xff] }
 0x3b0   :  { %23829 = vmatpush.bf16.msrb.mxu1 %v38482_v59  ;;  %v38520_v59 = vld [vmem:[%s49651_s1 + $0x1e90] sm:$0xff]  ;;  %v481_v16 = vpack.c.bf16 %v143_v8, %v143_v8 }
 0x3b1   :  { %23855 = vmatpush.bf16.msrb.mxu3 %v38498_v60 }
 0x3b2   :  { %23817 = vmatpush.bf16.msrb.mxu0 %v38473_v61  ;;  %v38512_v61 = vld [vmem:[%s49651_s1 + $0x1e50] sm:$0xff] }
 0x3b3   :  { %23843 = vmatpush.bf16.msrb.mxu2 %v38489_v62  ;;  %v38528_v62 = vld [vmem:[%s49651_s1 + $0x1ed0] sm:$0xff] }
 0x3b4   :  { %23830 = vmatpush.bf16.msrb.mxu1 %v38481_v1 }
 0x3b5   :  { %23856 = vmatpush.bf16.msrb.mxu3 %v38497_v2  ;;  %v38511_v2 = vld [vmem:[%s49651_s1 + $0x1e48] sm:$0xff] }
 0x3b6   :  { %23818 = vmatpush.bf16.msrb.mxu0 %v38472_v6  ;;  %v38518_v6 = vld [vmem:[%s49651_s1 + $0x1e80] sm:$0xff] }
 0x3b7   :  { %23844 = vmatpush.bf16.msrb.mxu2 %v38488_v7  ;;  %v141_v7 = vld [vmem:[%s49652_s0 + $0x3c0] sm:$0xff] }
 0x3b8   :  { %23831 = vmatpush.bf16.msrb.mxu1 %v38480_v9  ;;  %v38541_v9 = vld [vmem:[%s49651_s1 + $0x1f38] sm:$0xff] }
 0x3b9   :  { %23857 = vmatpush.bf16.msrb.mxu3 %v38496_v10  ;;  %v38557_v10 = vld [vmem:[%s49651_s1 + $0x1fb8] sm:$0xff] }
 0x3ba   :  { %23819 = vmatpush.bf16.msrb.mxu0 %v38471_v11  ;;  %v38510_v11 = vld [vmem:[%s49651_s1 + $0x1e40] sm:$0xff] }
 0x3bb   :  { %23845 = vmatpush.bf16.msrb.mxu2 %v38487_v12  ;;  %v38526_v12 = vld [vmem:[%s49651_s1 + $0x1ec0] sm:$0xff] }
 0x3bc   :  { %23832 = vmatpush.bf16.msrb.mxu1 %v38479_v14  ;;  %v144_v14 = vld [vmem:[%s49652_s0 + $0x3d8] sm:$0xff] }
 0x3bd   :  { %23858 = vmatpush.bf16.msrb.mxu3 %v38495_v15  ;;  %v479_v15 = vpack.c.bf16 %v141_v7, %v141_v7  ;;  %v482_v20 = vpack.c.bf16 %v144_v14, %v144_v14  ;;  %v38587_v14 = vld [vmem:[%s49651_s1 + $0x20a8] sm:$0xff] }
 0x3be   :  { %23820 = vmatpush.bf16.msrb.mxu0 %v38470_v17  ;;  %v23614_v41 = vpop.f32.mrf.mxu0  ;;  %v38549_v17 = vld [vmem:[%s49651_s1 + $0x1f78] sm:$0xff] }
 0x3bf   :  { %23846 = vmatpush.bf16.msrb.mxu2 %v38486_v18  ;;  %v23615_v42 = vadd.f32 %v23614_v41, %v43535_v5  ;;  %v38502_v5 = vld [vmem:[%s49651_s1 + $0x1e00] sm:$0xff]  ;;  %v38565_v18 = vld [vmem:[%s49651_s1 + $0x1ff8] sm:$0xff] }
 0x3c0   :  { %23833 = vmatpush.bf16.msrb.mxu1 %v38478_v23  ;;  %v23627_v45 = vpop.f32.mrf.mxu1  ;;  %v38548_v23 = vld [vmem:[%s49651_s1 + $0x1f70] sm:$0xff]  ;;  %v38545_v41 = vld [vmem:[%s49651_s1 + $0x1f58] sm:$0xff] }
 0x3c1   :  { %23859 = vmatpush.bf16.msrb.mxu3 %v38494_v24  ;;  %23821 = vmatmul.bf16.vlgmr.msrb.gmra.mxu0 %v475_v27  ;;  %v23628_v46 = vadd.f32 %v23627_v45, %v23615_v42  ;;  %v38564_v24 = vld [vmem:[%s49651_s1 + $0x1ff0] sm:$0xff]  ;;  %v38547_v27 = vld [vmem:[%s49651_s1 + $0x1f68] sm:$0xff]  ;;  %v38561_v42 = vld [vmem:[%s49651_s1 + $0x1fd8] sm:$0xff] }
 0x3c2   :  { %23865 = vmatpush.bf16.msra.mxu0 %v38509_v21  ;;  %23847 = vmatmul.bf16.vlgmr.msrb.gmra.mxu2 %v477_v28  ;;  %v38540_v21 = vld [vmem:[%s49651_s1 + $0x1f30] sm:$0xff]  ;;  %v38563_v28 = vld [vmem:[%s49651_s1 + $0x1fe8] sm:$0xff] }
 0x3c3   :  { %23891 = vmatpush.bf16.msra.mxu2 %v38525_v22  ;;  %23834 = vmatmul.bf16.vlgmr.msrb.gmra.mxu1 %v476_v31  ;;  %v38556_v22 = vld [vmem:[%s49651_s1 + $0x1fb0] sm:$0xff]  ;;  %v38538_v31 = vld [vmem:[%s49651_s1 + $0x1f20] sm:$0xff] }
 0x3c4   :  { %23878 = vmatpush.bf16.msra.mxu1 %v38517_v29  ;;  %23860 = vmatmul.bf16.vlgmr.msrb.gmra.mxu3 %v478_v32  ;;  %v38554_v32 = vld [vmem:[%s49651_s1 + $0x1fa0] sm:$0xff] }
 0x3c5   :  { %23904 = vmatpush.bf16.msra.mxu3 %v38533_v30  ;;  %v23640_v51 = vpop.f32.mrf.mxu2 }
 0x3c6   :  { %23866 = vmatpush.bf16.msra.mxu0 %v38508_v33  ;;  %v23641_v52 = vadd.f32 %v23640_v51, %v23628_v46  ;;  %v23616_v56 = vpop.f32.mrf.mxu0  ;;  %v38536_v46 = vld [vmem:[%s49651_s1 + $0x1f10] sm:$0xff]  ;;  %v38535_v51 = vld [vmem:[%s49651_s1 + $0x1f08] sm:$0xff] }
 0x3c7   :  { %23892 = vmatpush.bf16.msra.mxu2 %v38524_v34  ;;  %v23653_v55 = vpop.f32.mrf.mxu3 }
 0x3c8   :  { %23879 = vmatpush.bf16.msra.mxu1 %v38516_v35  ;;  %v43646_v57 = vadd.f32 %v23653_v55, %v23641_v52  ;;  %v23629_v60 = vpop.f32.mrf.mxu1  ;;  %v38546_v35 = vld [vmem:[%s49651_s1 + $0x1f60] sm:$0xff]  ;;  %v38551_v52 = vld [vmem:[%s49651_s1 + $0x1f88] sm:$0xff] }
 0x3c9   :  { %23905 = vmatpush.bf16.msra.mxu3 %v38532_v36  ;;  %v38562_v36 = vld [vmem:[%s49651_s1 + $0x1fe0] sm:$0xff]  ;;  %v38559_v55 = vld [vmem:[%s49651_s1 + $0x1fc8] sm:$0xff]  ;;  %v147_v60 = vld [vmem:[%s49652_s0 + $0x3f0] sm:$0xff] }
 0x3ca   :  { %23867 = vmatpush.bf16.msra.mxu0 %v38507_v37  ;;  %v38537_v37 = vld [vmem:[%s49651_s1 + $0x1f18] sm:$0xff] }
 0x3cb   :  { %23893 = vmatpush.bf16.msra.mxu2 %v38523_v38  ;;  %v38553_v38 = vld [vmem:[%s49651_s1 + $0x1f98] sm:$0xff] }
 0x3cc   :  { %23880 = vmatpush.bf16.msra.mxu1 %v38515_v39 }
 0x3cd   :  { %23906 = vmatpush.bf16.msra.mxu3 %v38531_v40  ;;  %v23642_v1 = vpop.f32.mrf.mxu2 }
 0x3ce   :  { %23868 = vmatpush.bf16.msra.mxu0 %v38506_v43  ;;  %v146_v1 = vld [vmem:[%s49652_s0 + $0x3e8] sm:$0xff] }
 0x3cf   :  { %23894 = vmatpush.bf16.msra.mxu2 %v38522_v44  ;;  %v23655_v4 = vpop.f32.mrf.mxu3  ;;  %v484_v7 = vpack.c.bf16 %v146_v1, %v146_v1  ;;  %v38603_v1 = vld [vmem:[%s49651_s1 + $0x2128] sm:$0xff] }
 0x3d0   :  { %23881 = vmatpush.bf16.msra.mxu1 %v38514_v47  ;;  %v38552_v47 = vld [vmem:[%s49651_s1 + $0x1f90] sm:$0xff]  ;;  %v485_v4 = vpack.c.bf16 %v147_v60, %v147_v60 }
 0x3d1   :  { %23907 = vmatpush.bf16.msra.mxu3 %v38530_v48 }
 0x3d2   :  { %23869 = vmatpush.bf16.msra.mxu0 %v38505_v49  ;;  %v38544_v49 = vld [vmem:[%s49651_s1 + $0x1f50] sm:$0xff] }
 0x3d3   :  { %23895 = vmatpush.bf16.msra.mxu2 %v38521_v50  ;;  %v38560_v50 = vld [vmem:[%s49651_s1 + $0x1fd0] sm:$0xff] }
 0x3d4   :  { %23882 = vmatpush.bf16.msra.mxu1 %v38513_v53 }
 0x3d5   :  { %23908 = vmatpush.bf16.msra.mxu3 %v38529_v54  ;;  %v38543_v54 = vld [vmem:[%s49651_s1 + $0x1f48] sm:$0xff] }
 0x3d6   :  { %23870 = vmatpush.bf16.msra.mxu0 %v38504_v58  ;;  %v38550_v58 = vld [vmem:[%s49651_s1 + $0x1f80] sm:$0xff] }
 0x3d7   :  { %23896 = vmatpush.bf16.msra.mxu2 %v38520_v59  ;;  %v145_v59 = vld [vmem:[%s49652_s0 + $0x3e0] sm:$0xff] }
 0x3d8   :  { %23883 = vmatpush.bf16.msra.mxu1 %v38512_v61  ;;  %v38573_v61 = vld [vmem:[%s49651_s1 + $0x2038] sm:$0xff] }
 0x3d9   :  { %23909 = vmatpush.bf16.msra.mxu3 %v38528_v62  ;;  %v38589_v62 = vld [vmem:[%s49651_s1 + $0x20b8] sm:$0xff] }
 0x3da   :  { %23871 = vmatpush.bf16.msra.mxu0 %v38503_v63  ;;  %v38542_v63 = vld [vmem:[%s49651_s1 + $0x1f40] sm:$0xff] }
 0x3db   :  { %23897 = vmatpush.bf16.msra.mxu2 %v38519_v0  ;;  %v38558_v0 = vld [vmem:[%s49651_s1 + $0x1fc0] sm:$0xff] }
 0x3dc   :  { %23884 = vmatpush.bf16.msra.mxu1 %v38511_v2  ;;  %v148_v2 = vld [vmem:[%s49652_s0 + $0x3f8] sm:$0xff] }
 0x3dd   :  { %23910 = vmatpush.bf16.msra.mxu3 %v38527_v3  ;;  %v483_v3 = vpack.c.bf16 %v145_v59, %v145_v59  ;;  %v486_v8 = vpack.c.bf16 %v148_v2, %v148_v2  ;;  %v38619_v2 = vld [vmem:[%s49651_s1 + $0x21a8] sm:$0xff] }
 0x3de   :  { %23872 = vmatpush.bf16.msra.mxu0 %v38502_v5  ;;  %v23666_v29 = vpop.f32.mrf.mxu0  ;;  %v38581_v5 = vld [vmem:[%s49651_s1 + $0x2078] sm:$0xff] }
 0x3df   :  { %23898 = vmatpush.bf16.msra.mxu2 %v38518_v6  ;;  %v23667_v30 = vadd.f32 %v23666_v29, %v43646_v57  ;;  %v38534_v57 = vld [vmem:[%s49651_s1 + $0x1f00] sm:$0xff]  ;;  %v38597_v6 = vld [vmem:[%s49651_s1 + $0x20f8] sm:$0xff] }
 0x3e0   :  { %23885 = vmatpush.bf16.msra.mxu1 %v38510_v11  ;;  %v23679_v33 = vpop.f32.mrf.mxu1  ;;  %v38580_v11 = vld [vmem:[%s49651_s1 + $0x2070] sm:$0xff]  ;;  %v38577_v29 = vld [vmem:[%s49651_s1 + $0x2058] sm:$0xff] }
 0x3e1   :  { %23911 = vmatpush.bf16.msra.mxu3 %v38526_v12  ;;  %23873 = vmatmul.bf16.vlgmr.msra.gmra.mxu0 %v479_v15  ;;  %v23680_v34 = vadd.f32 %v23679_v33, %v23667_v30  ;;  %v38596_v12 = vld [vmem:[%s49651_s1 + $0x20f0] sm:$0xff]  ;;  %v38579_v15 = vld [vmem:[%s49651_s1 + $0x2068] sm:$0xff]  ;;  %v38593_v30 = vld [vmem:[%s49651_s1 + $0x20d8] sm:$0xff] }
 0x3e2   :  { %23917 = vmatpush.bf16.msrb.mxu0 %v38541_v9  ;;  %23899 = vmatmul.bf16.vlgmr.msra.gmra.mxu2 %v481_v16  ;;  %v38572_v9 = vld [vmem:[%s49651_s1 + $0x2030] sm:$0xff]  ;;  %v38595_v16 = vld [vmem:[%s49651_s1 + $0x20e8] sm:$0xff] }
 0x3e3   :  { %23943 = vmatpush.bf16.msrb.mxu2 %v38557_v10  ;;  %23886 = vmatmul.bf16.vlgmr.msra.gmra.mxu1 %v480_v19  ;;  %v38588_v10 = vld [vmem:[%s49651_s1 + $0x20b0] sm:$0xff]  ;;  %v38570_v19 = vld [vmem:[%s49651_s1 + $0x2020] sm:$0xff] }
 0x3e4   :  { %23930 = vmatpush.bf16.msrb.mxu1 %v38549_v17  ;;  %23912 = vmatmul.bf16.vlgmr.msra.gmra.mxu3 %v482_v20  ;;  %v38586_v20 = vld [vmem:[%s49651_s1 + $0x20a0] sm:$0xff] }
 0x3e5   :  { %23956 = vmatpush.bf16.msrb.mxu3 %v38565_v18  ;;  %v23692_v39 = vpop.f32.mrf.mxu2 }
 0x3e6   :  { %23918 = vmatpush.bf16.msrb.mxu0 %v38540_v21  ;;  %v23693_v40 = vadd.f32 %v23692_v39, %v23680_v34  ;;  %v23668_v44 = vpop.f32.mrf.mxu0  ;;  %v38568_v34 = vld [vmem:[%s49651_s1 + $0x2010] sm:$0xff]  ;;  %v38567_v39 = vld [vmem:[%s49651_s1 + $0x2008] sm:$0xff] }
 0x3e7   :  { %23944 = vmatpush.bf16.msrb.mxu2 %v38556_v22  ;;  %v23705_v43 = vpop.f32.mrf.mxu3 }
 0x3e8   :  { %23931 = vmatpush.bf16.msrb.mxu1 %v38548_v23  ;;  %v43757_v45 = vadd.f32 %v23705_v43, %v23693_v40  ;;  %v23681_v48 = vpop.f32.mrf.mxu1  ;;  %v38578_v23 = vld [vmem:[%s49651_s1 + $0x2060] sm:$0xff]  ;;  %v38583_v40 = vld [vmem:[%s49651_s1 + $0x2088] sm:$0xff] }
 0x3e9   :  { %23957 = vmatpush.bf16.msrb.mxu3 %v38564_v24  ;;  %v38594_v24 = vld [vmem:[%s49651_s1 + $0x20e0] sm:$0xff]  ;;  %v38591_v43 = vld [vmem:[%s49651_s1 + $0x20c8] sm:$0xff]  ;;  %v151_v48 = vld [vmem:[%s49652_s0 + $0x410] sm:$0xff] }
 0x3ea   :  { %23919 = vmatpush.bf16.msrb.mxu0 %v38539_v25  ;;  %v38569_v25 = vld [vmem:[%s49651_s1 + $0x2018] sm:$0xff] }
 0x3eb   :  { %23945 = vmatpush.bf16.msrb.mxu2 %v38555_v26  ;;  %v38585_v26 = vld [vmem:[%s49651_s1 + $0x2098] sm:$0xff] }
 0x3ec   :  { %23932 = vmatpush.bf16.msrb.mxu1 %v38547_v27 }
 0x3ed   :  { %23958 = vmatpush.bf16.msrb.mxu3 %v38563_v28  ;;  %v23694_v53 = vpop.f32.mrf.mxu2 }
 0x3ee   :  { %23920 = vmatpush.bf16.msrb.mxu0 %v38538_v31  ;;  %v150_v53 = vld [vmem:[%s49652_s0 + $0x408] sm:$0xff] }
 0x3ef   :  { %23946 = vmatpush.bf16.msrb.mxu2 %v38554_v32  ;;  %v23707_v56 = vpop.f32.mrf.mxu3  ;;  %v488_v59 = vpack.c.bf16 %v150_v53, %v150_v53  ;;  %v38635_v53 = vld [vmem:[%s49651_s1 + $0x2228] sm:$0xff] }
 0x3f0   :  { %23933 = vmatpush.bf16.msrb.mxu1 %v38546_v35  ;;  %v38584_v35 = vld [vmem:[%s49651_s1 + $0x2090] sm:$0xff]  ;;  %v489_v56 = vpack.c.bf16 %v151_v48, %v151_v48 }
 0x3f1   :  { %23959 = vmatpush.bf16.msrb.mxu3 %v38562_v36 }
 0x3f2   :  { %23921 = vmatpush.bf16.msrb.mxu0 %v38537_v37  ;;  %v38576_v37 = vld [vmem:[%s49651_s1 + $0x2050] sm:$0xff] }
 0x3f3   :  { %23947 = vmatpush.bf16.msrb.mxu2 %v38553_v38  ;;  %v38592_v38 = vld [vmem:[%s49651_s1 + $0x20d0] sm:$0xff] }
 0x3f4   :  { %23934 = vmatpush.bf16.msrb.mxu1 %v38545_v41 }
 0x3f5   :  { %23960 = vmatpush.bf16.msrb.mxu3 %v38561_v42  ;;  %v38575_v42 = vld [vmem:[%s49651_s1 + $0x2048] sm:$0xff] }
 0x3f6   :  { %23922 = vmatpush.bf16.msrb.mxu0 %v38536_v46  ;;  %v38582_v46 = vld [vmem:[%s49651_s1 + $0x2080] sm:$0xff] }
 0x3f7   :  { %23948 = vmatpush.bf16.msrb.mxu2 %v38552_v47  ;;  %v149_v47 = vld [vmem:[%s49652_s0 + $0x400] sm:$0xff] }
 0x3f8   :  { %23935 = vmatpush.bf16.msrb.mxu1 %v38544_v49  ;;  %v38605_v49 = vld [vmem:[%s49651_s1 + $0x2138] sm:$0xff] }
 0x3f9   :  { %23961 = vmatpush.bf16.msrb.mxu3 %v38560_v50  ;;  %v38621_v50 = vld [vmem:[%s49651_s1 + $0x21b8] sm:$0xff] }
 0x3fa   :  { %23923 = vmatpush.bf16.msrb.mxu0 %v38535_v51  ;;  %v38574_v51 = vld [vmem:[%s49651_s1 + $0x2040] sm:$0xff] }
 0x3fb   :  { %23949 = vmatpush.bf16.msrb.mxu2 %v38551_v52  ;;  %v38590_v52 = vld [vmem:[%s49651_s1 + $0x20c0] sm:$0xff] }
 0x3fc   :  { %23936 = vmatpush.bf16.msrb.mxu1 %v38543_v54  ;;  %v152_v54 = vld [vmem:[%s49652_s0 + $0x418] sm:$0xff] }
 0x3fd   :  { %23962 = vmatpush.bf16.msrb.mxu3 %v38559_v55  ;;  %v487_v55 = vpack.c.bf16 %v149_v47, %v149_v47  ;;  %v490_v60 = vpack.c.bf16 %v152_v54, %v152_v54  ;;  %v38651_v54 = vld [vmem:[%s49651_s1 + $0x22a8] sm:$0xff] }
 0x3fe   :  { %23924 = vmatpush.bf16.msrb.mxu0 %v38534_v57  ;;  %v23718_v17 = vpop.f32.mrf.mxu0  ;;  %v38613_v57 = vld [vmem:[%s49651_s1 + $0x2178] sm:$0xff] }
 0x3ff   :  { %23950 = vmatpush.bf16.msrb.mxu2 %v38550_v58  ;;  %v23719_v18 = vadd.f32 %v23718_v17, %v43757_v45  ;;  %v38566_v45 = vld [vmem:[%s49651_s1 + $0x2000] sm:$0xff]  ;;  %v38629_v58 = vld [vmem:[%s49651_s1 + $0x21f8] sm:$0xff] }
 0x400   :  { %23937 = vmatpush.bf16.msrb.mxu1 %v38542_v63  ;;  %v23731_v21 = vpop.f32.mrf.mxu1  ;;  %v38612_v63 = vld [vmem:[%s49651_s1 + $0x2170] sm:$0xff]  ;;  %v38609_v17 = vld [vmem:[%s49651_s1 + $0x2158] sm:$0xff] }
 0x401   :  { %23963 = vmatpush.bf16.msrb.mxu3 %v38558_v0  ;;  %23925 = vmatmul.bf16.vlgmr.msrb.gmra.mxu0 %v483_v3  ;;  %v23732_v22 = vadd.f32 %v23731_v21, %v23719_v18  ;;  %v38628_v0 = vld [vmem:[%s49651_s1 + $0x21f0] sm:$0xff]  ;;  %v38611_v3 = vld [vmem:[%s49651_s1 + $0x2168] sm:$0xff]  ;;  %v38625_v18 = vld [vmem:[%s49651_s1 + $0x21d8] sm:$0xff] }
 0x402   :  { %23969 = vmatpush.bf16.msra.mxu0 %v38573_v61  ;;  %23951 = vmatmul.bf16.vlgmr.msrb.gmra.mxu2 %v485_v4  ;;  %v38604_v61 = vld [vmem:[%s49651_s1 + $0x2130] sm:$0xff]  ;;  %v38627_v4 = vld [vmem:[%s49651_s1 + $0x21e8] sm:$0xff] }
 0x403   :  { %23995 = vmatpush.bf16.msra.mxu2 %v38589_v62  ;;  %23938 = vmatmul.bf16.vlgmr.msrb.gmra.mxu1 %v484_v7  ;;  %v38620_v62 = vld [vmem:[%s49651_s1 + $0x21b0] sm:$0xff]  ;;  %v38602_v7 = vld [vmem:[%s49651_s1 + $0x2120] sm:$0xff] }
 0x404   :  { %23982 = vmatpush.bf16.msra.mxu1 %v38581_v5  ;;  %23964 = vmatmul.bf16.vlgmr.msrb.gmra.mxu3 %v486_v8  ;;  %v38618_v8 = vld [vmem:[%s49651_s1 + $0x21a0] sm:$0xff] }
 0x405   :  { %24008 = vmatpush.bf16.msra.mxu3 %v38597_v6  ;;  %v23744_v27 = vpop.f32.mrf.mxu2 }
 0x406   :  { %23970 = vmatpush.bf16.msra.mxu0 %v38572_v9  ;;  %v23745_v28 = vadd.f32 %v23744_v27, %v23732_v22  ;;  %v23720_v32 = vpop.f32.mrf.mxu0  ;;  %v38600_v22 = vld [vmem:[%s49651_s1 + $0x2110] sm:$0xff]  ;;  %v38599_v27 = vld [vmem:[%s49651_s1 + $0x2108] sm:$0xff] }
 0x407   :  { %23996 = vmatpush.bf16.msra.mxu2 %v38588_v10  ;;  %v23757_v31 = vpop.f32.mrf.mxu3 }
 0x408   :  { %23983 = vmatpush.bf16.msra.mxu1 %v38580_v11  ;;  %v43868_v33 = vadd.f32 %v23757_v31, %v23745_v28  ;;  %v23733_v36 = vpop.f32.mrf.mxu1  ;;  %v38610_v11 = vld [vmem:[%s49651_s1 + $0x2160] sm:$0xff]  ;;  %v38615_v28 = vld [vmem:[%s49651_s1 + $0x2188] sm:$0xff] }
 0x409   :  { %24009 = vmatpush.bf16.msra.mxu3 %v38596_v12  ;;  %v38626_v12 = vld [vmem:[%s49651_s1 + $0x21e0] sm:$0xff]  ;;  %v38623_v31 = vld [vmem:[%s49651_s1 + $0x21c8] sm:$0xff]  ;;  %v155_v36 = vld [vmem:[%s49652_s0 + $0x430] sm:$0xff] }
 0x40a   :  { %23971 = vmatpush.bf16.msra.mxu0 %v38571_v13  ;;  %v38601_v13 = vld [vmem:[%s49651_s1 + $0x2118] sm:$0xff] }
 0x40b   :  { %23997 = vmatpush.bf16.msra.mxu2 %v38587_v14  ;;  %v38617_v14 = vld [vmem:[%s49651_s1 + $0x2198] sm:$0xff] }
 0x40c   :  { %23984 = vmatpush.bf16.msra.mxu1 %v38579_v15 }
 0x40d   :  { %24010 = vmatpush.bf16.msra.mxu3 %v38595_v16  ;;  %v23746_v41 = vpop.f32.mrf.mxu2 }
 0x40e   :  { %23972 = vmatpush.bf16.msra.mxu0 %v38570_v19  ;;  %v154_v41 = vld [vmem:[%s49652_s0 + $0x428] sm:$0xff] }
 0x40f   :  { %23998 = vmatpush.bf16.msra.mxu2 %v38586_v20  ;;  %v23759_v44 = vpop.f32.mrf.mxu3  ;;  %v492_v47 = vpack.c.bf16 %v154_v41, %v154_v41  ;;  %v38667_v41 = vld [vmem:[%s49651_s1 + $0x2328] sm:$0xff] }
 0x410   :  { %23985 = vmatpush.bf16.msra.mxu1 %v38578_v23  ;;  %v38616_v23 = vld [vmem:[%s49651_s1 + $0x2190] sm:$0xff]  ;;  %v493_v44 = vpack.c.bf16 %v155_v36, %v155_v36 }
 0x411   :  { %24011 = vmatpush.bf16.msra.mxu3 %v38594_v24 }
 0x412   :  { %23973 = vmatpush.bf16.msra.mxu0 %v38569_v25  ;;  %v38608_v25 = vld [vmem:[%s49651_s1 + $0x2150] sm:$0xff] }
 0x413   :  { %23999 = vmatpush.bf16.msra.mxu2 %v38585_v26  ;;  %v38624_v26 = vld [vmem:[%s49651_s1 + $0x21d0] sm:$0xff] }
 0x414   :  { %23986 = vmatpush.bf16.msra.mxu1 %v38577_v29 }
 0x415   :  { %24012 = vmatpush.bf16.msra.mxu3 %v38593_v30  ;;  %v38607_v30 = vld [vmem:[%s49651_s1 + $0x2148] sm:$0xff] }
 0x416   :  { %23974 = vmatpush.bf16.msra.mxu0 %v38568_v34  ;;  %v38614_v34 = vld [vmem:[%s49651_s1 + $0x2180] sm:$0xff] }
 0x417   :  { %24000 = vmatpush.bf16.msra.mxu2 %v38584_v35  ;;  %v153_v35 = vld [vmem:[%s49652_s0 + $0x420] sm:$0xff] }
 0x418   :  { %23987 = vmatpush.bf16.msra.mxu1 %v38576_v37  ;;  %v38637_v37 = vld [vmem:[%s49651_s1 + $0x2238] sm:$0xff] }
 0x419   :  { %24013 = vmatpush.bf16.msra.mxu3 %v38592_v38  ;;  %v38653_v38 = vld [vmem:[%s49651_s1 + $0x22b8] sm:$0xff] }
 0x41a   :  { %23975 = vmatpush.bf16.msra.mxu0 %v38567_v39  ;;  %v38606_v39 = vld [vmem:[%s49651_s1 + $0x2140] sm:$0xff] }
 0x41b   :  { %24001 = vmatpush.bf16.msra.mxu2 %v38583_v40  ;;  %v38622_v40 = vld [vmem:[%s49651_s1 + $0x21c0] sm:$0xff] }
 0x41c   :  { %23988 = vmatpush.bf16.msra.mxu1 %v38575_v42  ;;  %v156_v42 = vld [vmem:[%s49652_s0 + $0x438] sm:$0xff] }
 0x41d   :  { %24014 = vmatpush.bf16.msra.mxu3 %v38591_v43  ;;  %v491_v43 = vpack.c.bf16 %v153_v35, %v153_v35  ;;  %v494_v48 = vpack.c.bf16 %v156_v42, %v156_v42  ;;  %v38683_v42 = vld [vmem:[%s49651_s1 + $0x23a8] sm:$0xff] }
 0x41e   :  { %23976 = vmatpush.bf16.msra.mxu0 %v38566_v45  ;;  %v23770_v5 = vpop.f32.mrf.mxu0  ;;  %v38645_v45 = vld [vmem:[%s49651_s1 + $0x2278] sm:$0xff] }
 0x41f   :  { %24002 = vmatpush.bf16.msra.mxu2 %v38582_v46  ;;  %v23771_v6 = vadd.f32 %v23770_v5, %v43868_v33  ;;  %v38598_v33 = vld [vmem:[%s49651_s1 + $0x2100] sm:$0xff]  ;;  %v38661_v46 = vld [vmem:[%s49651_s1 + $0x22f8] sm:$0xff] }
 0x420   :  { %23989 = vmatpush.bf16.msra.mxu1 %v38574_v51  ;;  %v23783_v9 = vpop.f32.mrf.mxu1  ;;  %v38644_v51 = vld [vmem:[%s49651_s1 + $0x2270] sm:$0xff]  ;;  %v38641_v5 = vld [vmem:[%s49651_s1 + $0x2258] sm:$0xff] }
 0x421   :  { %24015 = vmatpush.bf16.msra.mxu3 %v38590_v52  ;;  %23977 = vmatmul.bf16.vlgmr.msra.gmra.mxu0 %v487_v55  ;;  %v23784_v10 = vadd.f32 %v23783_v9, %v23771_v6  ;;  %v38660_v52 = vld [vmem:[%s49651_s1 + $0x22f0] sm:$0xff]  ;;  %v38643_v55 = vld [vmem:[%s49651_s1 + $0x2268] sm:$0xff]  ;;  %v38657_v6 = vld [vmem:[%s49651_s1 + $0x22d8] sm:$0xff] }
 0x422   :  { %24021 = vmatpush.bf16.msrb.mxu0 %v38605_v49  ;;  %24003 = vmatmul.bf16.vlgmr.msra.gmra.mxu2 %v489_v56  ;;  %v38636_v49 = vld [vmem:[%s49651_s1 + $0x2230] sm:$0xff]  ;;  %v38659_v56 = vld [vmem:[%s49651_s1 + $0x22e8] sm:$0xff] }
 0x423   :  { %24047 = vmatpush.bf16.msrb.mxu2 %v38621_v50  ;;  %23990 = vmatmul.bf16.vlgmr.msra.gmra.mxu1 %v488_v59  ;;  %v38652_v50 = vld [vmem:[%s49651_s1 + $0x22b0] sm:$0xff]  ;;  %v38634_v59 = vld [vmem:[%s49651_s1 + $0x2220] sm:$0xff] }
 0x424   :  { %24034 = vmatpush.bf16.msrb.mxu1 %v38613_v57  ;;  %24016 = vmatmul.bf16.vlgmr.msra.gmra.mxu3 %v490_v60  ;;  %v38650_v60 = vld [vmem:[%s49651_s1 + $0x22a0] sm:$0xff] }
 0x425   :  { %24060 = vmatpush.bf16.msrb.mxu3 %v38629_v58  ;;  %v23796_v15 = vpop.f32.mrf.mxu2 }
 0x426   :  { %24022 = vmatpush.bf16.msrb.mxu0 %v38604_v61  ;;  %v23797_v16 = vadd.f32 %v23796_v15, %v23784_v10  ;;  %v23772_v20 = vpop.f32.mrf.mxu0  ;;  %v38632_v10 = vld [vmem:[%s49651_s1 + $0x2210] sm:$0xff]  ;;  %v38631_v15 = vld [vmem:[%s49651_s1 + $0x2208] sm:$0xff] }
 0x427   :  { %24048 = vmatpush.bf16.msrb.mxu2 %v38620_v62  ;;  %v23809_v19 = vpop.f32.mrf.mxu3 }
 0x428   :  { %24035 = vmatpush.bf16.msrb.mxu1 %v38612_v63  ;;  %v43979_v21 = vadd.f32 %v23809_v19, %v23797_v16  ;;  %v23785_v24 = vpop.f32.mrf.mxu1  ;;  %v38642_v63 = vld [vmem:[%s49651_s1 + $0x2260] sm:$0xff]  ;;  %v38647_v16 = vld [vmem:[%s49651_s1 + $0x2288] sm:$0xff] }
 0x429   :  { %24061 = vmatpush.bf16.msrb.mxu3 %v38628_v0  ;;  %v38658_v0 = vld [vmem:[%s49651_s1 + $0x22e0] sm:$0xff]  ;;  %v38655_v19 = vld [vmem:[%s49651_s1 + $0x22c8] sm:$0xff]  ;;  %v159_v24 = vld [vmem:[%s49652_s0 + $0x450] sm:$0xff] }
 0x42a   :  { %24023 = vmatpush.bf16.msrb.mxu0 %v38603_v1  ;;  %v38633_v1 = vld [vmem:[%s49651_s1 + $0x2218] sm:$0xff] }
 0x42b   :  { %24049 = vmatpush.bf16.msrb.mxu2 %v38619_v2  ;;  %v38649_v2 = vld [vmem:[%s49651_s1 + $0x2298] sm:$0xff] }
 0x42c   :  { %24036 = vmatpush.bf16.msrb.mxu1 %v38611_v3 }
 0x42d   :  { %24062 = vmatpush.bf16.msrb.mxu3 %v38627_v4  ;;  %v23798_v29 = vpop.f32.mrf.mxu2 }
 0x42e   :  { %24024 = vmatpush.bf16.msrb.mxu0 %v38602_v7  ;;  %v158_v29 = vld [vmem:[%s49652_s0 + $0x448] sm:$0xff] }
 0x42f   :  { %24050 = vmatpush.bf16.msrb.mxu2 %v38618_v8  ;;  %v23811_v32 = vpop.f32.mrf.mxu3  ;;  %v496_v35 = vpack.c.bf16 %v158_v29, %v158_v29  ;;  %v38699_v29 = vld [vmem:[%s49651_s1 + $0x2428] sm:$0xff] }
 0x430   :  { %24037 = vmatpush.bf16.msrb.mxu1 %v38610_v11  ;;  %v38648_v11 = vld [vmem:[%s49651_s1 + $0x2290] sm:$0xff]  ;;  %v497_v32 = vpack.c.bf16 %v159_v24, %v159_v24 }
 0x431   :  { %24063 = vmatpush.bf16.msrb.mxu3 %v38626_v12 }
 0x432   :  { %24025 = vmatpush.bf16.msrb.mxu0 %v38601_v13  ;;  %v38640_v13 = vld [vmem:[%s49651_s1 + $0x2250] sm:$0xff] }
 0x433   :  { %24051 = vmatpush.bf16.msrb.mxu2 %v38617_v14  ;;  %v38656_v14 = vld [vmem:[%s49651_s1 + $0x22d0] sm:$0xff] }
 0x434   :  { %24038 = vmatpush.bf16.msrb.mxu1 %v38609_v17 }
 0x435   :  { %24064 = vmatpush.bf16.msrb.mxu3 %v38625_v18  ;;  %v38639_v18 = vld [vmem:[%s49651_s1 + $0x2248] sm:$0xff] }
 0x436   :  { %24026 = vmatpush.bf16.msrb.mxu0 %v38600_v22  ;;  %v38646_v22 = vld [vmem:[%s49651_s1 + $0x2280] sm:$0xff] }
 0x437   :  { %24052 = vmatpush.bf16.msrb.mxu2 %v38616_v23  ;;  %v157_v23 = vld [vmem:[%s49652_s0 + $0x440] sm:$0xff] }
 0x438   :  { %24039 = vmatpush.bf16.msrb.mxu1 %v38608_v25  ;;  %v38669_v25 = vld [vmem:[%s49651_s1 + $0x2338] sm:$0xff] }
 0x439   :  { %24065 = vmatpush.bf16.msrb.mxu3 %v38624_v26  ;;  %v38685_v26 = vld [vmem:[%s49651_s1 + $0x23b8] sm:$0xff] }
 0x43a   :  { %24027 = vmatpush.bf16.msrb.mxu0 %v38599_v27  ;;  %v38638_v27 = vld [vmem:[%s49651_s1 + $0x2240] sm:$0xff] }
 0x43b   :  { %24053 = vmatpush.bf16.msrb.mxu2 %v38615_v28  ;;  %v38654_v28 = vld [vmem:[%s49651_s1 + $0x22c0] sm:$0xff] }
 0x43c   :  { %24040 = vmatpush.bf16.msrb.mxu1 %v38607_v30  ;;  %v160_v30 = vld [vmem:[%s49652_s0 + $0x458] sm:$0xff] }
 0x43d   :  { %24066 = vmatpush.bf16.msrb.mxu3 %v38623_v31  ;;  %v495_v31 = vpack.c.bf16 %v157_v23, %v157_v23  ;;  %v498_v36 = vpack.c.bf16 %v160_v30, %v160_v30  ;;  %v38715_v30 = vld [vmem:[%s49651_s1 + $0x24a8] sm:$0xff] }
 0x43e   :  { %24028 = vmatpush.bf16.msrb.mxu0 %v38598_v33  ;;  %v23822_v57 = vpop.f32.mrf.mxu0  ;;  %v38677_v33 = vld [vmem:[%s49651_s1 + $0x2378] sm:$0xff] }
 0x43f   :  { %24054 = vmatpush.bf16.msrb.mxu2 %v38614_v34  ;;  %v23823_v58 = vadd.f32 %v23822_v57, %v43979_v21  ;;  %v38630_v21 = vld [vmem:[%s49651_s1 + $0x2200] sm:$0xff]  ;;  %v38693_v34 = vld [vmem:[%s49651_s1 + $0x23f8] sm:$0xff] }
 0x440   :  { %24041 = vmatpush.bf16.msrb.mxu1 %v38606_v39  ;;  %v23835_v61 = vpop.f32.mrf.mxu1  ;;  %v38676_v39 = vld [vmem:[%s49651_s1 + $0x2370] sm:$0xff]  ;;  %v38673_v57 = vld [vmem:[%s49651_s1 + $0x2358] sm:$0xff] }
 0x441   :  { %24067 = vmatpush.bf16.msrb.mxu3 %v38622_v40  ;;  %24029 = vmatmul.bf16.vlgmr.msrb.gmra.mxu0 %v491_v43  ;;  %v23836_v62 = vadd.f32 %v23835_v61, %v23823_v58  ;;  %v38692_v40 = vld [vmem:[%s49651_s1 + $0x23f0] sm:$0xff]  ;;  %v38675_v43 = vld [vmem:[%s49651_s1 + $0x2368] sm:$0xff]  ;;  %v38689_v58 = vld [vmem:[%s49651_s1 + $0x23d8] sm:$0xff] }
 0x442   :  { %24073 = vmatpush.bf16.msra.mxu0 %v38637_v37  ;;  %24055 = vmatmul.bf16.vlgmr.msrb.gmra.mxu2 %v493_v44  ;;  %v38668_v37 = vld [vmem:[%s49651_s1 + $0x2330] sm:$0xff]  ;;  %v38691_v44 = vld [vmem:[%s49651_s1 + $0x23e8] sm:$0xff] }
 0x443   :  { %24099 = vmatpush.bf16.msra.mxu2 %v38653_v38  ;;  %24042 = vmatmul.bf16.vlgmr.msrb.gmra.mxu1 %v492_v47  ;;  %v38684_v38 = vld [vmem:[%s49651_s1 + $0x23b0] sm:$0xff]  ;;  %v38666_v47 = vld [vmem:[%s49651_s1 + $0x2320] sm:$0xff] }
 0x444   :  { %24086 = vmatpush.bf16.msra.mxu1 %v38645_v45  ;;  %24068 = vmatmul.bf16.vlgmr.msrb.gmra.mxu3 %v494_v48  ;;  %v38682_v48 = vld [vmem:[%s49651_s1 + $0x23a0] sm:$0xff] }
 0x445   :  { %24112 = vmatpush.bf16.msra.mxu3 %v38661_v46  ;;  %v23848_v3 = vpop.f32.mrf.mxu2 }
 0x446   :  { %24074 = vmatpush.bf16.msra.mxu0 %v38636_v49  ;;  %v23849_v4 = vadd.f32 %v23848_v3, %v23836_v62  ;;  %v23824_v8 = vpop.f32.mrf.mxu0  ;;  %v38664_v62 = vld [vmem:[%s49651_s1 + $0x2310] sm:$0xff]  ;;  %v38663_v3 = vld [vmem:[%s49651_s1 + $0x2308] sm:$0xff] }
 0x447   :  { %24100 = vmatpush.bf16.msra.mxu2 %v38652_v50  ;;  %v23861_v7 = vpop.f32.mrf.mxu3 }
 0x448   :  { %24087 = vmatpush.bf16.msra.mxu1 %v38644_v51  ;;  %v44090_v9 = vadd.f32 %v23861_v7, %v23849_v4  ;;  %v23837_v12 = vpop.f32.mrf.mxu1  ;;  %v38674_v51 = vld [vmem:[%s49651_s1 + $0x2360] sm:$0xff]  ;;  %v38679_v4 = vld [vmem:[%s49651_s1 + $0x2388] sm:$0xff] }
 0x449   :  { %24113 = vmatpush.bf16.msra.mxu3 %v38660_v52  ;;  %v38690_v52 = vld [vmem:[%s49651_s1 + $0x23e0] sm:$0xff]  ;;  %v38687_v7 = vld [vmem:[%s49651_s1 + $0x23c8] sm:$0xff]  ;;  %v163_v12 = vld [vmem:[%s49652_s0 + $0x470] sm:$0xff] }
 0x44a   :  { %24075 = vmatpush.bf16.msra.mxu0 %v38635_v53  ;;  %v38665_v53 = vld [vmem:[%s49651_s1 + $0x2318] sm:$0xff] }
 0x44b   :  { %24101 = vmatpush.bf16.msra.mxu2 %v38651_v54  ;;  %v38681_v54 = vld [vmem:[%s49651_s1 + $0x2398] sm:$0xff] }
 0x44c   :  { %24088 = vmatpush.bf16.msra.mxu1 %v38643_v55 }
 0x44d   :  { %24114 = vmatpush.bf16.msra.mxu3 %v38659_v56  ;;  %v23850_v17 = vpop.f32.mrf.mxu2 }
 0x44e   :  { %24076 = vmatpush.bf16.msra.mxu0 %v38634_v59  ;;  %v162_v17 = vld [vmem:[%s49652_s0 + $0x468] sm:$0xff] }
 0x44f   :  { %24102 = vmatpush.bf16.msra.mxu2 %v38650_v60  ;;  %v23863_v20 = vpop.f32.mrf.mxu3  ;;  %v500_v23 = vpack.c.bf16 %v162_v17, %v162_v17  ;;  %v38731_v17 = vld [vmem:[%s49651_s1 + $0x2528] sm:$0xff] }
 0x450   :  { %24089 = vmatpush.bf16.msra.mxu1 %v38642_v63  ;;  %v38680_v63 = vld [vmem:[%s49651_s1 + $0x2390] sm:$0xff]  ;;  %v501_v20 = vpack.c.bf16 %v163_v12, %v163_v12 }
 0x451   :  { %24115 = vmatpush.bf16.msra.mxu3 %v38658_v0 }
 0x452   :  { %24077 = vmatpush.bf16.msra.mxu0 %v38633_v1  ;;  %v38672_v1 = vld [vmem:[%s49651_s1 + $0x2350] sm:$0xff] }
 0x453   :  { %24103 = vmatpush.bf16.msra.mxu2 %v38649_v2  ;;  %v38688_v2 = vld [vmem:[%s49651_s1 + $0x23d0] sm:$0xff] }
 0x454   :  { %24090 = vmatpush.bf16.msra.mxu1 %v38641_v5 }
 0x455   :  { %24116 = vmatpush.bf16.msra.mxu3 %v38657_v6  ;;  %v38671_v6 = vld [vmem:[%s49651_s1 + $0x2348] sm:$0xff] }
 0x456   :  { %24078 = vmatpush.bf16.msra.mxu0 %v38632_v10  ;;  %v38678_v10 = vld [vmem:[%s49651_s1 + $0x2380] sm:$0xff] }
 0x457   :  { %24104 = vmatpush.bf16.msra.mxu2 %v38648_v11  ;;  %v161_v11 = vld [vmem:[%s49652_s0 + $0x460] sm:$0xff] }
 0x458   :  { %24091 = vmatpush.bf16.msra.mxu1 %v38640_v13  ;;  %v38701_v13 = vld [vmem:[%s49651_s1 + $0x2438] sm:$0xff] }
 0x459   :  { %24117 = vmatpush.bf16.msra.mxu3 %v38656_v14  ;;  %v38717_v14 = vld [vmem:[%s49651_s1 + $0x24b8] sm:$0xff] }
 0x45a   :  { %24079 = vmatpush.bf16.msra.mxu0 %v38631_v15  ;;  %v38670_v15 = vld [vmem:[%s49651_s1 + $0x2340] sm:$0xff] }
 0x45b   :  { %24105 = vmatpush.bf16.msra.mxu2 %v38647_v16  ;;  %v38686_v16 = vld [vmem:[%s49651_s1 + $0x23c0] sm:$0xff] }
 0x45c   :  { %24092 = vmatpush.bf16.msra.mxu1 %v38639_v18  ;;  %v164_v18 = vld [vmem:[%s49652_s0 + $0x478] sm:$0xff] }
 0x45d   :  { %24118 = vmatpush.bf16.msra.mxu3 %v38655_v19  ;;  %v499_v19 = vpack.c.bf16 %v161_v11, %v161_v11  ;;  %v502_v24 = vpack.c.bf16 %v164_v18, %v164_v18  ;;  %v38747_v18 = vld [vmem:[%s49651_s1 + $0x25a8] sm:$0xff] }
 0x45e   :  { %24080 = vmatpush.bf16.msra.mxu0 %v38630_v21  ;;  %v23874_v45 = vpop.f32.mrf.mxu0  ;;  %v38709_v21 = vld [vmem:[%s49651_s1 + $0x2478] sm:$0xff] }
 0x45f   :  { %24106 = vmatpush.bf16.msra.mxu2 %v38646_v22  ;;  %v23875_v46 = vadd.f32 %v23874_v45, %v44090_v9  ;;  %v38662_v9 = vld [vmem:[%s49651_s1 + $0x2300] sm:$0xff]  ;;  %v38725_v22 = vld [vmem:[%s49651_s1 + $0x24f8] sm:$0xff] }
 0x460   :  { %24093 = vmatpush.bf16.msra.mxu1 %v38638_v27  ;;  %v23887_v49 = vpop.f32.mrf.mxu1  ;;  %v38708_v27 = vld [vmem:[%s49651_s1 + $0x2470] sm:$0xff]  ;;  %v38705_v45 = vld [vmem:[%s49651_s1 + $0x2458] sm:$0xff] }
 0x461   :  { %24119 = vmatpush.bf16.msra.mxu3 %v38654_v28  ;;  %24081 = vmatmul.bf16.vlgmr.msra.gmra.mxu0 %v495_v31  ;;  %v23888_v50 = vadd.f32 %v23887_v49, %v23875_v46  ;;  %v38724_v28 = vld [vmem:[%s49651_s1 + $0x24f0] sm:$0xff]  ;;  %v38707_v31 = vld [vmem:[%s49651_s1 + $0x2468] sm:$0xff]  ;;  %v38721_v46 = vld [vmem:[%s49651_s1 + $0x24d8] sm:$0xff] }
 0x462   :  { %24125 = vmatpush.bf16.msrb.mxu0 %v38669_v25  ;;  %24107 = vmatmul.bf16.vlgmr.msra.gmra.mxu2 %v497_v32  ;;  %v38700_v25 = vld [vmem:[%s49651_s1 + $0x2430] sm:$0xff]  ;;  %v38723_v32 = vld [vmem:[%s49651_s1 + $0x24e8] sm:$0xff] }
 0x463   :  { %24151 = vmatpush.bf16.msrb.mxu2 %v38685_v26  ;;  %24094 = vmatmul.bf16.vlgmr.msra.gmra.mxu1 %v496_v35  ;;  %v38716_v26 = vld [vmem:[%s49651_s1 + $0x24b0] sm:$0xff]  ;;  %v38698_v35 = vld [vmem:[%s49651_s1 + $0x2420] sm:$0xff] }
 0x464   :  { %24138 = vmatpush.bf16.msrb.mxu1 %v38677_v33  ;;  %24120 = vmatmul.bf16.vlgmr.msra.gmra.mxu3 %v498_v36  ;;  %v38714_v36 = vld [vmem:[%s49651_s1 + $0x24a0] sm:$0xff] }
 0x465   :  { %24164 = vmatpush.bf16.msrb.mxu3 %v38693_v34  ;;  %v23900_v55 = vpop.f32.mrf.mxu2 }
 0x466   :  { %24126 = vmatpush.bf16.msrb.mxu0 %v38668_v37  ;;  %v23901_v56 = vadd.f32 %v23900_v55, %v23888_v50  ;;  %v23876_v60 = vpop.f32.mrf.mxu0  ;;  %v38696_v50 = vld [vmem:[%s49651_s1 + $0x2410] sm:$0xff]  ;;  %v38695_v55 = vld [vmem:[%s49651_s1 + $0x2408] sm:$0xff] }
 0x467   :  { %24152 = vmatpush.bf16.msrb.mxu2 %v38684_v38  ;;  %v23913_v59 = vpop.f32.mrf.mxu3 }
 0x468   :  { %24139 = vmatpush.bf16.msrb.mxu1 %v38676_v39  ;;  %v44201_v61 = vadd.f32 %v23913_v59, %v23901_v56  ;;  %v23889_v0 = vpop.f32.mrf.mxu1  ;;  %v38706_v39 = vld [vmem:[%s49651_s1 + $0x2460] sm:$0xff]  ;;  %v38711_v56 = vld [vmem:[%s49651_s1 + $0x2488] sm:$0xff] }
 0x469   :  { %24165 = vmatpush.bf16.msrb.mxu3 %v38692_v40  ;;  %v38722_v40 = vld [vmem:[%s49651_s1 + $0x24e0] sm:$0xff]  ;;  %v38719_v59 = vld [vmem:[%s49651_s1 + $0x24c8] sm:$0xff]  ;;  %v167_v0 = vld [vmem:[%s49652_s0 + $0x490] sm:$0xff] }
 0x46a   :  { %24127 = vmatpush.bf16.msrb.mxu0 %v38667_v41  ;;  %v38697_v41 = vld [vmem:[%s49651_s1 + $0x2418] sm:$0xff] }
 0x46b   :  { %24153 = vmatpush.bf16.msrb.mxu2 %v38683_v42  ;;  %v38713_v42 = vld [vmem:[%s49651_s1 + $0x2498] sm:$0xff] }
 0x46c   :  { %24140 = vmatpush.bf16.msrb.mxu1 %v38675_v43 }
 0x46d   :  { %24166 = vmatpush.bf16.msrb.mxu3 %v38691_v44  ;;  %v23902_v5 = vpop.f32.mrf.mxu2 }
 0x46e   :  { %24128 = vmatpush.bf16.msrb.mxu0 %v38666_v47  ;;  %v166_v5 = vld [vmem:[%s49652_s0 + $0x488] sm:$0xff] }
 0x46f   :  { %24154 = vmatpush.bf16.msrb.mxu2 %v38682_v48  ;;  %v23915_v8 = vpop.f32.mrf.mxu3  ;;  %v504_v11 = vpack.c.bf16 %v166_v5, %v166_v5  ;;  %v38763_v5 = vld [vmem:[%s49651_s1 + $0x2628] sm:$0xff] }
 0x470   :  { %24141 = vmatpush.bf16.msrb.mxu1 %v38674_v51  ;;  %v38712_v51 = vld [vmem:[%s49651_s1 + $0x2490] sm:$0xff]  ;;  %v505_v8 = vpack.c.bf16 %v167_v0, %v167_v0 }
 0x471   :  { %24167 = vmatpush.bf16.msrb.mxu3 %v38690_v52 }
 0x472   :  { %24129 = vmatpush.bf16.msrb.mxu0 %v38665_v53  ;;  %v38704_v53 = vld [vmem:[%s49651_s1 + $0x2450] sm:$0xff] }
 0x473   :  { %24155 = vmatpush.bf16.msrb.mxu2 %v38681_v54  ;;  %v38720_v54 = vld [vmem:[%s49651_s1 + $0x24d0] sm:$0xff] }
 0x474   :  { %24142 = vmatpush.bf16.msrb.mxu1 %v38673_v57 }
 0x475   :  { %24168 = vmatpush.bf16.msrb.mxu3 %v38689_v58  ;;  %v38703_v58 = vld [vmem:[%s49651_s1 + $0x2448] sm:$0xff] }
 0x476   :  { %24130 = vmatpush.bf16.msrb.mxu0 %v38664_v62  ;;  %v38710_v62 = vld [vmem:[%s49651_s1 + $0x2480] sm:$0xff] }
 0x477   :  { %24156 = vmatpush.bf16.msrb.mxu2 %v38680_v63  ;;  %v165_v63 = vld [vmem:[%s49652_s0 + $0x480] sm:$0xff] }
 0x478   :  { %24143 = vmatpush.bf16.msrb.mxu1 %v38672_v1  ;;  %v38733_v1 = vld [vmem:[%s49651_s1 + $0x2538] sm:$0xff] }
 0x479   :  { %24169 = vmatpush.bf16.msrb.mxu3 %v38688_v2  ;;  %v38749_v2 = vld [vmem:[%s49651_s1 + $0x25b8] sm:$0xff] }
 0x47a   :  { %24131 = vmatpush.bf16.msrb.mxu0 %v38663_v3  ;;  %v38702_v3 = vld [vmem:[%s49651_s1 + $0x2440] sm:$0xff] }
 0x47b   :  { %24157 = vmatpush.bf16.msrb.mxu2 %v38679_v4  ;;  %v38718_v4 = vld [vmem:[%s49651_s1 + $0x24c0] sm:$0xff] }
 0x47c   :  { %24144 = vmatpush.bf16.msrb.mxu1 %v38671_v6  ;;  %v168_v6 = vld [vmem:[%s49652_s0 + $0x498] sm:$0xff] }
 0x47d   :  { %24170 = vmatpush.bf16.msrb.mxu3 %v38687_v7  ;;  %v503_v7 = vpack.c.bf16 %v165_v63, %v165_v63  ;;  %v506_v12 = vpack.c.bf16 %v168_v6, %v168_v6  ;;  %v38779_v6 = vld [vmem:[%s49651_s1 + $0x26a8] sm:$0xff] }
 0x47e   :  { %24132 = vmatpush.bf16.msrb.mxu0 %v38662_v9  ;;  %v23926_v33 = vpop.f32.mrf.mxu0  ;;  %v38741_v9 = vld [vmem:[%s49651_s1 + $0x2578] sm:$0xff] }
 0x47f   :  { %24158 = vmatpush.bf16.msrb.mxu2 %v38678_v10  ;;  %v23927_v34 = vadd.f32 %v23926_v33, %v44201_v61  ;;  %v38694_v61 = vld [vmem:[%s49651_s1 + $0x2400] sm:$0xff]  ;;  %v38757_v10 = vld [vmem:[%s49651_s1 + $0x25f8] sm:$0xff] }
 0x480   :  { %24145 = vmatpush.bf16.msrb.mxu1 %v38670_v15  ;;  %v23939_v37 = vpop.f32.mrf.mxu1  ;;  %v38740_v15 = vld [vmem:[%s49651_s1 + $0x2570] sm:$0xff]  ;;  %v38737_v33 = vld [vmem:[%s49651_s1 + $0x2558] sm:$0xff] }
 0x481   :  { %24171 = vmatpush.bf16.msrb.mxu3 %v38686_v16  ;;  %24133 = vmatmul.bf16.vlgmr.msrb.gmra.mxu0 %v499_v19  ;;  %v23940_v38 = vadd.f32 %v23939_v37, %v23927_v34  ;;  %v38756_v16 = vld [vmem:[%s49651_s1 + $0x25f0] sm:$0xff]  ;;  %v38739_v19 = vld [vmem:[%s49651_s1 + $0x2568] sm:$0xff]  ;;  %v38753_v34 = vld [vmem:[%s49651_s1 + $0x25d8] sm:$0xff] }
 0x482   :  { %24177 = vmatpush.bf16.msra.mxu0 %v38701_v13  ;;  %24159 = vmatmul.bf16.vlgmr.msrb.gmra.mxu2 %v501_v20  ;;  %v38732_v13 = vld [vmem:[%s49651_s1 + $0x2530] sm:$0xff]  ;;  %v38755_v20 = vld [vmem:[%s49651_s1 + $0x25e8] sm:$0xff] }
 0x483   :  { %24203 = vmatpush.bf16.msra.mxu2 %v38717_v14  ;;  %24146 = vmatmul.bf16.vlgmr.msrb.gmra.mxu1 %v500_v23  ;;  %v38748_v14 = vld [vmem:[%s49651_s1 + $0x25b0] sm:$0xff]  ;;  %v38730_v23 = vld [vmem:[%s49651_s1 + $0x2520] sm:$0xff] }
 0x484   :  { %24190 = vmatpush.bf16.msra.mxu1 %v38709_v21  ;;  %24172 = vmatmul.bf16.vlgmr.msrb.gmra.mxu3 %v502_v24  ;;  %v38746_v24 = vld [vmem:[%s49651_s1 + $0x25a0] sm:$0xff] }
 0x485   :  { %24216 = vmatpush.bf16.msra.mxu3 %v38725_v22  ;;  %v23952_v43 = vpop.f32.mrf.mxu2 }
 0x486   :  { %24178 = vmatpush.bf16.msra.mxu0 %v38700_v25  ;;  %v23953_v44 = vadd.f32 %v23952_v43, %v23940_v38  ;;  %v23928_v48 = vpop.f32.mrf.mxu0  ;;  %v38728_v38 = vld [vmem:[%s49651_s1 + $0x2510] sm:$0xff]  ;;  %v38727_v43 = vld [vmem:[%s49651_s1 + $0x2508] sm:$0xff] }
 0x487   :  { %24204 = vmatpush.bf16.msra.mxu2 %v38716_v26  ;;  %v23965_v47 = vpop.f32.mrf.mxu3 }
 0x488   :  { %24191 = vmatpush.bf16.msra.mxu1 %v38708_v27  ;;  %v44312_v49 = vadd.f32 %v23965_v47, %v23953_v44  ;;  %v23941_v52 = vpop.f32.mrf.mxu1  ;;  %v38738_v27 = vld [vmem:[%s49651_s1 + $0x2560] sm:$0xff]  ;;  %v38743_v44 = vld [vmem:[%s49651_s1 + $0x2588] sm:$0xff] }
 0x489   :  { %24217 = vmatpush.bf16.msra.mxu3 %v38724_v28  ;;  %v38754_v28 = vld [vmem:[%s49651_s1 + $0x25e0] sm:$0xff]  ;;  %v38751_v47 = vld [vmem:[%s49651_s1 + $0x25c8] sm:$0xff]  ;;  %v171_v52 = vld [vmem:[%s49652_s0 + $0x4b0] sm:$0xff] }
 0x48a   :  { %24179 = vmatpush.bf16.msra.mxu0 %v38699_v29  ;;  %v38729_v29 = vld [vmem:[%s49651_s1 + $0x2518] sm:$0xff] }
 0x48b   :  { %24205 = vmatpush.bf16.msra.mxu2 %v38715_v30  ;;  %v38745_v30 = vld [vmem:[%s49651_s1 + $0x2598] sm:$0xff] }
 0x48c   :  { %24192 = vmatpush.bf16.msra.mxu1 %v38707_v31 }
 0x48d   :  { %24218 = vmatpush.bf16.msra.mxu3 %v38723_v32  ;;  %v23954_v57 = vpop.f32.mrf.mxu2 }
 0x48e   :  { %24180 = vmatpush.bf16.msra.mxu0 %v38698_v35  ;;  %v170_v57 = vld [vmem:[%s49652_s0 + $0x4a8] sm:$0xff] }
 0x48f   :  { %24206 = vmatpush.bf16.msra.mxu2 %v38714_v36  ;;  %v23967_v60 = vpop.f32.mrf.mxu3  ;;  %v508_v63 = vpack.c.bf16 %v170_v57, %v170_v57  ;;  %v38795_v57 = vld [vmem:[%s49651_s1 + $0x2728] sm:$0xff] }
 0x490   :  { %24193 = vmatpush.bf16.msra.mxu1 %v38706_v39  ;;  %v38744_v39 = vld [vmem:[%s49651_s1 + $0x2590] sm:$0xff]  ;;  %v509_v60 = vpack.c.bf16 %v171_v52, %v171_v52 }
 0x491   :  { %24219 = vmatpush.bf16.msra.mxu3 %v38722_v40 }
 0x492   :  { %24181 = vmatpush.bf16.msra.mxu0 %v38697_v41  ;;  %v38736_v41 = vld [vmem:[%s49651_s1 + $0x2550] sm:$0xff] }
 0x493   :  { %24207 = vmatpush.bf16.msra.mxu2 %v38713_v42  ;;  %v38752_v42 = vld [vmem:[%s49651_s1 + $0x25d0] sm:$0xff] }
 0x494   :  { %24194 = vmatpush.bf16.msra.mxu1 %v38705_v45 }
 0x495   :  { %24220 = vmatpush.bf16.msra.mxu3 %v38721_v46  ;;  %v38735_v46 = vld [vmem:[%s49651_s1 + $0x2548] sm:$0xff] }
 0x496   :  { %24182 = vmatpush.bf16.msra.mxu0 %v38696_v50  ;;  %v38742_v50 = vld [vmem:[%s49651_s1 + $0x2580] sm:$0xff] }
 0x497   :  { %24208 = vmatpush.bf16.msra.mxu2 %v38712_v51  ;;  %v169_v51 = vld [vmem:[%s49652_s0 + $0x4a0] sm:$0xff] }
 0x498   :  { %24195 = vmatpush.bf16.msra.mxu1 %v38704_v53  ;;  %v38765_v53 = vld [vmem:[%s49651_s1 + $0x2638] sm:$0xff] }
 0x499   :  { %24221 = vmatpush.bf16.msra.mxu3 %v38720_v54  ;;  %v38781_v54 = vld [vmem:[%s49651_s1 + $0x26b8] sm:$0xff] }
 0x49a   :  { %24183 = vmatpush.bf16.msra.mxu0 %v38695_v55  ;;  %v38734_v55 = vld [vmem:[%s49651_s1 + $0x2540] sm:$0xff] }
 0x49b   :  { %24209 = vmatpush.bf16.msra.mxu2 %v38711_v56  ;;  %v38750_v56 = vld [vmem:[%s49651_s1 + $0x25c0] sm:$0xff] }
 0x49c   :  { %24196 = vmatpush.bf16.msra.mxu1 %v38703_v58  ;;  %v172_v58 = vld [vmem:[%s49652_s0 + $0x4b8] sm:$0xff] }
 0x49d   :  { %24222 = vmatpush.bf16.msra.mxu3 %v38719_v59  ;;  %v507_v59 = vpack.c.bf16 %v169_v51, %v169_v51  ;;  %v510_v0 = vpack.c.bf16 %v172_v58, %v172_v58  ;;  %v38811_v58 = vld [vmem:[%s49651_s1 + $0x27a8] sm:$0xff] }
 0x49e   :  { %24184 = vmatpush.bf16.msra.mxu0 %v38694_v61  ;;  %v23978_v21 = vpop.f32.mrf.mxu0  ;;  %v38773_v61 = vld [vmem:[%s49651_s1 + $0x2678] sm:$0xff] }
 0x49f   :  { %24210 = vmatpush.bf16.msra.mxu2 %v38710_v62  ;;  %v23979_v22 = vadd.f32 %v23978_v21, %v44312_v49  ;;  %v38726_v49 = vld [vmem:[%s49651_s1 + $0x2500] sm:$0xff]  ;;  %v38789_v62 = vld [vmem:[%s49651_s1 + $0x26f8] sm:$0xff] }
 0x4a0   :  { %24197 = vmatpush.bf16.msra.mxu1 %v38702_v3  ;;  %v23991_v25 = vpop.f32.mrf.mxu1  ;;  %v38772_v3 = vld [vmem:[%s49651_s1 + $0x2670] sm:$0xff]  ;;  %v38769_v21 = vld [vmem:[%s49651_s1 + $0x2658] sm:$0xff] }
 0x4a1   :  { %24223 = vmatpush.bf16.msra.mxu3 %v38718_v4  ;;  %24185 = vmatmul.bf16.vlgmr.msra.gmra.mxu0 %v503_v7  ;;  %v23992_v26 = vadd.f32 %v23991_v25, %v23979_v22  ;;  %v38788_v4 = vld [vmem:[%s49651_s1 + $0x26f0] sm:$0xff]  ;;  %v38771_v7 = vld [vmem:[%s49651_s1 + $0x2668] sm:$0xff]  ;;  %v38785_v22 = vld [vmem:[%s49651_s1 + $0x26d8] sm:$0xff] }
 0x4a2   :  { %24229 = vmatpush.bf16.msrb.mxu0 %v38733_v1  ;;  %24211 = vmatmul.bf16.vlgmr.msra.gmra.mxu2 %v505_v8  ;;  %v38764_v1 = vld [vmem:[%s49651_s1 + $0x2630] sm:$0xff]  ;;  %v38787_v8 = vld [vmem:[%s49651_s1 + $0x26e8] sm:$0xff] }
 0x4a3   :  { %24255 = vmatpush.bf16.msrb.mxu2 %v38749_v2  ;;  %24198 = vmatmul.bf16.vlgmr.msra.gmra.mxu1 %v504_v11  ;;  %v38780_v2 = vld [vmem:[%s49651_s1 + $0x26b0] sm:$0xff]  ;;  %v38762_v11 = vld [vmem:[%s49651_s1 + $0x2620] sm:$0xff] }
 0x4a4   :  { %24242 = vmatpush.bf16.msrb.mxu1 %v38741_v9  ;;  %24224 = vmatmul.bf16.vlgmr.msra.gmra.mxu3 %v506_v12  ;;  %v38778_v12 = vld [vmem:[%s49651_s1 + $0x26a0] sm:$0xff] }
 0x4a5   :  { %24268 = vmatpush.bf16.msrb.mxu3 %v38757_v10  ;;  %v24004_v31 = vpop.f32.mrf.mxu2 }
 0x4a6   :  { %24230 = vmatpush.bf16.msrb.mxu0 %v38732_v13  ;;  %v24005_v32 = vadd.f32 %v24004_v31, %v23992_v26  ;;  %v23980_v36 = vpop.f32.mrf.mxu0  ;;  %v38760_v26 = vld [vmem:[%s49651_s1 + $0x2610] sm:$0xff]  ;;  %v38759_v31 = vld [vmem:[%s49651_s1 + $0x2608] sm:$0xff] }
 0x4a7   :  { %24256 = vmatpush.bf16.msrb.mxu2 %v38748_v14  ;;  %v24017_v35 = vpop.f32.mrf.mxu3 }
 0x4a8   :  { %24243 = vmatpush.bf16.msrb.mxu1 %v38740_v15  ;;  %v44423_v37 = vadd.f32 %v24017_v35, %v24005_v32  ;;  %v23993_v40 = vpop.f32.mrf.mxu1  ;;  %v38770_v15 = vld [vmem:[%s49651_s1 + $0x2660] sm:$0xff]  ;;  %v38775_v32 = vld [vmem:[%s49651_s1 + $0x2688] sm:$0xff] }
 0x4a9   :  { %24269 = vmatpush.bf16.msrb.mxu3 %v38756_v16  ;;  %v38786_v16 = vld [vmem:[%s49651_s1 + $0x26e0] sm:$0xff]  ;;  %v38783_v35 = vld [vmem:[%s49651_s1 + $0x26c8] sm:$0xff]  ;;  %v175_v40 = vld [vmem:[%s49652_s0 + $0x4d0] sm:$0xff] }
 0x4aa   :  { %24231 = vmatpush.bf16.msrb.mxu0 %v38731_v17  ;;  %v38761_v17 = vld [vmem:[%s49651_s1 + $0x2618] sm:$0xff] }
 0x4ab   :  { %24257 = vmatpush.bf16.msrb.mxu2 %v38747_v18  ;;  %v38777_v18 = vld [vmem:[%s49651_s1 + $0x2698] sm:$0xff] }
 0x4ac   :  { %24244 = vmatpush.bf16.msrb.mxu1 %v38739_v19 }
 0x4ad   :  { %24270 = vmatpush.bf16.msrb.mxu3 %v38755_v20  ;;  %v24006_v45 = vpop.f32.mrf.mxu2 }
 0x4ae   :  { %24232 = vmatpush.bf16.msrb.mxu0 %v38730_v23  ;;  %v174_v45 = vld [vmem:[%s49652_s0 + $0x4c8] sm:$0xff] }
 0x4af   :  { %24258 = vmatpush.bf16.msrb.mxu2 %v38746_v24  ;;  %v24019_v48 = vpop.f32.mrf.mxu3  ;;  %v512_v51 = vpack.c.bf16 %v174_v45, %v174_v45  ;;  %v38827_v45 = vld [vmem:[%s49651_s1 + $0x2828] sm:$0xff] }
 0x4b0   :  { %24245 = vmatpush.bf16.msrb.mxu1 %v38738_v27  ;;  %v38776_v27 = vld [vmem:[%s49651_s1 + $0x2690] sm:$0xff]  ;;  %v513_v48 = vpack.c.bf16 %v175_v40, %v175_v40 }
 0x4b1   :  { %24271 = vmatpush.bf16.msrb.mxu3 %v38754_v28 }
 0x4b2   :  { %24233 = vmatpush.bf16.msrb.mxu0 %v38729_v29  ;;  %v38768_v29 = vld [vmem:[%s49651_s1 + $0x2650] sm:$0xff] }
 0x4b3   :  { %24259 = vmatpush.bf16.msrb.mxu2 %v38745_v30  ;;  %v38784_v30 = vld [vmem:[%s49651_s1 + $0x26d0] sm:$0xff] }
 0x4b4   :  { %24246 = vmatpush.bf16.msrb.mxu1 %v38737_v33 }
 0x4b5   :  { %24272 = vmatpush.bf16.msrb.mxu3 %v38753_v34  ;;  %v38767_v34 = vld [vmem:[%s49651_s1 + $0x2648] sm:$0xff] }
 0x4b6   :  { %24234 = vmatpush.bf16.msrb.mxu0 %v38728_v38  ;;  %v38774_v38 = vld [vmem:[%s49651_s1 + $0x2680] sm:$0xff] }
 0x4b7   :  { %24260 = vmatpush.bf16.msrb.mxu2 %v38744_v39  ;;  %v173_v39 = vld [vmem:[%s49652_s0 + $0x4c0] sm:$0xff] }
 0x4b8   :  { %24247 = vmatpush.bf16.msrb.mxu1 %v38736_v41  ;;  %v38797_v41 = vld [vmem:[%s49651_s1 + $0x2738] sm:$0xff] }
 0x4b9   :  { %24273 = vmatpush.bf16.msrb.mxu3 %v38752_v42  ;;  %v38813_v42 = vld [vmem:[%s49651_s1 + $0x27b8] sm:$0xff] }
 0x4ba   :  { %24235 = vmatpush.bf16.msrb.mxu0 %v38727_v43  ;;  %v38766_v43 = vld [vmem:[%s49651_s1 + $0x2640] sm:$0xff] }
 0x4bb   :  { %24261 = vmatpush.bf16.msrb.mxu2 %v38743_v44  ;;  %v38782_v44 = vld [vmem:[%s49651_s1 + $0x26c0] sm:$0xff] }
 0x4bc   :  { %24248 = vmatpush.bf16.msrb.mxu1 %v38735_v46  ;;  %v176_v46 = vld [vmem:[%s49652_s0 + $0x4d8] sm:$0xff] }
 0x4bd   :  { %24274 = vmatpush.bf16.msrb.mxu3 %v38751_v47  ;;  %v511_v47 = vpack.c.bf16 %v173_v39, %v173_v39  ;;  %v514_v52 = vpack.c.bf16 %v176_v46, %v176_v46  ;;  %v38843_v46 = vld [vmem:[%s49651_s1 + $0x28a8] sm:$0xff] }
 0x4be   :  { %24236 = vmatpush.bf16.msrb.mxu0 %v38726_v49  ;;  %v24030_v9 = vpop.f32.mrf.mxu0  ;;  %v38805_v49 = vld [vmem:[%s49651_s1 + $0x2778] sm:$0xff] }
 0x4bf   :  { %24262 = vmatpush.bf16.msrb.mxu2 %v38742_v50  ;;  %v24031_v10 = vadd.f32 %v24030_v9, %v44423_v37  ;;  %v38758_v37 = vld [vmem:[%s49651_s1 + $0x2600] sm:$0xff]  ;;  %v38821_v50 = vld [vmem:[%s49651_s1 + $0x27f8] sm:$0xff] }
 0x4c0   :  { %24249 = vmatpush.bf16.msrb.mxu1 %v38734_v55  ;;  %v24043_v13 = vpop.f32.mrf.mxu1  ;;  %v38804_v55 = vld [vmem:[%s49651_s1 + $0x2770] sm:$0xff]  ;;  %v38801_v9 = vld [vmem:[%s49651_s1 + $0x2758] sm:$0xff] }
 0x4c1   :  { %24275 = vmatpush.bf16.msrb.mxu3 %v38750_v56  ;;  %24237 = vmatmul.bf16.vlgmr.msrb.gmra.mxu0 %v507_v59  ;;  %v24044_v14 = vadd.f32 %v24043_v13, %v24031_v10  ;;  %v38820_v56 = vld [vmem:[%s49651_s1 + $0x27f0] sm:$0xff]  ;;  %v38803_v59 = vld [vmem:[%s49651_s1 + $0x2768] sm:$0xff]  ;;  %v38817_v10 = vld [vmem:[%s49651_s1 + $0x27d8] sm:$0xff] }
 0x4c2   :  { %24281 = vmatpush.bf16.msra.mxu0 %v38765_v53  ;;  %24263 = vmatmul.bf16.vlgmr.msrb.gmra.mxu2 %v509_v60  ;;  %v38796_v53 = vld [vmem:[%s49651_s1 + $0x2730] sm:$0xff]  ;;  %v38819_v60 = vld [vmem:[%s49651_s1 + $0x27e8] sm:$0xff] }
 0x4c3   :  { %24307 = vmatpush.bf16.msra.mxu2 %v38781_v54  ;;  %24250 = vmatmul.bf16.vlgmr.msrb.gmra.mxu1 %v508_v63  ;;  %v38812_v54 = vld [vmem:[%s49651_s1 + $0x27b0] sm:$0xff]  ;;  %v38794_v63 = vld [vmem:[%s49651_s1 + $0x2720] sm:$0xff] }
 0x4c4   :  { %24294 = vmatpush.bf16.msra.mxu1 %v38773_v61  ;;  %24276 = vmatmul.bf16.vlgmr.msrb.gmra.mxu3 %v510_v0  ;;  %v38810_v0 = vld [vmem:[%s49651_s1 + $0x27a0] sm:$0xff] }
 0x4c5   :  { %24320 = vmatpush.bf16.msra.mxu3 %v38789_v62  ;;  %v24056_v19 = vpop.f32.mrf.mxu2 }
 0x4c6   :  { %24282 = vmatpush.bf16.msra.mxu0 %v38764_v1  ;;  %v24057_v20 = vadd.f32 %v24056_v19, %v24044_v14  ;;  %v24032_v24 = vpop.f32.mrf.mxu0  ;;  %v38792_v14 = vld [vmem:[%s49651_s1 + $0x2710] sm:$0xff]  ;;  %v38791_v19 = vld [vmem:[%s49651_s1 + $0x2708] sm:$0xff] }
 0x4c7   :  { %24308 = vmatpush.bf16.msra.mxu2 %v38780_v2  ;;  %v24069_v23 = vpop.f32.mrf.mxu3 }
 0x4c8   :  { %24295 = vmatpush.bf16.msra.mxu1 %v38772_v3  ;;  %v44534_v25 = vadd.f32 %v24069_v23, %v24057_v20  ;;  %v24045_v28 = vpop.f32.mrf.mxu1  ;;  %v38802_v3 = vld [vmem:[%s49651_s1 + $0x2760] sm:$0xff]  ;;  %v38807_v20 = vld [vmem:[%s49651_s1 + $0x2788] sm:$0xff] }
 0x4c9   :  { %24321 = vmatpush.bf16.msra.mxu3 %v38788_v4  ;;  %v38818_v4 = vld [vmem:[%s49651_s1 + $0x27e0] sm:$0xff]  ;;  %v38815_v23 = vld [vmem:[%s49651_s1 + $0x27c8] sm:$0xff]  ;;  %v179_v28 = vld [vmem:[%s49652_s0 + $0x4f0] sm:$0xff] }
 0x4ca   :  { %24283 = vmatpush.bf16.msra.mxu0 %v38763_v5  ;;  %v38793_v5 = vld [vmem:[%s49651_s1 + $0x2718] sm:$0xff] }
 0x4cb   :  { %24309 = vmatpush.bf16.msra.mxu2 %v38779_v6  ;;  %v38809_v6 = vld [vmem:[%s49651_s1 + $0x2798] sm:$0xff] }
 0x4cc   :  { %24296 = vmatpush.bf16.msra.mxu1 %v38771_v7 }
 0x4cd   :  { %24322 = vmatpush.bf16.msra.mxu3 %v38787_v8  ;;  %v24058_v33 = vpop.f32.mrf.mxu2 }
 0x4ce   :  { %24284 = vmatpush.bf16.msra.mxu0 %v38762_v11  ;;  %v178_v33 = vld [vmem:[%s49652_s0 + $0x4e8] sm:$0xff] }
 0x4cf   :  { %24310 = vmatpush.bf16.msra.mxu2 %v38778_v12  ;;  %v24071_v36 = vpop.f32.mrf.mxu3  ;;  %v516_v39 = vpack.c.bf16 %v178_v33, %v178_v33  ;;  %v38859_v33 = vld [vmem:[%s49651_s1 + $0x2928] sm:$0xff] }
 0x4d0   :  { %24297 = vmatpush.bf16.msra.mxu1 %v38770_v15  ;;  %v38808_v15 = vld [vmem:[%s49651_s1 + $0x2790] sm:$0xff]  ;;  %v517_v36 = vpack.c.bf16 %v179_v28, %v179_v28 }
 0x4d1   :  { %24323 = vmatpush.bf16.msra.mxu3 %v38786_v16 }
 0x4d2   :  { %24285 = vmatpush.bf16.msra.mxu0 %v38761_v17  ;;  %v38800_v17 = vld [vmem:[%s49651_s1 + $0x2750] sm:$0xff] }
 0x4d3   :  { %24311 = vmatpush.bf16.msra.mxu2 %v38777_v18  ;;  %v38816_v18 = vld [vmem:[%s49651_s1 + $0x27d0] sm:$0xff] }
 0x4d4   :  { %24298 = vmatpush.bf16.msra.mxu1 %v38769_v21 }
 0x4d5   :  { %24324 = vmatpush.bf16.msra.mxu3 %v38785_v22  ;;  %v38799_v22 = vld [vmem:[%s49651_s1 + $0x2748] sm:$0xff] }
 0x4d6   :  { %24286 = vmatpush.bf16.msra.mxu0 %v38760_v26  ;;  %v38806_v26 = vld [vmem:[%s49651_s1 + $0x2780] sm:$0xff] }
 0x4d7   :  { %24312 = vmatpush.bf16.msra.mxu2 %v38776_v27  ;;  %v177_v27 = vld [vmem:[%s49652_s0 + $0x4e0] sm:$0xff] }
 0x4d8   :  { %24299 = vmatpush.bf16.msra.mxu1 %v38768_v29  ;;  %v38829_v29 = vld [vmem:[%s49651_s1 + $0x2838] sm:$0xff] }
 0x4d9   :  { %24325 = vmatpush.bf16.msra.mxu3 %v38784_v30  ;;  %v38845_v30 = vld [vmem:[%s49651_s1 + $0x28b8] sm:$0xff] }
 0x4da   :  { %24287 = vmatpush.bf16.msra.mxu0 %v38759_v31  ;;  %v38798_v31 = vld [vmem:[%s49651_s1 + $0x2740] sm:$0xff] }
 0x4db   :  { %24313 = vmatpush.bf16.msra.mxu2 %v38775_v32  ;;  %v38814_v32 = vld [vmem:[%s49651_s1 + $0x27c0] sm:$0xff] }
 0x4dc   :  { %24300 = vmatpush.bf16.msra.mxu1 %v38767_v34  ;;  %v180_v34 = vld [vmem:[%s49652_s0 + $0x4f8] sm:$0xff] }
 0x4dd   :  { %24326 = vmatpush.bf16.msra.mxu3 %v38783_v35  ;;  %v515_v35 = vpack.c.bf16 %v177_v27, %v177_v27  ;;  %v518_v40 = vpack.c.bf16 %v180_v34, %v180_v34  ;;  %v38875_v34 = vld [vmem:[%s49651_s1 + $0x29a8] sm:$0xff] }
 0x4de   :  { %24288 = vmatpush.bf16.msra.mxu0 %v38758_v37  ;;  %v24082_v61 = vpop.f32.mrf.mxu0  ;;  %v38837_v37 = vld [vmem:[%s49651_s1 + $0x2878] sm:$0xff] }
 0x4df   :  { %24314 = vmatpush.bf16.msra.mxu2 %v38774_v38  ;;  %v24083_v62 = vadd.f32 %v24082_v61, %v44534_v25  ;;  %v38790_v25 = vld [vmem:[%s49651_s1 + $0x2700] sm:$0xff]  ;;  %v38853_v38 = vld [vmem:[%s49651_s1 + $0x28f8] sm:$0xff] }
 0x4e0   :  { %24301 = vmatpush.bf16.msra.mxu1 %v38766_v43  ;;  %v24095_v1 = vpop.f32.mrf.mxu1  ;;  %v38836_v43 = vld [vmem:[%s49651_s1 + $0x2870] sm:$0xff]  ;;  %v38833_v61 = vld [vmem:[%s49651_s1 + $0x2858] sm:$0xff] }
 0x4e1   :  { %24327 = vmatpush.bf16.msra.mxu3 %v38782_v44  ;;  %24289 = vmatmul.bf16.vlgmr.msra.gmra.mxu0 %v511_v47  ;;  %v24096_v2 = vadd.f32 %v24095_v1, %v24083_v62  ;;  %v38852_v44 = vld [vmem:[%s49651_s1 + $0x28f0] sm:$0xff]  ;;  %v38835_v47 = vld [vmem:[%s49651_s1 + $0x2868] sm:$0xff]  ;;  %v38849_v62 = vld [vmem:[%s49651_s1 + $0x28d8] sm:$0xff] }
 0x4e2   :  { %24333 = vmatpush.bf16.msrb.mxu0 %v38797_v41  ;;  %24315 = vmatmul.bf16.vlgmr.msra.gmra.mxu2 %v513_v48  ;;  %v38828_v41 = vld [vmem:[%s49651_s1 + $0x2830] sm:$0xff]  ;;  %v38851_v48 = vld [vmem:[%s49651_s1 + $0x28e8] sm:$0xff] }
 0x4e3   :  { %24359 = vmatpush.bf16.msrb.mxu2 %v38813_v42  ;;  %24302 = vmatmul.bf16.vlgmr.msra.gmra.mxu1 %v512_v51  ;;  %v38844_v42 = vld [vmem:[%s49651_s1 + $0x28b0] sm:$0xff]  ;;  %v38826_v51 = vld [vmem:[%s49651_s1 + $0x2820] sm:$0xff] }
 0x4e4   :  { %24346 = vmatpush.bf16.msrb.mxu1 %v38805_v49  ;;  %24328 = vmatmul.bf16.vlgmr.msra.gmra.mxu3 %v514_v52  ;;  %v38842_v52 = vld [vmem:[%s49651_s1 + $0x28a0] sm:$0xff] }
 0x4e5   :  { %24372 = vmatpush.bf16.msrb.mxu3 %v38821_v50  ;;  %v24108_v7 = vpop.f32.mrf.mxu2 }
 0x4e6   :  { %24334 = vmatpush.bf16.msrb.mxu0 %v38796_v53  ;;  %v24109_v8 = vadd.f32 %v24108_v7, %v24096_v2  ;;  %v24084_v12 = vpop.f32.mrf.mxu0  ;;  %v38824_v2 = vld [vmem:[%s49651_s1 + $0x2810] sm:$0xff]  ;;  %v38823_v7 = vld [vmem:[%s49651_s1 + $0x2808] sm:$0xff] }
 0x4e7   :  { %24360 = vmatpush.bf16.msrb.mxu2 %v38812_v54  ;;  %v24121_v11 = vpop.f32.mrf.mxu3 }
 0x4e8   :  { %24347 = vmatpush.bf16.msrb.mxu1 %v38804_v55  ;;  %v44645_v13 = vadd.f32 %v24121_v11, %v24109_v8  ;;  %v24097_v16 = vpop.f32.mrf.mxu1  ;;  %v38834_v55 = vld [vmem:[%s49651_s1 + $0x2860] sm:$0xff]  ;;  %v38839_v8 = vld [vmem:[%s49651_s1 + $0x2888] sm:$0xff] }
 0x4e9   :  { %24373 = vmatpush.bf16.msrb.mxu3 %v38820_v56  ;;  %v38850_v56 = vld [vmem:[%s49651_s1 + $0x28e0] sm:$0xff]  ;;  %v38847_v11 = vld [vmem:[%s49651_s1 + $0x28c8] sm:$0xff]  ;;  %v183_v16 = vld [vmem:[%s49652_s0 + $0x510] sm:$0xff] }
 0x4ea   :  { %24335 = vmatpush.bf16.msrb.mxu0 %v38795_v57  ;;  %v38825_v57 = vld [vmem:[%s49651_s1 + $0x2818] sm:$0xff] }
 0x4eb   :  { %24361 = vmatpush.bf16.msrb.mxu2 %v38811_v58  ;;  %v38841_v58 = vld [vmem:[%s49651_s1 + $0x2898] sm:$0xff] }
 0x4ec   :  { %24348 = vmatpush.bf16.msrb.mxu1 %v38803_v59 }
 0x4ed   :  { %24374 = vmatpush.bf16.msrb.mxu3 %v38819_v60  ;;  %v24110_v21 = vpop.f32.mrf.mxu2 }
 0x4ee   :  { %24336 = vmatpush.bf16.msrb.mxu0 %v38794_v63  ;;  %v182_v21 = vld [vmem:[%s49652_s0 + $0x508] sm:$0xff] }
 0x4ef   :  { %24362 = vmatpush.bf16.msrb.mxu2 %v38810_v0  ;;  %v24123_v24 = vpop.f32.mrf.mxu3  ;;  %v520_v27 = vpack.c.bf16 %v182_v21, %v182_v21  ;;  %v38891_v21 = vld [vmem:[%s49651_s1 + $0x2a28] sm:$0xff] }
 0x4f0   :  { %24349 = vmatpush.bf16.msrb.mxu1 %v38802_v3  ;;  %v38840_v3 = vld [vmem:[%s49651_s1 + $0x2890] sm:$0xff]  ;;  %v521_v24 = vpack.c.bf16 %v183_v16, %v183_v16 }
 0x4f1   :  { %24375 = vmatpush.bf16.msrb.mxu3 %v38818_v4 }
 0x4f2   :  { %24337 = vmatpush.bf16.msrb.mxu0 %v38793_v5  ;;  %v38832_v5 = vld [vmem:[%s49651_s1 + $0x2850] sm:$0xff] }
 0x4f3   :  { %24363 = vmatpush.bf16.msrb.mxu2 %v38809_v6  ;;  %v38848_v6 = vld [vmem:[%s49651_s1 + $0x28d0] sm:$0xff] }
 0x4f4   :  { %24350 = vmatpush.bf16.msrb.mxu1 %v38801_v9 }
 0x4f5   :  { %24376 = vmatpush.bf16.msrb.mxu3 %v38817_v10  ;;  %v38831_v10 = vld [vmem:[%s49651_s1 + $0x2848] sm:$0xff] }
 0x4f6   :  { %24338 = vmatpush.bf16.msrb.mxu0 %v38792_v14  ;;  %v38838_v14 = vld [vmem:[%s49651_s1 + $0x2880] sm:$0xff] }
 0x4f7   :  { %24364 = vmatpush.bf16.msrb.mxu2 %v38808_v15  ;;  %v181_v15 = vld [vmem:[%s49652_s0 + $0x500] sm:$0xff] }
 0x4f8   :  { %24351 = vmatpush.bf16.msrb.mxu1 %v38800_v17  ;;  %v38861_v17 = vld [vmem:[%s49651_s1 + $0x2938] sm:$0xff] }
 0x4f9   :  { %24377 = vmatpush.bf16.msrb.mxu3 %v38816_v18  ;;  %v38877_v18 = vld [vmem:[%s49651_s1 + $0x29b8] sm:$0xff] }
 0x4fa   :  { %24339 = vmatpush.bf16.msrb.mxu0 %v38791_v19  ;;  %v38830_v19 = vld [vmem:[%s49651_s1 + $0x2840] sm:$0xff] }
 0x4fb   :  { %24365 = vmatpush.bf16.msrb.mxu2 %v38807_v20  ;;  %v38846_v20 = vld [vmem:[%s49651_s1 + $0x28c0] sm:$0xff] }
 0x4fc   :  { %24352 = vmatpush.bf16.msrb.mxu1 %v38799_v22  ;;  %v184_v22 = vld [vmem:[%s49652_s0 + $0x518] sm:$0xff] }
 0x4fd   :  { %24378 = vmatpush.bf16.msrb.mxu3 %v38815_v23  ;;  %v519_v23 = vpack.c.bf16 %v181_v15, %v181_v15  ;;  %v522_v28 = vpack.c.bf16 %v184_v22, %v184_v22  ;;  %v38907_v22 = vld [vmem:[%s49651_s1 + $0x2aa8] sm:$0xff] }
 0x4fe   :  { %24340 = vmatpush.bf16.msrb.mxu0 %v38790_v25  ;;  %v24134_v49 = vpop.f32.mrf.mxu0  ;;  %v38869_v25 = vld [vmem:[%s49651_s1 + $0x2978] sm:$0xff] }
 0x4ff   :  { %24366 = vmatpush.bf16.msrb.mxu2 %v38806_v26  ;;  %v24135_v50 = vadd.f32 %v24134_v49, %v44645_v13  ;;  %v38822_v13 = vld [vmem:[%s49651_s1 + $0x2800] sm:$0xff]  ;;  %v38885_v26 = vld [vmem:[%s49651_s1 + $0x29f8] sm:$0xff] }
 0x500   :  { %24353 = vmatpush.bf16.msrb.mxu1 %v38798_v31  ;;  %v24147_v53 = vpop.f32.mrf.mxu1  ;;  %v38868_v31 = vld [vmem:[%s49651_s1 + $0x2970] sm:$0xff]  ;;  %v38865_v49 = vld [vmem:[%s49651_s1 + $0x2958] sm:$0xff] }
 0x501   :  { %24379 = vmatpush.bf16.msrb.mxu3 %v38814_v32  ;;  %24341 = vmatmul.bf16.vlgmr.msrb.gmra.mxu0 %v515_v35  ;;  %v24148_v54 = vadd.f32 %v24147_v53, %v24135_v50  ;;  %v38884_v32 = vld [vmem:[%s49651_s1 + $0x29f0] sm:$0xff]  ;;  %v38867_v35 = vld [vmem:[%s49651_s1 + $0x2968] sm:$0xff]  ;;  %v38881_v50 = vld [vmem:[%s49651_s1 + $0x29d8] sm:$0xff] }
 0x502   :  { %24385 = vmatpush.bf16.msra.mxu0 %v38829_v29  ;;  %24367 = vmatmul.bf16.vlgmr.msrb.gmra.mxu2 %v517_v36  ;;  %v38860_v29 = vld [vmem:[%s49651_s1 + $0x2930] sm:$0xff]  ;;  %v38883_v36 = vld [vmem:[%s49651_s1 + $0x29e8] sm:$0xff] }
 0x503   :  { %24411 = vmatpush.bf16.msra.mxu2 %v38845_v30  ;;  %24354 = vmatmul.bf16.vlgmr.msrb.gmra.mxu1 %v516_v39  ;;  %v38876_v30 = vld [vmem:[%s49651_s1 + $0x29b0] sm:$0xff]  ;;  %v38858_v39 = vld [vmem:[%s49651_s1 + $0x2920] sm:$0xff] }
 0x504   :  { %24398 = vmatpush.bf16.msra.mxu1 %v38837_v37  ;;  %24380 = vmatmul.bf16.vlgmr.msrb.gmra.mxu3 %v518_v40  ;;  %v38874_v40 = vld [vmem:[%s49651_s1 + $0x29a0] sm:$0xff] }
 0x505   :  { %24424 = vmatpush.bf16.msra.mxu3 %v38853_v38  ;;  %v24160_v59 = vpop.f32.mrf.mxu2 }
 0x506   :  { %24386 = vmatpush.bf16.msra.mxu0 %v38828_v41  ;;  %v24161_v60 = vadd.f32 %v24160_v59, %v24148_v54  ;;  %v24136_v0 = vpop.f32.mrf.mxu0  ;;  %v38856_v54 = vld [vmem:[%s49651_s1 + $0x2910] sm:$0xff]  ;;  %v38855_v59 = vld [vmem:[%s49651_s1 + $0x2908] sm:$0xff] }
 0x507   :  { %24412 = vmatpush.bf16.msra.mxu2 %v38844_v42  ;;  %v24173_v63 = vpop.f32.mrf.mxu3 }
 0x508   :  { %24399 = vmatpush.bf16.msra.mxu1 %v38836_v43  ;;  %v44756_v1 = vadd.f32 %v24173_v63, %v24161_v60  ;;  %v24149_v4 = vpop.f32.mrf.mxu1  ;;  %v38866_v43 = vld [vmem:[%s49651_s1 + $0x2960] sm:$0xff]  ;;  %v38871_v60 = vld [vmem:[%s49651_s1 + $0x2988] sm:$0xff] }
 0x509   :  { %24425 = vmatpush.bf16.msra.mxu3 %v38852_v44  ;;  %v38882_v44 = vld [vmem:[%s49651_s1 + $0x29e0] sm:$0xff]  ;;  %v38879_v63 = vld [vmem:[%s49651_s1 + $0x29c8] sm:$0xff]  ;;  %v187_v4 = vld [vmem:[%s49652_s0 + $0x530] sm:$0xff] }
 0x50a   :  { %24387 = vmatpush.bf16.msra.mxu0 %v38827_v45  ;;  %v38857_v45 = vld [vmem:[%s49651_s1 + $0x2918] sm:$0xff] }
 0x50b   :  { %24413 = vmatpush.bf16.msra.mxu2 %v38843_v46  ;;  %v38873_v46 = vld [vmem:[%s49651_s1 + $0x2998] sm:$0xff] }
 0x50c   :  { %24400 = vmatpush.bf16.msra.mxu1 %v38835_v47 }
 0x50d   :  { %24426 = vmatpush.bf16.msra.mxu3 %v38851_v48  ;;  %v24162_v9 = vpop.f32.mrf.mxu2 }
 0x50e   :  { %24388 = vmatpush.bf16.msra.mxu0 %v38826_v51  ;;  %v186_v9 = vld [vmem:[%s49652_s0 + $0x528] sm:$0xff] }
 0x50f   :  { %24414 = vmatpush.bf16.msra.mxu2 %v38842_v52  ;;  %v24175_v12 = vpop.f32.mrf.mxu3  ;;  %v524_v15 = vpack.c.bf16 %v186_v9, %v186_v9  ;;  %v38923_v9 = vld [vmem:[%s49651_s1 + $0x2b28] sm:$0xff] }
 0x510   :  { %24401 = vmatpush.bf16.msra.mxu1 %v38834_v55  ;;  %v38872_v55 = vld [vmem:[%s49651_s1 + $0x2990] sm:$0xff]  ;;  %v525_v12 = vpack.c.bf16 %v187_v4, %v187_v4 }
 0x511   :  { %24427 = vmatpush.bf16.msra.mxu3 %v38850_v56 }
 0x512   :  { %24389 = vmatpush.bf16.msra.mxu0 %v38825_v57  ;;  %v38864_v57 = vld [vmem:[%s49651_s1 + $0x2950] sm:$0xff] }
 0x513   :  { %24415 = vmatpush.bf16.msra.mxu2 %v38841_v58  ;;  %v38880_v58 = vld [vmem:[%s49651_s1 + $0x29d0] sm:$0xff] }
 0x514   :  { %24402 = vmatpush.bf16.msra.mxu1 %v38833_v61 }
 0x515   :  { %24428 = vmatpush.bf16.msra.mxu3 %v38849_v62  ;;  %v38863_v62 = vld [vmem:[%s49651_s1 + $0x2948] sm:$0xff] }
 0x516   :  { %24390 = vmatpush.bf16.msra.mxu0 %v38824_v2  ;;  %v38870_v2 = vld [vmem:[%s49651_s1 + $0x2980] sm:$0xff] }
 0x517   :  { %24416 = vmatpush.bf16.msra.mxu2 %v38840_v3  ;;  %v185_v3 = vld [vmem:[%s49652_s0 + $0x520] sm:$0xff] }
 0x518   :  { %24403 = vmatpush.bf16.msra.mxu1 %v38832_v5  ;;  %v38893_v5 = vld [vmem:[%s49651_s1 + $0x2a38] sm:$0xff] }
 0x519   :  { %24429 = vmatpush.bf16.msra.mxu3 %v38848_v6  ;;  %v38909_v6 = vld [vmem:[%s49651_s1 + $0x2ab8] sm:$0xff] }
 0x51a   :  { %24391 = vmatpush.bf16.msra.mxu0 %v38823_v7  ;;  %v38862_v7 = vld [vmem:[%s49651_s1 + $0x2940] sm:$0xff] }
 0x51b   :  { %24417 = vmatpush.bf16.msra.mxu2 %v38839_v8  ;;  %v38878_v8 = vld [vmem:[%s49651_s1 + $0x29c0] sm:$0xff] }
 0x51c   :  { %24404 = vmatpush.bf16.msra.mxu1 %v38831_v10  ;;  %v188_v10 = vld [vmem:[%s49652_s0 + $0x538] sm:$0xff] }
 0x51d   :  { %24430 = vmatpush.bf16.msra.mxu3 %v38847_v11  ;;  %v523_v11 = vpack.c.bf16 %v185_v3, %v185_v3  ;;  %v526_v16 = vpack.c.bf16 %v188_v10, %v188_v10  ;;  %v38939_v10 = vld [vmem:[%s49651_s1 + $0x2ba8] sm:$0xff] }
 0x51e   :  { %24392 = vmatpush.bf16.msra.mxu0 %v38822_v13  ;;  %v24186_v37 = vpop.f32.mrf.mxu0  ;;  %v38901_v13 = vld [vmem:[%s49651_s1 + $0x2a78] sm:$0xff] }
 0x51f   :  { %24418 = vmatpush.bf16.msra.mxu2 %v38838_v14  ;;  %v24187_v38 = vadd.f32 %v24186_v37, %v44756_v1  ;;  %v38854_v1 = vld [vmem:[%s49651_s1 + $0x2900] sm:$0xff]  ;;  %v38917_v14 = vld [vmem:[%s49651_s1 + $0x2af8] sm:$0xff] }
 0x520   :  { %24405 = vmatpush.bf16.msra.mxu1 %v38830_v19  ;;  %v24199_v41 = vpop.f32.mrf.mxu1  ;;  %v38900_v19 = vld [vmem:[%s49651_s1 + $0x2a70] sm:$0xff]  ;;  %v38897_v37 = vld [vmem:[%s49651_s1 + $0x2a58] sm:$0xff] }
 0x521   :  { %24431 = vmatpush.bf16.msra.mxu3 %v38846_v20  ;;  %24393 = vmatmul.bf16.vlgmr.msra.gmra.mxu0 %v519_v23  ;;  %v24200_v42 = vadd.f32 %v24199_v41, %v24187_v38  ;;  %v38916_v20 = vld [vmem:[%s49651_s1 + $0x2af0] sm:$0xff]  ;;  %v38899_v23 = vld [vmem:[%s49651_s1 + $0x2a68] sm:$0xff]  ;;  %v38913_v38 = vld [vmem:[%s49651_s1 + $0x2ad8] sm:$0xff] }
 0x522   :  { %24437 = vmatpush.bf16.msrb.mxu0 %v38861_v17  ;;  %24419 = vmatmul.bf16.vlgmr.msra.gmra.mxu2 %v521_v24  ;;  %v38892_v17 = vld [vmem:[%s49651_s1 + $0x2a30] sm:$0xff]  ;;  %v38915_v24 = vld [vmem:[%s49651_s1 + $0x2ae8] sm:$0xff] }
 0x523   :  { %24463 = vmatpush.bf16.msrb.mxu2 %v38877_v18  ;;  %24406 = vmatmul.bf16.vlgmr.msra.gmra.mxu1 %v520_v27  ;;  %v38908_v18 = vld [vmem:[%s49651_s1 + $0x2ab0] sm:$0xff]  ;;  %v38890_v27 = vld [vmem:[%s49651_s1 + $0x2a20] sm:$0xff] }
 0x524   :  { %24450 = vmatpush.bf16.msrb.mxu1 %v38869_v25  ;;  %24432 = vmatmul.bf16.vlgmr.msra.gmra.mxu3 %v522_v28  ;;  %v38906_v28 = vld [vmem:[%s49651_s1 + $0x2aa0] sm:$0xff] }
 0x525   :  { %24476 = vmatpush.bf16.msrb.mxu3 %v38885_v26  ;;  %v24212_v47 = vpop.f32.mrf.mxu2 }
 0x526   :  { %24438 = vmatpush.bf16.msrb.mxu0 %v38860_v29  ;;  %v24213_v48 = vadd.f32 %v24212_v47, %v24200_v42  ;;  %v24188_v52 = vpop.f32.mrf.mxu0  ;;  %v38888_v42 = vld [vmem:[%s49651_s1 + $0x2a10] sm:$0xff]  ;;  %v38887_v47 = vld [vmem:[%s49651_s1 + $0x2a08] sm:$0xff] }
 0x527   :  { %24464 = vmatpush.bf16.msrb.mxu2 %v38876_v30  ;;  %v24225_v51 = vpop.f32.mrf.mxu3 }
 0x528   :  { %24451 = vmatpush.bf16.msrb.mxu1 %v38868_v31  ;;  %v44867_v53 = vadd.f32 %v24225_v51, %v24213_v48  ;;  %v24201_v56 = vpop.f32.mrf.mxu1  ;;  %v38898_v31 = vld [vmem:[%s49651_s1 + $0x2a60] sm:$0xff]  ;;  %v38903_v48 = vld [vmem:[%s49651_s1 + $0x2a88] sm:$0xff] }
 0x529   :  { %24477 = vmatpush.bf16.msrb.mxu3 %v38884_v32  ;;  %v38914_v32 = vld [vmem:[%s49651_s1 + $0x2ae0] sm:$0xff]  ;;  %v38911_v51 = vld [vmem:[%s49651_s1 + $0x2ac8] sm:$0xff]  ;;  %v191_v56 = vld [vmem:[%s49652_s0 + $0x550] sm:$0xff] }
 0x52a   :  { %24439 = vmatpush.bf16.msrb.mxu0 %v38859_v33  ;;  %v38889_v33 = vld [vmem:[%s49651_s1 + $0x2a18] sm:$0xff] }
 0x52b   :  { %24465 = vmatpush.bf16.msrb.mxu2 %v38875_v34  ;;  %v38905_v34 = vld [vmem:[%s49651_s1 + $0x2a98] sm:$0xff] }
 0x52c   :  { %24452 = vmatpush.bf16.msrb.mxu1 %v38867_v35 }
 0x52d   :  { %24478 = vmatpush.bf16.msrb.mxu3 %v38883_v36  ;;  %v24214_v61 = vpop.f32.mrf.mxu2 }
 0x52e   :  { %24440 = vmatpush.bf16.msrb.mxu0 %v38858_v39  ;;  %v190_v61 = vld [vmem:[%s49652_s0 + $0x548] sm:$0xff] }
 0x52f   :  { %24466 = vmatpush.bf16.msrb.mxu2 %v38874_v40  ;;  %v24227_v0 = vpop.f32.mrf.mxu3  ;;  %v528_v3 = vpack.c.bf16 %v190_v61, %v190_v61  ;;  %v38955_v61 = vld [vmem:[%s49651_s1 + $0x2c28] sm:$0xff] }
 0x530   :  { %24453 = vmatpush.bf16.msrb.mxu1 %v38866_v43  ;;  %v38904_v43 = vld [vmem:[%s49651_s1 + $0x2a90] sm:$0xff]  ;;  %v529_v0 = vpack.c.bf16 %v191_v56, %v191_v56 }
 0x531   :  { %24479 = vmatpush.bf16.msrb.mxu3 %v38882_v44 }
 0x532   :  { %24441 = vmatpush.bf16.msrb.mxu0 %v38857_v45  ;;  %v38896_v45 = vld [vmem:[%s49651_s1 + $0x2a50] sm:$0xff] }
 0x533   :  { %24467 = vmatpush.bf16.msrb.mxu2 %v38873_v46  ;;  %v38912_v46 = vld [vmem:[%s49651_s1 + $0x2ad0] sm:$0xff] }
 0x534   :  { %24454 = vmatpush.bf16.msrb.mxu1 %v38865_v49 }
 0x535   :  { %24480 = vmatpush.bf16.msrb.mxu3 %v38881_v50  ;;  %v38895_v50 = vld [vmem:[%s49651_s1 + $0x2a48] sm:$0xff] }
 0x536   :  { %24442 = vmatpush.bf16.msrb.mxu0 %v38856_v54  ;;  %v38902_v54 = vld [vmem:[%s49651_s1 + $0x2a80] sm:$0xff] }
 0x537   :  { %24468 = vmatpush.bf16.msrb.mxu2 %v38872_v55  ;;  %v189_v55 = vld [vmem:[%s49652_s0 + $0x540] sm:$0xff] }
 0x538   :  { %24455 = vmatpush.bf16.msrb.mxu1 %v38864_v57  ;;  %v38925_v57 = vld [vmem:[%s49651_s1 + $0x2b38] sm:$0xff] }
 0x539   :  { %24481 = vmatpush.bf16.msrb.mxu3 %v38880_v58  ;;  %v38941_v58 = vld [vmem:[%s49651_s1 + $0x2bb8] sm:$0xff] }
 0x53a   :  { %24443 = vmatpush.bf16.msrb.mxu0 %v38855_v59  ;;  %v38894_v59 = vld [vmem:[%s49651_s1 + $0x2a40] sm:$0xff] }
 0x53b   :  { %24469 = vmatpush.bf16.msrb.mxu2 %v38871_v60  ;;  %v38910_v60 = vld [vmem:[%s49651_s1 + $0x2ac0] sm:$0xff] }
 0x53c   :  { %24456 = vmatpush.bf16.msrb.mxu1 %v38863_v62  ;;  %v192_v62 = vld [vmem:[%s49652_s0 + $0x558] sm:$0xff] }
 0x53d   :  { %24482 = vmatpush.bf16.msrb.mxu3 %v38879_v63  ;;  %v527_v63 = vpack.c.bf16 %v189_v55, %v189_v55  ;;  %v530_v4 = vpack.c.bf16 %v192_v62, %v192_v62  ;;  %v38971_v62 = vld [vmem:[%s49651_s1 + $0x2ca8] sm:$0xff] }
 0x53e   :  { %24444 = vmatpush.bf16.msrb.mxu0 %v38854_v1  ;;  %v24238_v25 = vpop.f32.mrf.mxu0  ;;  %v38933_v1 = vld [vmem:[%s49651_s1 + $0x2b78] sm:$0xff] }
 0x53f   :  { %24470 = vmatpush.bf16.msrb.mxu2 %v38870_v2  ;;  %v24239_v26 = vadd.f32 %v24238_v25, %v44867_v53  ;;  %v38886_v53 = vld [vmem:[%s49651_s1 + $0x2a00] sm:$0xff]  ;;  %v38949_v2 = vld [vmem:[%s49651_s1 + $0x2bf8] sm:$0xff] }
 0x540   :  { %24457 = vmatpush.bf16.msrb.mxu1 %v38862_v7  ;;  %v24251_v29 = vpop.f32.mrf.mxu1  ;;  %v38932_v7 = vld [vmem:[%s49651_s1 + $0x2b70] sm:$0xff]  ;;  %v38929_v25 = vld [vmem:[%s49651_s1 + $0x2b58] sm:$0xff] }
 0x541   :  { %24483 = vmatpush.bf16.msrb.mxu3 %v38878_v8  ;;  %24445 = vmatmul.bf16.vlgmr.msrb.gmra.mxu0 %v523_v11  ;;  %v24252_v30 = vadd.f32 %v24251_v29, %v24239_v26  ;;  %v38948_v8 = vld [vmem:[%s49651_s1 + $0x2bf0] sm:$0xff]  ;;  %v38931_v11 = vld [vmem:[%s49651_s1 + $0x2b68] sm:$0xff]  ;;  %v38945_v26 = vld [vmem:[%s49651_s1 + $0x2bd8] sm:$0xff] }
 0x542   :  { %24489 = vmatpush.bf16.msra.mxu0 %v38893_v5  ;;  %24471 = vmatmul.bf16.vlgmr.msrb.gmra.mxu2 %v525_v12  ;;  %v38924_v5 = vld [vmem:[%s49651_s1 + $0x2b30] sm:$0xff]  ;;  %v38947_v12 = vld [vmem:[%s49651_s1 + $0x2be8] sm:$0xff] }
 0x543   :  { %24515 = vmatpush.bf16.msra.mxu2 %v38909_v6  ;;  %24458 = vmatmul.bf16.vlgmr.msrb.gmra.mxu1 %v524_v15  ;;  %v38940_v6 = vld [vmem:[%s49651_s1 + $0x2bb0] sm:$0xff]  ;;  %v38922_v15 = vld [vmem:[%s49651_s1 + $0x2b20] sm:$0xff] }
 0x544   :  { %24502 = vmatpush.bf16.msra.mxu1 %v38901_v13  ;;  %24484 = vmatmul.bf16.vlgmr.msrb.gmra.mxu3 %v526_v16  ;;  %v38938_v16 = vld [vmem:[%s49651_s1 + $0x2ba0] sm:$0xff] }
 0x545   :  { %24528 = vmatpush.bf16.msra.mxu3 %v38917_v14  ;;  %v24264_v35 = vpop.f32.mrf.mxu2 }
 0x546   :  { %24490 = vmatpush.bf16.msra.mxu0 %v38892_v17  ;;  %v24265_v36 = vadd.f32 %v24264_v35, %v24252_v30  ;;  %v24240_v40 = vpop.f32.mrf.mxu0  ;;  %v38920_v30 = vld [vmem:[%s49651_s1 + $0x2b10] sm:$0xff]  ;;  %v38919_v35 = vld [vmem:[%s49651_s1 + $0x2b08] sm:$0xff] }
 0x547   :  { %24516 = vmatpush.bf16.msra.mxu2 %v38908_v18  ;;  %v24277_v39 = vpop.f32.mrf.mxu3 }
 0x548   :  { %24503 = vmatpush.bf16.msra.mxu1 %v38900_v19  ;;  %v44978_v41 = vadd.f32 %v24277_v39, %v24265_v36  ;;  %v24253_v44 = vpop.f32.mrf.mxu1  ;;  %v38930_v19 = vld [vmem:[%s49651_s1 + $0x2b60] sm:$0xff]  ;;  %v38935_v36 = vld [vmem:[%s49651_s1 + $0x2b88] sm:$0xff] }
 0x549   :  { %24529 = vmatpush.bf16.msra.mxu3 %v38916_v20  ;;  %v38946_v20 = vld [vmem:[%s49651_s1 + $0x2be0] sm:$0xff]  ;;  %v38943_v39 = vld [vmem:[%s49651_s1 + $0x2bc8] sm:$0xff]  ;;  %v195_v44 = vld [vmem:[%s49652_s0 + $0x570] sm:$0xff] }
 0x54a   :  { %24491 = vmatpush.bf16.msra.mxu0 %v38891_v21  ;;  %v38921_v21 = vld [vmem:[%s49651_s1 + $0x2b18] sm:$0xff] }
 0x54b   :  { %24517 = vmatpush.bf16.msra.mxu2 %v38907_v22  ;;  %v38937_v22 = vld [vmem:[%s49651_s1 + $0x2b98] sm:$0xff] }
 0x54c   :  { %24504 = vmatpush.bf16.msra.mxu1 %v38899_v23 }
 0x54d   :  { %24530 = vmatpush.bf16.msra.mxu3 %v38915_v24  ;;  %v24266_v49 = vpop.f32.mrf.mxu2 }
 0x54e   :  { %24492 = vmatpush.bf16.msra.mxu0 %v38890_v27  ;;  %v194_v49 = vld [vmem:[%s49652_s0 + $0x568] sm:$0xff] }
 0x54f   :  { %24518 = vmatpush.bf16.msra.mxu2 %v38906_v28  ;;  %v24279_v52 = vpop.f32.mrf.mxu3  ;;  %v532_v55 = vpack.c.bf16 %v194_v49, %v194_v49  ;;  %v38987_v49 = vld [vmem:[%s49651_s1 + $0x2d28] sm:$0xff] }
 0x550   :  { %24505 = vmatpush.bf16.msra.mxu1 %v38898_v31  ;;  %v38936_v31 = vld [vmem:[%s49651_s1 + $0x2b90] sm:$0xff]  ;;  %v533_v52 = vpack.c.bf16 %v195_v44, %v195_v44 }
 0x551   :  { %24531 = vmatpush.bf16.msra.mxu3 %v38914_v32 }
 0x552   :  { %24493 = vmatpush.bf16.msra.mxu0 %v38889_v33  ;;  %v38928_v33 = vld [vmem:[%s49651_s1 + $0x2b50] sm:$0xff] }
 0x553   :  { %24519 = vmatpush.bf16.msra.mxu2 %v38905_v34  ;;  %v38944_v34 = vld [vmem:[%s49651_s1 + $0x2bd0] sm:$0xff] }
 0x554   :  { %24506 = vmatpush.bf16.msra.mxu1 %v38897_v37 }
 0x555   :  { %24532 = vmatpush.bf16.msra.mxu3 %v38913_v38  ;;  %v38927_v38 = vld [vmem:[%s49651_s1 + $0x2b48] sm:$0xff] }
 0x556   :  { %24494 = vmatpush.bf16.msra.mxu0 %v38888_v42  ;;  %v38934_v42 = vld [vmem:[%s49651_s1 + $0x2b80] sm:$0xff] }
 0x557   :  { %24520 = vmatpush.bf16.msra.mxu2 %v38904_v43  ;;  %v193_v43 = vld [vmem:[%s49652_s0 + $0x560] sm:$0xff] }
 0x558   :  { %24507 = vmatpush.bf16.msra.mxu1 %v38896_v45  ;;  %v38957_v45 = vld [vmem:[%s49651_s1 + $0x2c38] sm:$0xff] }
 0x559   :  { %24533 = vmatpush.bf16.msra.mxu3 %v38912_v46  ;;  %v38973_v46 = vld [vmem:[%s49651_s1 + $0x2cb8] sm:$0xff] }
 0x55a   :  { %24495 = vmatpush.bf16.msra.mxu0 %v38887_v47  ;;  %v38926_v47 = vld [vmem:[%s49651_s1 + $0x2b40] sm:$0xff] }
 0x55b   :  { %24521 = vmatpush.bf16.msra.mxu2 %v38903_v48  ;;  %v38942_v48 = vld [vmem:[%s49651_s1 + $0x2bc0] sm:$0xff] }
 0x55c   :  { %24508 = vmatpush.bf16.msra.mxu1 %v38895_v50  ;;  %v196_v50 = vld [vmem:[%s49652_s0 + $0x578] sm:$0xff] }
 0x55d   :  { %24534 = vmatpush.bf16.msra.mxu3 %v38911_v51  ;;  %v531_v51 = vpack.c.bf16 %v193_v43, %v193_v43  ;;  %v534_v56 = vpack.c.bf16 %v196_v50, %v196_v50  ;;  %v39003_v50 = vld [vmem:[%s49651_s1 + $0x2da8] sm:$0xff] }
 0x55e   :  { %24496 = vmatpush.bf16.msra.mxu0 %v38886_v53  ;;  %v24290_v13 = vpop.f32.mrf.mxu0  ;;  %v38965_v53 = vld [vmem:[%s49651_s1 + $0x2c78] sm:$0xff] }
 0x55f   :  { %24522 = vmatpush.bf16.msra.mxu2 %v38902_v54  ;;  %v24291_v14 = vadd.f32 %v24290_v13, %v44978_v41  ;;  %v38918_v41 = vld [vmem:[%s49651_s1 + $0x2b00] sm:$0xff]  ;;  %v38981_v54 = vld [vmem:[%s49651_s1 + $0x2cf8] sm:$0xff] }
 0x560   :  { %24509 = vmatpush.bf16.msra.mxu1 %v38894_v59  ;;  %v24303_v17 = vpop.f32.mrf.mxu1  ;;  %v38964_v59 = vld [vmem:[%s49651_s1 + $0x2c70] sm:$0xff]  ;;  %v38961_v13 = vld [vmem:[%s49651_s1 + $0x2c58] sm:$0xff] }
 0x561   :  { %24535 = vmatpush.bf16.msra.mxu3 %v38910_v60  ;;  %24497 = vmatmul.bf16.vlgmr.msra.gmra.mxu0 %v527_v63  ;;  %v24304_v18 = vadd.f32 %v24303_v17, %v24291_v14  ;;  %v38980_v60 = vld [vmem:[%s49651_s1 + $0x2cf0] sm:$0xff]  ;;  %v38963_v63 = vld [vmem:[%s49651_s1 + $0x2c68] sm:$0xff]  ;;  %v38977_v14 = vld [vmem:[%s49651_s1 + $0x2cd8] sm:$0xff] }
 0x562   :  { %24541 = vmatpush.bf16.msrb.mxu0 %v38925_v57  ;;  %24523 = vmatmul.bf16.vlgmr.msra.gmra.mxu2 %v529_v0  ;;  %v38956_v57 = vld [vmem:[%s49651_s1 + $0x2c30] sm:$0xff]  ;;  %v38979_v0 = vld [vmem:[%s49651_s1 + $0x2ce8] sm:$0xff] }
 0x563   :  { %24567 = vmatpush.bf16.msrb.mxu2 %v38941_v58  ;;  %24510 = vmatmul.bf16.vlgmr.msra.gmra.mxu1 %v528_v3  ;;  %v38972_v58 = vld [vmem:[%s49651_s1 + $0x2cb0] sm:$0xff]  ;;  %v38954_v3 = vld [vmem:[%s49651_s1 + $0x2c20] sm:$0xff] }
 0x564   :  { %24554 = vmatpush.bf16.msrb.mxu1 %v38933_v1  ;;  %24536 = vmatmul.bf16.vlgmr.msra.gmra.mxu3 %v530_v4  ;;  %v38970_v4 = vld [vmem:[%s49651_s1 + $0x2ca0] sm:$0xff] }
 0x565   :  { %24580 = vmatpush.bf16.msrb.mxu3 %v38949_v2  ;;  %v24316_v23 = vpop.f32.mrf.mxu2 }
 0x566   :  { %24542 = vmatpush.bf16.msrb.mxu0 %v38924_v5  ;;  %v24317_v24 = vadd.f32 %v24316_v23, %v24304_v18  ;;  %v24292_v28 = vpop.f32.mrf.mxu0  ;;  %v38952_v18 = vld [vmem:[%s49651_s1 + $0x2c10] sm:$0xff]  ;;  %v38951_v23 = vld [vmem:[%s49651_s1 + $0x2c08] sm:$0xff] }
 0x567   :  { %24568 = vmatpush.bf16.msrb.mxu2 %v38940_v6  ;;  %v24329_v27 = vpop.f32.mrf.mxu3 }
 0x568   :  { %24555 = vmatpush.bf16.msrb.mxu1 %v38932_v7  ;;  %v45089_v29 = vadd.f32 %v24329_v27, %v24317_v24  ;;  %v24305_v32 = vpop.f32.mrf.mxu1  ;;  %v38962_v7 = vld [vmem:[%s49651_s1 + $0x2c60] sm:$0xff]  ;;  %v38967_v24 = vld [vmem:[%s49651_s1 + $0x2c88] sm:$0xff] }
 0x569   :  { %24581 = vmatpush.bf16.msrb.mxu3 %v38948_v8  ;;  %v38978_v8 = vld [vmem:[%s49651_s1 + $0x2ce0] sm:$0xff]  ;;  %v38975_v27 = vld [vmem:[%s49651_s1 + $0x2cc8] sm:$0xff]  ;;  %v199_v32 = vld [vmem:[%s49652_s0 + $0x590] sm:$0xff] }
 0x56a   :  { %24543 = vmatpush.bf16.msrb.mxu0 %v38923_v9  ;;  %v38953_v9 = vld [vmem:[%s49651_s1 + $0x2c18] sm:$0xff] }
 0x56b   :  { %24569 = vmatpush.bf16.msrb.mxu2 %v38939_v10  ;;  %v38969_v10 = vld [vmem:[%s49651_s1 + $0x2c98] sm:$0xff] }
 0x56c   :  { %24556 = vmatpush.bf16.msrb.mxu1 %v38931_v11 }
 0x56d   :  { %24582 = vmatpush.bf16.msrb.mxu3 %v38947_v12  ;;  %v24318_v37 = vpop.f32.mrf.mxu2 }
 0x56e   :  { %24544 = vmatpush.bf16.msrb.mxu0 %v38922_v15  ;;  %v198_v37 = vld [vmem:[%s49652_s0 + $0x588] sm:$0xff] }
 0x56f   :  { %24570 = vmatpush.bf16.msrb.mxu2 %v38938_v16  ;;  %v24331_v40 = vpop.f32.mrf.mxu3  ;;  %v536_v43 = vpack.c.bf16 %v198_v37, %v198_v37  ;;  %v39019_v37 = vld [vmem:[%s49651_s1 + $0x2e28] sm:$0xff] }
 0x570   :  { %24557 = vmatpush.bf16.msrb.mxu1 %v38930_v19  ;;  %v38968_v19 = vld [vmem:[%s49651_s1 + $0x2c90] sm:$0xff]  ;;  %v537_v40 = vpack.c.bf16 %v199_v32, %v199_v32 }
 0x571   :  { %24583 = vmatpush.bf16.msrb.mxu3 %v38946_v20 }
 0x572   :  { %24545 = vmatpush.bf16.msrb.mxu0 %v38921_v21  ;;  %v38960_v21 = vld [vmem:[%s49651_s1 + $0x2c50] sm:$0xff] }
 0x573   :  { %24571 = vmatpush.bf16.msrb.mxu2 %v38937_v22  ;;  %v38976_v22 = vld [vmem:[%s49651_s1 + $0x2cd0] sm:$0xff] }
 0x574   :  { %24558 = vmatpush.bf16.msrb.mxu1 %v38929_v25 }
 0x575   :  { %24584 = vmatpush.bf16.msrb.mxu3 %v38945_v26  ;;  %v38959_v26 = vld [vmem:[%s49651_s1 + $0x2c48] sm:$0xff] }
 0x576   :  { %24546 = vmatpush.bf16.msrb.mxu0 %v38920_v30  ;;  %v38966_v30 = vld [vmem:[%s49651_s1 + $0x2c80] sm:$0xff] }
 0x577   :  { %24572 = vmatpush.bf16.msrb.mxu2 %v38936_v31  ;;  %v197_v31 = vld [vmem:[%s49652_s0 + $0x580] sm:$0xff] }
 0x578   :  { %24559 = vmatpush.bf16.msrb.mxu1 %v38928_v33  ;;  %v38989_v33 = vld [vmem:[%s49651_s1 + $0x2d38] sm:$0xff] }
 0x579   :  { %24585 = vmatpush.bf16.msrb.mxu3 %v38944_v34  ;;  %v39005_v34 = vld [vmem:[%s49651_s1 + $0x2db8] sm:$0xff] }
 0x57a   :  { %24547 = vmatpush.bf16.msrb.mxu0 %v38919_v35  ;;  %v38958_v35 = vld [vmem:[%s49651_s1 + $0x2c40] sm:$0xff] }
 0x57b   :  { %24573 = vmatpush.bf16.msrb.mxu2 %v38935_v36  ;;  %v38974_v36 = vld [vmem:[%s49651_s1 + $0x2cc0] sm:$0xff] }
 0x57c   :  { %24560 = vmatpush.bf16.msrb.mxu1 %v38927_v38  ;;  %v200_v38 = vld [vmem:[%s49652_s0 + $0x598] sm:$0xff] }
 0x57d   :  { %24586 = vmatpush.bf16.msrb.mxu3 %v38943_v39  ;;  %v535_v39 = vpack.c.bf16 %v197_v31, %v197_v31  ;;  %v538_v44 = vpack.c.bf16 %v200_v38, %v200_v38  ;;  %v39035_v38 = vld [vmem:[%s49651_s1 + $0x2ea8] sm:$0xff] }
 0x57e   :  { %24548 = vmatpush.bf16.msrb.mxu0 %v38918_v41  ;;  %v24342_v1 = vpop.f32.mrf.mxu0  ;;  %v38997_v41 = vld [vmem:[%s49651_s1 + $0x2d78] sm:$0xff] }
 0x57f   :  { %24574 = vmatpush.bf16.msrb.mxu2 %v38934_v42  ;;  %v24343_v2 = vadd.f32 %v24342_v1, %v45089_v29  ;;  %v38950_v29 = vld [vmem:[%s49651_s1 + $0x2c00] sm:$0xff]  ;;  %v39013_v42 = vld [vmem:[%s49651_s1 + $0x2df8] sm:$0xff] }
 0x580   :  { %24561 = vmatpush.bf16.msrb.mxu1 %v38926_v47  ;;  %v24355_v5 = vpop.f32.mrf.mxu1  ;;  %v38996_v47 = vld [vmem:[%s49651_s1 + $0x2d70] sm:$0xff]  ;;  %v38993_v1 = vld [vmem:[%s49651_s1 + $0x2d58] sm:$0xff] }
 0x581   :  { %24587 = vmatpush.bf16.msrb.mxu3 %v38942_v48  ;;  %24549 = vmatmul.bf16.vlgmr.msrb.gmra.mxu0 %v531_v51  ;;  %v24356_v6 = vadd.f32 %v24355_v5, %v24343_v2  ;;  %v39012_v48 = vld [vmem:[%s49651_s1 + $0x2df0] sm:$0xff]  ;;  %v38995_v51 = vld [vmem:[%s49651_s1 + $0x2d68] sm:$0xff]  ;;  %v39009_v2 = vld [vmem:[%s49651_s1 + $0x2dd8] sm:$0xff] }
 0x582   :  { %24593 = vmatpush.bf16.msra.mxu0 %v38957_v45  ;;  %24575 = vmatmul.bf16.vlgmr.msrb.gmra.mxu2 %v533_v52  ;;  %v38988_v45 = vld [vmem:[%s49651_s1 + $0x2d30] sm:$0xff]  ;;  %v39011_v52 = vld [vmem:[%s49651_s1 + $0x2de8] sm:$0xff] }
 0x583   :  { %24619 = vmatpush.bf16.msra.mxu2 %v38973_v46  ;;  %24562 = vmatmul.bf16.vlgmr.msrb.gmra.mxu1 %v532_v55  ;;  %v39004_v46 = vld [vmem:[%s49651_s1 + $0x2db0] sm:$0xff]  ;;  %v38986_v55 = vld [vmem:[%s49651_s1 + $0x2d20] sm:$0xff] }
 0x584   :  { %24606 = vmatpush.bf16.msra.mxu1 %v38965_v53  ;;  %24588 = vmatmul.bf16.vlgmr.msrb.gmra.mxu3 %v534_v56  ;;  %v39002_v56 = vld [vmem:[%s49651_s1 + $0x2da0] sm:$0xff] }
 0x585   :  { %24632 = vmatpush.bf16.msra.mxu3 %v38981_v54  ;;  %v24368_v11 = vpop.f32.mrf.mxu2 }
 0x586   :  { %24594 = vmatpush.bf16.msra.mxu0 %v38956_v57  ;;  %v24369_v12 = vadd.f32 %v24368_v11, %v24356_v6  ;;  %v24344_v16 = vpop.f32.mrf.mxu0  ;;  %v38984_v6 = vld [vmem:[%s49651_s1 + $0x2d10] sm:$0xff]  ;;  %v38983_v11 = vld [vmem:[%s49651_s1 + $0x2d08] sm:$0xff] }
 0x587   :  { %24620 = vmatpush.bf16.msra.mxu2 %v38972_v58  ;;  %v24381_v15 = vpop.f32.mrf.mxu3 }
 0x588   :  { %24607 = vmatpush.bf16.msra.mxu1 %v38964_v59  ;;  %v45200_v17 = vadd.f32 %v24381_v15, %v24369_v12  ;;  %v24357_v20 = vpop.f32.mrf.mxu1  ;;  %v38994_v59 = vld [vmem:[%s49651_s1 + $0x2d60] sm:$0xff]  ;;  %v38999_v12 = vld [vmem:[%s49651_s1 + $0x2d88] sm:$0xff] }
 0x589   :  { %24633 = vmatpush.bf16.msra.mxu3 %v38980_v60  ;;  %v39010_v60 = vld [vmem:[%s49651_s1 + $0x2de0] sm:$0xff]  ;;  %v39007_v15 = vld [vmem:[%s49651_s1 + $0x2dc8] sm:$0xff]  ;;  %v203_v20 = vld [vmem:[%s49652_s0 + $0x5b0] sm:$0xff] }
 0x58a   :  { %24595 = vmatpush.bf16.msra.mxu0 %v38955_v61  ;;  %v38985_v61 = vld [vmem:[%s49651_s1 + $0x2d18] sm:$0xff] }
 0x58b   :  { %24621 = vmatpush.bf16.msra.mxu2 %v38971_v62  ;;  %v39001_v62 = vld [vmem:[%s49651_s1 + $0x2d98] sm:$0xff] }
 0x58c   :  { %24608 = vmatpush.bf16.msra.mxu1 %v38963_v63 }
 0x58d   :  { %24634 = vmatpush.bf16.msra.mxu3 %v38979_v0  ;;  %v24370_v25 = vpop.f32.mrf.mxu2 }
 0x58e   :  { %24596 = vmatpush.bf16.msra.mxu0 %v38954_v3  ;;  %v202_v25 = vld [vmem:[%s49652_s0 + $0x5a8] sm:$0xff] }
 0x58f   :  { %24622 = vmatpush.bf16.msra.mxu2 %v38970_v4  ;;  %v24383_v28 = vpop.f32.mrf.mxu3  ;;  %v540_v31 = vpack.c.bf16 %v202_v25, %v202_v25  ;;  %v39051_v25 = vld [vmem:[%s49651_s1 + $0x2f28] sm:$0xff] }
 0x590   :  { %24609 = vmatpush.bf16.msra.mxu1 %v38962_v7  ;;  %v39000_v7 = vld [vmem:[%s49651_s1 + $0x2d90] sm:$0xff]  ;;  %v541_v28 = vpack.c.bf16 %v203_v20, %v203_v20 }
 0x591   :  { %24635 = vmatpush.bf16.msra.mxu3 %v38978_v8 }
 0x592   :  { %24597 = vmatpush.bf16.msra.mxu0 %v38953_v9  ;;  %v38992_v9 = vld [vmem:[%s49651_s1 + $0x2d50] sm:$0xff] }
 0x593   :  { %24623 = vmatpush.bf16.msra.mxu2 %v38969_v10  ;;  %v39008_v10 = vld [vmem:[%s49651_s1 + $0x2dd0] sm:$0xff] }
 0x594   :  { %24610 = vmatpush.bf16.msra.mxu1 %v38961_v13 }
 0x595   :  { %24636 = vmatpush.bf16.msra.mxu3 %v38977_v14  ;;  %v38991_v14 = vld [vmem:[%s49651_s1 + $0x2d48] sm:$0xff] }
 0x596   :  { %24598 = vmatpush.bf16.msra.mxu0 %v38952_v18  ;;  %v38998_v18 = vld [vmem:[%s49651_s1 + $0x2d80] sm:$0xff] }
 0x597   :  { %24624 = vmatpush.bf16.msra.mxu2 %v38968_v19  ;;  %v201_v19 = vld [vmem:[%s49652_s0 + $0x5a0] sm:$0xff] }
 0x598   :  { %24611 = vmatpush.bf16.msra.mxu1 %v38960_v21  ;;  %v39021_v21 = vld [vmem:[%s49651_s1 + $0x2e38] sm:$0xff] }
 0x599   :  { %24637 = vmatpush.bf16.msra.mxu3 %v38976_v22  ;;  %v39037_v22 = vld [vmem:[%s49651_s1 + $0x2eb8] sm:$0xff] }
 0x59a   :  { %24599 = vmatpush.bf16.msra.mxu0 %v38951_v23  ;;  %v38990_v23 = vld [vmem:[%s49651_s1 + $0x2d40] sm:$0xff] }
 0x59b   :  { %24625 = vmatpush.bf16.msra.mxu2 %v38967_v24  ;;  %v39006_v24 = vld [vmem:[%s49651_s1 + $0x2dc0] sm:$0xff] }
 0x59c   :  { %24612 = vmatpush.bf16.msra.mxu1 %v38959_v26  ;;  %v204_v26 = vld [vmem:[%s49652_s0 + $0x5b8] sm:$0xff] }
 0x59d   :  { %24638 = vmatpush.bf16.msra.mxu3 %v38975_v27  ;;  %v539_v27 = vpack.c.bf16 %v201_v19, %v201_v19  ;;  %v542_v32 = vpack.c.bf16 %v204_v26, %v204_v26  ;;  %v39067_v26 = vld [vmem:[%s49651_s1 + $0x2fa8] sm:$0xff] }
 0x59e   :  { %24600 = vmatpush.bf16.msra.mxu0 %v38950_v29  ;;  %v24394_v53 = vpop.f32.mrf.mxu0  ;;  %v39029_v29 = vld [vmem:[%s49651_s1 + $0x2e78] sm:$0xff] }
 0x59f   :  { %24626 = vmatpush.bf16.msra.mxu2 %v38966_v30  ;;  %v24395_v54 = vadd.f32 %v24394_v53, %v45200_v17  ;;  %v38982_v17 = vld [vmem:[%s49651_s1 + $0x2d00] sm:$0xff]  ;;  %v39045_v30 = vld [vmem:[%s49651_s1 + $0x2ef8] sm:$0xff] }
 0x5a0   :  { %24613 = vmatpush.bf16.msra.mxu1 %v38958_v35  ;;  %v24407_v57 = vpop.f32.mrf.mxu1  ;;  %v39028_v35 = vld [vmem:[%s49651_s1 + $0x2e70] sm:$0xff]  ;;  %v39025_v53 = vld [vmem:[%s49651_s1 + $0x2e58] sm:$0xff] }
 0x5a1   :  { %24639 = vmatpush.bf16.msra.mxu3 %v38974_v36  ;;  %24601 = vmatmul.bf16.vlgmr.msra.gmra.mxu0 %v535_v39  ;;  %v24408_v58 = vadd.f32 %v24407_v57, %v24395_v54  ;;  %v39044_v36 = vld [vmem:[%s49651_s1 + $0x2ef0] sm:$0xff]  ;;  %v39027_v39 = vld [vmem:[%s49651_s1 + $0x2e68] sm:$0xff]  ;;  %v39041_v54 = vld [vmem:[%s49651_s1 + $0x2ed8] sm:$0xff] }
 0x5a2   :  { %24645 = vmatpush.bf16.msrb.mxu0 %v38989_v33  ;;  %24627 = vmatmul.bf16.vlgmr.msra.gmra.mxu2 %v537_v40  ;;  %v39020_v33 = vld [vmem:[%s49651_s1 + $0x2e30] sm:$0xff]  ;;  %v39043_v40 = vld [vmem:[%s49651_s1 + $0x2ee8] sm:$0xff] }
 0x5a3   :  { %24671 = vmatpush.bf16.msrb.mxu2 %v39005_v34  ;;  %24614 = vmatmul.bf16.vlgmr.msra.gmra.mxu1 %v536_v43  ;;  %v39036_v34 = vld [vmem:[%s49651_s1 + $0x2eb0] sm:$0xff]  ;;  %v39018_v43 = vld [vmem:[%s49651_s1 + $0x2e20] sm:$0xff] }
 0x5a4   :  { %24658 = vmatpush.bf16.msrb.mxu1 %v38997_v41  ;;  %24640 = vmatmul.bf16.vlgmr.msra.gmra.mxu3 %v538_v44  ;;  %v39034_v44 = vld [vmem:[%s49651_s1 + $0x2ea0] sm:$0xff] }
 0x5a5   :  { %24684 = vmatpush.bf16.msrb.mxu3 %v39013_v42  ;;  %v24420_v63 = vpop.f32.mrf.mxu2 }
 0x5a6   :  { %24646 = vmatpush.bf16.msrb.mxu0 %v38988_v45  ;;  %v24421_v0 = vadd.f32 %v24420_v63, %v24408_v58  ;;  %v24396_v4 = vpop.f32.mrf.mxu0  ;;  %v39016_v58 = vld [vmem:[%s49651_s1 + $0x2e10] sm:$0xff]  ;;  %v39015_v63 = vld [vmem:[%s49651_s1 + $0x2e08] sm:$0xff] }
 0x5a7   :  { %24672 = vmatpush.bf16.msrb.mxu2 %v39004_v46  ;;  %v24433_v3 = vpop.f32.mrf.mxu3 }
 0x5a8   :  { %24659 = vmatpush.bf16.msrb.mxu1 %v38996_v47  ;;  %v45311_v5 = vadd.f32 %v24433_v3, %v24421_v0  ;;  %v24409_v8 = vpop.f32.mrf.mxu1  ;;  %v39026_v47 = vld [vmem:[%s49651_s1 + $0x2e60] sm:$0xff]  ;;  %v39031_v0 = vld [vmem:[%s49651_s1 + $0x2e88] sm:$0xff] }
 0x5a9   :  { %24685 = vmatpush.bf16.msrb.mxu3 %v39012_v48  ;;  %v39042_v48 = vld [vmem:[%s49651_s1 + $0x2ee0] sm:$0xff]  ;;  %v39039_v3 = vld [vmem:[%s49651_s1 + $0x2ec8] sm:$0xff]  ;;  %v207_v8 = vld [vmem:[%s49652_s0 + $0x5d0] sm:$0xff] }
 0x5aa   :  { %24647 = vmatpush.bf16.msrb.mxu0 %v38987_v49  ;;  %v39017_v49 = vld [vmem:[%s49651_s1 + $0x2e18] sm:$0xff] }
 0x5ab   :  { %24673 = vmatpush.bf16.msrb.mxu2 %v39003_v50  ;;  %v39033_v50 = vld [vmem:[%s49651_s1 + $0x2e98] sm:$0xff] }
 0x5ac   :  { %24660 = vmatpush.bf16.msrb.mxu1 %v38995_v51 }
 0x5ad   :  { %24686 = vmatpush.bf16.msrb.mxu3 %v39011_v52  ;;  %v24422_v13 = vpop.f32.mrf.mxu2 }
 0x5ae   :  { %24648 = vmatpush.bf16.msrb.mxu0 %v38986_v55  ;;  %v206_v13 = vld [vmem:[%s49652_s0 + $0x5c8] sm:$0xff] }
 0x5af   :  { %24674 = vmatpush.bf16.msrb.mxu2 %v39002_v56  ;;  %v24435_v16 = vpop.f32.mrf.mxu3  ;;  %v544_v19 = vpack.c.bf16 %v206_v13, %v206_v13  ;;  %v39083_v13 = vld [vmem:[%s49651_s1 + $0x3028] sm:$0xff] }
 0x5b0   :  { %24661 = vmatpush.bf16.msrb.mxu1 %v38994_v59  ;;  %v39032_v59 = vld [vmem:[%s49651_s1 + $0x2e90] sm:$0xff]  ;;  %v545_v16 = vpack.c.bf16 %v207_v8, %v207_v8 }
 0x5b1   :  { %24687 = vmatpush.bf16.msrb.mxu3 %v39010_v60 }
 0x5b2   :  { %24649 = vmatpush.bf16.msrb.mxu0 %v38985_v61  ;;  %v39024_v61 = vld [vmem:[%s49651_s1 + $0x2e50] sm:$0xff] }
 0x5b3   :  { %24675 = vmatpush.bf16.msrb.mxu2 %v39001_v62  ;;  %v39040_v62 = vld [vmem:[%s49651_s1 + $0x2ed0] sm:$0xff] }
 0x5b4   :  { %24662 = vmatpush.bf16.msrb.mxu1 %v38993_v1 }
 0x5b5   :  { %24688 = vmatpush.bf16.msrb.mxu3 %v39009_v2  ;;  %v39023_v2 = vld [vmem:[%s49651_s1 + $0x2e48] sm:$0xff] }
 0x5b6   :  { %24650 = vmatpush.bf16.msrb.mxu0 %v38984_v6  ;;  %v39030_v6 = vld [vmem:[%s49651_s1 + $0x2e80] sm:$0xff] }
 0x5b7   :  { %24676 = vmatpush.bf16.msrb.mxu2 %v39000_v7  ;;  %v205_v7 = vld [vmem:[%s49652_s0 + $0x5c0] sm:$0xff] }
 0x5b8   :  { %24663 = vmatpush.bf16.msrb.mxu1 %v38992_v9  ;;  %v39053_v9 = vld [vmem:[%s49651_s1 + $0x2f38] sm:$0xff] }
 0x5b9   :  { %24689 = vmatpush.bf16.msrb.mxu3 %v39008_v10  ;;  %v39069_v10 = vld [vmem:[%s49651_s1 + $0x2fb8] sm:$0xff] }
 0x5ba   :  { %24651 = vmatpush.bf16.msrb.mxu0 %v38983_v11  ;;  %v39022_v11 = vld [vmem:[%s49651_s1 + $0x2e40] sm:$0xff] }
 0x5bb   :  { %24677 = vmatpush.bf16.msrb.mxu2 %v38999_v12  ;;  %v39038_v12 = vld [vmem:[%s49651_s1 + $0x2ec0] sm:$0xff] }
 0x5bc   :  { %24664 = vmatpush.bf16.msrb.mxu1 %v38991_v14  ;;  %v208_v14 = vld [vmem:[%s49652_s0 + $0x5d8] sm:$0xff] }
 0x5bd   :  { %24690 = vmatpush.bf16.msrb.mxu3 %v39007_v15  ;;  %v543_v15 = vpack.c.bf16 %v205_v7, %v205_v7  ;;  %v546_v20 = vpack.c.bf16 %v208_v14, %v208_v14  ;;  %v39099_v14 = vld [vmem:[%s49651_s1 + $0x30a8] sm:$0xff] }
 0x5be   :  { %24652 = vmatpush.bf16.msrb.mxu0 %v38982_v17  ;;  %v24446_v41 = vpop.f32.mrf.mxu0  ;;  %v39061_v17 = vld [vmem:[%s49651_s1 + $0x2f78] sm:$0xff] }
 0x5bf   :  { %24678 = vmatpush.bf16.msrb.mxu2 %v38998_v18  ;;  %v24447_v42 = vadd.f32 %v24446_v41, %v45311_v5  ;;  %v39014_v5 = vld [vmem:[%s49651_s1 + $0x2e00] sm:$0xff]  ;;  %v39077_v18 = vld [vmem:[%s49651_s1 + $0x2ff8] sm:$0xff] }
 0x5c0   :  { %24665 = vmatpush.bf16.msrb.mxu1 %v38990_v23  ;;  %v24459_v45 = vpop.f32.mrf.mxu1  ;;  %v39060_v23 = vld [vmem:[%s49651_s1 + $0x2f70] sm:$0xff]  ;;  %v39057_v41 = vld [vmem:[%s49651_s1 + $0x2f58] sm:$0xff] }
 0x5c1   :  { %24691 = vmatpush.bf16.msrb.mxu3 %v39006_v24  ;;  %24653 = vmatmul.bf16.vlgmr.msrb.gmra.mxu0 %v539_v27  ;;  %v24460_v46 = vadd.f32 %v24459_v45, %v24447_v42  ;;  %v39076_v24 = vld [vmem:[%s49651_s1 + $0x2ff0] sm:$0xff]  ;;  %v39059_v27 = vld [vmem:[%s49651_s1 + $0x2f68] sm:$0xff]  ;;  %v39073_v42 = vld [vmem:[%s49651_s1 + $0x2fd8] sm:$0xff] }
 0x5c2   :  { %24697 = vmatpush.bf16.msra.mxu0 %v39021_v21  ;;  %24679 = vmatmul.bf16.vlgmr.msrb.gmra.mxu2 %v541_v28  ;;  %v39052_v21 = vld [vmem:[%s49651_s1 + $0x2f30] sm:$0xff]  ;;  %v39075_v28 = vld [vmem:[%s49651_s1 + $0x2fe8] sm:$0xff] }
 0x5c3   :  { %24723 = vmatpush.bf16.msra.mxu2 %v39037_v22  ;;  %24666 = vmatmul.bf16.vlgmr.msrb.gmra.mxu1 %v540_v31  ;;  %v39068_v22 = vld [vmem:[%s49651_s1 + $0x2fb0] sm:$0xff]  ;;  %v39050_v31 = vld [vmem:[%s49651_s1 + $0x2f20] sm:$0xff] }
 0x5c4   :  { %24710 = vmatpush.bf16.msra.mxu1 %v39029_v29  ;;  %24692 = vmatmul.bf16.vlgmr.msrb.gmra.mxu3 %v542_v32  ;;  %v39066_v32 = vld [vmem:[%s49651_s1 + $0x2fa0] sm:$0xff] }
 0x5c5   :  { %24736 = vmatpush.bf16.msra.mxu3 %v39045_v30  ;;  %v24472_v51 = vpop.f32.mrf.mxu2 }
 0x5c6   :  { %24698 = vmatpush.bf16.msra.mxu0 %v39020_v33  ;;  %v24473_v52 = vadd.f32 %v24472_v51, %v24460_v46  ;;  %v24448_v56 = vpop.f32.mrf.mxu0  ;;  %v39048_v46 = vld [vmem:[%s49651_s1 + $0x2f10] sm:$0xff]  ;;  %v39047_v51 = vld [vmem:[%s49651_s1 + $0x2f08] sm:$0xff] }
 0x5c7   :  { %24724 = vmatpush.bf16.msra.mxu2 %v39036_v34  ;;  %v24485_v55 = vpop.f32.mrf.mxu3 }
 0x5c8   :  { %24711 = vmatpush.bf16.msra.mxu1 %v39028_v35  ;;  %v45422_v57 = vadd.f32 %v24485_v55, %v24473_v52  ;;  %v24461_v60 = vpop.f32.mrf.mxu1  ;;  %v39058_v35 = vld [vmem:[%s49651_s1 + $0x2f60] sm:$0xff]  ;;  %v39063_v52 = vld [vmem:[%s49651_s1 + $0x2f88] sm:$0xff] }
 0x5c9   :  { %24737 = vmatpush.bf16.msra.mxu3 %v39044_v36  ;;  %v39074_v36 = vld [vmem:[%s49651_s1 + $0x2fe0] sm:$0xff]  ;;  %v39071_v55 = vld [vmem:[%s49651_s1 + $0x2fc8] sm:$0xff]  ;;  %v211_v60 = vld [vmem:[%s49652_s0 + $0x5f0] sm:$0xff] }
 0x5ca   :  { %24699 = vmatpush.bf16.msra.mxu0 %v39019_v37  ;;  %v39049_v37 = vld [vmem:[%s49651_s1 + $0x2f18] sm:$0xff] }
 0x5cb   :  { %24725 = vmatpush.bf16.msra.mxu2 %v39035_v38  ;;  %v39065_v38 = vld [vmem:[%s49651_s1 + $0x2f98] sm:$0xff] }
 0x5cc   :  { %24712 = vmatpush.bf16.msra.mxu1 %v39027_v39 }
 0x5cd   :  { %24738 = vmatpush.bf16.msra.mxu3 %v39043_v40  ;;  %v24474_v1 = vpop.f32.mrf.mxu2 }
 0x5ce   :  { %24700 = vmatpush.bf16.msra.mxu0 %v39018_v43  ;;  %v210_v1 = vld [vmem:[%s49652_s0 + $0x5e8] sm:$0xff] }
 0x5cf   :  { %24726 = vmatpush.bf16.msra.mxu2 %v39034_v44  ;;  %v24487_v4 = vpop.f32.mrf.mxu3  ;;  %v548_v7 = vpack.c.bf16 %v210_v1, %v210_v1  ;;  %v39115_v1 = vld [vmem:[%s49651_s1 + $0x3128] sm:$0xff] }
 0x5d0   :  { %24713 = vmatpush.bf16.msra.mxu1 %v39026_v47  ;;  %v39064_v47 = vld [vmem:[%s49651_s1 + $0x2f90] sm:$0xff]  ;;  %v549_v4 = vpack.c.bf16 %v211_v60, %v211_v60 }
 0x5d1   :  { %24739 = vmatpush.bf16.msra.mxu3 %v39042_v48 }
 0x5d2   :  { %24701 = vmatpush.bf16.msra.mxu0 %v39017_v49  ;;  %v39056_v49 = vld [vmem:[%s49651_s1 + $0x2f50] sm:$0xff] }
 0x5d3   :  { %24727 = vmatpush.bf16.msra.mxu2 %v39033_v50  ;;  %v39072_v50 = vld [vmem:[%s49651_s1 + $0x2fd0] sm:$0xff] }
 0x5d4   :  { %24714 = vmatpush.bf16.msra.mxu1 %v39025_v53 }
 0x5d5   :  { %24740 = vmatpush.bf16.msra.mxu3 %v39041_v54  ;;  %v39055_v54 = vld [vmem:[%s49651_s1 + $0x2f48] sm:$0xff] }
 0x5d6   :  { %24702 = vmatpush.bf16.msra.mxu0 %v39016_v58  ;;  %v39062_v58 = vld [vmem:[%s49651_s1 + $0x2f80] sm:$0xff] }
 0x5d7   :  { %24728 = vmatpush.bf16.msra.mxu2 %v39032_v59  ;;  %v209_v59 = vld [vmem:[%s49652_s0 + $0x5e0] sm:$0xff] }
 0x5d8   :  { %24715 = vmatpush.bf16.msra.mxu1 %v39024_v61  ;;  %v39085_v61 = vld [vmem:[%s49651_s1 + $0x3038] sm:$0xff] }
 0x5d9   :  { %24741 = vmatpush.bf16.msra.mxu3 %v39040_v62  ;;  %v39101_v62 = vld [vmem:[%s49651_s1 + $0x30b8] sm:$0xff] }
 0x5da   :  { %24703 = vmatpush.bf16.msra.mxu0 %v39015_v63  ;;  %v39054_v63 = vld [vmem:[%s49651_s1 + $0x2f40] sm:$0xff] }
 0x5db   :  { %24729 = vmatpush.bf16.msra.mxu2 %v39031_v0  ;;  %v39070_v0 = vld [vmem:[%s49651_s1 + $0x2fc0] sm:$0xff] }
 0x5dc   :  { %24716 = vmatpush.bf16.msra.mxu1 %v39023_v2  ;;  %v212_v2 = vld [vmem:[%s49652_s0 + $0x5f8] sm:$0xff] }
 0x5dd   :  { %24742 = vmatpush.bf16.msra.mxu3 %v39039_v3  ;;  %v547_v3 = vpack.c.bf16 %v209_v59, %v209_v59  ;;  %v550_v8 = vpack.c.bf16 %v212_v2, %v212_v2  ;;  %v39131_v2 = vld [vmem:[%s49651_s1 + $0x31a8] sm:$0xff] }
 0x5de   :  { %24704 = vmatpush.bf16.msra.mxu0 %v39014_v5  ;;  %v24498_v29 = vpop.f32.mrf.mxu0  ;;  %v39093_v5 = vld [vmem:[%s49651_s1 + $0x3078] sm:$0xff] }
 0x5df   :  { %24730 = vmatpush.bf16.msra.mxu2 %v39030_v6  ;;  %v24499_v30 = vadd.f32 %v24498_v29, %v45422_v57  ;;  %v39046_v57 = vld [vmem:[%s49651_s1 + $0x2f00] sm:$0xff]  ;;  %v39109_v6 = vld [vmem:[%s49651_s1 + $0x30f8] sm:$0xff] }
 0x5e0   :  { %24717 = vmatpush.bf16.msra.mxu1 %v39022_v11  ;;  %v24511_v33 = vpop.f32.mrf.mxu1  ;;  %v39092_v11 = vld [vmem:[%s49651_s1 + $0x3070] sm:$0xff]  ;;  %v39089_v29 = vld [vmem:[%s49651_s1 + $0x3058] sm:$0xff] }
 0x5e1   :  { %24743 = vmatpush.bf16.msra.mxu3 %v39038_v12  ;;  %24705 = vmatmul.bf16.vlgmr.msra.gmra.mxu0 %v543_v15  ;;  %v24512_v34 = vadd.f32 %v24511_v33, %v24499_v30  ;;  %v39108_v12 = vld [vmem:[%s49651_s1 + $0x30f0] sm:$0xff]  ;;  %v39091_v15 = vld [vmem:[%s49651_s1 + $0x3068] sm:$0xff]  ;;  %v39105_v30 = vld [vmem:[%s49651_s1 + $0x30d8] sm:$0xff] }
 0x5e2   :  { %24749 = vmatpush.bf16.msrb.mxu0 %v39053_v9  ;;  %24731 = vmatmul.bf16.vlgmr.msra.gmra.mxu2 %v545_v16  ;;  %v39084_v9 = vld [vmem:[%s49651_s1 + $0x3030] sm:$0xff]  ;;  %v39107_v16 = vld [vmem:[%s49651_s1 + $0x30e8] sm:$0xff] }
 0x5e3   :  { %24775 = vmatpush.bf16.msrb.mxu2 %v39069_v10  ;;  %24718 = vmatmul.bf16.vlgmr.msra.gmra.mxu1 %v544_v19  ;;  %v39100_v10 = vld [vmem:[%s49651_s1 + $0x30b0] sm:$0xff]  ;;  %v39082_v19 = vld [vmem:[%s49651_s1 + $0x3020] sm:$0xff] }
 0x5e4   :  { %24762 = vmatpush.bf16.msrb.mxu1 %v39061_v17  ;;  %24744 = vmatmul.bf16.vlgmr.msra.gmra.mxu3 %v546_v20  ;;  %v39098_v20 = vld [vmem:[%s49651_s1 + $0x30a0] sm:$0xff] }
 0x5e5   :  { %24788 = vmatpush.bf16.msrb.mxu3 %v39077_v18  ;;  %v24524_v39 = vpop.f32.mrf.mxu2 }
 0x5e6   :  { %24750 = vmatpush.bf16.msrb.mxu0 %v39052_v21  ;;  %v24525_v40 = vadd.f32 %v24524_v39, %v24512_v34  ;;  %v24500_v44 = vpop.f32.mrf.mxu0  ;;  %v39080_v34 = vld [vmem:[%s49651_s1 + $0x3010] sm:$0xff]  ;;  %v39079_v39 = vld [vmem:[%s49651_s1 + $0x3008] sm:$0xff] }
 0x5e7   :  { %24776 = vmatpush.bf16.msrb.mxu2 %v39068_v22  ;;  %v24537_v43 = vpop.f32.mrf.mxu3 }
 0x5e8   :  { %24763 = vmatpush.bf16.msrb.mxu1 %v39060_v23  ;;  %v45533_v45 = vadd.f32 %v24537_v43, %v24525_v40  ;;  %v24513_v48 = vpop.f32.mrf.mxu1  ;;  %v39090_v23 = vld [vmem:[%s49651_s1 + $0x3060] sm:$0xff]  ;;  %v39095_v40 = vld [vmem:[%s49651_s1 + $0x3088] sm:$0xff] }
 0x5e9   :  { %24789 = vmatpush.bf16.msrb.mxu3 %v39076_v24  ;;  %v39106_v24 = vld [vmem:[%s49651_s1 + $0x30e0] sm:$0xff]  ;;  %v39103_v43 = vld [vmem:[%s49651_s1 + $0x30c8] sm:$0xff]  ;;  %v215_v48 = vld [vmem:[%s49652_s0 + $0x610] sm:$0xff] }
 0x5ea   :  { %24751 = vmatpush.bf16.msrb.mxu0 %v39051_v25  ;;  %v39081_v25 = vld [vmem:[%s49651_s1 + $0x3018] sm:$0xff] }
 0x5eb   :  { %24777 = vmatpush.bf16.msrb.mxu2 %v39067_v26  ;;  %v39097_v26 = vld [vmem:[%s49651_s1 + $0x3098] sm:$0xff] }
 0x5ec   :  { %24764 = vmatpush.bf16.msrb.mxu1 %v39059_v27 }
 0x5ed   :  { %24790 = vmatpush.bf16.msrb.mxu3 %v39075_v28  ;;  %v24526_v53 = vpop.f32.mrf.mxu2 }
 0x5ee   :  { %24752 = vmatpush.bf16.msrb.mxu0 %v39050_v31  ;;  %v214_v53 = vld [vmem:[%s49652_s0 + $0x608] sm:$0xff] }
 0x5ef   :  { %24778 = vmatpush.bf16.msrb.mxu2 %v39066_v32  ;;  %v24539_v56 = vpop.f32.mrf.mxu3  ;;  %v552_v59 = vpack.c.bf16 %v214_v53, %v214_v53  ;;  %v39147_v53 = vld [vmem:[%s49651_s1 + $0x3228] sm:$0xff] }
 0x5f0   :  { %24765 = vmatpush.bf16.msrb.mxu1 %v39058_v35  ;;  %v39096_v35 = vld [vmem:[%s49651_s1 + $0x3090] sm:$0xff]  ;;  %v553_v56 = vpack.c.bf16 %v215_v48, %v215_v48 }
 0x5f1   :  { %24791 = vmatpush.bf16.msrb.mxu3 %v39074_v36 }
 0x5f2   :  { %24753 = vmatpush.bf16.msrb.mxu0 %v39049_v37  ;;  %v39088_v37 = vld [vmem:[%s49651_s1 + $0x3050] sm:$0xff] }
 0x5f3   :  { %24779 = vmatpush.bf16.msrb.mxu2 %v39065_v38  ;;  %v39104_v38 = vld [vmem:[%s49651_s1 + $0x30d0] sm:$0xff] }
 0x5f4   :  { %24766 = vmatpush.bf16.msrb.mxu1 %v39057_v41 }
 0x5f5   :  { %24792 = vmatpush.bf16.msrb.mxu3 %v39073_v42  ;;  %v39087_v42 = vld [vmem:[%s49651_s1 + $0x3048] sm:$0xff] }
 0x5f6   :  { %24754 = vmatpush.bf16.msrb.mxu0 %v39048_v46  ;;  %v39094_v46 = vld [vmem:[%s49651_s1 + $0x3080] sm:$0xff] }
 0x5f7   :  { %24780 = vmatpush.bf16.msrb.mxu2 %v39064_v47  ;;  %v213_v47 = vld [vmem:[%s49652_s0 + $0x600] sm:$0xff] }
 0x5f8   :  { %24767 = vmatpush.bf16.msrb.mxu1 %v39056_v49  ;;  %v39117_v49 = vld [vmem:[%s49651_s1 + $0x3138] sm:$0xff] }
 0x5f9   :  { %24793 = vmatpush.bf16.msrb.mxu3 %v39072_v50  ;;  %v39133_v50 = vld [vmem:[%s49651_s1 + $0x31b8] sm:$0xff] }
 0x5fa   :  { %24755 = vmatpush.bf16.msrb.mxu0 %v39047_v51  ;;  %v39086_v51 = vld [vmem:[%s49651_s1 + $0x3040] sm:$0xff] }
 0x5fb   :  { %24781 = vmatpush.bf16.msrb.mxu2 %v39063_v52  ;;  %v39102_v52 = vld [vmem:[%s49651_s1 + $0x30c0] sm:$0xff] }
 0x5fc   :  { %24768 = vmatpush.bf16.msrb.mxu1 %v39055_v54  ;;  %v216_v54 = vld [vmem:[%s49652_s0 + $0x618] sm:$0xff] }
 0x5fd   :  { %24794 = vmatpush.bf16.msrb.mxu3 %v39071_v55  ;;  %v551_v55 = vpack.c.bf16 %v213_v47, %v213_v47  ;;  %v554_v60 = vpack.c.bf16 %v216_v54, %v216_v54  ;;  %v39163_v54 = vld [vmem:[%s49651_s1 + $0x32a8] sm:$0xff] }
 0x5fe   :  { %24756 = vmatpush.bf16.msrb.mxu0 %v39046_v57  ;;  %v24550_v17 = vpop.f32.mrf.mxu0  ;;  %v39125_v57 = vld [vmem:[%s49651_s1 + $0x3178] sm:$0xff] }
 0x5ff   :  { %24782 = vmatpush.bf16.msrb.mxu2 %v39062_v58  ;;  %v24551_v18 = vadd.f32 %v24550_v17, %v45533_v45  ;;  %v39078_v45 = vld [vmem:[%s49651_s1 + $0x3000] sm:$0xff]  ;;  %v39141_v58 = vld [vmem:[%s49651_s1 + $0x31f8] sm:$0xff] }
 0x600   :  { %24769 = vmatpush.bf16.msrb.mxu1 %v39054_v63  ;;  %v24563_v21 = vpop.f32.mrf.mxu1  ;;  %v39124_v63 = vld [vmem:[%s49651_s1 + $0x3170] sm:$0xff]  ;;  %v39121_v17 = vld [vmem:[%s49651_s1 + $0x3158] sm:$0xff] }
 0x601   :  { %24795 = vmatpush.bf16.msrb.mxu3 %v39070_v0  ;;  %24757 = vmatmul.bf16.vlgmr.msrb.gmra.mxu0 %v547_v3  ;;  %v24564_v22 = vadd.f32 %v24563_v21, %v24551_v18  ;;  %v39140_v0 = vld [vmem:[%s49651_s1 + $0x31f0] sm:$0xff]  ;;  %v39123_v3 = vld [vmem:[%s49651_s1 + $0x3168] sm:$0xff]  ;;  %v39137_v18 = vld [vmem:[%s49651_s1 + $0x31d8] sm:$0xff] }
 0x602   :  { %24801 = vmatpush.bf16.msra.mxu0 %v39085_v61  ;;  %24783 = vmatmul.bf16.vlgmr.msrb.gmra.mxu2 %v549_v4  ;;  %v39116_v61 = vld [vmem:[%s49651_s1 + $0x3130] sm:$0xff]  ;;  %v39139_v4 = vld [vmem:[%s49651_s1 + $0x31e8] sm:$0xff] }
 0x603   :  { %24827 = vmatpush.bf16.msra.mxu2 %v39101_v62  ;;  %24770 = vmatmul.bf16.vlgmr.msrb.gmra.mxu1 %v548_v7  ;;  %v39132_v62 = vld [vmem:[%s49651_s1 + $0x31b0] sm:$0xff]  ;;  %v39114_v7 = vld [vmem:[%s49651_s1 + $0x3120] sm:$0xff] }
 0x604   :  { %24814 = vmatpush.bf16.msra.mxu1 %v39093_v5  ;;  %24796 = vmatmul.bf16.vlgmr.msrb.gmra.mxu3 %v550_v8  ;;  %v39130_v8 = vld [vmem:[%s49651_s1 + $0x31a0] sm:$0xff] }
 0x605   :  { %24840 = vmatpush.bf16.msra.mxu3 %v39109_v6  ;;  %v24576_v27 = vpop.f32.mrf.mxu2 }
 0x606   :  { %24802 = vmatpush.bf16.msra.mxu0 %v39084_v9  ;;  %v24577_v28 = vadd.f32 %v24576_v27, %v24564_v22  ;;  %v24552_v32 = vpop.f32.mrf.mxu0  ;;  %v39112_v22 = vld [vmem:[%s49651_s1 + $0x3110] sm:$0xff]  ;;  %v39111_v27 = vld [vmem:[%s49651_s1 + $0x3108] sm:$0xff] }
 0x607   :  { %24828 = vmatpush.bf16.msra.mxu2 %v39100_v10  ;;  %v24589_v31 = vpop.f32.mrf.mxu3 }
 0x608   :  { %24815 = vmatpush.bf16.msra.mxu1 %v39092_v11  ;;  %v45644_v33 = vadd.f32 %v24589_v31, %v24577_v28  ;;  %v24565_v36 = vpop.f32.mrf.mxu1  ;;  %v39122_v11 = vld [vmem:[%s49651_s1 + $0x3160] sm:$0xff]  ;;  %v39127_v28 = vld [vmem:[%s49651_s1 + $0x3188] sm:$0xff] }
 0x609   :  { %24841 = vmatpush.bf16.msra.mxu3 %v39108_v12  ;;  %v39138_v12 = vld [vmem:[%s49651_s1 + $0x31e0] sm:$0xff]  ;;  %v39135_v31 = vld [vmem:[%s49651_s1 + $0x31c8] sm:$0xff]  ;;  %v219_v36 = vld [vmem:[%s49652_s0 + $0x630] sm:$0xff] }
 0x60a   :  { %24803 = vmatpush.bf16.msra.mxu0 %v39083_v13  ;;  %v39113_v13 = vld [vmem:[%s49651_s1 + $0x3118] sm:$0xff] }
 0x60b   :  { %24829 = vmatpush.bf16.msra.mxu2 %v39099_v14  ;;  %v39129_v14 = vld [vmem:[%s49651_s1 + $0x3198] sm:$0xff] }
 0x60c   :  { %24816 = vmatpush.bf16.msra.mxu1 %v39091_v15 }
 0x60d   :  { %24842 = vmatpush.bf16.msra.mxu3 %v39107_v16  ;;  %v24578_v41 = vpop.f32.mrf.mxu2 }
 0x60e   :  { %24804 = vmatpush.bf16.msra.mxu0 %v39082_v19  ;;  %v218_v41 = vld [vmem:[%s49652_s0 + $0x628] sm:$0xff] }
 0x60f   :  { %24830 = vmatpush.bf16.msra.mxu2 %v39098_v20  ;;  %v24591_v44 = vpop.f32.mrf.mxu3  ;;  %v556_v47 = vpack.c.bf16 %v218_v41, %v218_v41  ;;  %v39179_v41 = vld [vmem:[%s49651_s1 + $0x3328] sm:$0xff] }
 0x610   :  { %24817 = vmatpush.bf16.msra.mxu1 %v39090_v23  ;;  %v39128_v23 = vld [vmem:[%s49651_s1 + $0x3190] sm:$0xff]  ;;  %v557_v44 = vpack.c.bf16 %v219_v36, %v219_v36 }
 0x611   :  { %24843 = vmatpush.bf16.msra.mxu3 %v39106_v24 }
 0x612   :  { %24805 = vmatpush.bf16.msra.mxu0 %v39081_v25  ;;  %v39120_v25 = vld [vmem:[%s49651_s1 + $0x3150] sm:$0xff] }
 0x613   :  { %24831 = vmatpush.bf16.msra.mxu2 %v39097_v26  ;;  %v39136_v26 = vld [vmem:[%s49651_s1 + $0x31d0] sm:$0xff] }
 0x614   :  { %24818 = vmatpush.bf16.msra.mxu1 %v39089_v29 }
 0x615   :  { %24844 = vmatpush.bf16.msra.mxu3 %v39105_v30  ;;  %v39119_v30 = vld [vmem:[%s49651_s1 + $0x3148] sm:$0xff] }
 0x616   :  { %24806 = vmatpush.bf16.msra.mxu0 %v39080_v34  ;;  %v39126_v34 = vld [vmem:[%s49651_s1 + $0x3180] sm:$0xff] }
 0x617   :  { %24832 = vmatpush.bf16.msra.mxu2 %v39096_v35  ;;  %v217_v35 = vld [vmem:[%s49652_s0 + $0x620] sm:$0xff] }
 0x618   :  { %24819 = vmatpush.bf16.msra.mxu1 %v39088_v37  ;;  %v39149_v37 = vld [vmem:[%s49651_s1 + $0x3238] sm:$0xff] }
 0x619   :  { %24845 = vmatpush.bf16.msra.mxu3 %v39104_v38  ;;  %v39165_v38 = vld [vmem:[%s49651_s1 + $0x32b8] sm:$0xff] }
 0x61a   :  { %24807 = vmatpush.bf16.msra.mxu0 %v39079_v39  ;;  %v39118_v39 = vld [vmem:[%s49651_s1 + $0x3140] sm:$0xff] }
 0x61b   :  { %24833 = vmatpush.bf16.msra.mxu2 %v39095_v40  ;;  %v39134_v40 = vld [vmem:[%s49651_s1 + $0x31c0] sm:$0xff] }
 0x61c   :  { %24820 = vmatpush.bf16.msra.mxu1 %v39087_v42  ;;  %v220_v42 = vld [vmem:[%s49652_s0 + $0x638] sm:$0xff] }
 0x61d   :  { %24846 = vmatpush.bf16.msra.mxu3 %v39103_v43  ;;  %v555_v43 = vpack.c.bf16 %v217_v35, %v217_v35  ;;  %v558_v48 = vpack.c.bf16 %v220_v42, %v220_v42  ;;  %v39195_v42 = vld [vmem:[%s49651_s1 + $0x33a8] sm:$0xff] }
 0x61e   :  { %24808 = vmatpush.bf16.msra.mxu0 %v39078_v45  ;;  %v24602_v5 = vpop.f32.mrf.mxu0  ;;  %v39157_v45 = vld [vmem:[%s49651_s1 + $0x3278] sm:$0xff] }
 0x61f   :  { %24834 = vmatpush.bf16.msra.mxu2 %v39094_v46  ;;  %v24603_v6 = vadd.f32 %v24602_v5, %v45644_v33  ;;  %v39110_v33 = vld [vmem:[%s49651_s1 + $0x3100] sm:$0xff]  ;;  %v39173_v46 = vld [vmem:[%s49651_s1 + $0x32f8] sm:$0xff] }
 0x620   :  { %24821 = vmatpush.bf16.msra.mxu1 %v39086_v51  ;;  %v24615_v9 = vpop.f32.mrf.mxu1  ;;  %v39156_v51 = vld [vmem:[%s49651_s1 + $0x3270] sm:$0xff]  ;;  %v39153_v5 = vld [vmem:[%s49651_s1 + $0x3258] sm:$0xff] }
 0x621   :  { %24847 = vmatpush.bf16.msra.mxu3 %v39102_v52  ;;  %24809 = vmatmul.bf16.vlgmr.msra.gmra.mxu0 %v551_v55  ;;  %v24616_v10 = vadd.f32 %v24615_v9, %v24603_v6  ;;  %v39172_v52 = vld [vmem:[%s49651_s1 + $0x32f0] sm:$0xff]  ;;  %v39155_v55 = vld [vmem:[%s49651_s1 + $0x3268] sm:$0xff]  ;;  %v39169_v6 = vld [vmem:[%s49651_s1 + $0x32d8] sm:$0xff] }
 0x622   :  { %24853 = vmatpush.bf16.msrb.mxu0 %v39117_v49  ;;  %24835 = vmatmul.bf16.vlgmr.msra.gmra.mxu2 %v553_v56  ;;  %v39148_v49 = vld [vmem:[%s49651_s1 + $0x3230] sm:$0xff]  ;;  %v39171_v56 = vld [vmem:[%s49651_s1 + $0x32e8] sm:$0xff] }
 0x623   :  { %24879 = vmatpush.bf16.msrb.mxu2 %v39133_v50  ;;  %24822 = vmatmul.bf16.vlgmr.msra.gmra.mxu1 %v552_v59  ;;  %v39164_v50 = vld [vmem:[%s49651_s1 + $0x32b0] sm:$0xff]  ;;  %v39146_v59 = vld [vmem:[%s49651_s1 + $0x3220] sm:$0xff] }
 0x624   :  { %24866 = vmatpush.bf16.msrb.mxu1 %v39125_v57  ;;  %24848 = vmatmul.bf16.vlgmr.msra.gmra.mxu3 %v554_v60  ;;  %v39162_v60 = vld [vmem:[%s49651_s1 + $0x32a0] sm:$0xff] }
 0x625   :  { %24892 = vmatpush.bf16.msrb.mxu3 %v39141_v58  ;;  %v24628_v15 = vpop.f32.mrf.mxu2 }
 0x626   :  { %24854 = vmatpush.bf16.msrb.mxu0 %v39116_v61  ;;  %v24629_v16 = vadd.f32 %v24628_v15, %v24616_v10  ;;  %v24604_v20 = vpop.f32.mrf.mxu0  ;;  %v39144_v10 = vld [vmem:[%s49651_s1 + $0x3210] sm:$0xff]  ;;  %v39143_v15 = vld [vmem:[%s49651_s1 + $0x3208] sm:$0xff] }
 0x627   :  { %24880 = vmatpush.bf16.msrb.mxu2 %v39132_v62  ;;  %v24641_v19 = vpop.f32.mrf.mxu3 }
 0x628   :  { %24867 = vmatpush.bf16.msrb.mxu1 %v39124_v63  ;;  %v45755_v21 = vadd.f32 %v24641_v19, %v24629_v16  ;;  %v24617_v24 = vpop.f32.mrf.mxu1  ;;  %v39154_v63 = vld [vmem:[%s49651_s1 + $0x3260] sm:$0xff]  ;;  %v39159_v16 = vld [vmem:[%s49651_s1 + $0x3288] sm:$0xff] }
 0x629   :  { %24893 = vmatpush.bf16.msrb.mxu3 %v39140_v0  ;;  %v39170_v0 = vld [vmem:[%s49651_s1 + $0x32e0] sm:$0xff]  ;;  %v39167_v19 = vld [vmem:[%s49651_s1 + $0x32c8] sm:$0xff]  ;;  %v223_v24 = vld [vmem:[%s49652_s0 + $0x650] sm:$0xff] }
 0x62a   :  { %24855 = vmatpush.bf16.msrb.mxu0 %v39115_v1  ;;  %v39145_v1 = vld [vmem:[%s49651_s1 + $0x3218] sm:$0xff] }
 0x62b   :  { %24881 = vmatpush.bf16.msrb.mxu2 %v39131_v2  ;;  %v39161_v2 = vld [vmem:[%s49651_s1 + $0x3298] sm:$0xff] }
 0x62c   :  { %24868 = vmatpush.bf16.msrb.mxu1 %v39123_v3 }
 0x62d   :  { %24894 = vmatpush.bf16.msrb.mxu3 %v39139_v4  ;;  %v24630_v29 = vpop.f32.mrf.mxu2 }
 0x62e   :  { %24856 = vmatpush.bf16.msrb.mxu0 %v39114_v7  ;;  %v222_v29 = vld [vmem:[%s49652_s0 + $0x648] sm:$0xff] }
 0x62f   :  { %24882 = vmatpush.bf16.msrb.mxu2 %v39130_v8  ;;  %v24643_v32 = vpop.f32.mrf.mxu3  ;;  %v560_v35 = vpack.c.bf16 %v222_v29, %v222_v29  ;;  %v39211_v29 = vld [vmem:[%s49651_s1 + $0x3428] sm:$0xff] }
 0x630   :  { %24869 = vmatpush.bf16.msrb.mxu1 %v39122_v11  ;;  %v39160_v11 = vld [vmem:[%s49651_s1 + $0x3290] sm:$0xff]  ;;  %v561_v32 = vpack.c.bf16 %v223_v24, %v223_v24 }
 0x631   :  { %24895 = vmatpush.bf16.msrb.mxu3 %v39138_v12 }
 0x632   :  { %24857 = vmatpush.bf16.msrb.mxu0 %v39113_v13  ;;  %v39152_v13 = vld [vmem:[%s49651_s1 + $0x3250] sm:$0xff] }
 0x633   :  { %24883 = vmatpush.bf16.msrb.mxu2 %v39129_v14  ;;  %v39168_v14 = vld [vmem:[%s49651_s1 + $0x32d0] sm:$0xff] }
 0x634   :  { %24870 = vmatpush.bf16.msrb.mxu1 %v39121_v17 }
 0x635   :  { %24896 = vmatpush.bf16.msrb.mxu3 %v39137_v18  ;;  %v39151_v18 = vld [vmem:[%s49651_s1 + $0x3248] sm:$0xff] }
 0x636   :  { %24858 = vmatpush.bf16.msrb.mxu0 %v39112_v22  ;;  %v39158_v22 = vld [vmem:[%s49651_s1 + $0x3280] sm:$0xff] }
 0x637   :  { %24884 = vmatpush.bf16.msrb.mxu2 %v39128_v23  ;;  %v221_v23 = vld [vmem:[%s49652_s0 + $0x640] sm:$0xff] }
 0x638   :  { %24871 = vmatpush.bf16.msrb.mxu1 %v39120_v25  ;;  %v39181_v25 = vld [vmem:[%s49651_s1 + $0x3338] sm:$0xff] }
 0x639   :  { %24897 = vmatpush.bf16.msrb.mxu3 %v39136_v26  ;;  %v39197_v26 = vld [vmem:[%s49651_s1 + $0x33b8] sm:$0xff] }
 0x63a   :  { %24859 = vmatpush.bf16.msrb.mxu0 %v39111_v27  ;;  %v39150_v27 = vld [vmem:[%s49651_s1 + $0x3240] sm:$0xff] }
 0x63b   :  { %24885 = vmatpush.bf16.msrb.mxu2 %v39127_v28  ;;  %v39166_v28 = vld [vmem:[%s49651_s1 + $0x32c0] sm:$0xff] }
 0x63c   :  { %24872 = vmatpush.bf16.msrb.mxu1 %v39119_v30  ;;  %v224_v30 = vld [vmem:[%s49652_s0 + $0x658] sm:$0xff] }
 0x63d   :  { %24898 = vmatpush.bf16.msrb.mxu3 %v39135_v31  ;;  %v559_v31 = vpack.c.bf16 %v221_v23, %v221_v23  ;;  %v562_v36 = vpack.c.bf16 %v224_v30, %v224_v30  ;;  %v39227_v30 = vld [vmem:[%s49651_s1 + $0x34a8] sm:$0xff] }
 0x63e   :  { %24860 = vmatpush.bf16.msrb.mxu0 %v39110_v33  ;;  %v24654_v57 = vpop.f32.mrf.mxu0  ;;  %v39189_v33 = vld [vmem:[%s49651_s1 + $0x3378] sm:$0xff] }
 0x63f   :  { %24886 = vmatpush.bf16.msrb.mxu2 %v39126_v34  ;;  %v24655_v58 = vadd.f32 %v24654_v57, %v45755_v21  ;;  %v39142_v21 = vld [vmem:[%s49651_s1 + $0x3200] sm:$0xff]  ;;  %v39205_v34 = vld [vmem:[%s49651_s1 + $0x33f8] sm:$0xff] }
 0x640   :  { %24873 = vmatpush.bf16.msrb.mxu1 %v39118_v39  ;;  %v24667_v61 = vpop.f32.mrf.mxu1  ;;  %v39188_v39 = vld [vmem:[%s49651_s1 + $0x3370] sm:$0xff]  ;;  %v39185_v57 = vld [vmem:[%s49651_s1 + $0x3358] sm:$0xff] }
 0x641   :  { %24899 = vmatpush.bf16.msrb.mxu3 %v39134_v40  ;;  %24861 = vmatmul.bf16.vlgmr.msrb.gmra.mxu0 %v555_v43  ;;  %v24668_v62 = vadd.f32 %v24667_v61, %v24655_v58  ;;  %v39204_v40 = vld [vmem:[%s49651_s1 + $0x33f0] sm:$0xff]  ;;  %v39187_v43 = vld [vmem:[%s49651_s1 + $0x3368] sm:$0xff]  ;;  %v39201_v58 = vld [vmem:[%s49651_s1 + $0x33d8] sm:$0xff] }
 0x642   :  { %24905 = vmatpush.bf16.msra.mxu0 %v39149_v37  ;;  %24887 = vmatmul.bf16.vlgmr.msrb.gmra.mxu2 %v557_v44  ;;  %v39180_v37 = vld [vmem:[%s49651_s1 + $0x3330] sm:$0xff]  ;;  %v39203_v44 = vld [vmem:[%s49651_s1 + $0x33e8] sm:$0xff] }
 0x643   :  { %24931 = vmatpush.bf16.msra.mxu2 %v39165_v38  ;;  %24874 = vmatmul.bf16.vlgmr.msrb.gmra.mxu1 %v556_v47  ;;  %v39196_v38 = vld [vmem:[%s49651_s1 + $0x33b0] sm:$0xff]  ;;  %v39178_v47 = vld [vmem:[%s49651_s1 + $0x3320] sm:$0xff] }
 0x644   :  { %24918 = vmatpush.bf16.msra.mxu1 %v39157_v45  ;;  %24900 = vmatmul.bf16.vlgmr.msrb.gmra.mxu3 %v558_v48  ;;  %v39194_v48 = vld [vmem:[%s49651_s1 + $0x33a0] sm:$0xff] }
 0x645   :  { %24944 = vmatpush.bf16.msra.mxu3 %v39173_v46  ;;  %v24680_v3 = vpop.f32.mrf.mxu2 }
 0x646   :  { %24906 = vmatpush.bf16.msra.mxu0 %v39148_v49  ;;  %v24681_v4 = vadd.f32 %v24680_v3, %v24668_v62  ;;  %v24656_v8 = vpop.f32.mrf.mxu0  ;;  %v39176_v62 = vld [vmem:[%s49651_s1 + $0x3310] sm:$0xff]  ;;  %v39175_v3 = vld [vmem:[%s49651_s1 + $0x3308] sm:$0xff] }
 0x647   :  { %24932 = vmatpush.bf16.msra.mxu2 %v39164_v50  ;;  %v24693_v7 = vpop.f32.mrf.mxu3 }
 0x648   :  { %24919 = vmatpush.bf16.msra.mxu1 %v39156_v51  ;;  %v45866_v9 = vadd.f32 %v24693_v7, %v24681_v4  ;;  %v24669_v12 = vpop.f32.mrf.mxu1  ;;  %v39186_v51 = vld [vmem:[%s49651_s1 + $0x3360] sm:$0xff]  ;;  %v39191_v4 = vld [vmem:[%s49651_s1 + $0x3388] sm:$0xff] }
 0x649   :  { %24945 = vmatpush.bf16.msra.mxu3 %v39172_v52  ;;  %v39202_v52 = vld [vmem:[%s49651_s1 + $0x33e0] sm:$0xff]  ;;  %v39199_v7 = vld [vmem:[%s49651_s1 + $0x33c8] sm:$0xff]  ;;  %v227_v12 = vld [vmem:[%s49652_s0 + $0x670] sm:$0xff] }
 0x64a   :  { %24907 = vmatpush.bf16.msra.mxu0 %v39147_v53  ;;  %v39177_v53 = vld [vmem:[%s49651_s1 + $0x3318] sm:$0xff] }
 0x64b   :  { %24933 = vmatpush.bf16.msra.mxu2 %v39163_v54  ;;  %v39193_v54 = vld [vmem:[%s49651_s1 + $0x3398] sm:$0xff] }
 0x64c   :  { %24920 = vmatpush.bf16.msra.mxu1 %v39155_v55 }
 0x64d   :  { %24946 = vmatpush.bf16.msra.mxu3 %v39171_v56  ;;  %v24682_v17 = vpop.f32.mrf.mxu2 }
 0x64e   :  { %24908 = vmatpush.bf16.msra.mxu0 %v39146_v59  ;;  %v226_v17 = vld [vmem:[%s49652_s0 + $0x668] sm:$0xff] }
 0x64f   :  { %24934 = vmatpush.bf16.msra.mxu2 %v39162_v60  ;;  %v24695_v20 = vpop.f32.mrf.mxu3  ;;  %v564_v23 = vpack.c.bf16 %v226_v17, %v226_v17  ;;  %v39243_v17 = vld [vmem:[%s49651_s1 + $0x3528] sm:$0xff] }
 0x650   :  { %24921 = vmatpush.bf16.msra.mxu1 %v39154_v63  ;;  %v39192_v63 = vld [vmem:[%s49651_s1 + $0x3390] sm:$0xff]  ;;  %v565_v20 = vpack.c.bf16 %v227_v12, %v227_v12 }
 0x651   :  { %24947 = vmatpush.bf16.msra.mxu3 %v39170_v0 }
 0x652   :  { %24909 = vmatpush.bf16.msra.mxu0 %v39145_v1  ;;  %v39184_v1 = vld [vmem:[%s49651_s1 + $0x3350] sm:$0xff] }
 0x653   :  { %24935 = vmatpush.bf16.msra.mxu2 %v39161_v2  ;;  %v39200_v2 = vld [vmem:[%s49651_s1 + $0x33d0] sm:$0xff] }
 0x654   :  { %24922 = vmatpush.bf16.msra.mxu1 %v39153_v5 }
 0x655   :  { %24948 = vmatpush.bf16.msra.mxu3 %v39169_v6  ;;  %v39183_v6 = vld [vmem:[%s49651_s1 + $0x3348] sm:$0xff] }
 0x656   :  { %24910 = vmatpush.bf16.msra.mxu0 %v39144_v10  ;;  %v39190_v10 = vld [vmem:[%s49651_s1 + $0x3380] sm:$0xff] }
 0x657   :  { %24936 = vmatpush.bf16.msra.mxu2 %v39160_v11  ;;  %v225_v11 = vld [vmem:[%s49652_s0 + $0x660] sm:$0xff] }
 0x658   :  { %24923 = vmatpush.bf16.msra.mxu1 %v39152_v13  ;;  %v39213_v13 = vld [vmem:[%s49651_s1 + $0x3438] sm:$0xff] }
 0x659   :  { %24949 = vmatpush.bf16.msra.mxu3 %v39168_v14  ;;  %v39229_v14 = vld [vmem:[%s49651_s1 + $0x34b8] sm:$0xff] }
 0x65a   :  { %24911 = vmatpush.bf16.msra.mxu0 %v39143_v15  ;;  %v39182_v15 = vld [vmem:[%s49651_s1 + $0x3340] sm:$0xff] }
 0x65b   :  { %24937 = vmatpush.bf16.msra.mxu2 %v39159_v16  ;;  %v39198_v16 = vld [vmem:[%s49651_s1 + $0x33c0] sm:$0xff] }
 0x65c   :  { %24924 = vmatpush.bf16.msra.mxu1 %v39151_v18  ;;  %v228_v18 = vld [vmem:[%s49652_s0 + $0x678] sm:$0xff] }
 0x65d   :  { %24950 = vmatpush.bf16.msra.mxu3 %v39167_v19  ;;  %v563_v19 = vpack.c.bf16 %v225_v11, %v225_v11  ;;  %v566_v24 = vpack.c.bf16 %v228_v18, %v228_v18  ;;  %v39259_v18 = vld [vmem:[%s49651_s1 + $0x35a8] sm:$0xff] }
 0x65e   :  { %24912 = vmatpush.bf16.msra.mxu0 %v39142_v21  ;;  %v24706_v45 = vpop.f32.mrf.mxu0  ;;  %v39221_v21 = vld [vmem:[%s49651_s1 + $0x3478] sm:$0xff] }
 0x65f   :  { %24938 = vmatpush.bf16.msra.mxu2 %v39158_v22  ;;  %v24707_v46 = vadd.f32 %v24706_v45, %v45866_v9  ;;  %v39174_v9 = vld [vmem:[%s49651_s1 + $0x3300] sm:$0xff]  ;;  %v39237_v22 = vld [vmem:[%s49651_s1 + $0x34f8] sm:$0xff] }
 0x660   :  { %24925 = vmatpush.bf16.msra.mxu1 %v39150_v27  ;;  %v24719_v49 = vpop.f32.mrf.mxu1  ;;  %v39220_v27 = vld [vmem:[%s49651_s1 + $0x3470] sm:$0xff]  ;;  %v39217_v45 = vld [vmem:[%s49651_s1 + $0x3458] sm:$0xff] }
 0x661   :  { %24951 = vmatpush.bf16.msra.mxu3 %v39166_v28  ;;  %24913 = vmatmul.bf16.vlgmr.msra.gmra.mxu0 %v559_v31  ;;  %v24720_v50 = vadd.f32 %v24719_v49, %v24707_v46  ;;  %v39236_v28 = vld [vmem:[%s49651_s1 + $0x34f0] sm:$0xff]  ;;  %v39219_v31 = vld [vmem:[%s49651_s1 + $0x3468] sm:$0xff]  ;;  %v39233_v46 = vld [vmem:[%s49651_s1 + $0x34d8] sm:$0xff] }
 0x662   :  { %24957 = vmatpush.bf16.msrb.mxu0 %v39181_v25  ;;  %24939 = vmatmul.bf16.vlgmr.msra.gmra.mxu2 %v561_v32  ;;  %v39212_v25 = vld [vmem:[%s49651_s1 + $0x3430] sm:$0xff]  ;;  %v39235_v32 = vld [vmem:[%s49651_s1 + $0x34e8] sm:$0xff] }
 0x663   :  { %24983 = vmatpush.bf16.msrb.mxu2 %v39197_v26  ;;  %24926 = vmatmul.bf16.vlgmr.msra.gmra.mxu1 %v560_v35  ;;  %v39228_v26 = vld [vmem:[%s49651_s1 + $0x34b0] sm:$0xff]  ;;  %v39210_v35 = vld [vmem:[%s49651_s1 + $0x3420] sm:$0xff] }
 0x664   :  { %24970 = vmatpush.bf16.msrb.mxu1 %v39189_v33  ;;  %24952 = vmatmul.bf16.vlgmr.msra.gmra.mxu3 %v562_v36  ;;  %v39226_v36 = vld [vmem:[%s49651_s1 + $0x34a0] sm:$0xff] }
 0x665   :  { %24996 = vmatpush.bf16.msrb.mxu3 %v39205_v34  ;;  %v24732_v55 = vpop.f32.mrf.mxu2 }
 0x666   :  { %24958 = vmatpush.bf16.msrb.mxu0 %v39180_v37  ;;  %v24733_v56 = vadd.f32 %v24732_v55, %v24720_v50  ;;  %v24708_v60 = vpop.f32.mrf.mxu0  ;;  %v39208_v50 = vld [vmem:[%s49651_s1 + $0x3410] sm:$0xff]  ;;  %v39207_v55 = vld [vmem:[%s49651_s1 + $0x3408] sm:$0xff] }
 0x667   :  { %24984 = vmatpush.bf16.msrb.mxu2 %v39196_v38  ;;  %v24745_v59 = vpop.f32.mrf.mxu3 }
 0x668   :  { %24971 = vmatpush.bf16.msrb.mxu1 %v39188_v39  ;;  %v45977_v61 = vadd.f32 %v24745_v59, %v24733_v56  ;;  %v24721_v0 = vpop.f32.mrf.mxu1  ;;  %v39218_v39 = vld [vmem:[%s49651_s1 + $0x3460] sm:$0xff]  ;;  %v39223_v56 = vld [vmem:[%s49651_s1 + $0x3488] sm:$0xff] }
 0x669   :  { %24997 = vmatpush.bf16.msrb.mxu3 %v39204_v40  ;;  %v39234_v40 = vld [vmem:[%s49651_s1 + $0x34e0] sm:$0xff]  ;;  %v39231_v59 = vld [vmem:[%s49651_s1 + $0x34c8] sm:$0xff]  ;;  %v231_v0 = vld [vmem:[%s49652_s0 + $0x690] sm:$0xff] }
 0x66a   :  { %24959 = vmatpush.bf16.msrb.mxu0 %v39179_v41  ;;  %v39209_v41 = vld [vmem:[%s49651_s1 + $0x3418] sm:$0xff] }
 0x66b   :  { %24985 = vmatpush.bf16.msrb.mxu2 %v39195_v42  ;;  %v39225_v42 = vld [vmem:[%s49651_s1 + $0x3498] sm:$0xff] }
 0x66c   :  { %24972 = vmatpush.bf16.msrb.mxu1 %v39187_v43 }
 0x66d   :  { %24998 = vmatpush.bf16.msrb.mxu3 %v39203_v44  ;;  %v24734_v5 = vpop.f32.mrf.mxu2 }
 0x66e   :  { %24960 = vmatpush.bf16.msrb.mxu0 %v39178_v47  ;;  %v230_v5 = vld [vmem:[%s49652_s0 + $0x688] sm:$0xff] }
 0x66f   :  { %24986 = vmatpush.bf16.msrb.mxu2 %v39194_v48  ;;  %v24747_v8 = vpop.f32.mrf.mxu3  ;;  %v568_v11 = vpack.c.bf16 %v230_v5, %v230_v5  ;;  %v39275_v5 = vld [vmem:[%s49651_s1 + $0x3628] sm:$0xff] }
 0x670   :  { %24973 = vmatpush.bf16.msrb.mxu1 %v39186_v51  ;;  %v39224_v51 = vld [vmem:[%s49651_s1 + $0x3490] sm:$0xff]  ;;  %v569_v8 = vpack.c.bf16 %v231_v0, %v231_v0 }
 0x671   :  { %24999 = vmatpush.bf16.msrb.mxu3 %v39202_v52 }
 0x672   :  { %24961 = vmatpush.bf16.msrb.mxu0 %v39177_v53  ;;  %v39216_v53 = vld [vmem:[%s49651_s1 + $0x3450] sm:$0xff] }
 0x673   :  { %24987 = vmatpush.bf16.msrb.mxu2 %v39193_v54  ;;  %v39232_v54 = vld [vmem:[%s49651_s1 + $0x34d0] sm:$0xff] }
 0x674   :  { %24974 = vmatpush.bf16.msrb.mxu1 %v39185_v57 }
 0x675   :  { %25000 = vmatpush.bf16.msrb.mxu3 %v39201_v58  ;;  %v39215_v58 = vld [vmem:[%s49651_s1 + $0x3448] sm:$0xff] }
 0x676   :  { %24962 = vmatpush.bf16.msrb.mxu0 %v39176_v62  ;;  %v39222_v62 = vld [vmem:[%s49651_s1 + $0x3480] sm:$0xff] }
 0x677   :  { %24988 = vmatpush.bf16.msrb.mxu2 %v39192_v63  ;;  %v229_v63 = vld [vmem:[%s49652_s0 + $0x680] sm:$0xff] }
 0x678   :  { %24975 = vmatpush.bf16.msrb.mxu1 %v39184_v1  ;;  %v39245_v1 = vld [vmem:[%s49651_s1 + $0x3538] sm:$0xff] }
 0x679   :  { %25001 = vmatpush.bf16.msrb.mxu3 %v39200_v2  ;;  %v39261_v2 = vld [vmem:[%s49651_s1 + $0x35b8] sm:$0xff] }
 0x67a   :  { %24963 = vmatpush.bf16.msrb.mxu0 %v39175_v3  ;;  %v39214_v3 = vld [vmem:[%s49651_s1 + $0x3440] sm:$0xff] }
 0x67b   :  { %24989 = vmatpush.bf16.msrb.mxu2 %v39191_v4  ;;  %v39230_v4 = vld [vmem:[%s49651_s1 + $0x34c0] sm:$0xff] }
 0x67c   :  { %24976 = vmatpush.bf16.msrb.mxu1 %v39183_v6  ;;  %v232_v6 = vld [vmem:[%s49652_s0 + $0x698] sm:$0xff] }
 0x67d   :  { %25002 = vmatpush.bf16.msrb.mxu3 %v39199_v7  ;;  %v567_v7 = vpack.c.bf16 %v229_v63, %v229_v63  ;;  %v570_v12 = vpack.c.bf16 %v232_v6, %v232_v6  ;;  %v39291_v6 = vld [vmem:[%s49651_s1 + $0x36a8] sm:$0xff] }
 0x67e   :  { %24964 = vmatpush.bf16.msrb.mxu0 %v39174_v9  ;;  %v24758_v33 = vpop.f32.mrf.mxu0  ;;  %v39253_v9 = vld [vmem:[%s49651_s1 + $0x3578] sm:$0xff] }
 0x67f   :  { %24990 = vmatpush.bf16.msrb.mxu2 %v39190_v10  ;;  %v24759_v34 = vadd.f32 %v24758_v33, %v45977_v61  ;;  %v39206_v61 = vld [vmem:[%s49651_s1 + $0x3400] sm:$0xff]  ;;  %v39269_v10 = vld [vmem:[%s49651_s1 + $0x35f8] sm:$0xff] }
 0x680   :  { %24977 = vmatpush.bf16.msrb.mxu1 %v39182_v15  ;;  %v24771_v37 = vpop.f32.mrf.mxu1  ;;  %v39252_v15 = vld [vmem:[%s49651_s1 + $0x3570] sm:$0xff]  ;;  %v39249_v33 = vld [vmem:[%s49651_s1 + $0x3558] sm:$0xff] }
 0x681   :  { %25003 = vmatpush.bf16.msrb.mxu3 %v39198_v16  ;;  %24965 = vmatmul.bf16.vlgmr.msrb.gmra.mxu0 %v563_v19  ;;  %v24772_v38 = vadd.f32 %v24771_v37, %v24759_v34  ;;  %v39268_v16 = vld [vmem:[%s49651_s1 + $0x35f0] sm:$0xff]  ;;  %v39251_v19 = vld [vmem:[%s49651_s1 + $0x3568] sm:$0xff]  ;;  %v39265_v34 = vld [vmem:[%s49651_s1 + $0x35d8] sm:$0xff] }
 0x682   :  { %25009 = vmatpush.bf16.msra.mxu0 %v39213_v13  ;;  %24991 = vmatmul.bf16.vlgmr.msrb.gmra.mxu2 %v565_v20  ;;  %v39244_v13 = vld [vmem:[%s49651_s1 + $0x3530] sm:$0xff]  ;;  %v39267_v20 = vld [vmem:[%s49651_s1 + $0x35e8] sm:$0xff] }
 0x683   :  { %25035 = vmatpush.bf16.msra.mxu2 %v39229_v14  ;;  %24978 = vmatmul.bf16.vlgmr.msrb.gmra.mxu1 %v564_v23  ;;  %v39260_v14 = vld [vmem:[%s49651_s1 + $0x35b0] sm:$0xff]  ;;  %v39242_v23 = vld [vmem:[%s49651_s1 + $0x3520] sm:$0xff] }
 0x684   :  { %25022 = vmatpush.bf16.msra.mxu1 %v39221_v21  ;;  %25004 = vmatmul.bf16.vlgmr.msrb.gmra.mxu3 %v566_v24  ;;  %v39258_v24 = vld [vmem:[%s49651_s1 + $0x35a0] sm:$0xff] }
 0x685   :  { %25048 = vmatpush.bf16.msra.mxu3 %v39237_v22  ;;  %v24784_v43 = vpop.f32.mrf.mxu2 }
 0x686   :  { %25010 = vmatpush.bf16.msra.mxu0 %v39212_v25  ;;  %v24785_v44 = vadd.f32 %v24784_v43, %v24772_v38  ;;  %v24760_v48 = vpop.f32.mrf.mxu0  ;;  %v39240_v38 = vld [vmem:[%s49651_s1 + $0x3510] sm:$0xff]  ;;  %v39239_v43 = vld [vmem:[%s49651_s1 + $0x3508] sm:$0xff] }
 0x687   :  { %25036 = vmatpush.bf16.msra.mxu2 %v39228_v26  ;;  %v24797_v47 = vpop.f32.mrf.mxu3 }
 0x688   :  { %25023 = vmatpush.bf16.msra.mxu1 %v39220_v27  ;;  %v46088_v49 = vadd.f32 %v24797_v47, %v24785_v44  ;;  %v24773_v52 = vpop.f32.mrf.mxu1  ;;  %v39250_v27 = vld [vmem:[%s49651_s1 + $0x3560] sm:$0xff]  ;;  %v39255_v44 = vld [vmem:[%s49651_s1 + $0x3588] sm:$0xff] }
 0x689   :  { %25049 = vmatpush.bf16.msra.mxu3 %v39236_v28  ;;  %v39266_v28 = vld [vmem:[%s49651_s1 + $0x35e0] sm:$0xff]  ;;  %v39263_v47 = vld [vmem:[%s49651_s1 + $0x35c8] sm:$0xff]  ;;  %v235_v52 = vld [vmem:[%s49652_s0 + $0x6b0] sm:$0xff] }
 0x68a   :  { %25011 = vmatpush.bf16.msra.mxu0 %v39211_v29  ;;  %v39241_v29 = vld [vmem:[%s49651_s1 + $0x3518] sm:$0xff] }
 0x68b   :  { %25037 = vmatpush.bf16.msra.mxu2 %v39227_v30  ;;  %v39257_v30 = vld [vmem:[%s49651_s1 + $0x3598] sm:$0xff] }
 0x68c   :  { %25024 = vmatpush.bf16.msra.mxu1 %v39219_v31 }
 0x68d   :  { %25050 = vmatpush.bf16.msra.mxu3 %v39235_v32  ;;  %v24786_v57 = vpop.f32.mrf.mxu2 }
 0x68e   :  { %25012 = vmatpush.bf16.msra.mxu0 %v39210_v35  ;;  %v234_v57 = vld [vmem:[%s49652_s0 + $0x6a8] sm:$0xff] }
 0x68f   :  { %25038 = vmatpush.bf16.msra.mxu2 %v39226_v36  ;;  %v24799_v60 = vpop.f32.mrf.mxu3  ;;  %v572_v63 = vpack.c.bf16 %v234_v57, %v234_v57  ;;  %v39307_v57 = vld [vmem:[%s49651_s1 + $0x3728] sm:$0xff] }
 0x690   :  { %25025 = vmatpush.bf16.msra.mxu1 %v39218_v39  ;;  %v39256_v39 = vld [vmem:[%s49651_s1 + $0x3590] sm:$0xff]  ;;  %v573_v60 = vpack.c.bf16 %v235_v52, %v235_v52 }
 0x691   :  { %25051 = vmatpush.bf16.msra.mxu3 %v39234_v40 }
 0x692   :  { %25013 = vmatpush.bf16.msra.mxu0 %v39209_v41  ;;  %v39248_v41 = vld [vmem:[%s49651_s1 + $0x3550] sm:$0xff] }
 0x693   :  { %25039 = vmatpush.bf16.msra.mxu2 %v39225_v42  ;;  %v39264_v42 = vld [vmem:[%s49651_s1 + $0x35d0] sm:$0xff] }
 0x694   :  { %25026 = vmatpush.bf16.msra.mxu1 %v39217_v45 }
 0x695   :  { %25052 = vmatpush.bf16.msra.mxu3 %v39233_v46  ;;  %v39247_v46 = vld [vmem:[%s49651_s1 + $0x3548] sm:$0xff] }
 0x696   :  { %25014 = vmatpush.bf16.msra.mxu0 %v39208_v50  ;;  %v39254_v50 = vld [vmem:[%s49651_s1 + $0x3580] sm:$0xff] }
 0x697   :  { %25040 = vmatpush.bf16.msra.mxu2 %v39224_v51  ;;  %v233_v51 = vld [vmem:[%s49652_s0 + $0x6a0] sm:$0xff] }
 0x698   :  { %25027 = vmatpush.bf16.msra.mxu1 %v39216_v53  ;;  %v39277_v53 = vld [vmem:[%s49651_s1 + $0x3638] sm:$0xff] }
 0x699   :  { %25053 = vmatpush.bf16.msra.mxu3 %v39232_v54  ;;  %v39293_v54 = vld [vmem:[%s49651_s1 + $0x36b8] sm:$0xff] }
 0x69a   :  { %25015 = vmatpush.bf16.msra.mxu0 %v39207_v55  ;;  %v39246_v55 = vld [vmem:[%s49651_s1 + $0x3540] sm:$0xff] }
 0x69b   :  { %25041 = vmatpush.bf16.msra.mxu2 %v39223_v56  ;;  %v39262_v56 = vld [vmem:[%s49651_s1 + $0x35c0] sm:$0xff] }
 0x69c   :  { %25028 = vmatpush.bf16.msra.mxu1 %v39215_v58  ;;  %v236_v58 = vld [vmem:[%s49652_s0 + $0x6b8] sm:$0xff] }
 0x69d   :  { %25054 = vmatpush.bf16.msra.mxu3 %v39231_v59  ;;  %v571_v59 = vpack.c.bf16 %v233_v51, %v233_v51  ;;  %v574_v0 = vpack.c.bf16 %v236_v58, %v236_v58  ;;  %v39323_v58 = vld [vmem:[%s49651_s1 + $0x37a8] sm:$0xff] }
 0x69e   :  { %25016 = vmatpush.bf16.msra.mxu0 %v39206_v61  ;;  %v24810_v21 = vpop.f32.mrf.mxu0  ;;  %v39285_v61 = vld [vmem:[%s49651_s1 + $0x3678] sm:$0xff] }
 0x69f   :  { %25042 = vmatpush.bf16.msra.mxu2 %v39222_v62  ;;  %v24811_v22 = vadd.f32 %v24810_v21, %v46088_v49  ;;  %v39238_v49 = vld [vmem:[%s49651_s1 + $0x3500] sm:$0xff]  ;;  %v39301_v62 = vld [vmem:[%s49651_s1 + $0x36f8] sm:$0xff] }
 0x6a0   :  { %25029 = vmatpush.bf16.msra.mxu1 %v39214_v3  ;;  %v24823_v25 = vpop.f32.mrf.mxu1  ;;  %v39284_v3 = vld [vmem:[%s49651_s1 + $0x3670] sm:$0xff]  ;;  %v39281_v21 = vld [vmem:[%s49651_s1 + $0x3658] sm:$0xff] }
 0x6a1   :  { %25055 = vmatpush.bf16.msra.mxu3 %v39230_v4  ;;  %25017 = vmatmul.bf16.vlgmr.msra.gmra.mxu0 %v567_v7  ;;  %v24824_v26 = vadd.f32 %v24823_v25, %v24811_v22  ;;  %v39300_v4 = vld [vmem:[%s49651_s1 + $0x36f0] sm:$0xff]  ;;  %v39283_v7 = vld [vmem:[%s49651_s1 + $0x3668] sm:$0xff]  ;;  %v39297_v22 = vld [vmem:[%s49651_s1 + $0x36d8] sm:$0xff] }
 0x6a2   :  { %25061 = vmatpush.bf16.msrb.mxu0 %v39245_v1  ;;  %25043 = vmatmul.bf16.vlgmr.msra.gmra.mxu2 %v569_v8  ;;  %v39276_v1 = vld [vmem:[%s49651_s1 + $0x3630] sm:$0xff]  ;;  %v39299_v8 = vld [vmem:[%s49651_s1 + $0x36e8] sm:$0xff] }
 0x6a3   :  { %25087 = vmatpush.bf16.msrb.mxu2 %v39261_v2  ;;  %25030 = vmatmul.bf16.vlgmr.msra.gmra.mxu1 %v568_v11  ;;  %v39292_v2 = vld [vmem:[%s49651_s1 + $0x36b0] sm:$0xff]  ;;  %v39274_v11 = vld [vmem:[%s49651_s1 + $0x3620] sm:$0xff] }
 0x6a4   :  { %25074 = vmatpush.bf16.msrb.mxu1 %v39253_v9  ;;  %25056 = vmatmul.bf16.vlgmr.msra.gmra.mxu3 %v570_v12  ;;  %v39290_v12 = vld [vmem:[%s49651_s1 + $0x36a0] sm:$0xff] }
 0x6a5   :  { %25100 = vmatpush.bf16.msrb.mxu3 %v39269_v10  ;;  %v24836_v31 = vpop.f32.mrf.mxu2 }
 0x6a6   :  { %25062 = vmatpush.bf16.msrb.mxu0 %v39244_v13  ;;  %v24837_v32 = vadd.f32 %v24836_v31, %v24824_v26  ;;  %v24812_v36 = vpop.f32.mrf.mxu0  ;;  %v39272_v26 = vld [vmem:[%s49651_s1 + $0x3610] sm:$0xff]  ;;  %v39271_v31 = vld [vmem:[%s49651_s1 + $0x3608] sm:$0xff] }
 0x6a7   :  { %25088 = vmatpush.bf16.msrb.mxu2 %v39260_v14  ;;  %v24849_v35 = vpop.f32.mrf.mxu3 }
 0x6a8   :  { %25075 = vmatpush.bf16.msrb.mxu1 %v39252_v15  ;;  %v46199_v37 = vadd.f32 %v24849_v35, %v24837_v32  ;;  %v24825_v40 = vpop.f32.mrf.mxu1  ;;  %v39282_v15 = vld [vmem:[%s49651_s1 + $0x3660] sm:$0xff]  ;;  %v39287_v32 = vld [vmem:[%s49651_s1 + $0x3688] sm:$0xff] }
 0x6a9   :  { %25101 = vmatpush.bf16.msrb.mxu3 %v39268_v16  ;;  %v39298_v16 = vld [vmem:[%s49651_s1 + $0x36e0] sm:$0xff]  ;;  %v39295_v35 = vld [vmem:[%s49651_s1 + $0x36c8] sm:$0xff]  ;;  %v239_v40 = vld [vmem:[%s49652_s0 + $0x6d0] sm:$0xff] }
 0x6aa   :  { %25063 = vmatpush.bf16.msrb.mxu0 %v39243_v17  ;;  %v39273_v17 = vld [vmem:[%s49651_s1 + $0x3618] sm:$0xff] }
 0x6ab   :  { %25089 = vmatpush.bf16.msrb.mxu2 %v39259_v18  ;;  %v39289_v18 = vld [vmem:[%s49651_s1 + $0x3698] sm:$0xff] }
 0x6ac   :  { %25076 = vmatpush.bf16.msrb.mxu1 %v39251_v19 }
 0x6ad   :  { %25102 = vmatpush.bf16.msrb.mxu3 %v39267_v20  ;;  %v24838_v45 = vpop.f32.mrf.mxu2 }
 0x6ae   :  { %25064 = vmatpush.bf16.msrb.mxu0 %v39242_v23  ;;  %v238_v45 = vld [vmem:[%s49652_s0 + $0x6c8] sm:$0xff] }
 0x6af   :  { %25090 = vmatpush.bf16.msrb.mxu2 %v39258_v24  ;;  %v24851_v48 = vpop.f32.mrf.mxu3  ;;  %v576_v51 = vpack.c.bf16 %v238_v45, %v238_v45  ;;  %v39339_v45 = vld [vmem:[%s49651_s1 + $0x3828] sm:$0xff] }
 0x6b0   :  { %25077 = vmatpush.bf16.msrb.mxu1 %v39250_v27  ;;  %v39288_v27 = vld [vmem:[%s49651_s1 + $0x3690] sm:$0xff]  ;;  %v577_v48 = vpack.c.bf16 %v239_v40, %v239_v40 }
 0x6b1   :  { %25103 = vmatpush.bf16.msrb.mxu3 %v39266_v28 }
 0x6b2   :  { %25065 = vmatpush.bf16.msrb.mxu0 %v39241_v29  ;;  %v39280_v29 = vld [vmem:[%s49651_s1 + $0x3650] sm:$0xff] }
 0x6b3   :  { %25091 = vmatpush.bf16.msrb.mxu2 %v39257_v30  ;;  %v39296_v30 = vld [vmem:[%s49651_s1 + $0x36d0] sm:$0xff] }
 0x6b4   :  { %25078 = vmatpush.bf16.msrb.mxu1 %v39249_v33 }
 0x6b5   :  { %25104 = vmatpush.bf16.msrb.mxu3 %v39265_v34  ;;  %v39279_v34 = vld [vmem:[%s49651_s1 + $0x3648] sm:$0xff] }
 0x6b6   :  { %25066 = vmatpush.bf16.msrb.mxu0 %v39240_v38  ;;  %v39286_v38 = vld [vmem:[%s49651_s1 + $0x3680] sm:$0xff] }
 0x6b7   :  { %25092 = vmatpush.bf16.msrb.mxu2 %v39256_v39  ;;  %v237_v39 = vld [vmem:[%s49652_s0 + $0x6c0] sm:$0xff] }
 0x6b8   :  { %25079 = vmatpush.bf16.msrb.mxu1 %v39248_v41  ;;  %v39309_v41 = vld [vmem:[%s49651_s1 + $0x3738] sm:$0xff] }
 0x6b9   :  { %25105 = vmatpush.bf16.msrb.mxu3 %v39264_v42  ;;  %v39325_v42 = vld [vmem:[%s49651_s1 + $0x37b8] sm:$0xff] }
 0x6ba   :  { %25067 = vmatpush.bf16.msrb.mxu0 %v39239_v43  ;;  %v39278_v43 = vld [vmem:[%s49651_s1 + $0x3640] sm:$0xff] }
 0x6bb   :  { %25093 = vmatpush.bf16.msrb.mxu2 %v39255_v44  ;;  %v39294_v44 = vld [vmem:[%s49651_s1 + $0x36c0] sm:$0xff] }
 0x6bc   :  { %25080 = vmatpush.bf16.msrb.mxu1 %v39247_v46  ;;  %v240_v46 = vld [vmem:[%s49652_s0 + $0x6d8] sm:$0xff] }
 0x6bd   :  { %25106 = vmatpush.bf16.msrb.mxu3 %v39263_v47  ;;  %v575_v47 = vpack.c.bf16 %v237_v39, %v237_v39  ;;  %v578_v52 = vpack.c.bf16 %v240_v46, %v240_v46  ;;  %v39355_v46 = vld [vmem:[%s49651_s1 + $0x38a8] sm:$0xff] }
 0x6be   :  { %25068 = vmatpush.bf16.msrb.mxu0 %v39238_v49  ;;  %v24862_v9 = vpop.f32.mrf.mxu0  ;;  %v39317_v49 = vld [vmem:[%s49651_s1 + $0x3778] sm:$0xff] }
 0x6bf   :  { %25094 = vmatpush.bf16.msrb.mxu2 %v39254_v50  ;;  %v24863_v10 = vadd.f32 %v24862_v9, %v46199_v37  ;;  %v39270_v37 = vld [vmem:[%s49651_s1 + $0x3600] sm:$0xff]  ;;  %v39333_v50 = vld [vmem:[%s49651_s1 + $0x37f8] sm:$0xff] }
 0x6c0   :  { %25081 = vmatpush.bf16.msrb.mxu1 %v39246_v55  ;;  %v24875_v13 = vpop.f32.mrf.mxu1  ;;  %v39316_v55 = vld [vmem:[%s49651_s1 + $0x3770] sm:$0xff]  ;;  %v39313_v9 = vld [vmem:[%s49651_s1 + $0x3758] sm:$0xff] }
 0x6c1   :  { %25107 = vmatpush.bf16.msrb.mxu3 %v39262_v56  ;;  %25069 = vmatmul.bf16.vlgmr.msrb.gmra.mxu0 %v571_v59  ;;  %v24876_v14 = vadd.f32 %v24875_v13, %v24863_v10  ;;  %v39332_v56 = vld [vmem:[%s49651_s1 + $0x37f0] sm:$0xff]  ;;  %v39315_v59 = vld [vmem:[%s49651_s1 + $0x3768] sm:$0xff]  ;;  %v39329_v10 = vld [vmem:[%s49651_s1 + $0x37d8] sm:$0xff] }
 0x6c2   :  { %25113 = vmatpush.bf16.msra.mxu0 %v39277_v53  ;;  %25095 = vmatmul.bf16.vlgmr.msrb.gmra.mxu2 %v573_v60  ;;  %v39308_v53 = vld [vmem:[%s49651_s1 + $0x3730] sm:$0xff]  ;;  %v39331_v60 = vld [vmem:[%s49651_s1 + $0x37e8] sm:$0xff] }
 0x6c3   :  { %25139 = vmatpush.bf16.msra.mxu2 %v39293_v54  ;;  %25082 = vmatmul.bf16.vlgmr.msrb.gmra.mxu1 %v572_v63  ;;  %v39324_v54 = vld [vmem:[%s49651_s1 + $0x37b0] sm:$0xff]  ;;  %v39306_v63 = vld [vmem:[%s49651_s1 + $0x3720] sm:$0xff] }
 0x6c4   :  { %25126 = vmatpush.bf16.msra.mxu1 %v39285_v61  ;;  %25108 = vmatmul.bf16.vlgmr.msrb.gmra.mxu3 %v574_v0  ;;  %v39322_v0 = vld [vmem:[%s49651_s1 + $0x37a0] sm:$0xff] }
 0x6c5   :  { %25152 = vmatpush.bf16.msra.mxu3 %v39301_v62  ;;  %v24888_v19 = vpop.f32.mrf.mxu2 }
 0x6c6   :  { %25114 = vmatpush.bf16.msra.mxu0 %v39276_v1  ;;  %v24889_v20 = vadd.f32 %v24888_v19, %v24876_v14  ;;  %v24864_v24 = vpop.f32.mrf.mxu0  ;;  %v39304_v14 = vld [vmem:[%s49651_s1 + $0x3710] sm:$0xff]  ;;  %v39303_v19 = vld [vmem:[%s49651_s1 + $0x3708] sm:$0xff] }
 0x6c7   :  { %25140 = vmatpush.bf16.msra.mxu2 %v39292_v2  ;;  %v24901_v23 = vpop.f32.mrf.mxu3 }
 0x6c8   :  { %25127 = vmatpush.bf16.msra.mxu1 %v39284_v3  ;;  %v46310_v25 = vadd.f32 %v24901_v23, %v24889_v20  ;;  %v24877_v28 = vpop.f32.mrf.mxu1  ;;  %v39314_v3 = vld [vmem:[%s49651_s1 + $0x3760] sm:$0xff]  ;;  %v39319_v20 = vld [vmem:[%s49651_s1 + $0x3788] sm:$0xff] }
 0x6c9   :  { %25153 = vmatpush.bf16.msra.mxu3 %v39300_v4  ;;  %v39330_v4 = vld [vmem:[%s49651_s1 + $0x37e0] sm:$0xff]  ;;  %v39327_v23 = vld [vmem:[%s49651_s1 + $0x37c8] sm:$0xff]  ;;  %v243_v28 = vld [vmem:[%s49652_s0 + $0x6f0] sm:$0xff] }
 0x6ca   :  { %25115 = vmatpush.bf16.msra.mxu0 %v39275_v5  ;;  %v39305_v5 = vld [vmem:[%s49651_s1 + $0x3718] sm:$0xff] }
 0x6cb   :  { %25141 = vmatpush.bf16.msra.mxu2 %v39291_v6  ;;  %v39321_v6 = vld [vmem:[%s49651_s1 + $0x3798] sm:$0xff] }
 0x6cc   :  { %25128 = vmatpush.bf16.msra.mxu1 %v39283_v7 }
 0x6cd   :  { %25154 = vmatpush.bf16.msra.mxu3 %v39299_v8  ;;  %v24890_v33 = vpop.f32.mrf.mxu2 }
 0x6ce   :  { %25116 = vmatpush.bf16.msra.mxu0 %v39274_v11  ;;  %v242_v33 = vld [vmem:[%s49652_s0 + $0x6e8] sm:$0xff] }
 0x6cf   :  { %25142 = vmatpush.bf16.msra.mxu2 %v39290_v12  ;;  %v24903_v36 = vpop.f32.mrf.mxu3  ;;  %v580_v39 = vpack.c.bf16 %v242_v33, %v242_v33  ;;  %v39371_v33 = vld [vmem:[%s49651_s1 + $0x3928] sm:$0xff] }
 0x6d0   :  { %25129 = vmatpush.bf16.msra.mxu1 %v39282_v15  ;;  %v39320_v15 = vld [vmem:[%s49651_s1 + $0x3790] sm:$0xff]  ;;  %v581_v36 = vpack.c.bf16 %v243_v28, %v243_v28 }
 0x6d1   :  { %25155 = vmatpush.bf16.msra.mxu3 %v39298_v16 }
 0x6d2   :  { %25117 = vmatpush.bf16.msra.mxu0 %v39273_v17  ;;  %v39312_v17 = vld [vmem:[%s49651_s1 + $0x3750] sm:$0xff] }
 0x6d3   :  { %25143 = vmatpush.bf16.msra.mxu2 %v39289_v18  ;;  %v39328_v18 = vld [vmem:[%s49651_s1 + $0x37d0] sm:$0xff] }
 0x6d4   :  { %25130 = vmatpush.bf16.msra.mxu1 %v39281_v21 }
 0x6d5   :  { %25156 = vmatpush.bf16.msra.mxu3 %v39297_v22  ;;  %v39311_v22 = vld [vmem:[%s49651_s1 + $0x3748] sm:$0xff] }
 0x6d6   :  { %25118 = vmatpush.bf16.msra.mxu0 %v39272_v26  ;;  %v39318_v26 = vld [vmem:[%s49651_s1 + $0x3780] sm:$0xff] }
 0x6d7   :  { %25144 = vmatpush.bf16.msra.mxu2 %v39288_v27  ;;  %v241_v27 = vld [vmem:[%s49652_s0 + $0x6e0] sm:$0xff] }
 0x6d8   :  { %25131 = vmatpush.bf16.msra.mxu1 %v39280_v29  ;;  %v39341_v29 = vld [vmem:[%s49651_s1 + $0x3838] sm:$0xff] }
 0x6d9   :  { %25157 = vmatpush.bf16.msra.mxu3 %v39296_v30  ;;  %v39357_v30 = vld [vmem:[%s49651_s1 + $0x38b8] sm:$0xff] }
 0x6da   :  { %25119 = vmatpush.bf16.msra.mxu0 %v39271_v31  ;;  %v39310_v31 = vld [vmem:[%s49651_s1 + $0x3740] sm:$0xff] }
 0x6db   :  { %25145 = vmatpush.bf16.msra.mxu2 %v39287_v32  ;;  %v39326_v32 = vld [vmem:[%s49651_s1 + $0x37c0] sm:$0xff] }
 0x6dc   :  { %25132 = vmatpush.bf16.msra.mxu1 %v39279_v34  ;;  %v244_v34 = vld [vmem:[%s49652_s0 + $0x6f8] sm:$0xff] }
 0x6dd   :  { %25158 = vmatpush.bf16.msra.mxu3 %v39295_v35  ;;  %v579_v35 = vpack.c.bf16 %v241_v27, %v241_v27  ;;  %v582_v40 = vpack.c.bf16 %v244_v34, %v244_v34  ;;  %v39387_v34 = vld [vmem:[%s49651_s1 + $0x39a8] sm:$0xff] }
 0x6de   :  { %25120 = vmatpush.bf16.msra.mxu0 %v39270_v37  ;;  %v24914_v61 = vpop.f32.mrf.mxu0  ;;  %v39349_v37 = vld [vmem:[%s49651_s1 + $0x3878] sm:$0xff] }
 0x6df   :  { %25146 = vmatpush.bf16.msra.mxu2 %v39286_v38  ;;  %v24915_v62 = vadd.f32 %v24914_v61, %v46310_v25  ;;  %v39302_v25 = vld [vmem:[%s49651_s1 + $0x3700] sm:$0xff]  ;;  %v39365_v38 = vld [vmem:[%s49651_s1 + $0x38f8] sm:$0xff] }
 0x6e0   :  { %25133 = vmatpush.bf16.msra.mxu1 %v39278_v43  ;;  %v24927_v1 = vpop.f32.mrf.mxu1  ;;  %v39348_v43 = vld [vmem:[%s49651_s1 + $0x3870] sm:$0xff]  ;;  %v39345_v61 = vld [vmem:[%s49651_s1 + $0x3858] sm:$0xff] }
 0x6e1   :  { %25159 = vmatpush.bf16.msra.mxu3 %v39294_v44  ;;  %25121 = vmatmul.bf16.vlgmr.msra.gmra.mxu0 %v575_v47  ;;  %v24928_v2 = vadd.f32 %v24927_v1, %v24915_v62  ;;  %v39364_v44 = vld [vmem:[%s49651_s1 + $0x38f0] sm:$0xff]  ;;  %v39347_v47 = vld [vmem:[%s49651_s1 + $0x3868] sm:$0xff]  ;;  %v39361_v62 = vld [vmem:[%s49651_s1 + $0x38d8] sm:$0xff] }
 0x6e2   :  { %25165 = vmatpush.bf16.msrb.mxu0 %v39309_v41  ;;  %25147 = vmatmul.bf16.vlgmr.msra.gmra.mxu2 %v577_v48  ;;  %v39340_v41 = vld [vmem:[%s49651_s1 + $0x3830] sm:$0xff]  ;;  %v39363_v48 = vld [vmem:[%s49651_s1 + $0x38e8] sm:$0xff] }
 0x6e3   :  { %25191 = vmatpush.bf16.msrb.mxu2 %v39325_v42  ;;  %25134 = vmatmul.bf16.vlgmr.msra.gmra.mxu1 %v576_v51  ;;  %v39356_v42 = vld [vmem:[%s49651_s1 + $0x38b0] sm:$0xff]  ;;  %v39338_v51 = vld [vmem:[%s49651_s1 + $0x3820] sm:$0xff] }
 0x6e4   :  { %25178 = vmatpush.bf16.msrb.mxu1 %v39317_v49  ;;  %25160 = vmatmul.bf16.vlgmr.msra.gmra.mxu3 %v578_v52  ;;  %v39354_v52 = vld [vmem:[%s49651_s1 + $0x38a0] sm:$0xff] }
 0x6e5   :  { %25204 = vmatpush.bf16.msrb.mxu3 %v39333_v50  ;;  %v24940_v7 = vpop.f32.mrf.mxu2 }
 0x6e6   :  { %25166 = vmatpush.bf16.msrb.mxu0 %v39308_v53  ;;  %v24941_v8 = vadd.f32 %v24940_v7, %v24928_v2  ;;  %v24916_v12 = vpop.f32.mrf.mxu0  ;;  %v39336_v2 = vld [vmem:[%s49651_s1 + $0x3810] sm:$0xff]  ;;  %v39335_v7 = vld [vmem:[%s49651_s1 + $0x3808] sm:$0xff] }
 0x6e7   :  { %25192 = vmatpush.bf16.msrb.mxu2 %v39324_v54  ;;  %v24953_v11 = vpop.f32.mrf.mxu3 }
 0x6e8   :  { %25179 = vmatpush.bf16.msrb.mxu1 %v39316_v55  ;;  %v46421_v13 = vadd.f32 %v24953_v11, %v24941_v8  ;;  %v24929_v16 = vpop.f32.mrf.mxu1  ;;  %v39346_v55 = vld [vmem:[%s49651_s1 + $0x3860] sm:$0xff]  ;;  %v39351_v8 = vld [vmem:[%s49651_s1 + $0x3888] sm:$0xff] }
 0x6e9   :  { %25205 = vmatpush.bf16.msrb.mxu3 %v39332_v56  ;;  %v39362_v56 = vld [vmem:[%s49651_s1 + $0x38e0] sm:$0xff]  ;;  %v39359_v11 = vld [vmem:[%s49651_s1 + $0x38c8] sm:$0xff]  ;;  %v247_v16 = vld [vmem:[%s49652_s0 + $0x710] sm:$0xff] }
 0x6ea   :  { %25167 = vmatpush.bf16.msrb.mxu0 %v39307_v57  ;;  %v39337_v57 = vld [vmem:[%s49651_s1 + $0x3818] sm:$0xff] }
 0x6eb   :  { %25193 = vmatpush.bf16.msrb.mxu2 %v39323_v58  ;;  %v39353_v58 = vld [vmem:[%s49651_s1 + $0x3898] sm:$0xff] }
 0x6ec   :  { %25180 = vmatpush.bf16.msrb.mxu1 %v39315_v59 }
 0x6ed   :  { %25206 = vmatpush.bf16.msrb.mxu3 %v39331_v60  ;;  %v24942_v21 = vpop.f32.mrf.mxu2 }
 0x6ee   :  { %25168 = vmatpush.bf16.msrb.mxu0 %v39306_v63  ;;  %v246_v21 = vld [vmem:[%s49652_s0 + $0x708] sm:$0xff] }
 0x6ef   :  { %25194 = vmatpush.bf16.msrb.mxu2 %v39322_v0  ;;  %v24955_v24 = vpop.f32.mrf.mxu3  ;;  %v584_v27 = vpack.c.bf16 %v246_v21, %v246_v21  ;;  %v39403_v21 = vld [vmem:[%s49651_s1 + $0x3a28] sm:$0xff] }
 0x6f0   :  { %25181 = vmatpush.bf16.msrb.mxu1 %v39314_v3  ;;  %v39352_v3 = vld [vmem:[%s49651_s1 + $0x3890] sm:$0xff]  ;;  %v585_v24 = vpack.c.bf16 %v247_v16, %v247_v16 }
 0x6f1   :  { %25207 = vmatpush.bf16.msrb.mxu3 %v39330_v4 }
 0x6f2   :  { %25169 = vmatpush.bf16.msrb.mxu0 %v39305_v5  ;;  %v39344_v5 = vld [vmem:[%s49651_s1 + $0x3850] sm:$0xff] }
 0x6f3   :  { %25195 = vmatpush.bf16.msrb.mxu2 %v39321_v6  ;;  %v39360_v6 = vld [vmem:[%s49651_s1 + $0x38d0] sm:$0xff] }
 0x6f4   :  { %25182 = vmatpush.bf16.msrb.mxu1 %v39313_v9 }
 0x6f5   :  { %25208 = vmatpush.bf16.msrb.mxu3 %v39329_v10  ;;  %v39343_v10 = vld [vmem:[%s49651_s1 + $0x3848] sm:$0xff] }
 0x6f6   :  { %25170 = vmatpush.bf16.msrb.mxu0 %v39304_v14  ;;  %v39350_v14 = vld [vmem:[%s49651_s1 + $0x3880] sm:$0xff] }
 0x6f7   :  { %25196 = vmatpush.bf16.msrb.mxu2 %v39320_v15  ;;  %v245_v15 = vld [vmem:[%s49652_s0 + $0x700] sm:$0xff] }
 0x6f8   :  { %25183 = vmatpush.bf16.msrb.mxu1 %v39312_v17  ;;  %v39373_v17 = vld [vmem:[%s49651_s1 + $0x3938] sm:$0xff] }
 0x6f9   :  { %25209 = vmatpush.bf16.msrb.mxu3 %v39328_v18  ;;  %v39389_v18 = vld [vmem:[%s49651_s1 + $0x39b8] sm:$0xff] }
 0x6fa   :  { %25171 = vmatpush.bf16.msrb.mxu0 %v39303_v19  ;;  %v39342_v19 = vld [vmem:[%s49651_s1 + $0x3840] sm:$0xff] }
 0x6fb   :  { %25197 = vmatpush.bf16.msrb.mxu2 %v39319_v20  ;;  %v39358_v20 = vld [vmem:[%s49651_s1 + $0x38c0] sm:$0xff] }
 0x6fc   :  { %25184 = vmatpush.bf16.msrb.mxu1 %v39311_v22  ;;  %v248_v22 = vld [vmem:[%s49652_s0 + $0x718] sm:$0xff] }
 0x6fd   :  { %25210 = vmatpush.bf16.msrb.mxu3 %v39327_v23  ;;  %v583_v23 = vpack.c.bf16 %v245_v15, %v245_v15  ;;  %v586_v28 = vpack.c.bf16 %v248_v22, %v248_v22  ;;  %v39419_v22 = vld [vmem:[%s49651_s1 + $0x3aa8] sm:$0xff] }
 0x6fe   :  { %25172 = vmatpush.bf16.msrb.mxu0 %v39302_v25  ;;  %v24966_v49 = vpop.f32.mrf.mxu0  ;;  %v39381_v25 = vld [vmem:[%s49651_s1 + $0x3978] sm:$0xff] }
 0x6ff   :  { %25198 = vmatpush.bf16.msrb.mxu2 %v39318_v26  ;;  %v24967_v50 = vadd.f32 %v24966_v49, %v46421_v13  ;;  %v39334_v13 = vld [vmem:[%s49651_s1 + $0x3800] sm:$0xff]  ;;  %v39397_v26 = vld [vmem:[%s49651_s1 + $0x39f8] sm:$0xff] }
 0x700   :  { %25185 = vmatpush.bf16.msrb.mxu1 %v39310_v31  ;;  %v24979_v53 = vpop.f32.mrf.mxu1  ;;  %v39380_v31 = vld [vmem:[%s49651_s1 + $0x3970] sm:$0xff]  ;;  %v39377_v49 = vld [vmem:[%s49651_s1 + $0x3958] sm:$0xff] }
 0x701   :  { %25211 = vmatpush.bf16.msrb.mxu3 %v39326_v32  ;;  %25173 = vmatmul.bf16.vlgmr.msrb.gmra.mxu0 %v579_v35  ;;  %v24980_v54 = vadd.f32 %v24979_v53, %v24967_v50  ;;  %v39396_v32 = vld [vmem:[%s49651_s1 + $0x39f0] sm:$0xff]  ;;  %v39379_v35 = vld [vmem:[%s49651_s1 + $0x3968] sm:$0xff]  ;;  %v39393_v50 = vld [vmem:[%s49651_s1 + $0x39d8] sm:$0xff] }
 0x702   :  { %25217 = vmatpush.bf16.msra.mxu0 %v39341_v29  ;;  %25199 = vmatmul.bf16.vlgmr.msrb.gmra.mxu2 %v581_v36  ;;  %v39372_v29 = vld [vmem:[%s49651_s1 + $0x3930] sm:$0xff]  ;;  %v39395_v36 = vld [vmem:[%s49651_s1 + $0x39e8] sm:$0xff] }
 0x703   :  { %25243 = vmatpush.bf16.msra.mxu2 %v39357_v30  ;;  %25186 = vmatmul.bf16.vlgmr.msrb.gmra.mxu1 %v580_v39  ;;  %v39388_v30 = vld [vmem:[%s49651_s1 + $0x39b0] sm:$0xff]  ;;  %v39370_v39 = vld [vmem:[%s49651_s1 + $0x3920] sm:$0xff] }
 0x704   :  { %25230 = vmatpush.bf16.msra.mxu1 %v39349_v37  ;;  %25212 = vmatmul.bf16.vlgmr.msrb.gmra.mxu3 %v582_v40  ;;  %v39386_v40 = vld [vmem:[%s49651_s1 + $0x39a0] sm:$0xff] }
 0x705   :  { %25256 = vmatpush.bf16.msra.mxu3 %v39365_v38  ;;  %v24992_v59 = vpop.f32.mrf.mxu2 }
 0x706   :  { %25218 = vmatpush.bf16.msra.mxu0 %v39340_v41  ;;  %v24993_v60 = vadd.f32 %v24992_v59, %v24980_v54  ;;  %v24968_v0 = vpop.f32.mrf.mxu0  ;;  %v39368_v54 = vld [vmem:[%s49651_s1 + $0x3910] sm:$0xff]  ;;  %v39367_v59 = vld [vmem:[%s49651_s1 + $0x3908] sm:$0xff] }
 0x707   :  { %25244 = vmatpush.bf16.msra.mxu2 %v39356_v42  ;;  %v25005_v63 = vpop.f32.mrf.mxu3 }
 0x708   :  { %25231 = vmatpush.bf16.msra.mxu1 %v39348_v43  ;;  %v46532_v1 = vadd.f32 %v25005_v63, %v24993_v60  ;;  %v24981_v4 = vpop.f32.mrf.mxu1  ;;  %v39378_v43 = vld [vmem:[%s49651_s1 + $0x3960] sm:$0xff]  ;;  %v39383_v60 = vld [vmem:[%s49651_s1 + $0x3988] sm:$0xff] }
 0x709   :  { %25257 = vmatpush.bf16.msra.mxu3 %v39364_v44  ;;  %v39394_v44 = vld [vmem:[%s49651_s1 + $0x39e0] sm:$0xff]  ;;  %v39391_v63 = vld [vmem:[%s49651_s1 + $0x39c8] sm:$0xff]  ;;  %v251_v4 = vld [vmem:[%s49652_s0 + $0x730] sm:$0xff] }
 0x70a   :  { %25219 = vmatpush.bf16.msra.mxu0 %v39339_v45  ;;  %v39369_v45 = vld [vmem:[%s49651_s1 + $0x3918] sm:$0xff] }
 0x70b   :  { %25245 = vmatpush.bf16.msra.mxu2 %v39355_v46  ;;  %v39385_v46 = vld [vmem:[%s49651_s1 + $0x3998] sm:$0xff] }
 0x70c   :  { %25232 = vmatpush.bf16.msra.mxu1 %v39347_v47 }
 0x70d   :  { %25258 = vmatpush.bf16.msra.mxu3 %v39363_v48  ;;  %v24994_v9 = vpop.f32.mrf.mxu2 }
 0x70e   :  { %25220 = vmatpush.bf16.msra.mxu0 %v39338_v51  ;;  %v250_v9 = vld [vmem:[%s49652_s0 + $0x728] sm:$0xff] }
 0x70f   :  { %25246 = vmatpush.bf16.msra.mxu2 %v39354_v52  ;;  %v25007_v12 = vpop.f32.mrf.mxu3  ;;  %v588_v15 = vpack.c.bf16 %v250_v9, %v250_v9  ;;  %v39435_v9 = vld [vmem:[%s49651_s1 + $0x3b28] sm:$0xff] }
 0x710   :  { %25233 = vmatpush.bf16.msra.mxu1 %v39346_v55  ;;  %v39384_v55 = vld [vmem:[%s49651_s1 + $0x3990] sm:$0xff]  ;;  %v589_v12 = vpack.c.bf16 %v251_v4, %v251_v4 }
 0x711   :  { %25259 = vmatpush.bf16.msra.mxu3 %v39362_v56 }
 0x712   :  { %25221 = vmatpush.bf16.msra.mxu0 %v39337_v57  ;;  %v39376_v57 = vld [vmem:[%s49651_s1 + $0x3950] sm:$0xff] }
 0x713   :  { %25247 = vmatpush.bf16.msra.mxu2 %v39353_v58  ;;  %v39392_v58 = vld [vmem:[%s49651_s1 + $0x39d0] sm:$0xff] }
 0x714   :  { %25234 = vmatpush.bf16.msra.mxu1 %v39345_v61 }
 0x715   :  { %25260 = vmatpush.bf16.msra.mxu3 %v39361_v62  ;;  %v39375_v62 = vld [vmem:[%s49651_s1 + $0x3948] sm:$0xff] }
 0x716   :  { %25222 = vmatpush.bf16.msra.mxu0 %v39336_v2  ;;  %v39382_v2 = vld [vmem:[%s49651_s1 + $0x3980] sm:$0xff] }
 0x717   :  { %25248 = vmatpush.bf16.msra.mxu2 %v39352_v3  ;;  %v249_v3 = vld [vmem:[%s49652_s0 + $0x720] sm:$0xff] }
 0x718   :  { %25235 = vmatpush.bf16.msra.mxu1 %v39344_v5  ;;  %v39405_v5 = vld [vmem:[%s49651_s1 + $0x3a38] sm:$0xff] }
 0x719   :  { %25261 = vmatpush.bf16.msra.mxu3 %v39360_v6  ;;  %v39421_v6 = vld [vmem:[%s49651_s1 + $0x3ab8] sm:$0xff] }
 0x71a   :  { %25223 = vmatpush.bf16.msra.mxu0 %v39335_v7  ;;  %v39374_v7 = vld [vmem:[%s49651_s1 + $0x3940] sm:$0xff] }
 0x71b   :  { %25249 = vmatpush.bf16.msra.mxu2 %v39351_v8  ;;  %v39390_v8 = vld [vmem:[%s49651_s1 + $0x39c0] sm:$0xff] }
 0x71c   :  { %25236 = vmatpush.bf16.msra.mxu1 %v39343_v10  ;;  %v252_v10 = vld [vmem:[%s49652_s0 + $0x738] sm:$0xff] }
 0x71d   :  { %25262 = vmatpush.bf16.msra.mxu3 %v39359_v11  ;;  %v587_v11 = vpack.c.bf16 %v249_v3, %v249_v3  ;;  %v590_v16 = vpack.c.bf16 %v252_v10, %v252_v10  ;;  %v39451_v10 = vld [vmem:[%s49651_s1 + $0x3ba8] sm:$0xff] }
 0x71e   :  { %25224 = vmatpush.bf16.msra.mxu0 %v39334_v13  ;;  %v25018_v37 = vpop.f32.mrf.mxu0  ;;  %v39413_v13 = vld [vmem:[%s49651_s1 + $0x3a78] sm:$0xff] }
 0x71f   :  { %25250 = vmatpush.bf16.msra.mxu2 %v39350_v14  ;;  %v25019_v38 = vadd.f32 %v25018_v37, %v46532_v1  ;;  %v39366_v1 = vld [vmem:[%s49651_s1 + $0x3900] sm:$0xff]  ;;  %v39429_v14 = vld [vmem:[%s49651_s1 + $0x3af8] sm:$0xff] }
 0x720   :  { %25237 = vmatpush.bf16.msra.mxu1 %v39342_v19  ;;  %v25031_v41 = vpop.f32.mrf.mxu1  ;;  %v39412_v19 = vld [vmem:[%s49651_s1 + $0x3a70] sm:$0xff]  ;;  %v39409_v37 = vld [vmem:[%s49651_s1 + $0x3a58] sm:$0xff] }
 0x721   :  { %25263 = vmatpush.bf16.msra.mxu3 %v39358_v20  ;;  %25225 = vmatmul.bf16.vlgmr.msra.gmra.mxu0 %v583_v23  ;;  %v25032_v42 = vadd.f32 %v25031_v41, %v25019_v38  ;;  %v39428_v20 = vld [vmem:[%s49651_s1 + $0x3af0] sm:$0xff]  ;;  %v39411_v23 = vld [vmem:[%s49651_s1 + $0x3a68] sm:$0xff]  ;;  %v39425_v38 = vld [vmem:[%s49651_s1 + $0x3ad8] sm:$0xff] }
 0x722   :  { %25269 = vmatpush.bf16.msrb.mxu0 %v39373_v17  ;;  %25251 = vmatmul.bf16.vlgmr.msra.gmra.mxu2 %v585_v24  ;;  %v39404_v17 = vld [vmem:[%s49651_s1 + $0x3a30] sm:$0xff]  ;;  %v39427_v24 = vld [vmem:[%s49651_s1 + $0x3ae8] sm:$0xff] }
 0x723   :  { %25295 = vmatpush.bf16.msrb.mxu2 %v39389_v18  ;;  %25238 = vmatmul.bf16.vlgmr.msra.gmra.mxu1 %v584_v27  ;;  %v39420_v18 = vld [vmem:[%s49651_s1 + $0x3ab0] sm:$0xff]  ;;  %v39402_v27 = vld [vmem:[%s49651_s1 + $0x3a20] sm:$0xff] }
 0x724   :  { %25282 = vmatpush.bf16.msrb.mxu1 %v39381_v25  ;;  %25264 = vmatmul.bf16.vlgmr.msra.gmra.mxu3 %v586_v28  ;;  %v39418_v28 = vld [vmem:[%s49651_s1 + $0x3aa0] sm:$0xff] }
 0x725   :  { %25308 = vmatpush.bf16.msrb.mxu3 %v39397_v26  ;;  %v25044_v47 = vpop.f32.mrf.mxu2 }
 0x726   :  { %25270 = vmatpush.bf16.msrb.mxu0 %v39372_v29  ;;  %v25045_v48 = vadd.f32 %v25044_v47, %v25032_v42  ;;  %v25020_v52 = vpop.f32.mrf.mxu0  ;;  %v39400_v42 = vld [vmem:[%s49651_s1 + $0x3a10] sm:$0xff]  ;;  %v39399_v47 = vld [vmem:[%s49651_s1 + $0x3a08] sm:$0xff] }
 0x727   :  { %25296 = vmatpush.bf16.msrb.mxu2 %v39388_v30  ;;  %v25057_v51 = vpop.f32.mrf.mxu3 }
 0x728   :  { %25283 = vmatpush.bf16.msrb.mxu1 %v39380_v31  ;;  %v46643_v53 = vadd.f32 %v25057_v51, %v25045_v48  ;;  %v25033_v56 = vpop.f32.mrf.mxu1  ;;  %v39410_v31 = vld [vmem:[%s49651_s1 + $0x3a60] sm:$0xff]  ;;  %v39415_v48 = vld [vmem:[%s49651_s1 + $0x3a88] sm:$0xff] }
 0x729   :  { %25309 = vmatpush.bf16.msrb.mxu3 %v39396_v32  ;;  %v39426_v32 = vld [vmem:[%s49651_s1 + $0x3ae0] sm:$0xff]  ;;  %v39423_v51 = vld [vmem:[%s49651_s1 + $0x3ac8] sm:$0xff]  ;;  %v255_v56 = vld [vmem:[%s49652_s0 + $0x750] sm:$0xff] }
 0x72a   :  { %25271 = vmatpush.bf16.msrb.mxu0 %v39371_v33  ;;  %v39401_v33 = vld [vmem:[%s49651_s1 + $0x3a18] sm:$0xff] }
 0x72b   :  { %25297 = vmatpush.bf16.msrb.mxu2 %v39387_v34  ;;  %v39417_v34 = vld [vmem:[%s49651_s1 + $0x3a98] sm:$0xff] }
 0x72c   :  { %25284 = vmatpush.bf16.msrb.mxu1 %v39379_v35 }
 0x72d   :  { %25310 = vmatpush.bf16.msrb.mxu3 %v39395_v36  ;;  %v25046_v61 = vpop.f32.mrf.mxu2 }
 0x72e   :  { %25272 = vmatpush.bf16.msrb.mxu0 %v39370_v39  ;;  %v254_v61 = vld [vmem:[%s49652_s0 + $0x748] sm:$0xff] }
 0x72f   :  { %25298 = vmatpush.bf16.msrb.mxu2 %v39386_v40  ;;  %v25059_v0 = vpop.f32.mrf.mxu3  ;;  %v592_v3 = vpack.c.bf16 %v254_v61, %v254_v61  ;;  %v39467_v61 = vld [vmem:[%s49651_s1 + $0x3c28] sm:$0xff] }
 0x730   :  { %25285 = vmatpush.bf16.msrb.mxu1 %v39378_v43  ;;  %v39416_v43 = vld [vmem:[%s49651_s1 + $0x3a90] sm:$0xff]  ;;  %v593_v0 = vpack.c.bf16 %v255_v56, %v255_v56 }
 0x731   :  { %25311 = vmatpush.bf16.msrb.mxu3 %v39394_v44 }
 0x732   :  { %25273 = vmatpush.bf16.msrb.mxu0 %v39369_v45  ;;  %v39408_v45 = vld [vmem:[%s49651_s1 + $0x3a50] sm:$0xff] }
 0x733   :  { %25299 = vmatpush.bf16.msrb.mxu2 %v39385_v46  ;;  %v39424_v46 = vld [vmem:[%s49651_s1 + $0x3ad0] sm:$0xff] }
 0x734   :  { %25286 = vmatpush.bf16.msrb.mxu1 %v39377_v49 }
 0x735   :  { %25312 = vmatpush.bf16.msrb.mxu3 %v39393_v50  ;;  %v39407_v50 = vld [vmem:[%s49651_s1 + $0x3a48] sm:$0xff] }
 0x736   :  { %25274 = vmatpush.bf16.msrb.mxu0 %v39368_v54  ;;  %v39414_v54 = vld [vmem:[%s49651_s1 + $0x3a80] sm:$0xff] }
 0x737   :  { %25300 = vmatpush.bf16.msrb.mxu2 %v39384_v55  ;;  %v253_v55 = vld [vmem:[%s49652_s0 + $0x740] sm:$0xff] }
 0x738   :  { %25287 = vmatpush.bf16.msrb.mxu1 %v39376_v57  ;;  %v39437_v57 = vld [vmem:[%s49651_s1 + $0x3b38] sm:$0xff] }
 0x739   :  { %25313 = vmatpush.bf16.msrb.mxu3 %v39392_v58  ;;  %v39453_v58 = vld [vmem:[%s49651_s1 + $0x3bb8] sm:$0xff] }
 0x73a   :  { %25275 = vmatpush.bf16.msrb.mxu0 %v39367_v59  ;;  %v39406_v59 = vld [vmem:[%s49651_s1 + $0x3a40] sm:$0xff] }
 0x73b   :  { %25301 = vmatpush.bf16.msrb.mxu2 %v39383_v60  ;;  %v39422_v60 = vld [vmem:[%s49651_s1 + $0x3ac0] sm:$0xff] }
 0x73c   :  { %25288 = vmatpush.bf16.msrb.mxu1 %v39375_v62  ;;  %v256_v62 = vld [vmem:[%s49652_s0 + $0x758] sm:$0xff] }
 0x73d   :  { %25314 = vmatpush.bf16.msrb.mxu3 %v39391_v63  ;;  %v591_v63 = vpack.c.bf16 %v253_v55, %v253_v55  ;;  %v594_v4 = vpack.c.bf16 %v256_v62, %v256_v62  ;;  %v39483_v62 = vld [vmem:[%s49651_s1 + $0x3ca8] sm:$0xff] }
 0x73e   :  { %25276 = vmatpush.bf16.msrb.mxu0 %v39366_v1  ;;  %v25070_v25 = vpop.f32.mrf.mxu0  ;;  %v39445_v1 = vld [vmem:[%s49651_s1 + $0x3b78] sm:$0xff] }
 0x73f   :  { %25302 = vmatpush.bf16.msrb.mxu2 %v39382_v2  ;;  %v25071_v26 = vadd.f32 %v25070_v25, %v46643_v53  ;;  %v39398_v53 = vld [vmem:[%s49651_s1 + $0x3a00] sm:$0xff]  ;;  %v39461_v2 = vld [vmem:[%s49651_s1 + $0x3bf8] sm:$0xff] }
 0x740   :  { %25289 = vmatpush.bf16.msrb.mxu1 %v39374_v7  ;;  %v25083_v29 = vpop.f32.mrf.mxu1  ;;  %v39444_v7 = vld [vmem:[%s49651_s1 + $0x3b70] sm:$0xff]  ;;  %v39441_v25 = vld [vmem:[%s49651_s1 + $0x3b58] sm:$0xff] }
 0x741   :  { %25315 = vmatpush.bf16.msrb.mxu3 %v39390_v8  ;;  %25277 = vmatmul.bf16.vlgmr.msrb.gmra.mxu0 %v587_v11  ;;  %v25084_v30 = vadd.f32 %v25083_v29, %v25071_v26  ;;  %v39460_v8 = vld [vmem:[%s49651_s1 + $0x3bf0] sm:$0xff]  ;;  %v39443_v11 = vld [vmem:[%s49651_s1 + $0x3b68] sm:$0xff]  ;;  %v39457_v26 = vld [vmem:[%s49651_s1 + $0x3bd8] sm:$0xff] }
 0x742   :  { %25321 = vmatpush.bf16.msra.mxu0 %v39405_v5  ;;  %25303 = vmatmul.bf16.vlgmr.msrb.gmra.mxu2 %v589_v12  ;;  %v39436_v5 = vld [vmem:[%s49651_s1 + $0x3b30] sm:$0xff]  ;;  %v39459_v12 = vld [vmem:[%s49651_s1 + $0x3be8] sm:$0xff] }
 0x743   :  { %25347 = vmatpush.bf16.msra.mxu2 %v39421_v6  ;;  %25290 = vmatmul.bf16.vlgmr.msrb.gmra.mxu1 %v588_v15  ;;  %v39452_v6 = vld [vmem:[%s49651_s1 + $0x3bb0] sm:$0xff]  ;;  %v39434_v15 = vld [vmem:[%s49651_s1 + $0x3b20] sm:$0xff] }
 0x744   :  { %25334 = vmatpush.bf16.msra.mxu1 %v39413_v13  ;;  %25316 = vmatmul.bf16.vlgmr.msrb.gmra.mxu3 %v590_v16  ;;  %v39450_v16 = vld [vmem:[%s49651_s1 + $0x3ba0] sm:$0xff] }
 0x745   :  { %25360 = vmatpush.bf16.msra.mxu3 %v39429_v14  ;;  %v25096_v35 = vpop.f32.mrf.mxu2 }
 0x746   :  { %25322 = vmatpush.bf16.msra.mxu0 %v39404_v17  ;;  %v25097_v36 = vadd.f32 %v25096_v35, %v25084_v30  ;;  %v25072_v40 = vpop.f32.mrf.mxu0  ;;  %v39432_v30 = vld [vmem:[%s49651_s1 + $0x3b10] sm:$0xff]  ;;  %v39431_v35 = vld [vmem:[%s49651_s1 + $0x3b08] sm:$0xff] }
 0x747   :  { %25348 = vmatpush.bf16.msra.mxu2 %v39420_v18  ;;  %v25109_v39 = vpop.f32.mrf.mxu3 }
 0x748   :  { %25335 = vmatpush.bf16.msra.mxu1 %v39412_v19  ;;  %v46754_v41 = vadd.f32 %v25109_v39, %v25097_v36  ;;  %v25085_v44 = vpop.f32.mrf.mxu1  ;;  %v39442_v19 = vld [vmem:[%s49651_s1 + $0x3b60] sm:$0xff]  ;;  %v39447_v36 = vld [vmem:[%s49651_s1 + $0x3b88] sm:$0xff] }
 0x749   :  { %25361 = vmatpush.bf16.msra.mxu3 %v39428_v20  ;;  %v39458_v20 = vld [vmem:[%s49651_s1 + $0x3be0] sm:$0xff]  ;;  %v39455_v39 = vld [vmem:[%s49651_s1 + $0x3bc8] sm:$0xff]  ;;  %v259_v44 = vld [vmem:[%s49652_s0 + $0x770] sm:$0xff] }
 0x74a   :  { %25323 = vmatpush.bf16.msra.mxu0 %v39403_v21  ;;  %v39433_v21 = vld [vmem:[%s49651_s1 + $0x3b18] sm:$0xff] }
 0x74b   :  { %25349 = vmatpush.bf16.msra.mxu2 %v39419_v22  ;;  %v39449_v22 = vld [vmem:[%s49651_s1 + $0x3b98] sm:$0xff] }
 0x74c   :  { %25336 = vmatpush.bf16.msra.mxu1 %v39411_v23 }
 0x74d   :  { %25362 = vmatpush.bf16.msra.mxu3 %v39427_v24  ;;  %v25098_v49 = vpop.f32.mrf.mxu2 }
 0x74e   :  { %25324 = vmatpush.bf16.msra.mxu0 %v39402_v27  ;;  %v258_v49 = vld [vmem:[%s49652_s0 + $0x768] sm:$0xff] }
 0x74f   :  { %25350 = vmatpush.bf16.msra.mxu2 %v39418_v28  ;;  %v25111_v52 = vpop.f32.mrf.mxu3  ;;  %v596_v55 = vpack.c.bf16 %v258_v49, %v258_v49  ;;  %v39499_v49 = vld [vmem:[%s49651_s1 + $0x3d28] sm:$0xff] }
 0x750   :  { %25337 = vmatpush.bf16.msra.mxu1 %v39410_v31  ;;  %v39448_v31 = vld [vmem:[%s49651_s1 + $0x3b90] sm:$0xff]  ;;  %v597_v52 = vpack.c.bf16 %v259_v44, %v259_v44 }
 0x751   :  { %25363 = vmatpush.bf16.msra.mxu3 %v39426_v32 }
 0x752   :  { %25325 = vmatpush.bf16.msra.mxu0 %v39401_v33  ;;  %v39440_v33 = vld [vmem:[%s49651_s1 + $0x3b50] sm:$0xff] }
 0x753   :  { %25351 = vmatpush.bf16.msra.mxu2 %v39417_v34  ;;  %v39456_v34 = vld [vmem:[%s49651_s1 + $0x3bd0] sm:$0xff] }
 0x754   :  { %25338 = vmatpush.bf16.msra.mxu1 %v39409_v37 }
 0x755   :  { %25364 = vmatpush.bf16.msra.mxu3 %v39425_v38  ;;  %v39439_v38 = vld [vmem:[%s49651_s1 + $0x3b48] sm:$0xff] }
 0x756   :  { %25326 = vmatpush.bf16.msra.mxu0 %v39400_v42  ;;  %v39446_v42 = vld [vmem:[%s49651_s1 + $0x3b80] sm:$0xff] }
 0x757   :  { %25352 = vmatpush.bf16.msra.mxu2 %v39416_v43  ;;  %v257_v43 = vld [vmem:[%s49652_s0 + $0x760] sm:$0xff] }
 0x758   :  { %25339 = vmatpush.bf16.msra.mxu1 %v39408_v45  ;;  %v39469_v45 = vld [vmem:[%s49651_s1 + $0x3c38] sm:$0xff] }
 0x759   :  { %25365 = vmatpush.bf16.msra.mxu3 %v39424_v46  ;;  %v39485_v46 = vld [vmem:[%s49651_s1 + $0x3cb8] sm:$0xff] }
 0x75a   :  { %25327 = vmatpush.bf16.msra.mxu0 %v39399_v47  ;;  %v39438_v47 = vld [vmem:[%s49651_s1 + $0x3b40] sm:$0xff] }
 0x75b   :  { %25353 = vmatpush.bf16.msra.mxu2 %v39415_v48  ;;  %v39454_v48 = vld [vmem:[%s49651_s1 + $0x3bc0] sm:$0xff] }
 0x75c   :  { %25340 = vmatpush.bf16.msra.mxu1 %v39407_v50  ;;  %v260_v50 = vld [vmem:[%s49652_s0 + $0x778] sm:$0xff] }
 0x75d   :  { %25366 = vmatpush.bf16.msra.mxu3 %v39423_v51  ;;  %v595_v51 = vpack.c.bf16 %v257_v43, %v257_v43  ;;  %v598_v56 = vpack.c.bf16 %v260_v50, %v260_v50  ;;  %v39515_v50 = vld [vmem:[%s49651_s1 + $0x3da8] sm:$0xff] }
 0x75e   :  { %25328 = vmatpush.bf16.msra.mxu0 %v39398_v53  ;;  %v25122_v13 = vpop.f32.mrf.mxu0  ;;  %v39477_v53 = vld [vmem:[%s49651_s1 + $0x3c78] sm:$0xff] }
 0x75f   :  { %25354 = vmatpush.bf16.msra.mxu2 %v39414_v54  ;;  %v25123_v14 = vadd.f32 %v25122_v13, %v46754_v41  ;;  %v39430_v41 = vld [vmem:[%s49651_s1 + $0x3b00] sm:$0xff]  ;;  %v39493_v54 = vld [vmem:[%s49651_s1 + $0x3cf8] sm:$0xff] }
 0x760   :  { %25341 = vmatpush.bf16.msra.mxu1 %v39406_v59  ;;  %v25135_v17 = vpop.f32.mrf.mxu1  ;;  %v39476_v59 = vld [vmem:[%s49651_s1 + $0x3c70] sm:$0xff]  ;;  %v39473_v13 = vld [vmem:[%s49651_s1 + $0x3c58] sm:$0xff] }
 0x761   :  { %25367 = vmatpush.bf16.msra.mxu3 %v39422_v60  ;;  %25329 = vmatmul.bf16.vlgmr.msra.gmra.mxu0 %v591_v63  ;;  %v25136_v18 = vadd.f32 %v25135_v17, %v25123_v14  ;;  %v39492_v60 = vld [vmem:[%s49651_s1 + $0x3cf0] sm:$0xff]  ;;  %v39475_v63 = vld [vmem:[%s49651_s1 + $0x3c68] sm:$0xff]  ;;  %v39489_v14 = vld [vmem:[%s49651_s1 + $0x3cd8] sm:$0xff] }
 0x762   :  { %25373 = vmatpush.bf16.msrb.mxu0 %v39437_v57  ;;  %25355 = vmatmul.bf16.vlgmr.msra.gmra.mxu2 %v593_v0  ;;  %v39468_v57 = vld [vmem:[%s49651_s1 + $0x3c30] sm:$0xff]  ;;  %v39491_v0 = vld [vmem:[%s49651_s1 + $0x3ce8] sm:$0xff] }
 0x763   :  { %25399 = vmatpush.bf16.msrb.mxu2 %v39453_v58  ;;  %25342 = vmatmul.bf16.vlgmr.msra.gmra.mxu1 %v592_v3  ;;  %v39484_v58 = vld [vmem:[%s49651_s1 + $0x3cb0] sm:$0xff]  ;;  %v39466_v3 = vld [vmem:[%s49651_s1 + $0x3c20] sm:$0xff] }
 0x764   :  { %25386 = vmatpush.bf16.msrb.mxu1 %v39445_v1  ;;  %25368 = vmatmul.bf16.vlgmr.msra.gmra.mxu3 %v594_v4  ;;  %v39482_v4 = vld [vmem:[%s49651_s1 + $0x3ca0] sm:$0xff] }
 0x765   :  { %25412 = vmatpush.bf16.msrb.mxu3 %v39461_v2  ;;  %v25148_v23 = vpop.f32.mrf.mxu2 }
 0x766   :  { %25374 = vmatpush.bf16.msrb.mxu0 %v39436_v5  ;;  %v25149_v24 = vadd.f32 %v25148_v23, %v25136_v18  ;;  %v25124_v28 = vpop.f32.mrf.mxu0  ;;  %v39464_v18 = vld [vmem:[%s49651_s1 + $0x3c10] sm:$0xff]  ;;  %v39463_v23 = vld [vmem:[%s49651_s1 + $0x3c08] sm:$0xff] }
 0x767   :  { %25400 = vmatpush.bf16.msrb.mxu2 %v39452_v6  ;;  %v25161_v27 = vpop.f32.mrf.mxu3 }
 0x768   :  { %25387 = vmatpush.bf16.msrb.mxu1 %v39444_v7  ;;  %v46865_v29 = vadd.f32 %v25161_v27, %v25149_v24  ;;  %v25137_v32 = vpop.f32.mrf.mxu1  ;;  %v39474_v7 = vld [vmem:[%s49651_s1 + $0x3c60] sm:$0xff]  ;;  %v39479_v24 = vld [vmem:[%s49651_s1 + $0x3c88] sm:$0xff] }
 0x769   :  { %25413 = vmatpush.bf16.msrb.mxu3 %v39460_v8  ;;  %v39490_v8 = vld [vmem:[%s49651_s1 + $0x3ce0] sm:$0xff]  ;;  %v39487_v27 = vld [vmem:[%s49651_s1 + $0x3cc8] sm:$0xff]  ;;  %v263_v32 = vld [vmem:[%s49652_s0 + $0x790] sm:$0xff] }
 0x76a   :  { %25375 = vmatpush.bf16.msrb.mxu0 %v39435_v9  ;;  %v39465_v9 = vld [vmem:[%s49651_s1 + $0x3c18] sm:$0xff] }
 0x76b   :  { %25401 = vmatpush.bf16.msrb.mxu2 %v39451_v10  ;;  %v39481_v10 = vld [vmem:[%s49651_s1 + $0x3c98] sm:$0xff] }
 0x76c   :  { %25388 = vmatpush.bf16.msrb.mxu1 %v39443_v11 }
 0x76d   :  { %25414 = vmatpush.bf16.msrb.mxu3 %v39459_v12  ;;  %v25150_v37 = vpop.f32.mrf.mxu2 }
 0x76e   :  { %25376 = vmatpush.bf16.msrb.mxu0 %v39434_v15  ;;  %v262_v37 = vld [vmem:[%s49652_s0 + $0x788] sm:$0xff] }
 0x76f   :  { %25402 = vmatpush.bf16.msrb.mxu2 %v39450_v16  ;;  %v25163_v40 = vpop.f32.mrf.mxu3  ;;  %v600_v43 = vpack.c.bf16 %v262_v37, %v262_v37  ;;  %v39531_v37 = vld [vmem:[%s49651_s1 + $0x3e28] sm:$0xff] }
 0x770   :  { %25389 = vmatpush.bf16.msrb.mxu1 %v39442_v19  ;;  %v39480_v19 = vld [vmem:[%s49651_s1 + $0x3c90] sm:$0xff]  ;;  %v601_v40 = vpack.c.bf16 %v263_v32, %v263_v32 }
 0x771   :  { %25415 = vmatpush.bf16.msrb.mxu3 %v39458_v20 }
 0x772   :  { %25377 = vmatpush.bf16.msrb.mxu0 %v39433_v21  ;;  %v39472_v21 = vld [vmem:[%s49651_s1 + $0x3c50] sm:$0xff] }
 0x773   :  { %25403 = vmatpush.bf16.msrb.mxu2 %v39449_v22  ;;  %v39488_v22 = vld [vmem:[%s49651_s1 + $0x3cd0] sm:$0xff] }
 0x774   :  { %25390 = vmatpush.bf16.msrb.mxu1 %v39441_v25 }
 0x775   :  { %25416 = vmatpush.bf16.msrb.mxu3 %v39457_v26  ;;  %v39471_v26 = vld [vmem:[%s49651_s1 + $0x3c48] sm:$0xff] }
 0x776   :  { %25378 = vmatpush.bf16.msrb.mxu0 %v39432_v30  ;;  %v39478_v30 = vld [vmem:[%s49651_s1 + $0x3c80] sm:$0xff] }
 0x777   :  { %25404 = vmatpush.bf16.msrb.mxu2 %v39448_v31  ;;  %v261_v31 = vld [vmem:[%s49652_s0 + $0x780] sm:$0xff] }
 0x778   :  { %25391 = vmatpush.bf16.msrb.mxu1 %v39440_v33  ;;  %v39501_v33 = vld [vmem:[%s49651_s1 + $0x3d38] sm:$0xff] }
 0x779   :  { %25417 = vmatpush.bf16.msrb.mxu3 %v39456_v34  ;;  %v39517_v34 = vld [vmem:[%s49651_s1 + $0x3db8] sm:$0xff] }
 0x77a   :  { %25379 = vmatpush.bf16.msrb.mxu0 %v39431_v35  ;;  %v39470_v35 = vld [vmem:[%s49651_s1 + $0x3c40] sm:$0xff] }
 0x77b   :  { %25405 = vmatpush.bf16.msrb.mxu2 %v39447_v36  ;;  %v39486_v36 = vld [vmem:[%s49651_s1 + $0x3cc0] sm:$0xff] }
 0x77c   :  { %25392 = vmatpush.bf16.msrb.mxu1 %v39439_v38  ;;  %v264_v38 = vld [vmem:[%s49652_s0 + $0x798] sm:$0xff] }
 0x77d   :  { %25418 = vmatpush.bf16.msrb.mxu3 %v39455_v39  ;;  %v599_v39 = vpack.c.bf16 %v261_v31, %v261_v31  ;;  %v602_v44 = vpack.c.bf16 %v264_v38, %v264_v38  ;;  %v39547_v38 = vld [vmem:[%s49651_s1 + $0x3ea8] sm:$0xff] }
 0x77e   :  { %25380 = vmatpush.bf16.msrb.mxu0 %v39430_v41  ;;  %v25174_v1 = vpop.f32.mrf.mxu0  ;;  %v39509_v41 = vld [vmem:[%s49651_s1 + $0x3d78] sm:$0xff] }
 0x77f   :  { %25406 = vmatpush.bf16.msrb.mxu2 %v39446_v42  ;;  %v25175_v2 = vadd.f32 %v25174_v1, %v46865_v29  ;;  %v39462_v29 = vld [vmem:[%s49651_s1 + $0x3c00] sm:$0xff]  ;;  %v39525_v42 = vld [vmem:[%s49651_s1 + $0x3df8] sm:$0xff] }
 0x780   :  { %25393 = vmatpush.bf16.msrb.mxu1 %v39438_v47  ;;  %v25187_v5 = vpop.f32.mrf.mxu1  ;;  %v39508_v47 = vld [vmem:[%s49651_s1 + $0x3d70] sm:$0xff]  ;;  %v39505_v1 = vld [vmem:[%s49651_s1 + $0x3d58] sm:$0xff] }
 0x781   :  { %25419 = vmatpush.bf16.msrb.mxu3 %v39454_v48  ;;  %25381 = vmatmul.bf16.vlgmr.msrb.gmra.mxu0 %v595_v51  ;;  %v25188_v6 = vadd.f32 %v25187_v5, %v25175_v2  ;;  %v39524_v48 = vld [vmem:[%s49651_s1 + $0x3df0] sm:$0xff]  ;;  %v39507_v51 = vld [vmem:[%s49651_s1 + $0x3d68] sm:$0xff]  ;;  %v39521_v2 = vld [vmem:[%s49651_s1 + $0x3dd8] sm:$0xff] }
 0x782   :  { %25425 = vmatpush.bf16.msra.mxu0 %v39469_v45  ;;  %25407 = vmatmul.bf16.vlgmr.msrb.gmra.mxu2 %v597_v52  ;;  %v39500_v45 = vld [vmem:[%s49651_s1 + $0x3d30] sm:$0xff]  ;;  %v39523_v52 = vld [vmem:[%s49651_s1 + $0x3de8] sm:$0xff] }
 0x783   :  { %25451 = vmatpush.bf16.msra.mxu2 %v39485_v46  ;;  %25394 = vmatmul.bf16.vlgmr.msrb.gmra.mxu1 %v596_v55  ;;  %v39516_v46 = vld [vmem:[%s49651_s1 + $0x3db0] sm:$0xff]  ;;  %v39498_v55 = vld [vmem:[%s49651_s1 + $0x3d20] sm:$0xff] }
 0x784   :  { %25438 = vmatpush.bf16.msra.mxu1 %v39477_v53  ;;  %25420 = vmatmul.bf16.vlgmr.msrb.gmra.mxu3 %v598_v56  ;;  %v39514_v56 = vld [vmem:[%s49651_s1 + $0x3da0] sm:$0xff] }
 0x785   :  { %25464 = vmatpush.bf16.msra.mxu3 %v39493_v54  ;;  %v25200_v11 = vpop.f32.mrf.mxu2 }
 0x786   :  { %25426 = vmatpush.bf16.msra.mxu0 %v39468_v57  ;;  %v25201_v12 = vadd.f32 %v25200_v11, %v25188_v6  ;;  %v25176_v16 = vpop.f32.mrf.mxu0  ;;  %v39496_v6 = vld [vmem:[%s49651_s1 + $0x3d10] sm:$0xff]  ;;  %v39495_v11 = vld [vmem:[%s49651_s1 + $0x3d08] sm:$0xff] }
 0x787   :  { %25452 = vmatpush.bf16.msra.mxu2 %v39484_v58  ;;  %v25213_v15 = vpop.f32.mrf.mxu3 }
 0x788   :  { %25439 = vmatpush.bf16.msra.mxu1 %v39476_v59  ;;  %v46976_v17 = vadd.f32 %v25213_v15, %v25201_v12  ;;  %v25189_v20 = vpop.f32.mrf.mxu1  ;;  %v39506_v59 = vld [vmem:[%s49651_s1 + $0x3d60] sm:$0xff]  ;;  %v39511_v12 = vld [vmem:[%s49651_s1 + $0x3d88] sm:$0xff] }
 0x789   :  { %25465 = vmatpush.bf16.msra.mxu3 %v39492_v60  ;;  %v39522_v60 = vld [vmem:[%s49651_s1 + $0x3de0] sm:$0xff]  ;;  %v39519_v15 = vld [vmem:[%s49651_s1 + $0x3dc8] sm:$0xff]  ;;  %v267_v20 = vld [vmem:[%s49652_s0 + $0x7b0] sm:$0xff] }
 0x78a   :  { %25427 = vmatpush.bf16.msra.mxu0 %v39467_v61  ;;  %v39497_v61 = vld [vmem:[%s49651_s1 + $0x3d18] sm:$0xff] }
 0x78b   :  { %25453 = vmatpush.bf16.msra.mxu2 %v39483_v62  ;;  %v39513_v62 = vld [vmem:[%s49651_s1 + $0x3d98] sm:$0xff] }
 0x78c   :  { %25440 = vmatpush.bf16.msra.mxu1 %v39475_v63 }
 0x78d   :  { %25466 = vmatpush.bf16.msra.mxu3 %v39491_v0  ;;  %v25202_v25 = vpop.f32.mrf.mxu2 }
 0x78e   :  { %25428 = vmatpush.bf16.msra.mxu0 %v39466_v3  ;;  %v266_v25 = vld [vmem:[%s49652_s0 + $0x7a8] sm:$0xff] }
 0x78f   :  { %25454 = vmatpush.bf16.msra.mxu2 %v39482_v4  ;;  %v25215_v28 = vpop.f32.mrf.mxu3  ;;  %v604_v31 = vpack.c.bf16 %v266_v25, %v266_v25  ;;  %v39563_v25 = vld [vmem:[%s49651_s1 + $0x3f28] sm:$0xff] }
 0x790   :  { %25441 = vmatpush.bf16.msra.mxu1 %v39474_v7  ;;  %v39512_v7 = vld [vmem:[%s49651_s1 + $0x3d90] sm:$0xff]  ;;  %v605_v28 = vpack.c.bf16 %v267_v20, %v267_v20 }
 0x791   :  { %25467 = vmatpush.bf16.msra.mxu3 %v39490_v8 }
 0x792   :  { %25429 = vmatpush.bf16.msra.mxu0 %v39465_v9  ;;  %v39504_v9 = vld [vmem:[%s49651_s1 + $0x3d50] sm:$0xff] }
 0x793   :  { %25455 = vmatpush.bf16.msra.mxu2 %v39481_v10  ;;  %v39520_v10 = vld [vmem:[%s49651_s1 + $0x3dd0] sm:$0xff] }
 0x794   :  { %25442 = vmatpush.bf16.msra.mxu1 %v39473_v13 }
 0x795   :  { %25468 = vmatpush.bf16.msra.mxu3 %v39489_v14  ;;  %v39503_v14 = vld [vmem:[%s49651_s1 + $0x3d48] sm:$0xff] }
 0x796   :  { %25430 = vmatpush.bf16.msra.mxu0 %v39464_v18  ;;  %v39510_v18 = vld [vmem:[%s49651_s1 + $0x3d80] sm:$0xff] }
 0x797   :  { %25456 = vmatpush.bf16.msra.mxu2 %v39480_v19  ;;  %v265_v19 = vld [vmem:[%s49652_s0 + $0x7a0] sm:$0xff] }
 0x798   :  { %25443 = vmatpush.bf16.msra.mxu1 %v39472_v21  ;;  %v39533_v21 = vld [vmem:[%s49651_s1 + $0x3e38] sm:$0xff] }
 0x799   :  { %25469 = vmatpush.bf16.msra.mxu3 %v39488_v22  ;;  %v39549_v22 = vld [vmem:[%s49651_s1 + $0x3eb8] sm:$0xff] }
 0x79a   :  { %25431 = vmatpush.bf16.msra.mxu0 %v39463_v23  ;;  %v39502_v23 = vld [vmem:[%s49651_s1 + $0x3d40] sm:$0xff] }
 0x79b   :  { %25457 = vmatpush.bf16.msra.mxu2 %v39479_v24  ;;  %v39518_v24 = vld [vmem:[%s49651_s1 + $0x3dc0] sm:$0xff] }
 0x79c   :  { %25444 = vmatpush.bf16.msra.mxu1 %v39471_v26  ;;  %v268_v26 = vld [vmem:[%s49652_s0 + $0x7b8] sm:$0xff] }
 0x79d   :  { %25470 = vmatpush.bf16.msra.mxu3 %v39487_v27  ;;  %v603_v27 = vpack.c.bf16 %v265_v19, %v265_v19  ;;  %v606_v32 = vpack.c.bf16 %v268_v26, %v268_v26  ;;  %v39579_v26 = vld [vmem:[%s49651_s1 + $0x3fa8] sm:$0xff] }
 0x79e   :  { %25432 = vmatpush.bf16.msra.mxu0 %v39462_v29  ;;  %v25226_v53 = vpop.f32.mrf.mxu0  ;;  %v39541_v29 = vld [vmem:[%s49651_s1 + $0x3e78] sm:$0xff] }
 0x79f   :  { %25458 = vmatpush.bf16.msra.mxu2 %v39478_v30  ;;  %v25227_v54 = vadd.f32 %v25226_v53, %v46976_v17  ;;  %v39494_v17 = vld [vmem:[%s49651_s1 + $0x3d00] sm:$0xff]  ;;  %v39557_v30 = vld [vmem:[%s49651_s1 + $0x3ef8] sm:$0xff] }
 0x7a0   :  { %25445 = vmatpush.bf16.msra.mxu1 %v39470_v35  ;;  %v25239_v57 = vpop.f32.mrf.mxu1  ;;  %v39540_v35 = vld [vmem:[%s49651_s1 + $0x3e70] sm:$0xff]  ;;  %v39537_v53 = vld [vmem:[%s49651_s1 + $0x3e58] sm:$0xff] }
 0x7a1   :  { %25471 = vmatpush.bf16.msra.mxu3 %v39486_v36  ;;  %25433 = vmatmul.bf16.vlgmr.msra.gmra.mxu0 %v599_v39  ;;  %v25240_v58 = vadd.f32 %v25239_v57, %v25227_v54  ;;  %v39556_v36 = vld [vmem:[%s49651_s1 + $0x3ef0] sm:$0xff]  ;;  %v39539_v39 = vld [vmem:[%s49651_s1 + $0x3e68] sm:$0xff]  ;;  %v39553_v54 = vld [vmem:[%s49651_s1 + $0x3ed8] sm:$0xff] }
 0x7a2   :  { %25477 = vmatpush.bf16.msrb.mxu0 %v39501_v33  ;;  %25459 = vmatmul.bf16.vlgmr.msra.gmra.mxu2 %v601_v40  ;;  %v39532_v33 = vld [vmem:[%s49651_s1 + $0x3e30] sm:$0xff]  ;;  %v39555_v40 = vld [vmem:[%s49651_s1 + $0x3ee8] sm:$0xff] }
 0x7a3   :  { %25503 = vmatpush.bf16.msrb.mxu2 %v39517_v34  ;;  %25446 = vmatmul.bf16.vlgmr.msra.gmra.mxu1 %v600_v43  ;;  %v39548_v34 = vld [vmem:[%s49651_s1 + $0x3eb0] sm:$0xff]  ;;  %v39530_v43 = vld [vmem:[%s49651_s1 + $0x3e20] sm:$0xff] }
 0x7a4   :  { %25490 = vmatpush.bf16.msrb.mxu1 %v39509_v41  ;;  %25472 = vmatmul.bf16.vlgmr.msra.gmra.mxu3 %v602_v44  ;;  %v39546_v44 = vld [vmem:[%s49651_s1 + $0x3ea0] sm:$0xff] }
 0x7a5   :  { %25516 = vmatpush.bf16.msrb.mxu3 %v39525_v42  ;;  %v25252_v63 = vpop.f32.mrf.mxu2 }
 0x7a6   :  { %25478 = vmatpush.bf16.msrb.mxu0 %v39500_v45  ;;  %v25253_v0 = vadd.f32 %v25252_v63, %v25240_v58  ;;  %v25228_v4 = vpop.f32.mrf.mxu0  ;;  %v39528_v58 = vld [vmem:[%s49651_s1 + $0x3e10] sm:$0xff]  ;;  %v39527_v63 = vld [vmem:[%s49651_s1 + $0x3e08] sm:$0xff] }
 0x7a7   :  { %25504 = vmatpush.bf16.msrb.mxu2 %v39516_v46  ;;  %v25265_v3 = vpop.f32.mrf.mxu3 }
 0x7a8   :  { %25491 = vmatpush.bf16.msrb.mxu1 %v39508_v47  ;;  %v47087_v5 = vadd.f32 %v25265_v3, %v25253_v0  ;;  %v25241_v8 = vpop.f32.mrf.mxu1  ;;  %v39538_v47 = vld [vmem:[%s49651_s1 + $0x3e60] sm:$0xff]  ;;  %v39543_v0 = vld [vmem:[%s49651_s1 + $0x3e88] sm:$0xff] }
 0x7a9   :  { %25517 = vmatpush.bf16.msrb.mxu3 %v39524_v48  ;;  %v39554_v48 = vld [vmem:[%s49651_s1 + $0x3ee0] sm:$0xff]  ;;  %v39551_v3 = vld [vmem:[%s49651_s1 + $0x3ec8] sm:$0xff]  ;;  %v271_v8 = vld [vmem:[%s49652_s0 + $0x7d0] sm:$0xff] }
 0x7aa   :  { %25479 = vmatpush.bf16.msrb.mxu0 %v39499_v49  ;;  %v39529_v49 = vld [vmem:[%s49651_s1 + $0x3e18] sm:$0xff] }
 0x7ab   :  { %25505 = vmatpush.bf16.msrb.mxu2 %v39515_v50  ;;  %v39545_v50 = vld [vmem:[%s49651_s1 + $0x3e98] sm:$0xff] }
 0x7ac   :  { %25492 = vmatpush.bf16.msrb.mxu1 %v39507_v51 }
 0x7ad   :  { %25518 = vmatpush.bf16.msrb.mxu3 %v39523_v52  ;;  %v25254_v13 = vpop.f32.mrf.mxu2 }
 0x7ae   :  { %25480 = vmatpush.bf16.msrb.mxu0 %v39498_v55  ;;  %v270_v13 = vld [vmem:[%s49652_s0 + $0x7c8] sm:$0xff] }
 0x7af   :  { %25506 = vmatpush.bf16.msrb.mxu2 %v39514_v56  ;;  %v25267_v16 = vpop.f32.mrf.mxu3  ;;  %v608_v19 = vpack.c.bf16 %v270_v13, %v270_v13  ;;  %v39595_v13 = vld [vmem:[%s49651_s1 + $0x4028] sm:$0xff] }
 0x7b0   :  { %25493 = vmatpush.bf16.msrb.mxu1 %v39506_v59  ;;  %v39544_v59 = vld [vmem:[%s49651_s1 + $0x3e90] sm:$0xff]  ;;  %v609_v16 = vpack.c.bf16 %v271_v8, %v271_v8 }
 0x7b1   :  { %25519 = vmatpush.bf16.msrb.mxu3 %v39522_v60 }
 0x7b2   :  { %25481 = vmatpush.bf16.msrb.mxu0 %v39497_v61  ;;  %v39536_v61 = vld [vmem:[%s49651_s1 + $0x3e50] sm:$0xff] }
 0x7b3   :  { %25507 = vmatpush.bf16.msrb.mxu2 %v39513_v62  ;;  %v39552_v62 = vld [vmem:[%s49651_s1 + $0x3ed0] sm:$0xff] }
 0x7b4   :  { %25494 = vmatpush.bf16.msrb.mxu1 %v39505_v1 }
 0x7b5   :  { %25520 = vmatpush.bf16.msrb.mxu3 %v39521_v2  ;;  %v39535_v2 = vld [vmem:[%s49651_s1 + $0x3e48] sm:$0xff] }
 0x7b6   :  { %25482 = vmatpush.bf16.msrb.mxu0 %v39496_v6  ;;  %v39542_v6 = vld [vmem:[%s49651_s1 + $0x3e80] sm:$0xff] }
 0x7b7   :  { %25508 = vmatpush.bf16.msrb.mxu2 %v39512_v7  ;;  %v269_v7 = vld [vmem:[%s49652_s0 + $0x7c0] sm:$0xff] }
 0x7b8   :  { %25495 = vmatpush.bf16.msrb.mxu1 %v39504_v9  ;;  %v39565_v9 = vld [vmem:[%s49651_s1 + $0x3f38] sm:$0xff] }
 0x7b9   :  { %25521 = vmatpush.bf16.msrb.mxu3 %v39520_v10  ;;  %v39581_v10 = vld [vmem:[%s49651_s1 + $0x3fb8] sm:$0xff] }
 0x7ba   :  { %25483 = vmatpush.bf16.msrb.mxu0 %v39495_v11  ;;  %v39534_v11 = vld [vmem:[%s49651_s1 + $0x3e40] sm:$0xff] }
 0x7bb   :  { %25509 = vmatpush.bf16.msrb.mxu2 %v39511_v12  ;;  %v39550_v12 = vld [vmem:[%s49651_s1 + $0x3ec0] sm:$0xff] }
 0x7bc   :  { %25496 = vmatpush.bf16.msrb.mxu1 %v39503_v14  ;;  %v272_v14 = vld [vmem:[%s49652_s0 + $0x7d8] sm:$0xff] }
 0x7bd   :  { %25522 = vmatpush.bf16.msrb.mxu3 %v39519_v15  ;;  %v607_v15 = vpack.c.bf16 %v269_v7, %v269_v7  ;;  %v610_v20 = vpack.c.bf16 %v272_v14, %v272_v14  ;;  %v39611_v14 = vld [vmem:[%s49651_s1 + $0x40a8] sm:$0xff] }
 0x7be   :  { %25484 = vmatpush.bf16.msrb.mxu0 %v39494_v17  ;;  %v25278_v41 = vpop.f32.mrf.mxu0  ;;  %v39573_v17 = vld [vmem:[%s49651_s1 + $0x3f78] sm:$0xff] }
 0x7bf   :  { %25510 = vmatpush.bf16.msrb.mxu2 %v39510_v18  ;;  %v25279_v42 = vadd.f32 %v25278_v41, %v47087_v5  ;;  %v39526_v5 = vld [vmem:[%s49651_s1 + $0x3e00] sm:$0xff]  ;;  %v39589_v18 = vld [vmem:[%s49651_s1 + $0x3ff8] sm:$0xff] }
 0x7c0   :  { %25497 = vmatpush.bf16.msrb.mxu1 %v39502_v23  ;;  %v25291_v45 = vpop.f32.mrf.mxu1  ;;  %v39572_v23 = vld [vmem:[%s49651_s1 + $0x3f70] sm:$0xff]  ;;  %v39569_v41 = vld [vmem:[%s49651_s1 + $0x3f58] sm:$0xff] }
 0x7c1   :  { %25523 = vmatpush.bf16.msrb.mxu3 %v39518_v24  ;;  %25485 = vmatmul.bf16.vlgmr.msrb.gmra.mxu0 %v603_v27  ;;  %v25292_v46 = vadd.f32 %v25291_v45, %v25279_v42  ;;  %v39588_v24 = vld [vmem:[%s49651_s1 + $0x3ff0] sm:$0xff]  ;;  %v39571_v27 = vld [vmem:[%s49651_s1 + $0x3f68] sm:$0xff]  ;;  %v39585_v42 = vld [vmem:[%s49651_s1 + $0x3fd8] sm:$0xff] }
 0x7c2   :  { %25529 = vmatpush.bf16.msra.mxu0 %v39533_v21  ;;  %25511 = vmatmul.bf16.vlgmr.msrb.gmra.mxu2 %v605_v28  ;;  %v39564_v21 = vld [vmem:[%s49651_s1 + $0x3f30] sm:$0xff]  ;;  %v39587_v28 = vld [vmem:[%s49651_s1 + $0x3fe8] sm:$0xff] }
 0x7c3   :  { %25555 = vmatpush.bf16.msra.mxu2 %v39549_v22  ;;  %25498 = vmatmul.bf16.vlgmr.msrb.gmra.mxu1 %v604_v31  ;;  %v39580_v22 = vld [vmem:[%s49651_s1 + $0x3fb0] sm:$0xff]  ;;  %v39562_v31 = vld [vmem:[%s49651_s1 + $0x3f20] sm:$0xff] }
 0x7c4   :  { %25542 = vmatpush.bf16.msra.mxu1 %v39541_v29  ;;  %25524 = vmatmul.bf16.vlgmr.msrb.gmra.mxu3 %v606_v32  ;;  %v39578_v32 = vld [vmem:[%s49651_s1 + $0x3fa0] sm:$0xff] }
 0x7c5   :  { %25568 = vmatpush.bf16.msra.mxu3 %v39557_v30  ;;  %v25304_v51 = vpop.f32.mrf.mxu2 }
 0x7c6   :  { %25530 = vmatpush.bf16.msra.mxu0 %v39532_v33  ;;  %v25305_v52 = vadd.f32 %v25304_v51, %v25292_v46  ;;  %v25280_v56 = vpop.f32.mrf.mxu0  ;;  %v39560_v46 = vld [vmem:[%s49651_s1 + $0x3f10] sm:$0xff]  ;;  %v39559_v51 = vld [vmem:[%s49651_s1 + $0x3f08] sm:$0xff] }
 0x7c7   :  { %25556 = vmatpush.bf16.msra.mxu2 %v39548_v34  ;;  %v25317_v55 = vpop.f32.mrf.mxu3 }
 0x7c8   :  { %25543 = vmatpush.bf16.msra.mxu1 %v39540_v35  ;;  %v47198_v57 = vadd.f32 %v25317_v55, %v25305_v52  ;;  %v25293_v60 = vpop.f32.mrf.mxu1  ;;  %v39570_v35 = vld [vmem:[%s49651_s1 + $0x3f60] sm:$0xff]  ;;  %v39575_v52 = vld [vmem:[%s49651_s1 + $0x3f88] sm:$0xff] }
 0x7c9   :  { %25569 = vmatpush.bf16.msra.mxu3 %v39556_v36  ;;  %v39586_v36 = vld [vmem:[%s49651_s1 + $0x3fe0] sm:$0xff]  ;;  %v39583_v55 = vld [vmem:[%s49651_s1 + $0x3fc8] sm:$0xff]  ;;  %v275_v60 = vld [vmem:[%s49652_s0 + $0x7f0] sm:$0xff] }
 0x7ca   :  { %25531 = vmatpush.bf16.msra.mxu0 %v39531_v37  ;;  %v39561_v37 = vld [vmem:[%s49651_s1 + $0x3f18] sm:$0xff] }
 0x7cb   :  { %25557 = vmatpush.bf16.msra.mxu2 %v39547_v38  ;;  %v39577_v38 = vld [vmem:[%s49651_s1 + $0x3f98] sm:$0xff] }
 0x7cc   :  { %25544 = vmatpush.bf16.msra.mxu1 %v39539_v39 }
 0x7cd   :  { %25570 = vmatpush.bf16.msra.mxu3 %v39555_v40  ;;  %v25306_v1 = vpop.f32.mrf.mxu2 }
 0x7ce   :  { %25532 = vmatpush.bf16.msra.mxu0 %v39530_v43  ;;  %v274_v1 = vld [vmem:[%s49652_s0 + $0x7e8] sm:$0xff] }
 0x7cf   :  { %25558 = vmatpush.bf16.msra.mxu2 %v39546_v44  ;;  %v25319_v4 = vpop.f32.mrf.mxu3  ;;  %v612_v7 = vpack.c.bf16 %v274_v1, %v274_v1  ;;  %v39627_v1 = vld [vmem:[%s49651_s1 + $0x4128] sm:$0xff] }
 0x7d0   :  { %25545 = vmatpush.bf16.msra.mxu1 %v39538_v47  ;;  %v39576_v47 = vld [vmem:[%s49651_s1 + $0x3f90] sm:$0xff]  ;;  %v613_v4 = vpack.c.bf16 %v275_v60, %v275_v60 }
 0x7d1   :  { %25571 = vmatpush.bf16.msra.mxu3 %v39554_v48 }
 0x7d2   :  { %25533 = vmatpush.bf16.msra.mxu0 %v39529_v49  ;;  %v39568_v49 = vld [vmem:[%s49651_s1 + $0x3f50] sm:$0xff] }
 0x7d3   :  { %25559 = vmatpush.bf16.msra.mxu2 %v39545_v50  ;;  %v39584_v50 = vld [vmem:[%s49651_s1 + $0x3fd0] sm:$0xff] }
 0x7d4   :  { %25546 = vmatpush.bf16.msra.mxu1 %v39537_v53 }
 0x7d5   :  { %25572 = vmatpush.bf16.msra.mxu3 %v39553_v54  ;;  %v39567_v54 = vld [vmem:[%s49651_s1 + $0x3f48] sm:$0xff] }
 0x7d6   :  { %25534 = vmatpush.bf16.msra.mxu0 %v39528_v58  ;;  %v39574_v58 = vld [vmem:[%s49651_s1 + $0x3f80] sm:$0xff] }
 0x7d7   :  { %25560 = vmatpush.bf16.msra.mxu2 %v39544_v59  ;;  %v273_v59 = vld [vmem:[%s49652_s0 + $0x7e0] sm:$0xff] }
 0x7d8   :  { %25547 = vmatpush.bf16.msra.mxu1 %v39536_v61  ;;  %v39597_v61 = vld [vmem:[%s49651_s1 + $0x4038] sm:$0xff] }
 0x7d9   :  { %25573 = vmatpush.bf16.msra.mxu3 %v39552_v62  ;;  %v39613_v62 = vld [vmem:[%s49651_s1 + $0x40b8] sm:$0xff] }
 0x7da   :  { %25535 = vmatpush.bf16.msra.mxu0 %v39527_v63  ;;  %v39566_v63 = vld [vmem:[%s49651_s1 + $0x3f40] sm:$0xff] }
 0x7db   :  { %25561 = vmatpush.bf16.msra.mxu2 %v39543_v0  ;;  %v39582_v0 = vld [vmem:[%s49651_s1 + $0x3fc0] sm:$0xff] }
 0x7dc   :  { %25548 = vmatpush.bf16.msra.mxu1 %v39535_v2  ;;  %v276_v2 = vld [vmem:[%s49652_s0 + $0x7f8] sm:$0xff] }
 0x7dd   :  { %25574 = vmatpush.bf16.msra.mxu3 %v39551_v3  ;;  %v611_v3 = vpack.c.bf16 %v273_v59, %v273_v59  ;;  %v614_v8 = vpack.c.bf16 %v276_v2, %v276_v2  ;;  %v39643_v2 = vld [vmem:[%s49651_s1 + $0x41a8] sm:$0xff] }
 0x7de   :  { %25536 = vmatpush.bf16.msra.mxu0 %v39526_v5  ;;  %v25330_v29 = vpop.f32.mrf.mxu0  ;;  %v39605_v5 = vld [vmem:[%s49651_s1 + $0x4078] sm:$0xff] }
 0x7df   :  { %25562 = vmatpush.bf16.msra.mxu2 %v39542_v6  ;;  %v25331_v30 = vadd.f32 %v25330_v29, %v47198_v57  ;;  %v39558_v57 = vld [vmem:[%s49651_s1 + $0x3f00] sm:$0xff]  ;;  %v39621_v6 = vld [vmem:[%s49651_s1 + $0x40f8] sm:$0xff] }
 0x7e0   :  { %25549 = vmatpush.bf16.msra.mxu1 %v39534_v11  ;;  %v25343_v33 = vpop.f32.mrf.mxu1  ;;  %v39604_v11 = vld [vmem:[%s49651_s1 + $0x4070] sm:$0xff]  ;;  %v39601_v29 = vld [vmem:[%s49651_s1 + $0x4058] sm:$0xff] }
 0x7e1   :  { %25575 = vmatpush.bf16.msra.mxu3 %v39550_v12  ;;  %25537 = vmatmul.bf16.vlgmr.msra.gmra.mxu0 %v607_v15  ;;  %v25344_v34 = vadd.f32 %v25343_v33, %v25331_v30  ;;  %v39620_v12 = vld [vmem:[%s49651_s1 + $0x40f0] sm:$0xff]  ;;  %v39603_v15 = vld [vmem:[%s49651_s1 + $0x4068] sm:$0xff]  ;;  %v39617_v30 = vld [vmem:[%s49651_s1 + $0x40d8] sm:$0xff] }
 0x7e2   :  { %25581 = vmatpush.bf16.msrb.mxu0 %v39565_v9  ;;  %25563 = vmatmul.bf16.vlgmr.msra.gmra.mxu2 %v609_v16  ;;  %v39596_v9 = vld [vmem:[%s49651_s1 + $0x4030] sm:$0xff]  ;;  %v39619_v16 = vld [vmem:[%s49651_s1 + $0x40e8] sm:$0xff] }
 0x7e3   :  { %25607 = vmatpush.bf16.msrb.mxu2 %v39581_v10  ;;  %25550 = vmatmul.bf16.vlgmr.msra.gmra.mxu1 %v608_v19  ;;  %v39612_v10 = vld [vmem:[%s49651_s1 + $0x40b0] sm:$0xff]  ;;  %v39594_v19 = vld [vmem:[%s49651_s1 + $0x4020] sm:$0xff] }
 0x7e4   :  { %25594 = vmatpush.bf16.msrb.mxu1 %v39573_v17  ;;  %25576 = vmatmul.bf16.vlgmr.msra.gmra.mxu3 %v610_v20  ;;  %v39610_v20 = vld [vmem:[%s49651_s1 + $0x40a0] sm:$0xff] }
 0x7e5   :  { %25620 = vmatpush.bf16.msrb.mxu3 %v39589_v18  ;;  %v25356_v39 = vpop.f32.mrf.mxu2 }
 0x7e6   :  { %25582 = vmatpush.bf16.msrb.mxu0 %v39564_v21  ;;  %v25357_v40 = vadd.f32 %v25356_v39, %v25344_v34  ;;  %v25332_v44 = vpop.f32.mrf.mxu0  ;;  %v39592_v34 = vld [vmem:[%s49651_s1 + $0x4010] sm:$0xff]  ;;  %v39591_v39 = vld [vmem:[%s49651_s1 + $0x4008] sm:$0xff] }
 0x7e7   :  { %25608 = vmatpush.bf16.msrb.mxu2 %v39580_v22  ;;  %v25369_v43 = vpop.f32.mrf.mxu3 }
 0x7e8   :  { %25595 = vmatpush.bf16.msrb.mxu1 %v39572_v23  ;;  %v47309_v45 = vadd.f32 %v25369_v43, %v25357_v40  ;;  %v25345_v48 = vpop.f32.mrf.mxu1  ;;  %v39602_v23 = vld [vmem:[%s49651_s1 + $0x4060] sm:$0xff]  ;;  %v39607_v40 = vld [vmem:[%s49651_s1 + $0x4088] sm:$0xff] }
 0x7e9   :  { %25621 = vmatpush.bf16.msrb.mxu3 %v39588_v24  ;;  %v39618_v24 = vld [vmem:[%s49651_s1 + $0x40e0] sm:$0xff]  ;;  %v39615_v43 = vld [vmem:[%s49651_s1 + $0x40c8] sm:$0xff]  ;;  %v279_v48 = vld [vmem:[%s49652_s0 + $0x810] sm:$0xff] }
 0x7ea   :  { %25583 = vmatpush.bf16.msrb.mxu0 %v39563_v25  ;;  %v39593_v25 = vld [vmem:[%s49651_s1 + $0x4018] sm:$0xff] }
 0x7eb   :  { %25609 = vmatpush.bf16.msrb.mxu2 %v39579_v26  ;;  %v39609_v26 = vld [vmem:[%s49651_s1 + $0x4098] sm:$0xff] }
 0x7ec   :  { %25596 = vmatpush.bf16.msrb.mxu1 %v39571_v27 }
 0x7ed   :  { %25622 = vmatpush.bf16.msrb.mxu3 %v39587_v28  ;;  %v25358_v53 = vpop.f32.mrf.mxu2 }
 0x7ee   :  { %25584 = vmatpush.bf16.msrb.mxu0 %v39562_v31  ;;  %v278_v53 = vld [vmem:[%s49652_s0 + $0x808] sm:$0xff] }
 0x7ef   :  { %25610 = vmatpush.bf16.msrb.mxu2 %v39578_v32  ;;  %v25371_v56 = vpop.f32.mrf.mxu3  ;;  %v616_v59 = vpack.c.bf16 %v278_v53, %v278_v53  ;;  %v39659_v53 = vld [vmem:[%s49651_s1 + $0x4228] sm:$0xff] }
 0x7f0   :  { %25597 = vmatpush.bf16.msrb.mxu1 %v39570_v35  ;;  %v39608_v35 = vld [vmem:[%s49651_s1 + $0x4090] sm:$0xff]  ;;  %v617_v56 = vpack.c.bf16 %v279_v48, %v279_v48 }
 0x7f1   :  { %25623 = vmatpush.bf16.msrb.mxu3 %v39586_v36 }
 0x7f2   :  { %25585 = vmatpush.bf16.msrb.mxu0 %v39561_v37  ;;  %v39600_v37 = vld [vmem:[%s49651_s1 + $0x4050] sm:$0xff] }
 0x7f3   :  { %25611 = vmatpush.bf16.msrb.mxu2 %v39577_v38  ;;  %v39616_v38 = vld [vmem:[%s49651_s1 + $0x40d0] sm:$0xff] }
 0x7f4   :  { %25598 = vmatpush.bf16.msrb.mxu1 %v39569_v41 }
 0x7f5   :  { %25624 = vmatpush.bf16.msrb.mxu3 %v39585_v42  ;;  %v39599_v42 = vld [vmem:[%s49651_s1 + $0x4048] sm:$0xff] }
 0x7f6   :  { %25586 = vmatpush.bf16.msrb.mxu0 %v39560_v46  ;;  %v39606_v46 = vld [vmem:[%s49651_s1 + $0x4080] sm:$0xff] }
 0x7f7   :  { %25612 = vmatpush.bf16.msrb.mxu2 %v39576_v47  ;;  %v277_v47 = vld [vmem:[%s49652_s0 + $0x800] sm:$0xff] }
 0x7f8   :  { %25599 = vmatpush.bf16.msrb.mxu1 %v39568_v49  ;;  %v39629_v49 = vld [vmem:[%s49651_s1 + $0x4138] sm:$0xff] }
 0x7f9   :  { %25625 = vmatpush.bf16.msrb.mxu3 %v39584_v50  ;;  %v39645_v50 = vld [vmem:[%s49651_s1 + $0x41b8] sm:$0xff] }
 0x7fa   :  { %25587 = vmatpush.bf16.msrb.mxu0 %v39559_v51  ;;  %v39598_v51 = vld [vmem:[%s49651_s1 + $0x4040] sm:$0xff] }
 0x7fb   :  { %25613 = vmatpush.bf16.msrb.mxu2 %v39575_v52  ;;  %v39614_v52 = vld [vmem:[%s49651_s1 + $0x40c0] sm:$0xff] }
 0x7fc   :  { %25600 = vmatpush.bf16.msrb.mxu1 %v39567_v54  ;;  %v280_v54 = vld [vmem:[%s49652_s0 + $0x818] sm:$0xff] }
 0x7fd   :  { %25626 = vmatpush.bf16.msrb.mxu3 %v39583_v55  ;;  %v615_v55 = vpack.c.bf16 %v277_v47, %v277_v47  ;;  %v618_v60 = vpack.c.bf16 %v280_v54, %v280_v54  ;;  %v39675_v54 = vld [vmem:[%s49651_s1 + $0x42a8] sm:$0xff] }
 0x7fe   :  { %25588 = vmatpush.bf16.msrb.mxu0 %v39558_v57  ;;  %v25382_v17 = vpop.f32.mrf.mxu0  ;;  %v39637_v57 = vld [vmem:[%s49651_s1 + $0x4178] sm:$0xff] }
 0x7ff   :  { %25614 = vmatpush.bf16.msrb.mxu2 %v39574_v58  ;;  %v25383_v18 = vadd.f32 %v25382_v17, %v47309_v45  ;;  %v39590_v45 = vld [vmem:[%s49651_s1 + $0x4000] sm:$0xff]  ;;  %v39653_v58 = vld [vmem:[%s49651_s1 + $0x41f8] sm:$0xff] }
 0x800   :  { %25601 = vmatpush.bf16.msrb.mxu1 %v39566_v63  ;;  %v25395_v21 = vpop.f32.mrf.mxu1  ;;  %v39636_v63 = vld [vmem:[%s49651_s1 + $0x4170] sm:$0xff]  ;;  %v39633_v17 = vld [vmem:[%s49651_s1 + $0x4158] sm:$0xff] }
 0x801   :  { %25627 = vmatpush.bf16.msrb.mxu3 %v39582_v0  ;;  %25589 = vmatmul.bf16.vlgmr.msrb.gmra.mxu0 %v611_v3  ;;  %v25396_v22 = vadd.f32 %v25395_v21, %v25383_v18  ;;  %v39652_v0 = vld [vmem:[%s49651_s1 + $0x41f0] sm:$0xff]  ;;  %v39635_v3 = vld [vmem:[%s49651_s1 + $0x4168] sm:$0xff]  ;;  %v39649_v18 = vld [vmem:[%s49651_s1 + $0x41d8] sm:$0xff] }
 0x802   :  { %25633 = vmatpush.bf16.msra.mxu0 %v39597_v61  ;;  %25615 = vmatmul.bf16.vlgmr.msrb.gmra.mxu2 %v613_v4  ;;  %v39628_v61 = vld [vmem:[%s49651_s1 + $0x4130] sm:$0xff]  ;;  %v39651_v4 = vld [vmem:[%s49651_s1 + $0x41e8] sm:$0xff] }
 0x803   :  { %25659 = vmatpush.bf16.msra.mxu2 %v39613_v62  ;;  %25602 = vmatmul.bf16.vlgmr.msrb.gmra.mxu1 %v612_v7  ;;  %v39644_v62 = vld [vmem:[%s49651_s1 + $0x41b0] sm:$0xff]  ;;  %v39626_v7 = vld [vmem:[%s49651_s1 + $0x4120] sm:$0xff] }
 0x804   :  { %25646 = vmatpush.bf16.msra.mxu1 %v39605_v5  ;;  %25628 = vmatmul.bf16.vlgmr.msrb.gmra.mxu3 %v614_v8  ;;  %v39642_v8 = vld [vmem:[%s49651_s1 + $0x41a0] sm:$0xff] }
 0x805   :  { %25672 = vmatpush.bf16.msra.mxu3 %v39621_v6  ;;  %v25408_v27 = vpop.f32.mrf.mxu2 }
 0x806   :  { %25634 = vmatpush.bf16.msra.mxu0 %v39596_v9  ;;  %v25409_v28 = vadd.f32 %v25408_v27, %v25396_v22  ;;  %v25384_v32 = vpop.f32.mrf.mxu0  ;;  %v39624_v22 = vld [vmem:[%s49651_s1 + $0x4110] sm:$0xff]  ;;  %v39623_v27 = vld [vmem:[%s49651_s1 + $0x4108] sm:$0xff] }
 0x807   :  { %25660 = vmatpush.bf16.msra.mxu2 %v39612_v10  ;;  %v25421_v31 = vpop.f32.mrf.mxu3 }
 0x808   :  { %25647 = vmatpush.bf16.msra.mxu1 %v39604_v11  ;;  %v47420_v33 = vadd.f32 %v25421_v31, %v25409_v28  ;;  %v25397_v36 = vpop.f32.mrf.mxu1  ;;  %v39634_v11 = vld [vmem:[%s49651_s1 + $0x4160] sm:$0xff]  ;;  %v39639_v28 = vld [vmem:[%s49651_s1 + $0x4188] sm:$0xff] }
 0x809   :  { %25673 = vmatpush.bf16.msra.mxu3 %v39620_v12  ;;  %v39650_v12 = vld [vmem:[%s49651_s1 + $0x41e0] sm:$0xff]  ;;  %v39647_v31 = vld [vmem:[%s49651_s1 + $0x41c8] sm:$0xff]  ;;  %v283_v36 = vld [vmem:[%s49652_s0 + $0x830] sm:$0xff] }
 0x80a   :  { %25635 = vmatpush.bf16.msra.mxu0 %v39595_v13  ;;  %v39625_v13 = vld [vmem:[%s49651_s1 + $0x4118] sm:$0xff] }
 0x80b   :  { %25661 = vmatpush.bf16.msra.mxu2 %v39611_v14  ;;  %v39641_v14 = vld [vmem:[%s49651_s1 + $0x4198] sm:$0xff] }
 0x80c   :  { %25648 = vmatpush.bf16.msra.mxu1 %v39603_v15 }
 0x80d   :  { %25674 = vmatpush.bf16.msra.mxu3 %v39619_v16  ;;  %v25410_v41 = vpop.f32.mrf.mxu2 }
 0x80e   :  { %25636 = vmatpush.bf16.msra.mxu0 %v39594_v19  ;;  %v282_v41 = vld [vmem:[%s49652_s0 + $0x828] sm:$0xff] }
 0x80f   :  { %25662 = vmatpush.bf16.msra.mxu2 %v39610_v20  ;;  %v25423_v44 = vpop.f32.mrf.mxu3  ;;  %v620_v47 = vpack.c.bf16 %v282_v41, %v282_v41  ;;  %v39691_v41 = vld [vmem:[%s49651_s1 + $0x4328] sm:$0xff] }
 0x810   :  { %25649 = vmatpush.bf16.msra.mxu1 %v39602_v23  ;;  %v39640_v23 = vld [vmem:[%s49651_s1 + $0x4190] sm:$0xff]  ;;  %v621_v44 = vpack.c.bf16 %v283_v36, %v283_v36 }
 0x811   :  { %25675 = vmatpush.bf16.msra.mxu3 %v39618_v24 }
 0x812   :  { %25637 = vmatpush.bf16.msra.mxu0 %v39593_v25  ;;  %v39632_v25 = vld [vmem:[%s49651_s1 + $0x4150] sm:$0xff] }
 0x813   :  { %25663 = vmatpush.bf16.msra.mxu2 %v39609_v26  ;;  %v39648_v26 = vld [vmem:[%s49651_s1 + $0x41d0] sm:$0xff] }
 0x814   :  { %25650 = vmatpush.bf16.msra.mxu1 %v39601_v29 }
 0x815   :  { %25676 = vmatpush.bf16.msra.mxu3 %v39617_v30  ;;  %v39631_v30 = vld [vmem:[%s49651_s1 + $0x4148] sm:$0xff] }
 0x816   :  { %25638 = vmatpush.bf16.msra.mxu0 %v39592_v34  ;;  %v39638_v34 = vld [vmem:[%s49651_s1 + $0x4180] sm:$0xff] }
 0x817   :  { %25664 = vmatpush.bf16.msra.mxu2 %v39608_v35  ;;  %v281_v35 = vld [vmem:[%s49652_s0 + $0x820] sm:$0xff] }
 0x818   :  { %25651 = vmatpush.bf16.msra.mxu1 %v39600_v37  ;;  %v39661_v37 = vld [vmem:[%s49651_s1 + $0x4238] sm:$0xff] }
 0x819   :  { %25677 = vmatpush.bf16.msra.mxu3 %v39616_v38  ;;  %v39677_v38 = vld [vmem:[%s49651_s1 + $0x42b8] sm:$0xff] }
 0x81a   :  { %25639 = vmatpush.bf16.msra.mxu0 %v39591_v39  ;;  %v39630_v39 = vld [vmem:[%s49651_s1 + $0x4140] sm:$0xff] }
 0x81b   :  { %25665 = vmatpush.bf16.msra.mxu2 %v39607_v40  ;;  %v39646_v40 = vld [vmem:[%s49651_s1 + $0x41c0] sm:$0xff] }
 0x81c   :  { %25652 = vmatpush.bf16.msra.mxu1 %v39599_v42  ;;  %v284_v42 = vld [vmem:[%s49652_s0 + $0x838] sm:$0xff] }
 0x81d   :  { %25678 = vmatpush.bf16.msra.mxu3 %v39615_v43  ;;  %v619_v43 = vpack.c.bf16 %v281_v35, %v281_v35  ;;  %v622_v48 = vpack.c.bf16 %v284_v42, %v284_v42  ;;  %v39707_v42 = vld [vmem:[%s49651_s1 + $0x43a8] sm:$0xff] }
 0x81e   :  { %25640 = vmatpush.bf16.msra.mxu0 %v39590_v45  ;;  %v25434_v5 = vpop.f32.mrf.mxu0  ;;  %v39669_v45 = vld [vmem:[%s49651_s1 + $0x4278] sm:$0xff] }
 0x81f   :  { %25666 = vmatpush.bf16.msra.mxu2 %v39606_v46  ;;  %v25435_v6 = vadd.f32 %v25434_v5, %v47420_v33  ;;  %v39622_v33 = vld [vmem:[%s49651_s1 + $0x4100] sm:$0xff]  ;;  %v39685_v46 = vld [vmem:[%s49651_s1 + $0x42f8] sm:$0xff] }
 0x820   :  { %25653 = vmatpush.bf16.msra.mxu1 %v39598_v51  ;;  %v25447_v9 = vpop.f32.mrf.mxu1  ;;  %v39668_v51 = vld [vmem:[%s49651_s1 + $0x4270] sm:$0xff]  ;;  %v39665_v5 = vld [vmem:[%s49651_s1 + $0x4258] sm:$0xff] }
 0x821   :  { %25679 = vmatpush.bf16.msra.mxu3 %v39614_v52  ;;  %25641 = vmatmul.bf16.vlgmr.msra.gmra.mxu0 %v615_v55  ;;  %v25448_v10 = vadd.f32 %v25447_v9, %v25435_v6  ;;  %v39684_v52 = vld [vmem:[%s49651_s1 + $0x42f0] sm:$0xff]  ;;  %v39667_v55 = vld [vmem:[%s49651_s1 + $0x4268] sm:$0xff]  ;;  %v39681_v6 = vld [vmem:[%s49651_s1 + $0x42d8] sm:$0xff] }
 0x822   :  { %25685 = vmatpush.bf16.msrb.mxu0 %v39629_v49  ;;  %25667 = vmatmul.bf16.vlgmr.msra.gmra.mxu2 %v617_v56  ;;  %v39660_v49 = vld [vmem:[%s49651_s1 + $0x4230] sm:$0xff]  ;;  %v39683_v56 = vld [vmem:[%s49651_s1 + $0x42e8] sm:$0xff] }
 0x823   :  { %25711 = vmatpush.bf16.msrb.mxu2 %v39645_v50  ;;  %25654 = vmatmul.bf16.vlgmr.msra.gmra.mxu1 %v616_v59  ;;  %v39676_v50 = vld [vmem:[%s49651_s1 + $0x42b0] sm:$0xff]  ;;  %v39658_v59 = vld [vmem:[%s49651_s1 + $0x4220] sm:$0xff] }
 0x824   :  { %25698 = vmatpush.bf16.msrb.mxu1 %v39637_v57  ;;  %25680 = vmatmul.bf16.vlgmr.msra.gmra.mxu3 %v618_v60  ;;  %v39674_v60 = vld [vmem:[%s49651_s1 + $0x42a0] sm:$0xff] }
 0x825   :  { %25724 = vmatpush.bf16.msrb.mxu3 %v39653_v58  ;;  %v25460_v15 = vpop.f32.mrf.mxu2 }
 0x826   :  { %25686 = vmatpush.bf16.msrb.mxu0 %v39628_v61  ;;  %v25461_v16 = vadd.f32 %v25460_v15, %v25448_v10  ;;  %v25436_v20 = vpop.f32.mrf.mxu0  ;;  %v39656_v10 = vld [vmem:[%s49651_s1 + $0x4210] sm:$0xff]  ;;  %v39655_v15 = vld [vmem:[%s49651_s1 + $0x4208] sm:$0xff] }
 0x827   :  { %25712 = vmatpush.bf16.msrb.mxu2 %v39644_v62  ;;  %v25473_v19 = vpop.f32.mrf.mxu3 }
 0x828   :  { %25699 = vmatpush.bf16.msrb.mxu1 %v39636_v63  ;;  %v47531_v21 = vadd.f32 %v25473_v19, %v25461_v16  ;;  %v25449_v24 = vpop.f32.mrf.mxu1  ;;  %v39666_v63 = vld [vmem:[%s49651_s1 + $0x4260] sm:$0xff]  ;;  %v39671_v16 = vld [vmem:[%s49651_s1 + $0x4288] sm:$0xff] }
 0x829   :  { %25725 = vmatpush.bf16.msrb.mxu3 %v39652_v0  ;;  %v39682_v0 = vld [vmem:[%s49651_s1 + $0x42e0] sm:$0xff]  ;;  %v39679_v19 = vld [vmem:[%s49651_s1 + $0x42c8] sm:$0xff]  ;;  %v287_v24 = vld [vmem:[%s49652_s0 + $0x850] sm:$0xff] }
 0x82a   :  { %25687 = vmatpush.bf16.msrb.mxu0 %v39627_v1  ;;  %v39657_v1 = vld [vmem:[%s49651_s1 + $0x4218] sm:$0xff] }
 0x82b   :  { %25713 = vmatpush.bf16.msrb.mxu2 %v39643_v2  ;;  %v39673_v2 = vld [vmem:[%s49651_s1 + $0x4298] sm:$0xff] }
 0x82c   :  { %25700 = vmatpush.bf16.msrb.mxu1 %v39635_v3 }
 0x82d   :  { %25726 = vmatpush.bf16.msrb.mxu3 %v39651_v4  ;;  %v25462_v29 = vpop.f32.mrf.mxu2 }
 0x82e   :  { %25688 = vmatpush.bf16.msrb.mxu0 %v39626_v7  ;;  %v286_v29 = vld [vmem:[%s49652_s0 + $0x848] sm:$0xff] }
 0x82f   :  { %25714 = vmatpush.bf16.msrb.mxu2 %v39642_v8  ;;  %v25475_v32 = vpop.f32.mrf.mxu3  ;;  %v624_v35 = vpack.c.bf16 %v286_v29, %v286_v29  ;;  %v39723_v29 = vld [vmem:[%s49651_s1 + $0x4428] sm:$0xff] }
 0x830   :  { %25701 = vmatpush.bf16.msrb.mxu1 %v39634_v11  ;;  %v39672_v11 = vld [vmem:[%s49651_s1 + $0x4290] sm:$0xff]  ;;  %v625_v32 = vpack.c.bf16 %v287_v24, %v287_v24 }
 0x831   :  { %25727 = vmatpush.bf16.msrb.mxu3 %v39650_v12 }
 0x832   :  { %25689 = vmatpush.bf16.msrb.mxu0 %v39625_v13  ;;  %v39664_v13 = vld [vmem:[%s49651_s1 + $0x4250] sm:$0xff] }
 0x833   :  { %25715 = vmatpush.bf16.msrb.mxu2 %v39641_v14  ;;  %v39680_v14 = vld [vmem:[%s49651_s1 + $0x42d0] sm:$0xff] }
 0x834   :  { %25702 = vmatpush.bf16.msrb.mxu1 %v39633_v17 }
 0x835   :  { %25728 = vmatpush.bf16.msrb.mxu3 %v39649_v18  ;;  %v39663_v18 = vld [vmem:[%s49651_s1 + $0x4248] sm:$0xff] }
 0x836   :  { %25690 = vmatpush.bf16.msrb.mxu0 %v39624_v22  ;;  %v39670_v22 = vld [vmem:[%s49651_s1 + $0x4280] sm:$0xff] }
 0x837   :  { %25716 = vmatpush.bf16.msrb.mxu2 %v39640_v23  ;;  %v285_v23 = vld [vmem:[%s49652_s0 + $0x840] sm:$0xff] }
 0x838   :  { %25703 = vmatpush.bf16.msrb.mxu1 %v39632_v25  ;;  %v39693_v25 = vld [vmem:[%s49651_s1 + $0x4338] sm:$0xff] }
 0x839   :  { %25729 = vmatpush.bf16.msrb.mxu3 %v39648_v26  ;;  %v39709_v26 = vld [vmem:[%s49651_s1 + $0x43b8] sm:$0xff] }
 0x83a   :  { %25691 = vmatpush.bf16.msrb.mxu0 %v39623_v27  ;;  %v39662_v27 = vld [vmem:[%s49651_s1 + $0x4240] sm:$0xff] }
 0x83b   :  { %25717 = vmatpush.bf16.msrb.mxu2 %v39639_v28  ;;  %v39678_v28 = vld [vmem:[%s49651_s1 + $0x42c0] sm:$0xff] }
 0x83c   :  { %25704 = vmatpush.bf16.msrb.mxu1 %v39631_v30  ;;  %v288_v30 = vld [vmem:[%s49652_s0 + $0x858] sm:$0xff] }
 0x83d   :  { %25730 = vmatpush.bf16.msrb.mxu3 %v39647_v31  ;;  %v623_v31 = vpack.c.bf16 %v285_v23, %v285_v23  ;;  %v626_v36 = vpack.c.bf16 %v288_v30, %v288_v30  ;;  %v39739_v30 = vld [vmem:[%s49651_s1 + $0x44a8] sm:$0xff] }
 0x83e   :  { %25692 = vmatpush.bf16.msrb.mxu0 %v39622_v33  ;;  %v25486_v57 = vpop.f32.mrf.mxu0  ;;  %v39701_v33 = vld [vmem:[%s49651_s1 + $0x4378] sm:$0xff] }
 0x83f   :  { %25718 = vmatpush.bf16.msrb.mxu2 %v39638_v34  ;;  %v25487_v58 = vadd.f32 %v25486_v57, %v47531_v21  ;;  %v39654_v21 = vld [vmem:[%s49651_s1 + $0x4200] sm:$0xff]  ;;  %v39717_v34 = vld [vmem:[%s49651_s1 + $0x43f8] sm:$0xff] }
 0x840   :  { %25705 = vmatpush.bf16.msrb.mxu1 %v39630_v39  ;;  %v25499_v61 = vpop.f32.mrf.mxu1  ;;  %v39700_v39 = vld [vmem:[%s49651_s1 + $0x4370] sm:$0xff]  ;;  %v39697_v57 = vld [vmem:[%s49651_s1 + $0x4358] sm:$0xff] }
 0x841   :  { %25731 = vmatpush.bf16.msrb.mxu3 %v39646_v40  ;;  %25693 = vmatmul.bf16.vlgmr.msrb.gmra.mxu0 %v619_v43  ;;  %v25500_v62 = vadd.f32 %v25499_v61, %v25487_v58  ;;  %v39716_v40 = vld [vmem:[%s49651_s1 + $0x43f0] sm:$0xff]  ;;  %v39699_v43 = vld [vmem:[%s49651_s1 + $0x4368] sm:$0xff]  ;;  %v39713_v58 = vld [vmem:[%s49651_s1 + $0x43d8] sm:$0xff] }
 0x842   :  { %25737 = vmatpush.bf16.msra.mxu0 %v39661_v37  ;;  %25719 = vmatmul.bf16.vlgmr.msrb.gmra.mxu2 %v621_v44  ;;  %v39692_v37 = vld [vmem:[%s49651_s1 + $0x4330] sm:$0xff]  ;;  %v39715_v44 = vld [vmem:[%s49651_s1 + $0x43e8] sm:$0xff] }
 0x843   :  { %25763 = vmatpush.bf16.msra.mxu2 %v39677_v38  ;;  %25706 = vmatmul.bf16.vlgmr.msrb.gmra.mxu1 %v620_v47  ;;  %v39708_v38 = vld [vmem:[%s49651_s1 + $0x43b0] sm:$0xff]  ;;  %v39690_v47 = vld [vmem:[%s49651_s1 + $0x4320] sm:$0xff] }
 0x844   :  { %25750 = vmatpush.bf16.msra.mxu1 %v39669_v45  ;;  %25732 = vmatmul.bf16.vlgmr.msrb.gmra.mxu3 %v622_v48  ;;  %v39706_v48 = vld [vmem:[%s49651_s1 + $0x43a0] sm:$0xff] }
 0x845   :  { %25776 = vmatpush.bf16.msra.mxu3 %v39685_v46  ;;  %v25512_v3 = vpop.f32.mrf.mxu2 }
 0x846   :  { %25738 = vmatpush.bf16.msra.mxu0 %v39660_v49  ;;  %v25513_v4 = vadd.f32 %v25512_v3, %v25500_v62  ;;  %v25488_v8 = vpop.f32.mrf.mxu0  ;;  %v39688_v62 = vld [vmem:[%s49651_s1 + $0x4310] sm:$0xff]  ;;  %v39687_v3 = vld [vmem:[%s49651_s1 + $0x4308] sm:$0xff] }
 0x847   :  { %25764 = vmatpush.bf16.msra.mxu2 %v39676_v50  ;;  %v25525_v7 = vpop.f32.mrf.mxu3 }
 0x848   :  { %25751 = vmatpush.bf16.msra.mxu1 %v39668_v51  ;;  %v47642_v9 = vadd.f32 %v25525_v7, %v25513_v4  ;;  %v25501_v12 = vpop.f32.mrf.mxu1  ;;  %v39698_v51 = vld [vmem:[%s49651_s1 + $0x4360] sm:$0xff]  ;;  %v39703_v4 = vld [vmem:[%s49651_s1 + $0x4388] sm:$0xff] }
 0x849   :  { %25777 = vmatpush.bf16.msra.mxu3 %v39684_v52  ;;  %v39714_v52 = vld [vmem:[%s49651_s1 + $0x43e0] sm:$0xff]  ;;  %v39711_v7 = vld [vmem:[%s49651_s1 + $0x43c8] sm:$0xff]  ;;  %v291_v12 = vld [vmem:[%s49652_s0 + $0x870] sm:$0xff] }
 0x84a   :  { %25739 = vmatpush.bf16.msra.mxu0 %v39659_v53  ;;  %v39689_v53 = vld [vmem:[%s49651_s1 + $0x4318] sm:$0xff] }
 0x84b   :  { %25765 = vmatpush.bf16.msra.mxu2 %v39675_v54  ;;  %v39705_v54 = vld [vmem:[%s49651_s1 + $0x4398] sm:$0xff] }
 0x84c   :  { %25752 = vmatpush.bf16.msra.mxu1 %v39667_v55 }
 0x84d   :  { %25778 = vmatpush.bf16.msra.mxu3 %v39683_v56  ;;  %v25514_v17 = vpop.f32.mrf.mxu2 }
 0x84e   :  { %25740 = vmatpush.bf16.msra.mxu0 %v39658_v59  ;;  %v290_v17 = vld [vmem:[%s49652_s0 + $0x868] sm:$0xff] }
 0x84f   :  { %25766 = vmatpush.bf16.msra.mxu2 %v39674_v60  ;;  %v25527_v20 = vpop.f32.mrf.mxu3  ;;  %v628_v23 = vpack.c.bf16 %v290_v17, %v290_v17  ;;  %v39755_v17 = vld [vmem:[%s49651_s1 + $0x4528] sm:$0xff] }
 0x850   :  { %25753 = vmatpush.bf16.msra.mxu1 %v39666_v63  ;;  %v39704_v63 = vld [vmem:[%s49651_s1 + $0x4390] sm:$0xff]  ;;  %v629_v20 = vpack.c.bf16 %v291_v12, %v291_v12 }
 0x851   :  { %25779 = vmatpush.bf16.msra.mxu3 %v39682_v0 }
 0x852   :  { %25741 = vmatpush.bf16.msra.mxu0 %v39657_v1  ;;  %v39696_v1 = vld [vmem:[%s49651_s1 + $0x4350] sm:$0xff] }
 0x853   :  { %25767 = vmatpush.bf16.msra.mxu2 %v39673_v2  ;;  %v39712_v2 = vld [vmem:[%s49651_s1 + $0x43d0] sm:$0xff] }
 0x854   :  { %25754 = vmatpush.bf16.msra.mxu1 %v39665_v5 }
 0x855   :  { %25780 = vmatpush.bf16.msra.mxu3 %v39681_v6  ;;  %v39695_v6 = vld [vmem:[%s49651_s1 + $0x4348] sm:$0xff] }
 0x856   :  { %25742 = vmatpush.bf16.msra.mxu0 %v39656_v10  ;;  %v39702_v10 = vld [vmem:[%s49651_s1 + $0x4380] sm:$0xff] }
 0x857   :  { %25768 = vmatpush.bf16.msra.mxu2 %v39672_v11  ;;  %v289_v11 = vld [vmem:[%s49652_s0 + $0x860] sm:$0xff] }
 0x858   :  { %25755 = vmatpush.bf16.msra.mxu1 %v39664_v13  ;;  %v39725_v13 = vld [vmem:[%s49651_s1 + $0x4438] sm:$0xff] }
 0x859   :  { %25781 = vmatpush.bf16.msra.mxu3 %v39680_v14  ;;  %v39741_v14 = vld [vmem:[%s49651_s1 + $0x44b8] sm:$0xff] }
 0x85a   :  { %25743 = vmatpush.bf16.msra.mxu0 %v39655_v15  ;;  %v39694_v15 = vld [vmem:[%s49651_s1 + $0x4340] sm:$0xff] }
 0x85b   :  { %25769 = vmatpush.bf16.msra.mxu2 %v39671_v16  ;;  %v39710_v16 = vld [vmem:[%s49651_s1 + $0x43c0] sm:$0xff] }
 0x85c   :  { %25756 = vmatpush.bf16.msra.mxu1 %v39663_v18  ;;  %v292_v18 = vld [vmem:[%s49652_s0 + $0x878] sm:$0xff] }
 0x85d   :  { %25782 = vmatpush.bf16.msra.mxu3 %v39679_v19  ;;  %v627_v19 = vpack.c.bf16 %v289_v11, %v289_v11  ;;  %v630_v24 = vpack.c.bf16 %v292_v18, %v292_v18  ;;  %v39771_v18 = vld [vmem:[%s49651_s1 + $0x45a8] sm:$0xff] }
 0x85e   :  { %25744 = vmatpush.bf16.msra.mxu0 %v39654_v21  ;;  %v25538_v45 = vpop.f32.mrf.mxu0  ;;  %v39733_v21 = vld [vmem:[%s49651_s1 + $0x4478] sm:$0xff] }
 0x85f   :  { %25770 = vmatpush.bf16.msra.mxu2 %v39670_v22  ;;  %v25539_v46 = vadd.f32 %v25538_v45, %v47642_v9  ;;  %v39686_v9 = vld [vmem:[%s49651_s1 + $0x4300] sm:$0xff]  ;;  %v39749_v22 = vld [vmem:[%s49651_s1 + $0x44f8] sm:$0xff] }
 0x860   :  { %25757 = vmatpush.bf16.msra.mxu1 %v39662_v27  ;;  %v25551_v49 = vpop.f32.mrf.mxu1  ;;  %v39732_v27 = vld [vmem:[%s49651_s1 + $0x4470] sm:$0xff]  ;;  %v39729_v45 = vld [vmem:[%s49651_s1 + $0x4458] sm:$0xff] }
 0x861   :  { %25783 = vmatpush.bf16.msra.mxu3 %v39678_v28  ;;  %25745 = vmatmul.bf16.vlgmr.msra.gmra.mxu0 %v623_v31  ;;  %v25552_v50 = vadd.f32 %v25551_v49, %v25539_v46  ;;  %v39748_v28 = vld [vmem:[%s49651_s1 + $0x44f0] sm:$0xff]  ;;  %v39731_v31 = vld [vmem:[%s49651_s1 + $0x4468] sm:$0xff]  ;;  %v39745_v46 = vld [vmem:[%s49651_s1 + $0x44d8] sm:$0xff] }
 0x862   :  { %25789 = vmatpush.bf16.msrb.mxu0 %v39693_v25  ;;  %25771 = vmatmul.bf16.vlgmr.msra.gmra.mxu2 %v625_v32  ;;  %v39724_v25 = vld [vmem:[%s49651_s1 + $0x4430] sm:$0xff]  ;;  %v39747_v32 = vld [vmem:[%s49651_s1 + $0x44e8] sm:$0xff] }
 0x863   :  { %25815 = vmatpush.bf16.msrb.mxu2 %v39709_v26  ;;  %25758 = vmatmul.bf16.vlgmr.msra.gmra.mxu1 %v624_v35  ;;  %v39740_v26 = vld [vmem:[%s49651_s1 + $0x44b0] sm:$0xff]  ;;  %v39722_v35 = vld [vmem:[%s49651_s1 + $0x4420] sm:$0xff] }
 0x864   :  { %25802 = vmatpush.bf16.msrb.mxu1 %v39701_v33  ;;  %25784 = vmatmul.bf16.vlgmr.msra.gmra.mxu3 %v626_v36  ;;  %v39738_v36 = vld [vmem:[%s49651_s1 + $0x44a0] sm:$0xff] }
 0x865   :  { %25828 = vmatpush.bf16.msrb.mxu3 %v39717_v34  ;;  %v25564_v55 = vpop.f32.mrf.mxu2 }
 0x866   :  { %25790 = vmatpush.bf16.msrb.mxu0 %v39692_v37  ;;  %v25565_v56 = vadd.f32 %v25564_v55, %v25552_v50  ;;  %v25540_v60 = vpop.f32.mrf.mxu0  ;;  %v39720_v50 = vld [vmem:[%s49651_s1 + $0x4410] sm:$0xff]  ;;  %v39719_v55 = vld [vmem:[%s49651_s1 + $0x4408] sm:$0xff] }
 0x867   :  { %25816 = vmatpush.bf16.msrb.mxu2 %v39708_v38  ;;  %v25577_v59 = vpop.f32.mrf.mxu3 }
 0x868   :  { %25803 = vmatpush.bf16.msrb.mxu1 %v39700_v39  ;;  %v47753_v61 = vadd.f32 %v25577_v59, %v25565_v56  ;;  %v25553_v0 = vpop.f32.mrf.mxu1  ;;  %v39730_v39 = vld [vmem:[%s49651_s1 + $0x4460] sm:$0xff]  ;;  %v39735_v56 = vld [vmem:[%s49651_s1 + $0x4488] sm:$0xff] }
 0x869   :  { %25829 = vmatpush.bf16.msrb.mxu3 %v39716_v40  ;;  %v39746_v40 = vld [vmem:[%s49651_s1 + $0x44e0] sm:$0xff]  ;;  %v39743_v59 = vld [vmem:[%s49651_s1 + $0x44c8] sm:$0xff]  ;;  %v295_v0 = vld [vmem:[%s49652_s0 + $0x890] sm:$0xff] }
 0x86a   :  { %25791 = vmatpush.bf16.msrb.mxu0 %v39691_v41  ;;  %v39721_v41 = vld [vmem:[%s49651_s1 + $0x4418] sm:$0xff] }
 0x86b   :  { %25817 = vmatpush.bf16.msrb.mxu2 %v39707_v42  ;;  %v39737_v42 = vld [vmem:[%s49651_s1 + $0x4498] sm:$0xff] }
 0x86c   :  { %25804 = vmatpush.bf16.msrb.mxu1 %v39699_v43 }
 0x86d   :  { %25830 = vmatpush.bf16.msrb.mxu3 %v39715_v44  ;;  %v25566_v5 = vpop.f32.mrf.mxu2 }
 0x86e   :  { %25792 = vmatpush.bf16.msrb.mxu0 %v39690_v47  ;;  %v294_v5 = vld [vmem:[%s49652_s0 + $0x888] sm:$0xff] }
 0x86f   :  { %25818 = vmatpush.bf16.msrb.mxu2 %v39706_v48  ;;  %v25579_v8 = vpop.f32.mrf.mxu3  ;;  %v632_v11 = vpack.c.bf16 %v294_v5, %v294_v5  ;;  %v39787_v5 = vld [vmem:[%s49651_s1 + $0x4628] sm:$0xff] }
 0x870   :  { %25805 = vmatpush.bf16.msrb.mxu1 %v39698_v51  ;;  %v39736_v51 = vld [vmem:[%s49651_s1 + $0x4490] sm:$0xff]  ;;  %v633_v8 = vpack.c.bf16 %v295_v0, %v295_v0 }
 0x871   :  { %25831 = vmatpush.bf16.msrb.mxu3 %v39714_v52 }
 0x872   :  { %25793 = vmatpush.bf16.msrb.mxu0 %v39689_v53  ;;  %v39728_v53 = vld [vmem:[%s49651_s1 + $0x4450] sm:$0xff] }
 0x873   :  { %25819 = vmatpush.bf16.msrb.mxu2 %v39705_v54  ;;  %v39744_v54 = vld [vmem:[%s49651_s1 + $0x44d0] sm:$0xff] }
 0x874   :  { %25806 = vmatpush.bf16.msrb.mxu1 %v39697_v57 }
 0x875   :  { %25832 = vmatpush.bf16.msrb.mxu3 %v39713_v58  ;;  %v39727_v58 = vld [vmem:[%s49651_s1 + $0x4448] sm:$0xff] }
 0x876   :  { %25794 = vmatpush.bf16.msrb.mxu0 %v39688_v62  ;;  %v39734_v62 = vld [vmem:[%s49651_s1 + $0x4480] sm:$0xff] }
 0x877   :  { %25820 = vmatpush.bf16.msrb.mxu2 %v39704_v63  ;;  %v293_v63 = vld [vmem:[%s49652_s0 + $0x880] sm:$0xff] }
 0x878   :  { %25807 = vmatpush.bf16.msrb.mxu1 %v39696_v1  ;;  %v39757_v1 = vld [vmem:[%s49651_s1 + $0x4538] sm:$0xff] }
 0x879   :  { %25833 = vmatpush.bf16.msrb.mxu3 %v39712_v2  ;;  %v39773_v2 = vld [vmem:[%s49651_s1 + $0x45b8] sm:$0xff] }
 0x87a   :  { %25795 = vmatpush.bf16.msrb.mxu0 %v39687_v3  ;;  %v39726_v3 = vld [vmem:[%s49651_s1 + $0x4440] sm:$0xff] }
 0x87b   :  { %25821 = vmatpush.bf16.msrb.mxu2 %v39703_v4  ;;  %v39742_v4 = vld [vmem:[%s49651_s1 + $0x44c0] sm:$0xff] }
 0x87c   :  { %25808 = vmatpush.bf16.msrb.mxu1 %v39695_v6  ;;  %v296_v6 = vld [vmem:[%s49652_s0 + $0x898] sm:$0xff] }
 0x87d   :  { %25834 = vmatpush.bf16.msrb.mxu3 %v39711_v7  ;;  %v631_v7 = vpack.c.bf16 %v293_v63, %v293_v63  ;;  %v634_v12 = vpack.c.bf16 %v296_v6, %v296_v6  ;;  %v39803_v6 = vld [vmem:[%s49651_s1 + $0x46a8] sm:$0xff] }
 0x87e   :  { %25796 = vmatpush.bf16.msrb.mxu0 %v39686_v9  ;;  %v25590_v33 = vpop.f32.mrf.mxu0  ;;  %v39765_v9 = vld [vmem:[%s49651_s1 + $0x4578] sm:$0xff] }
 0x87f   :  { %25822 = vmatpush.bf16.msrb.mxu2 %v39702_v10  ;;  %v25591_v34 = vadd.f32 %v25590_v33, %v47753_v61  ;;  %v39718_v61 = vld [vmem:[%s49651_s1 + $0x4400] sm:$0xff]  ;;  %v39781_v10 = vld [vmem:[%s49651_s1 + $0x45f8] sm:$0xff] }
 0x880   :  { %25809 = vmatpush.bf16.msrb.mxu1 %v39694_v15  ;;  %v25603_v37 = vpop.f32.mrf.mxu1  ;;  %v39764_v15 = vld [vmem:[%s49651_s1 + $0x4570] sm:$0xff]  ;;  %v39761_v33 = vld [vmem:[%s49651_s1 + $0x4558] sm:$0xff] }
 0x881   :  { %25835 = vmatpush.bf16.msrb.mxu3 %v39710_v16  ;;  %25797 = vmatmul.bf16.vlgmr.msrb.gmra.mxu0 %v627_v19  ;;  %v25604_v38 = vadd.f32 %v25603_v37, %v25591_v34  ;;  %v39780_v16 = vld [vmem:[%s49651_s1 + $0x45f0] sm:$0xff]  ;;  %v39763_v19 = vld [vmem:[%s49651_s1 + $0x4568] sm:$0xff]  ;;  %v39777_v34 = vld [vmem:[%s49651_s1 + $0x45d8] sm:$0xff] }
 0x882   :  { %25841 = vmatpush.bf16.msra.mxu0 %v39725_v13  ;;  %25823 = vmatmul.bf16.vlgmr.msrb.gmra.mxu2 %v629_v20  ;;  %v39756_v13 = vld [vmem:[%s49651_s1 + $0x4530] sm:$0xff]  ;;  %v39779_v20 = vld [vmem:[%s49651_s1 + $0x45e8] sm:$0xff] }
 0x883   :  { %25867 = vmatpush.bf16.msra.mxu2 %v39741_v14  ;;  %25810 = vmatmul.bf16.vlgmr.msrb.gmra.mxu1 %v628_v23  ;;  %v39772_v14 = vld [vmem:[%s49651_s1 + $0x45b0] sm:$0xff]  ;;  %v39754_v23 = vld [vmem:[%s49651_s1 + $0x4520] sm:$0xff] }
 0x884   :  { %25854 = vmatpush.bf16.msra.mxu1 %v39733_v21  ;;  %25836 = vmatmul.bf16.vlgmr.msrb.gmra.mxu3 %v630_v24  ;;  %v39770_v24 = vld [vmem:[%s49651_s1 + $0x45a0] sm:$0xff] }
 0x885   :  { %25880 = vmatpush.bf16.msra.mxu3 %v39749_v22  ;;  %v25616_v43 = vpop.f32.mrf.mxu2 }
 0x886   :  { %25842 = vmatpush.bf16.msra.mxu0 %v39724_v25  ;;  %v25617_v44 = vadd.f32 %v25616_v43, %v25604_v38  ;;  %v25592_v48 = vpop.f32.mrf.mxu0  ;;  %v39752_v38 = vld [vmem:[%s49651_s1 + $0x4510] sm:$0xff]  ;;  %v39751_v43 = vld [vmem:[%s49651_s1 + $0x4508] sm:$0xff] }
 0x887   :  { %25868 = vmatpush.bf16.msra.mxu2 %v39740_v26  ;;  %v25629_v47 = vpop.f32.mrf.mxu3 }
 0x888   :  { %25855 = vmatpush.bf16.msra.mxu1 %v39732_v27  ;;  %v47864_v49 = vadd.f32 %v25629_v47, %v25617_v44  ;;  %v25605_v52 = vpop.f32.mrf.mxu1  ;;  %v39762_v27 = vld [vmem:[%s49651_s1 + $0x4560] sm:$0xff]  ;;  %v39767_v44 = vld [vmem:[%s49651_s1 + $0x4588] sm:$0xff] }
 0x889   :  { %25881 = vmatpush.bf16.msra.mxu3 %v39748_v28  ;;  %v39778_v28 = vld [vmem:[%s49651_s1 + $0x45e0] sm:$0xff]  ;;  %v39775_v47 = vld [vmem:[%s49651_s1 + $0x45c8] sm:$0xff]  ;;  %v299_v52 = vld [vmem:[%s49652_s0 + $0x8b0] sm:$0xff] }
 0x88a   :  { %25843 = vmatpush.bf16.msra.mxu0 %v39723_v29  ;;  %v39753_v29 = vld [vmem:[%s49651_s1 + $0x4518] sm:$0xff] }
 0x88b   :  { %25869 = vmatpush.bf16.msra.mxu2 %v39739_v30  ;;  %v39769_v30 = vld [vmem:[%s49651_s1 + $0x4598] sm:$0xff] }
 0x88c   :  { %25856 = vmatpush.bf16.msra.mxu1 %v39731_v31 }
 0x88d   :  { %25882 = vmatpush.bf16.msra.mxu3 %v39747_v32  ;;  %v25618_v57 = vpop.f32.mrf.mxu2 }
 0x88e   :  { %25844 = vmatpush.bf16.msra.mxu0 %v39722_v35  ;;  %v298_v57 = vld [vmem:[%s49652_s0 + $0x8a8] sm:$0xff] }
 0x88f   :  { %25870 = vmatpush.bf16.msra.mxu2 %v39738_v36  ;;  %v25631_v60 = vpop.f32.mrf.mxu3  ;;  %v636_v63 = vpack.c.bf16 %v298_v57, %v298_v57  ;;  %v39819_v57 = vld [vmem:[%s49651_s1 + $0x4728] sm:$0xff] }
 0x890   :  { %25857 = vmatpush.bf16.msra.mxu1 %v39730_v39  ;;  %v39768_v39 = vld [vmem:[%s49651_s1 + $0x4590] sm:$0xff]  ;;  %v637_v60 = vpack.c.bf16 %v299_v52, %v299_v52 }
 0x891   :  { %25883 = vmatpush.bf16.msra.mxu3 %v39746_v40 }
 0x892   :  { %25845 = vmatpush.bf16.msra.mxu0 %v39721_v41  ;;  %v39760_v41 = vld [vmem:[%s49651_s1 + $0x4550] sm:$0xff] }
 0x893   :  { %25871 = vmatpush.bf16.msra.mxu2 %v39737_v42  ;;  %v39776_v42 = vld [vmem:[%s49651_s1 + $0x45d0] sm:$0xff] }
 0x894   :  { %25858 = vmatpush.bf16.msra.mxu1 %v39729_v45 }
 0x895   :  { %25884 = vmatpush.bf16.msra.mxu3 %v39745_v46  ;;  %v39759_v46 = vld [vmem:[%s49651_s1 + $0x4548] sm:$0xff] }
 0x896   :  { %25846 = vmatpush.bf16.msra.mxu0 %v39720_v50  ;;  %v39766_v50 = vld [vmem:[%s49651_s1 + $0x4580] sm:$0xff] }
 0x897   :  { %25872 = vmatpush.bf16.msra.mxu2 %v39736_v51  ;;  %v297_v51 = vld [vmem:[%s49652_s0 + $0x8a0] sm:$0xff] }
 0x898   :  { %25859 = vmatpush.bf16.msra.mxu1 %v39728_v53  ;;  %v39789_v53 = vld [vmem:[%s49651_s1 + $0x4638] sm:$0xff] }
 0x899   :  { %25885 = vmatpush.bf16.msra.mxu3 %v39744_v54  ;;  %v39805_v54 = vld [vmem:[%s49651_s1 + $0x46b8] sm:$0xff] }
 0x89a   :  { %25847 = vmatpush.bf16.msra.mxu0 %v39719_v55  ;;  %v39758_v55 = vld [vmem:[%s49651_s1 + $0x4540] sm:$0xff] }
 0x89b   :  { %25873 = vmatpush.bf16.msra.mxu2 %v39735_v56  ;;  %v39774_v56 = vld [vmem:[%s49651_s1 + $0x45c0] sm:$0xff] }
 0x89c   :  { %25860 = vmatpush.bf16.msra.mxu1 %v39727_v58  ;;  %v300_v58 = vld [vmem:[%s49652_s0 + $0x8b8] sm:$0xff] }
 0x89d   :  { %25886 = vmatpush.bf16.msra.mxu3 %v39743_v59  ;;  %v635_v59 = vpack.c.bf16 %v297_v51, %v297_v51  ;;  %v638_v0 = vpack.c.bf16 %v300_v58, %v300_v58  ;;  %v39835_v58 = vld [vmem:[%s49651_s1 + $0x47a8] sm:$0xff] }
 0x89e   :  { %25848 = vmatpush.bf16.msra.mxu0 %v39718_v61  ;;  %v25642_v21 = vpop.f32.mrf.mxu0  ;;  %v39797_v61 = vld [vmem:[%s49651_s1 + $0x4678] sm:$0xff] }
 0x89f   :  { %25874 = vmatpush.bf16.msra.mxu2 %v39734_v62  ;;  %v25643_v22 = vadd.f32 %v25642_v21, %v47864_v49  ;;  %v39750_v49 = vld [vmem:[%s49651_s1 + $0x4500] sm:$0xff]  ;;  %v39813_v62 = vld [vmem:[%s49651_s1 + $0x46f8] sm:$0xff] }
 0x8a0   :  { %25861 = vmatpush.bf16.msra.mxu1 %v39726_v3  ;;  %v25655_v25 = vpop.f32.mrf.mxu1  ;;  %v39796_v3 = vld [vmem:[%s49651_s1 + $0x4670] sm:$0xff]  ;;  %v39793_v21 = vld [vmem:[%s49651_s1 + $0x4658] sm:$0xff] }
 0x8a1   :  { %25887 = vmatpush.bf16.msra.mxu3 %v39742_v4  ;;  %25849 = vmatmul.bf16.vlgmr.msra.gmra.mxu0 %v631_v7  ;;  %v25656_v26 = vadd.f32 %v25655_v25, %v25643_v22  ;;  %v39812_v4 = vld [vmem:[%s49651_s1 + $0x46f0] sm:$0xff]  ;;  %v39795_v7 = vld [vmem:[%s49651_s1 + $0x4668] sm:$0xff]  ;;  %v39809_v22 = vld [vmem:[%s49651_s1 + $0x46d8] sm:$0xff] }
 0x8a2   :  { %25893 = vmatpush.bf16.msrb.mxu0 %v39757_v1  ;;  %25875 = vmatmul.bf16.vlgmr.msra.gmra.mxu2 %v633_v8  ;;  %v39788_v1 = vld [vmem:[%s49651_s1 + $0x4630] sm:$0xff]  ;;  %v39811_v8 = vld [vmem:[%s49651_s1 + $0x46e8] sm:$0xff] }
 0x8a3   :  { %25919 = vmatpush.bf16.msrb.mxu2 %v39773_v2  ;;  %25862 = vmatmul.bf16.vlgmr.msra.gmra.mxu1 %v632_v11  ;;  %v39804_v2 = vld [vmem:[%s49651_s1 + $0x46b0] sm:$0xff]  ;;  %v39786_v11 = vld [vmem:[%s49651_s1 + $0x4620] sm:$0xff] }
 0x8a4   :  { %25906 = vmatpush.bf16.msrb.mxu1 %v39765_v9  ;;  %25888 = vmatmul.bf16.vlgmr.msra.gmra.mxu3 %v634_v12  ;;  %v39802_v12 = vld [vmem:[%s49651_s1 + $0x46a0] sm:$0xff] }
 0x8a5   :  { %25932 = vmatpush.bf16.msrb.mxu3 %v39781_v10  ;;  %v25668_v31 = vpop.f32.mrf.mxu2 }
 0x8a6   :  { %25894 = vmatpush.bf16.msrb.mxu0 %v39756_v13  ;;  %v25669_v32 = vadd.f32 %v25668_v31, %v25656_v26  ;;  %v25644_v36 = vpop.f32.mrf.mxu0  ;;  %v39784_v26 = vld [vmem:[%s49651_s1 + $0x4610] sm:$0xff]  ;;  %v39783_v31 = vld [vmem:[%s49651_s1 + $0x4608] sm:$0xff] }
 0x8a7   :  { %25920 = vmatpush.bf16.msrb.mxu2 %v39772_v14  ;;  %v25681_v35 = vpop.f32.mrf.mxu3 }
 0x8a8   :  { %25907 = vmatpush.bf16.msrb.mxu1 %v39764_v15  ;;  %v47975_v37 = vadd.f32 %v25681_v35, %v25669_v32  ;;  %v25657_v40 = vpop.f32.mrf.mxu1  ;;  %v39794_v15 = vld [vmem:[%s49651_s1 + $0x4660] sm:$0xff]  ;;  %v39799_v32 = vld [vmem:[%s49651_s1 + $0x4688] sm:$0xff] }
 0x8a9   :  { %25933 = vmatpush.bf16.msrb.mxu3 %v39780_v16  ;;  %v39810_v16 = vld [vmem:[%s49651_s1 + $0x46e0] sm:$0xff]  ;;  %v39807_v35 = vld [vmem:[%s49651_s1 + $0x46c8] sm:$0xff]  ;;  %v303_v40 = vld [vmem:[%s49652_s0 + $0x8d0] sm:$0xff] }
 0x8aa   :  { %25895 = vmatpush.bf16.msrb.mxu0 %v39755_v17  ;;  %v39785_v17 = vld [vmem:[%s49651_s1 + $0x4618] sm:$0xff] }
 0x8ab   :  { %25921 = vmatpush.bf16.msrb.mxu2 %v39771_v18  ;;  %v39801_v18 = vld [vmem:[%s49651_s1 + $0x4698] sm:$0xff] }
 0x8ac   :  { %25908 = vmatpush.bf16.msrb.mxu1 %v39763_v19 }
 0x8ad   :  { %25934 = vmatpush.bf16.msrb.mxu3 %v39779_v20  ;;  %v25670_v45 = vpop.f32.mrf.mxu2 }
 0x8ae   :  { %25896 = vmatpush.bf16.msrb.mxu0 %v39754_v23  ;;  %v302_v45 = vld [vmem:[%s49652_s0 + $0x8c8] sm:$0xff] }
 0x8af   :  { %25922 = vmatpush.bf16.msrb.mxu2 %v39770_v24  ;;  %v25683_v48 = vpop.f32.mrf.mxu3  ;;  %v640_v51 = vpack.c.bf16 %v302_v45, %v302_v45  ;;  %v39851_v45 = vld [vmem:[%s49651_s1 + $0x4828] sm:$0xff] }
 0x8b0   :  { %25909 = vmatpush.bf16.msrb.mxu1 %v39762_v27  ;;  %v39800_v27 = vld [vmem:[%s49651_s1 + $0x4690] sm:$0xff]  ;;  %v641_v48 = vpack.c.bf16 %v303_v40, %v303_v40 }
 0x8b1   :  { %25935 = vmatpush.bf16.msrb.mxu3 %v39778_v28 }
 0x8b2   :  { %25897 = vmatpush.bf16.msrb.mxu0 %v39753_v29  ;;  %v39792_v29 = vld [vmem:[%s49651_s1 + $0x4650] sm:$0xff] }
 0x8b3   :  { %25923 = vmatpush.bf16.msrb.mxu2 %v39769_v30  ;;  %v39808_v30 = vld [vmem:[%s49651_s1 + $0x46d0] sm:$0xff] }
 0x8b4   :  { %25910 = vmatpush.bf16.msrb.mxu1 %v39761_v33 }
 0x8b5   :  { %25936 = vmatpush.bf16.msrb.mxu3 %v39777_v34  ;;  %v39791_v34 = vld [vmem:[%s49651_s1 + $0x4648] sm:$0xff] }
 0x8b6   :  { %25898 = vmatpush.bf16.msrb.mxu0 %v39752_v38  ;;  %v39798_v38 = vld [vmem:[%s49651_s1 + $0x4680] sm:$0xff] }
 0x8b7   :  { %25924 = vmatpush.bf16.msrb.mxu2 %v39768_v39  ;;  %v301_v39 = vld [vmem:[%s49652_s0 + $0x8c0] sm:$0xff] }
 0x8b8   :  { %25911 = vmatpush.bf16.msrb.mxu1 %v39760_v41  ;;  %v39821_v41 = vld [vmem:[%s49651_s1 + $0x4738] sm:$0xff] }
 0x8b9   :  { %25937 = vmatpush.bf16.msrb.mxu3 %v39776_v42  ;;  %v39837_v42 = vld [vmem:[%s49651_s1 + $0x47b8] sm:$0xff] }
 0x8ba   :  { %25899 = vmatpush.bf16.msrb.mxu0 %v39751_v43  ;;  %v39790_v43 = vld [vmem:[%s49651_s1 + $0x4640] sm:$0xff] }
 0x8bb   :  { %25925 = vmatpush.bf16.msrb.mxu2 %v39767_v44  ;;  %v39806_v44 = vld [vmem:[%s49651_s1 + $0x46c0] sm:$0xff] }
 0x8bc   :  { %25912 = vmatpush.bf16.msrb.mxu1 %v39759_v46  ;;  %v304_v46 = vld [vmem:[%s49652_s0 + $0x8d8] sm:$0xff] }
 0x8bd   :  { %25938 = vmatpush.bf16.msrb.mxu3 %v39775_v47  ;;  %v639_v47 = vpack.c.bf16 %v301_v39, %v301_v39  ;;  %v642_v52 = vpack.c.bf16 %v304_v46, %v304_v46  ;;  %v39867_v46 = vld [vmem:[%s49651_s1 + $0x48a8] sm:$0xff] }
 0x8be   :  { %25900 = vmatpush.bf16.msrb.mxu0 %v39750_v49  ;;  %v25694_v9 = vpop.f32.mrf.mxu0  ;;  %v39829_v49 = vld [vmem:[%s49651_s1 + $0x4778] sm:$0xff] }
 0x8bf   :  { %25926 = vmatpush.bf16.msrb.mxu2 %v39766_v50  ;;  %v25695_v10 = vadd.f32 %v25694_v9, %v47975_v37  ;;  %v39782_v37 = vld [vmem:[%s49651_s1 + $0x4600] sm:$0xff]  ;;  %v39845_v50 = vld [vmem:[%s49651_s1 + $0x47f8] sm:$0xff] }
 0x8c0   :  { %25913 = vmatpush.bf16.msrb.mxu1 %v39758_v55  ;;  %v25707_v13 = vpop.f32.mrf.mxu1  ;;  %v39828_v55 = vld [vmem:[%s49651_s1 + $0x4770] sm:$0xff]  ;;  %v39825_v9 = vld [vmem:[%s49651_s1 + $0x4758] sm:$0xff] }
 0x8c1   :  { %25939 = vmatpush.bf16.msrb.mxu3 %v39774_v56  ;;  %25901 = vmatmul.bf16.vlgmr.msrb.gmra.mxu0 %v635_v59  ;;  %v25708_v14 = vadd.f32 %v25707_v13, %v25695_v10  ;;  %v39844_v56 = vld [vmem:[%s49651_s1 + $0x47f0] sm:$0xff]  ;;  %v39827_v59 = vld [vmem:[%s49651_s1 + $0x4768] sm:$0xff]  ;;  %v39841_v10 = vld [vmem:[%s49651_s1 + $0x47d8] sm:$0xff] }
 0x8c2   :  { %25945 = vmatpush.bf16.msra.mxu0 %v39789_v53  ;;  %25927 = vmatmul.bf16.vlgmr.msrb.gmra.mxu2 %v637_v60  ;;  %v39820_v53 = vld [vmem:[%s49651_s1 + $0x4730] sm:$0xff]  ;;  %v39843_v60 = vld [vmem:[%s49651_s1 + $0x47e8] sm:$0xff] }
 0x8c3   :  { %25971 = vmatpush.bf16.msra.mxu2 %v39805_v54  ;;  %25914 = vmatmul.bf16.vlgmr.msrb.gmra.mxu1 %v636_v63  ;;  %v39836_v54 = vld [vmem:[%s49651_s1 + $0x47b0] sm:$0xff]  ;;  %v39818_v63 = vld [vmem:[%s49651_s1 + $0x4720] sm:$0xff] }
 0x8c4   :  { %25958 = vmatpush.bf16.msra.mxu1 %v39797_v61  ;;  %25940 = vmatmul.bf16.vlgmr.msrb.gmra.mxu3 %v638_v0  ;;  %v39834_v0 = vld [vmem:[%s49651_s1 + $0x47a0] sm:$0xff] }
 0x8c5   :  { %25984 = vmatpush.bf16.msra.mxu3 %v39813_v62  ;;  %v25720_v19 = vpop.f32.mrf.mxu2 }
 0x8c6   :  { %25946 = vmatpush.bf16.msra.mxu0 %v39788_v1  ;;  %v25721_v20 = vadd.f32 %v25720_v19, %v25708_v14  ;;  %v25696_v24 = vpop.f32.mrf.mxu0  ;;  %v39816_v14 = vld [vmem:[%s49651_s1 + $0x4710] sm:$0xff]  ;;  %v39815_v19 = vld [vmem:[%s49651_s1 + $0x4708] sm:$0xff] }
 0x8c7   :  { %25972 = vmatpush.bf16.msra.mxu2 %v39804_v2  ;;  %v25733_v23 = vpop.f32.mrf.mxu3 }
 0x8c8   :  { %25959 = vmatpush.bf16.msra.mxu1 %v39796_v3  ;;  %v48086_v25 = vadd.f32 %v25733_v23, %v25721_v20  ;;  %v25709_v28 = vpop.f32.mrf.mxu1  ;;  %v39826_v3 = vld [vmem:[%s49651_s1 + $0x4760] sm:$0xff]  ;;  %v39831_v20 = vld [vmem:[%s49651_s1 + $0x4788] sm:$0xff] }
 0x8c9   :  { %25985 = vmatpush.bf16.msra.mxu3 %v39812_v4  ;;  %v39842_v4 = vld [vmem:[%s49651_s1 + $0x47e0] sm:$0xff]  ;;  %v39839_v23 = vld [vmem:[%s49651_s1 + $0x47c8] sm:$0xff]  ;;  %v307_v28 = vld [vmem:[%s49652_s0 + $0x8f0] sm:$0xff] }
 0x8ca   :  { %25947 = vmatpush.bf16.msra.mxu0 %v39787_v5  ;;  %v39817_v5 = vld [vmem:[%s49651_s1 + $0x4718] sm:$0xff] }
 0x8cb   :  { %25973 = vmatpush.bf16.msra.mxu2 %v39803_v6  ;;  %v39833_v6 = vld [vmem:[%s49651_s1 + $0x4798] sm:$0xff] }
 0x8cc   :  { %25960 = vmatpush.bf16.msra.mxu1 %v39795_v7 }
 0x8cd   :  { %25986 = vmatpush.bf16.msra.mxu3 %v39811_v8  ;;  %v25722_v33 = vpop.f32.mrf.mxu2 }
 0x8ce   :  { %25948 = vmatpush.bf16.msra.mxu0 %v39786_v11  ;;  %v306_v33 = vld [vmem:[%s49652_s0 + $0x8e8] sm:$0xff] }
 0x8cf   :  { %25974 = vmatpush.bf16.msra.mxu2 %v39802_v12  ;;  %v25735_v36 = vpop.f32.mrf.mxu3  ;;  %v644_v39 = vpack.c.bf16 %v306_v33, %v306_v33  ;;  %v39883_v33 = vld [vmem:[%s49651_s1 + $0x4928] sm:$0xff] }
 0x8d0   :  { %25961 = vmatpush.bf16.msra.mxu1 %v39794_v15  ;;  %v39832_v15 = vld [vmem:[%s49651_s1 + $0x4790] sm:$0xff]  ;;  %v645_v36 = vpack.c.bf16 %v307_v28, %v307_v28 }
 0x8d1   :  { %25987 = vmatpush.bf16.msra.mxu3 %v39810_v16 }
 0x8d2   :  { %25949 = vmatpush.bf16.msra.mxu0 %v39785_v17  ;;  %v39824_v17 = vld [vmem:[%s49651_s1 + $0x4750] sm:$0xff] }
 0x8d3   :  { %25975 = vmatpush.bf16.msra.mxu2 %v39801_v18  ;;  %v39840_v18 = vld [vmem:[%s49651_s1 + $0x47d0] sm:$0xff] }
 0x8d4   :  { %25962 = vmatpush.bf16.msra.mxu1 %v39793_v21 }
 0x8d5   :  { %25988 = vmatpush.bf16.msra.mxu3 %v39809_v22  ;;  %v39823_v22 = vld [vmem:[%s49651_s1 + $0x4748] sm:$0xff] }
 0x8d6   :  { %25950 = vmatpush.bf16.msra.mxu0 %v39784_v26  ;;  %v39830_v26 = vld [vmem:[%s49651_s1 + $0x4780] sm:$0xff] }
 0x8d7   :  { %25976 = vmatpush.bf16.msra.mxu2 %v39800_v27  ;;  %v305_v27 = vld [vmem:[%s49652_s0 + $0x8e0] sm:$0xff] }
 0x8d8   :  { %25963 = vmatpush.bf16.msra.mxu1 %v39792_v29  ;;  %v39853_v29 = vld [vmem:[%s49651_s1 + $0x4838] sm:$0xff] }
 0x8d9   :  { %25989 = vmatpush.bf16.msra.mxu3 %v39808_v30  ;;  %v39869_v30 = vld [vmem:[%s49651_s1 + $0x48b8] sm:$0xff] }
 0x8da   :  { %25951 = vmatpush.bf16.msra.mxu0 %v39783_v31  ;;  %v39822_v31 = vld [vmem:[%s49651_s1 + $0x4740] sm:$0xff] }
 0x8db   :  { %25977 = vmatpush.bf16.msra.mxu2 %v39799_v32  ;;  %v39838_v32 = vld [vmem:[%s49651_s1 + $0x47c0] sm:$0xff] }
 0x8dc   :  { %25964 = vmatpush.bf16.msra.mxu1 %v39791_v34  ;;  %v308_v34 = vld [vmem:[%s49652_s0 + $0x8f8] sm:$0xff] }
 0x8dd   :  { %25990 = vmatpush.bf16.msra.mxu3 %v39807_v35  ;;  %v643_v35 = vpack.c.bf16 %v305_v27, %v305_v27  ;;  %v646_v40 = vpack.c.bf16 %v308_v34, %v308_v34  ;;  %v39899_v34 = vld [vmem:[%s49651_s1 + $0x49a8] sm:$0xff] }
 0x8de   :  { %25952 = vmatpush.bf16.msra.mxu0 %v39782_v37  ;;  %v25746_v61 = vpop.f32.mrf.mxu0  ;;  %v39861_v37 = vld [vmem:[%s49651_s1 + $0x4878] sm:$0xff] }
 0x8df   :  { %25978 = vmatpush.bf16.msra.mxu2 %v39798_v38  ;;  %v25747_v62 = vadd.f32 %v25746_v61, %v48086_v25  ;;  %v39814_v25 = vld [vmem:[%s49651_s1 + $0x4700] sm:$0xff]  ;;  %v39877_v38 = vld [vmem:[%s49651_s1 + $0x48f8] sm:$0xff] }
 0x8e0   :  { %25965 = vmatpush.bf16.msra.mxu1 %v39790_v43  ;;  %v25759_v1 = vpop.f32.mrf.mxu1  ;;  %v39860_v43 = vld [vmem:[%s49651_s1 + $0x4870] sm:$0xff]  ;;  %v39857_v61 = vld [vmem:[%s49651_s1 + $0x4858] sm:$0xff] }
 0x8e1   :  { %25991 = vmatpush.bf16.msra.mxu3 %v39806_v44  ;;  %25953 = vmatmul.bf16.vlgmr.msra.gmra.mxu0 %v639_v47  ;;  %v25760_v2 = vadd.f32 %v25759_v1, %v25747_v62  ;;  %v39876_v44 = vld [vmem:[%s49651_s1 + $0x48f0] sm:$0xff]  ;;  %v39859_v47 = vld [vmem:[%s49651_s1 + $0x4868] sm:$0xff]  ;;  %v39873_v62 = vld [vmem:[%s49651_s1 + $0x48d8] sm:$0xff] }
 0x8e2   :  { %25997 = vmatpush.bf16.msrb.mxu0 %v39821_v41  ;;  %25979 = vmatmul.bf16.vlgmr.msra.gmra.mxu2 %v641_v48  ;;  %v39852_v41 = vld [vmem:[%s49651_s1 + $0x4830] sm:$0xff]  ;;  %v39875_v48 = vld [vmem:[%s49651_s1 + $0x48e8] sm:$0xff] }
 0x8e3   :  { %26023 = vmatpush.bf16.msrb.mxu2 %v39837_v42  ;;  %25966 = vmatmul.bf16.vlgmr.msra.gmra.mxu1 %v640_v51  ;;  %v39868_v42 = vld [vmem:[%s49651_s1 + $0x48b0] sm:$0xff]  ;;  %v39850_v51 = vld [vmem:[%s49651_s1 + $0x4820] sm:$0xff] }
 0x8e4   :  { %26010 = vmatpush.bf16.msrb.mxu1 %v39829_v49  ;;  %25992 = vmatmul.bf16.vlgmr.msra.gmra.mxu3 %v642_v52  ;;  %v39866_v52 = vld [vmem:[%s49651_s1 + $0x48a0] sm:$0xff] }
 0x8e5   :  { %26036 = vmatpush.bf16.msrb.mxu3 %v39845_v50  ;;  %v25772_v7 = vpop.f32.mrf.mxu2 }
 0x8e6   :  { %25998 = vmatpush.bf16.msrb.mxu0 %v39820_v53  ;;  %v25773_v8 = vadd.f32 %v25772_v7, %v25760_v2  ;;  %v25748_v12 = vpop.f32.mrf.mxu0  ;;  %v39848_v2 = vld [vmem:[%s49651_s1 + $0x4810] sm:$0xff]  ;;  %v39847_v7 = vld [vmem:[%s49651_s1 + $0x4808] sm:$0xff] }
 0x8e7   :  { %26024 = vmatpush.bf16.msrb.mxu2 %v39836_v54  ;;  %v25785_v11 = vpop.f32.mrf.mxu3 }
 0x8e8   :  { %26011 = vmatpush.bf16.msrb.mxu1 %v39828_v55  ;;  %v48197_v13 = vadd.f32 %v25785_v11, %v25773_v8  ;;  %v25761_v16 = vpop.f32.mrf.mxu1  ;;  %v39858_v55 = vld [vmem:[%s49651_s1 + $0x4860] sm:$0xff]  ;;  %v39863_v8 = vld [vmem:[%s49651_s1 + $0x4888] sm:$0xff] }
 0x8e9   :  { %26037 = vmatpush.bf16.msrb.mxu3 %v39844_v56  ;;  %v39874_v56 = vld [vmem:[%s49651_s1 + $0x48e0] sm:$0xff]  ;;  %v39871_v11 = vld [vmem:[%s49651_s1 + $0x48c8] sm:$0xff]  ;;  %v311_v16 = vld [vmem:[%s49652_s0 + $0x910] sm:$0xff] }
 0x8ea   :  { %25999 = vmatpush.bf16.msrb.mxu0 %v39819_v57  ;;  %v39849_v57 = vld [vmem:[%s49651_s1 + $0x4818] sm:$0xff] }
 0x8eb   :  { %26025 = vmatpush.bf16.msrb.mxu2 %v39835_v58  ;;  %v39865_v58 = vld [vmem:[%s49651_s1 + $0x4898] sm:$0xff] }
 0x8ec   :  { %26012 = vmatpush.bf16.msrb.mxu1 %v39827_v59 }
 0x8ed   :  { %26038 = vmatpush.bf16.msrb.mxu3 %v39843_v60  ;;  %v25774_v21 = vpop.f32.mrf.mxu2 }
 0x8ee   :  { %26000 = vmatpush.bf16.msrb.mxu0 %v39818_v63  ;;  %v310_v21 = vld [vmem:[%s49652_s0 + $0x908] sm:$0xff] }
 0x8ef   :  { %26026 = vmatpush.bf16.msrb.mxu2 %v39834_v0  ;;  %v25787_v24 = vpop.f32.mrf.mxu3  ;;  %v648_v27 = vpack.c.bf16 %v310_v21, %v310_v21  ;;  %v39915_v21 = vld [vmem:[%s49651_s1 + $0x4a28] sm:$0xff] }
 0x8f0   :  { %26013 = vmatpush.bf16.msrb.mxu1 %v39826_v3  ;;  %v39864_v3 = vld [vmem:[%s49651_s1 + $0x4890] sm:$0xff]  ;;  %v649_v24 = vpack.c.bf16 %v311_v16, %v311_v16 }
 0x8f1   :  { %26039 = vmatpush.bf16.msrb.mxu3 %v39842_v4 }
 0x8f2   :  { %26001 = vmatpush.bf16.msrb.mxu0 %v39817_v5  ;;  %v39856_v5 = vld [vmem:[%s49651_s1 + $0x4850] sm:$0xff] }
 0x8f3   :  { %26027 = vmatpush.bf16.msrb.mxu2 %v39833_v6  ;;  %v39872_v6 = vld [vmem:[%s49651_s1 + $0x48d0] sm:$0xff] }
 0x8f4   :  { %26014 = vmatpush.bf16.msrb.mxu1 %v39825_v9 }
 0x8f5   :  { %26040 = vmatpush.bf16.msrb.mxu3 %v39841_v10  ;;  %v39855_v10 = vld [vmem:[%s49651_s1 + $0x4848] sm:$0xff] }
 0x8f6   :  { %26002 = vmatpush.bf16.msrb.mxu0 %v39816_v14  ;;  %v39862_v14 = vld [vmem:[%s49651_s1 + $0x4880] sm:$0xff] }
 0x8f7   :  { %26028 = vmatpush.bf16.msrb.mxu2 %v39832_v15  ;;  %v309_v15 = vld [vmem:[%s49652_s0 + $0x900] sm:$0xff] }
 0x8f8   :  { %26015 = vmatpush.bf16.msrb.mxu1 %v39824_v17  ;;  %v39885_v17 = vld [vmem:[%s49651_s1 + $0x4938] sm:$0xff] }
 0x8f9   :  { %26041 = vmatpush.bf16.msrb.mxu3 %v39840_v18  ;;  %v39901_v18 = vld [vmem:[%s49651_s1 + $0x49b8] sm:$0xff] }
 0x8fa   :  { %26003 = vmatpush.bf16.msrb.mxu0 %v39815_v19  ;;  %v39854_v19 = vld [vmem:[%s49651_s1 + $0x4840] sm:$0xff] }
 0x8fb   :  { %26029 = vmatpush.bf16.msrb.mxu2 %v39831_v20  ;;  %v39870_v20 = vld [vmem:[%s49651_s1 + $0x48c0] sm:$0xff] }
 0x8fc   :  { %26016 = vmatpush.bf16.msrb.mxu1 %v39823_v22  ;;  %v312_v22 = vld [vmem:[%s49652_s0 + $0x918] sm:$0xff] }
 0x8fd   :  { %26042 = vmatpush.bf16.msrb.mxu3 %v39839_v23  ;;  %v647_v23 = vpack.c.bf16 %v309_v15, %v309_v15  ;;  %v650_v28 = vpack.c.bf16 %v312_v22, %v312_v22  ;;  %v39931_v22 = vld [vmem:[%s49651_s1 + $0x4aa8] sm:$0xff] }
 0x8fe   :  { %26004 = vmatpush.bf16.msrb.mxu0 %v39814_v25  ;;  %v25798_v49 = vpop.f32.mrf.mxu0  ;;  %v39893_v25 = vld [vmem:[%s49651_s1 + $0x4978] sm:$0xff] }
 0x8ff   :  { %26030 = vmatpush.bf16.msrb.mxu2 %v39830_v26  ;;  %v25799_v50 = vadd.f32 %v25798_v49, %v48197_v13  ;;  %v39846_v13 = vld [vmem:[%s49651_s1 + $0x4800] sm:$0xff]  ;;  %v39909_v26 = vld [vmem:[%s49651_s1 + $0x49f8] sm:$0xff] }
 0x900   :  { %26017 = vmatpush.bf16.msrb.mxu1 %v39822_v31  ;;  %v25811_v53 = vpop.f32.mrf.mxu1  ;;  %v39892_v31 = vld [vmem:[%s49651_s1 + $0x4970] sm:$0xff]  ;;  %v39889_v49 = vld [vmem:[%s49651_s1 + $0x4958] sm:$0xff] }
 0x901   :  { %26043 = vmatpush.bf16.msrb.mxu3 %v39838_v32  ;;  %26005 = vmatmul.bf16.vlgmr.msrb.gmra.mxu0 %v643_v35  ;;  %v25812_v54 = vadd.f32 %v25811_v53, %v25799_v50  ;;  %v39908_v32 = vld [vmem:[%s49651_s1 + $0x49f0] sm:$0xff]  ;;  %v39891_v35 = vld [vmem:[%s49651_s1 + $0x4968] sm:$0xff]  ;;  %v39905_v50 = vld [vmem:[%s49651_s1 + $0x49d8] sm:$0xff] }
 0x902   :  { %26049 = vmatpush.bf16.msra.mxu0 %v39853_v29  ;;  %26031 = vmatmul.bf16.vlgmr.msrb.gmra.mxu2 %v645_v36  ;;  %v39884_v29 = vld [vmem:[%s49651_s1 + $0x4930] sm:$0xff]  ;;  %v39907_v36 = vld [vmem:[%s49651_s1 + $0x49e8] sm:$0xff] }
 0x903   :  { %26075 = vmatpush.bf16.msra.mxu2 %v39869_v30  ;;  %26018 = vmatmul.bf16.vlgmr.msrb.gmra.mxu1 %v644_v39  ;;  %v39900_v30 = vld [vmem:[%s49651_s1 + $0x49b0] sm:$0xff]  ;;  %v39882_v39 = vld [vmem:[%s49651_s1 + $0x4920] sm:$0xff] }
 0x904   :  { %26062 = vmatpush.bf16.msra.mxu1 %v39861_v37  ;;  %26044 = vmatmul.bf16.vlgmr.msrb.gmra.mxu3 %v646_v40  ;;  %v39898_v40 = vld [vmem:[%s49651_s1 + $0x49a0] sm:$0xff] }
 0x905   :  { %26088 = vmatpush.bf16.msra.mxu3 %v39877_v38  ;;  %v25824_v59 = vpop.f32.mrf.mxu2 }
 0x906   :  { %26050 = vmatpush.bf16.msra.mxu0 %v39852_v41  ;;  %v25825_v60 = vadd.f32 %v25824_v59, %v25812_v54  ;;  %v25800_v0 = vpop.f32.mrf.mxu0  ;;  %v39880_v54 = vld [vmem:[%s49651_s1 + $0x4910] sm:$0xff]  ;;  %v39879_v59 = vld [vmem:[%s49651_s1 + $0x4908] sm:$0xff] }
 0x907   :  { %26076 = vmatpush.bf16.msra.mxu2 %v39868_v42  ;;  %v25837_v63 = vpop.f32.mrf.mxu3 }
 0x908   :  { %26063 = vmatpush.bf16.msra.mxu1 %v39860_v43  ;;  %v48308_v1 = vadd.f32 %v25837_v63, %v25825_v60  ;;  %v25813_v4 = vpop.f32.mrf.mxu1  ;;  %v39890_v43 = vld [vmem:[%s49651_s1 + $0x4960] sm:$0xff]  ;;  %v39895_v60 = vld [vmem:[%s49651_s1 + $0x4988] sm:$0xff] }
 0x909   :  { %26089 = vmatpush.bf16.msra.mxu3 %v39876_v44  ;;  %v39906_v44 = vld [vmem:[%s49651_s1 + $0x49e0] sm:$0xff]  ;;  %v39903_v63 = vld [vmem:[%s49651_s1 + $0x49c8] sm:$0xff]  ;;  %v315_v4 = vld [vmem:[%s49652_s0 + $0x930] sm:$0xff] }
 0x90a   :  { %26051 = vmatpush.bf16.msra.mxu0 %v39851_v45  ;;  %v39881_v45 = vld [vmem:[%s49651_s1 + $0x4918] sm:$0xff] }
 0x90b   :  { %26077 = vmatpush.bf16.msra.mxu2 %v39867_v46  ;;  %v39897_v46 = vld [vmem:[%s49651_s1 + $0x4998] sm:$0xff] }
 0x90c   :  { %26064 = vmatpush.bf16.msra.mxu1 %v39859_v47 }
 0x90d   :  { %26090 = vmatpush.bf16.msra.mxu3 %v39875_v48  ;;  %v25826_v9 = vpop.f32.mrf.mxu2 }
 0x90e   :  { %26052 = vmatpush.bf16.msra.mxu0 %v39850_v51  ;;  %v314_v9 = vld [vmem:[%s49652_s0 + $0x928] sm:$0xff] }
 0x90f   :  { %26078 = vmatpush.bf16.msra.mxu2 %v39866_v52  ;;  %v25839_v12 = vpop.f32.mrf.mxu3  ;;  %v652_v15 = vpack.c.bf16 %v314_v9, %v314_v9  ;;  %v39947_v9 = vld [vmem:[%s49651_s1 + $0x4b28] sm:$0xff] }
 0x910   :  { %26065 = vmatpush.bf16.msra.mxu1 %v39858_v55  ;;  %v39896_v55 = vld [vmem:[%s49651_s1 + $0x4990] sm:$0xff]  ;;  %v653_v12 = vpack.c.bf16 %v315_v4, %v315_v4 }
 0x911   :  { %26091 = vmatpush.bf16.msra.mxu3 %v39874_v56 }
 0x912   :  { %26053 = vmatpush.bf16.msra.mxu0 %v39849_v57  ;;  %v39888_v57 = vld [vmem:[%s49651_s1 + $0x4950] sm:$0xff] }
 0x913   :  { %26079 = vmatpush.bf16.msra.mxu2 %v39865_v58  ;;  %v39904_v58 = vld [vmem:[%s49651_s1 + $0x49d0] sm:$0xff] }
 0x914   :  { %26066 = vmatpush.bf16.msra.mxu1 %v39857_v61 }
 0x915   :  { %26092 = vmatpush.bf16.msra.mxu3 %v39873_v62  ;;  %v39887_v62 = vld [vmem:[%s49651_s1 + $0x4948] sm:$0xff] }
 0x916   :  { %26054 = vmatpush.bf16.msra.mxu0 %v39848_v2  ;;  %v39894_v2 = vld [vmem:[%s49651_s1 + $0x4980] sm:$0xff] }
 0x917   :  { %26080 = vmatpush.bf16.msra.mxu2 %v39864_v3  ;;  %v313_v3 = vld [vmem:[%s49652_s0 + $0x920] sm:$0xff] }
 0x918   :  { %26067 = vmatpush.bf16.msra.mxu1 %v39856_v5  ;;  %v39917_v5 = vld [vmem:[%s49651_s1 + $0x4a38] sm:$0xff] }
 0x919   :  { %26093 = vmatpush.bf16.msra.mxu3 %v39872_v6  ;;  %v39933_v6 = vld [vmem:[%s49651_s1 + $0x4ab8] sm:$0xff] }
 0x91a   :  { %26055 = vmatpush.bf16.msra.mxu0 %v39847_v7  ;;  %v39886_v7 = vld [vmem:[%s49651_s1 + $0x4940] sm:$0xff] }
 0x91b   :  { %26081 = vmatpush.bf16.msra.mxu2 %v39863_v8  ;;  %v39902_v8 = vld [vmem:[%s49651_s1 + $0x49c0] sm:$0xff] }
 0x91c   :  { %26068 = vmatpush.bf16.msra.mxu1 %v39855_v10  ;;  %v316_v10 = vld [vmem:[%s49652_s0 + $0x938] sm:$0xff] }
 0x91d   :  { %26094 = vmatpush.bf16.msra.mxu3 %v39871_v11  ;;  %v651_v11 = vpack.c.bf16 %v313_v3, %v313_v3  ;;  %v654_v16 = vpack.c.bf16 %v316_v10, %v316_v10  ;;  %v39963_v10 = vld [vmem:[%s49651_s1 + $0x4ba8] sm:$0xff] }
 0x91e   :  { %26056 = vmatpush.bf16.msra.mxu0 %v39846_v13  ;;  %v25850_v37 = vpop.f32.mrf.mxu0  ;;  %v39925_v13 = vld [vmem:[%s49651_s1 + $0x4a78] sm:$0xff] }
 0x91f   :  { %26082 = vmatpush.bf16.msra.mxu2 %v39862_v14  ;;  %v25851_v38 = vadd.f32 %v25850_v37, %v48308_v1  ;;  %v39878_v1 = vld [vmem:[%s49651_s1 + $0x4900] sm:$0xff]  ;;  %v39941_v14 = vld [vmem:[%s49651_s1 + $0x4af8] sm:$0xff] }
 0x920   :  { %26069 = vmatpush.bf16.msra.mxu1 %v39854_v19  ;;  %v25863_v41 = vpop.f32.mrf.mxu1  ;;  %v39924_v19 = vld [vmem:[%s49651_s1 + $0x4a70] sm:$0xff]  ;;  %v39921_v37 = vld [vmem:[%s49651_s1 + $0x4a58] sm:$0xff] }
 0x921   :  { %26095 = vmatpush.bf16.msra.mxu3 %v39870_v20  ;;  %26057 = vmatmul.bf16.vlgmr.msra.gmra.mxu0 %v647_v23  ;;  %v25864_v42 = vadd.f32 %v25863_v41, %v25851_v38  ;;  %v39940_v20 = vld [vmem:[%s49651_s1 + $0x4af0] sm:$0xff]  ;;  %v39923_v23 = vld [vmem:[%s49651_s1 + $0x4a68] sm:$0xff]  ;;  %v39937_v38 = vld [vmem:[%s49651_s1 + $0x4ad8] sm:$0xff] }
 0x922   :  { %26101 = vmatpush.bf16.msrb.mxu0 %v39885_v17  ;;  %26083 = vmatmul.bf16.vlgmr.msra.gmra.mxu2 %v649_v24  ;;  %v39916_v17 = vld [vmem:[%s49651_s1 + $0x4a30] sm:$0xff]  ;;  %v39939_v24 = vld [vmem:[%s49651_s1 + $0x4ae8] sm:$0xff] }
 0x923   :  { %26127 = vmatpush.bf16.msrb.mxu2 %v39901_v18  ;;  %26070 = vmatmul.bf16.vlgmr.msra.gmra.mxu1 %v648_v27  ;;  %v39932_v18 = vld [vmem:[%s49651_s1 + $0x4ab0] sm:$0xff]  ;;  %v39914_v27 = vld [vmem:[%s49651_s1 + $0x4a20] sm:$0xff] }
 0x924   :  { %26114 = vmatpush.bf16.msrb.mxu1 %v39893_v25  ;;  %26096 = vmatmul.bf16.vlgmr.msra.gmra.mxu3 %v650_v28  ;;  %v39930_v28 = vld [vmem:[%s49651_s1 + $0x4aa0] sm:$0xff] }
 0x925   :  { %26140 = vmatpush.bf16.msrb.mxu3 %v39909_v26  ;;  %v25876_v47 = vpop.f32.mrf.mxu2 }
 0x926   :  { %26102 = vmatpush.bf16.msrb.mxu0 %v39884_v29  ;;  %v25877_v48 = vadd.f32 %v25876_v47, %v25864_v42  ;;  %v25852_v52 = vpop.f32.mrf.mxu0  ;;  %v39912_v42 = vld [vmem:[%s49651_s1 + $0x4a10] sm:$0xff]  ;;  %v39911_v47 = vld [vmem:[%s49651_s1 + $0x4a08] sm:$0xff] }
 0x927   :  { %26128 = vmatpush.bf16.msrb.mxu2 %v39900_v30  ;;  %v25889_v51 = vpop.f32.mrf.mxu3 }
 0x928   :  { %26115 = vmatpush.bf16.msrb.mxu1 %v39892_v31  ;;  %v48419_v53 = vadd.f32 %v25889_v51, %v25877_v48  ;;  %v25865_v56 = vpop.f32.mrf.mxu1  ;;  %v39922_v31 = vld [vmem:[%s49651_s1 + $0x4a60] sm:$0xff]  ;;  %v39927_v48 = vld [vmem:[%s49651_s1 + $0x4a88] sm:$0xff] }
 0x929   :  { %26141 = vmatpush.bf16.msrb.mxu3 %v39908_v32  ;;  %v39938_v32 = vld [vmem:[%s49651_s1 + $0x4ae0] sm:$0xff]  ;;  %v39935_v51 = vld [vmem:[%s49651_s1 + $0x4ac8] sm:$0xff]  ;;  %v319_v56 = vld [vmem:[%s49652_s0 + $0x950] sm:$0xff] }
 0x92a   :  { %26103 = vmatpush.bf16.msrb.mxu0 %v39883_v33  ;;  %v39913_v33 = vld [vmem:[%s49651_s1 + $0x4a18] sm:$0xff] }
 0x92b   :  { %26129 = vmatpush.bf16.msrb.mxu2 %v39899_v34  ;;  %v39929_v34 = vld [vmem:[%s49651_s1 + $0x4a98] sm:$0xff] }
 0x92c   :  { %26116 = vmatpush.bf16.msrb.mxu1 %v39891_v35 }
 0x92d   :  { %26142 = vmatpush.bf16.msrb.mxu3 %v39907_v36  ;;  %v25878_v61 = vpop.f32.mrf.mxu2 }
 0x92e   :  { %26104 = vmatpush.bf16.msrb.mxu0 %v39882_v39  ;;  %v318_v61 = vld [vmem:[%s49652_s0 + $0x948] sm:$0xff] }
 0x92f   :  { %26130 = vmatpush.bf16.msrb.mxu2 %v39898_v40  ;;  %v25891_v0 = vpop.f32.mrf.mxu3  ;;  %v656_v3 = vpack.c.bf16 %v318_v61, %v318_v61  ;;  %v39979_v61 = vld [vmem:[%s49651_s1 + $0x4c28] sm:$0xff] }
 0x930   :  { %26117 = vmatpush.bf16.msrb.mxu1 %v39890_v43  ;;  %v39928_v43 = vld [vmem:[%s49651_s1 + $0x4a90] sm:$0xff]  ;;  %v657_v0 = vpack.c.bf16 %v319_v56, %v319_v56 }
 0x931   :  { %26143 = vmatpush.bf16.msrb.mxu3 %v39906_v44 }
 0x932   :  { %26105 = vmatpush.bf16.msrb.mxu0 %v39881_v45  ;;  %v39920_v45 = vld [vmem:[%s49651_s1 + $0x4a50] sm:$0xff] }
 0x933   :  { %26131 = vmatpush.bf16.msrb.mxu2 %v39897_v46  ;;  %v39936_v46 = vld [vmem:[%s49651_s1 + $0x4ad0] sm:$0xff] }
 0x934   :  { %26118 = vmatpush.bf16.msrb.mxu1 %v39889_v49 }
 0x935   :  { %26144 = vmatpush.bf16.msrb.mxu3 %v39905_v50  ;;  %v39919_v50 = vld [vmem:[%s49651_s1 + $0x4a48] sm:$0xff] }
 0x936   :  { %26106 = vmatpush.bf16.msrb.mxu0 %v39880_v54  ;;  %v39926_v54 = vld [vmem:[%s49651_s1 + $0x4a80] sm:$0xff] }
 0x937   :  { %26132 = vmatpush.bf16.msrb.mxu2 %v39896_v55  ;;  %v317_v55 = vld [vmem:[%s49652_s0 + $0x940] sm:$0xff] }
 0x938   :  { %26119 = vmatpush.bf16.msrb.mxu1 %v39888_v57  ;;  %v39949_v57 = vld [vmem:[%s49651_s1 + $0x4b38] sm:$0xff] }
 0x939   :  { %26145 = vmatpush.bf16.msrb.mxu3 %v39904_v58  ;;  %v39965_v58 = vld [vmem:[%s49651_s1 + $0x4bb8] sm:$0xff] }
 0x93a   :  { %26107 = vmatpush.bf16.msrb.mxu0 %v39879_v59  ;;  %v39918_v59 = vld [vmem:[%s49651_s1 + $0x4a40] sm:$0xff] }
 0x93b   :  { %26133 = vmatpush.bf16.msrb.mxu2 %v39895_v60  ;;  %v39934_v60 = vld [vmem:[%s49651_s1 + $0x4ac0] sm:$0xff] }
 0x93c   :  { %26120 = vmatpush.bf16.msrb.mxu1 %v39887_v62  ;;  %v320_v62 = vld [vmem:[%s49652_s0 + $0x958] sm:$0xff] }
 0x93d   :  { %26146 = vmatpush.bf16.msrb.mxu3 %v39903_v63  ;;  %v655_v63 = vpack.c.bf16 %v317_v55, %v317_v55  ;;  %v658_v4 = vpack.c.bf16 %v320_v62, %v320_v62  ;;  %v39995_v62 = vld [vmem:[%s49651_s1 + $0x4ca8] sm:$0xff] }
 0x93e   :  { %26108 = vmatpush.bf16.msrb.mxu0 %v39878_v1  ;;  %v25902_v25 = vpop.f32.mrf.mxu0  ;;  %v39957_v1 = vld [vmem:[%s49651_s1 + $0x4b78] sm:$0xff] }
 0x93f   :  { %26134 = vmatpush.bf16.msrb.mxu2 %v39894_v2  ;;  %v25903_v26 = vadd.f32 %v25902_v25, %v48419_v53  ;;  %v39910_v53 = vld [vmem:[%s49651_s1 + $0x4a00] sm:$0xff]  ;;  %v39973_v2 = vld [vmem:[%s49651_s1 + $0x4bf8] sm:$0xff] }
 0x940   :  { %26121 = vmatpush.bf16.msrb.mxu1 %v39886_v7  ;;  %v25915_v29 = vpop.f32.mrf.mxu1  ;;  %v39956_v7 = vld [vmem:[%s49651_s1 + $0x4b70] sm:$0xff]  ;;  %v39953_v25 = vld [vmem:[%s49651_s1 + $0x4b58] sm:$0xff] }
 0x941   :  { %26147 = vmatpush.bf16.msrb.mxu3 %v39902_v8  ;;  %26109 = vmatmul.bf16.vlgmr.msrb.gmra.mxu0 %v651_v11  ;;  %v25916_v30 = vadd.f32 %v25915_v29, %v25903_v26  ;;  %v39972_v8 = vld [vmem:[%s49651_s1 + $0x4bf0] sm:$0xff]  ;;  %v39955_v11 = vld [vmem:[%s49651_s1 + $0x4b68] sm:$0xff]  ;;  %v39969_v26 = vld [vmem:[%s49651_s1 + $0x4bd8] sm:$0xff] }
 0x942   :  { %26153 = vmatpush.bf16.msra.mxu0 %v39917_v5  ;;  %26135 = vmatmul.bf16.vlgmr.msrb.gmra.mxu2 %v653_v12  ;;  %v39948_v5 = vld [vmem:[%s49651_s1 + $0x4b30] sm:$0xff]  ;;  %v39971_v12 = vld [vmem:[%s49651_s1 + $0x4be8] sm:$0xff] }
 0x943   :  { %26179 = vmatpush.bf16.msra.mxu2 %v39933_v6  ;;  %26122 = vmatmul.bf16.vlgmr.msrb.gmra.mxu1 %v652_v15  ;;  %v39964_v6 = vld [vmem:[%s49651_s1 + $0x4bb0] sm:$0xff]  ;;  %v39946_v15 = vld [vmem:[%s49651_s1 + $0x4b20] sm:$0xff] }
 0x944   :  { %26166 = vmatpush.bf16.msra.mxu1 %v39925_v13  ;;  %26148 = vmatmul.bf16.vlgmr.msrb.gmra.mxu3 %v654_v16  ;;  %v39962_v16 = vld [vmem:[%s49651_s1 + $0x4ba0] sm:$0xff] }
 0x945   :  { %26192 = vmatpush.bf16.msra.mxu3 %v39941_v14  ;;  %v25928_v35 = vpop.f32.mrf.mxu2 }
 0x946   :  { %26154 = vmatpush.bf16.msra.mxu0 %v39916_v17  ;;  %v25929_v36 = vadd.f32 %v25928_v35, %v25916_v30  ;;  %v25904_v40 = vpop.f32.mrf.mxu0  ;;  %v39944_v30 = vld [vmem:[%s49651_s1 + $0x4b10] sm:$0xff]  ;;  %v39943_v35 = vld [vmem:[%s49651_s1 + $0x4b08] sm:$0xff] }
 0x947   :  { %26180 = vmatpush.bf16.msra.mxu2 %v39932_v18  ;;  %v25941_v39 = vpop.f32.mrf.mxu3 }
 0x948   :  { %26167 = vmatpush.bf16.msra.mxu1 %v39924_v19  ;;  %v48530_v41 = vadd.f32 %v25941_v39, %v25929_v36  ;;  %v25917_v44 = vpop.f32.mrf.mxu1  ;;  %v39954_v19 = vld [vmem:[%s49651_s1 + $0x4b60] sm:$0xff]  ;;  %v39959_v36 = vld [vmem:[%s49651_s1 + $0x4b88] sm:$0xff] }
 0x949   :  { %26193 = vmatpush.bf16.msra.mxu3 %v39940_v20  ;;  %v39970_v20 = vld [vmem:[%s49651_s1 + $0x4be0] sm:$0xff]  ;;  %v39967_v39 = vld [vmem:[%s49651_s1 + $0x4bc8] sm:$0xff]  ;;  %v323_v44 = vld [vmem:[%s49652_s0 + $0x970] sm:$0xff] }
 0x94a   :  { %26155 = vmatpush.bf16.msra.mxu0 %v39915_v21  ;;  %v39945_v21 = vld [vmem:[%s49651_s1 + $0x4b18] sm:$0xff] }
 0x94b   :  { %26181 = vmatpush.bf16.msra.mxu2 %v39931_v22  ;;  %v39961_v22 = vld [vmem:[%s49651_s1 + $0x4b98] sm:$0xff] }
 0x94c   :  { %26168 = vmatpush.bf16.msra.mxu1 %v39923_v23 }
 0x94d   :  { %26194 = vmatpush.bf16.msra.mxu3 %v39939_v24  ;;  %v25930_v49 = vpop.f32.mrf.mxu2 }
 0x94e   :  { %26156 = vmatpush.bf16.msra.mxu0 %v39914_v27  ;;  %v322_v49 = vld [vmem:[%s49652_s0 + $0x968] sm:$0xff] }
 0x94f   :  { %26182 = vmatpush.bf16.msra.mxu2 %v39930_v28  ;;  %v25943_v52 = vpop.f32.mrf.mxu3  ;;  %v660_v55 = vpack.c.bf16 %v322_v49, %v322_v49  ;;  %v40011_v49 = vld [vmem:[%s49651_s1 + $0x4d28] sm:$0xff] }
 0x950   :  { %26169 = vmatpush.bf16.msra.mxu1 %v39922_v31  ;;  %v39960_v31 = vld [vmem:[%s49651_s1 + $0x4b90] sm:$0xff]  ;;  %v661_v52 = vpack.c.bf16 %v323_v44, %v323_v44 }
 0x951   :  { %26195 = vmatpush.bf16.msra.mxu3 %v39938_v32 }
 0x952   :  { %26157 = vmatpush.bf16.msra.mxu0 %v39913_v33  ;;  %v39952_v33 = vld [vmem:[%s49651_s1 + $0x4b50] sm:$0xff] }
 0x953   :  { %26183 = vmatpush.bf16.msra.mxu2 %v39929_v34  ;;  %v39968_v34 = vld [vmem:[%s49651_s1 + $0x4bd0] sm:$0xff] }
 0x954   :  { %26170 = vmatpush.bf16.msra.mxu1 %v39921_v37 }
 0x955   :  { %26196 = vmatpush.bf16.msra.mxu3 %v39937_v38  ;;  %v39951_v38 = vld [vmem:[%s49651_s1 + $0x4b48] sm:$0xff] }
 0x956   :  { %26158 = vmatpush.bf16.msra.mxu0 %v39912_v42  ;;  %v39958_v42 = vld [vmem:[%s49651_s1 + $0x4b80] sm:$0xff] }
 0x957   :  { %26184 = vmatpush.bf16.msra.mxu2 %v39928_v43  ;;  %v321_v43 = vld [vmem:[%s49652_s0 + $0x960] sm:$0xff] }
 0x958   :  { %26171 = vmatpush.bf16.msra.mxu1 %v39920_v45  ;;  %v39981_v45 = vld [vmem:[%s49651_s1 + $0x4c38] sm:$0xff] }
 0x959   :  { %26197 = vmatpush.bf16.msra.mxu3 %v39936_v46  ;;  %v39997_v46 = vld [vmem:[%s49651_s1 + $0x4cb8] sm:$0xff] }
 0x95a   :  { %26159 = vmatpush.bf16.msra.mxu0 %v39911_v47  ;;  %v39950_v47 = vld [vmem:[%s49651_s1 + $0x4b40] sm:$0xff] }
 0x95b   :  { %26185 = vmatpush.bf16.msra.mxu2 %v39927_v48  ;;  %v39966_v48 = vld [vmem:[%s49651_s1 + $0x4bc0] sm:$0xff] }
 0x95c   :  { %26172 = vmatpush.bf16.msra.mxu1 %v39919_v50  ;;  %v324_v50 = vld [vmem:[%s49652_s0 + $0x978] sm:$0xff] }
 0x95d   :  { %26198 = vmatpush.bf16.msra.mxu3 %v39935_v51  ;;  %v659_v51 = vpack.c.bf16 %v321_v43, %v321_v43  ;;  %v662_v56 = vpack.c.bf16 %v324_v50, %v324_v50  ;;  %v40027_v50 = vld [vmem:[%s49651_s1 + $0x4da8] sm:$0xff] }
 0x95e   :  { %26160 = vmatpush.bf16.msra.mxu0 %v39910_v53  ;;  %v25954_v13 = vpop.f32.mrf.mxu0  ;;  %v39989_v53 = vld [vmem:[%s49651_s1 + $0x4c78] sm:$0xff] }
 0x95f   :  { %26186 = vmatpush.bf16.msra.mxu2 %v39926_v54  ;;  %v25955_v14 = vadd.f32 %v25954_v13, %v48530_v41  ;;  %v39942_v41 = vld [vmem:[%s49651_s1 + $0x4b00] sm:$0xff]  ;;  %v40005_v54 = vld [vmem:[%s49651_s1 + $0x4cf8] sm:$0xff] }
 0x960   :  { %26173 = vmatpush.bf16.msra.mxu1 %v39918_v59  ;;  %v25967_v17 = vpop.f32.mrf.mxu1  ;;  %v39988_v59 = vld [vmem:[%s49651_s1 + $0x4c70] sm:$0xff]  ;;  %v39985_v13 = vld [vmem:[%s49651_s1 + $0x4c58] sm:$0xff] }
 0x961   :  { %26199 = vmatpush.bf16.msra.mxu3 %v39934_v60  ;;  %26161 = vmatmul.bf16.vlgmr.msra.gmra.mxu0 %v655_v63  ;;  %v25968_v18 = vadd.f32 %v25967_v17, %v25955_v14  ;;  %v40004_v60 = vld [vmem:[%s49651_s1 + $0x4cf0] sm:$0xff]  ;;  %v39987_v63 = vld [vmem:[%s49651_s1 + $0x4c68] sm:$0xff]  ;;  %v40001_v14 = vld [vmem:[%s49651_s1 + $0x4cd8] sm:$0xff] }
 0x962   :  { %26205 = vmatpush.bf16.msrb.mxu0 %v39949_v57  ;;  %26187 = vmatmul.bf16.vlgmr.msra.gmra.mxu2 %v657_v0  ;;  %v39980_v57 = vld [vmem:[%s49651_s1 + $0x4c30] sm:$0xff]  ;;  %v40003_v0 = vld [vmem:[%s49651_s1 + $0x4ce8] sm:$0xff] }
 0x963   :  { %26231 = vmatpush.bf16.msrb.mxu2 %v39965_v58  ;;  %26174 = vmatmul.bf16.vlgmr.msra.gmra.mxu1 %v656_v3  ;;  %v39996_v58 = vld [vmem:[%s49651_s1 + $0x4cb0] sm:$0xff]  ;;  %v39978_v3 = vld [vmem:[%s49651_s1 + $0x4c20] sm:$0xff] }
 0x964   :  { %26218 = vmatpush.bf16.msrb.mxu1 %v39957_v1  ;;  %26200 = vmatmul.bf16.vlgmr.msra.gmra.mxu3 %v658_v4  ;;  %v39994_v4 = vld [vmem:[%s49651_s1 + $0x4ca0] sm:$0xff] }
 0x965   :  { %26244 = vmatpush.bf16.msrb.mxu3 %v39973_v2  ;;  %v25980_v23 = vpop.f32.mrf.mxu2 }
 0x966   :  { %26206 = vmatpush.bf16.msrb.mxu0 %v39948_v5  ;;  %v25981_v24 = vadd.f32 %v25980_v23, %v25968_v18  ;;  %v25956_v28 = vpop.f32.mrf.mxu0  ;;  %v39976_v18 = vld [vmem:[%s49651_s1 + $0x4c10] sm:$0xff]  ;;  %v39975_v23 = vld [vmem:[%s49651_s1 + $0x4c08] sm:$0xff] }
 0x967   :  { %26232 = vmatpush.bf16.msrb.mxu2 %v39964_v6  ;;  %v25993_v27 = vpop.f32.mrf.mxu3 }
 0x968   :  { %26219 = vmatpush.bf16.msrb.mxu1 %v39956_v7  ;;  %v48641_v29 = vadd.f32 %v25993_v27, %v25981_v24  ;;  %v25969_v32 = vpop.f32.mrf.mxu1  ;;  %v39986_v7 = vld [vmem:[%s49651_s1 + $0x4c60] sm:$0xff]  ;;  %v39991_v24 = vld [vmem:[%s49651_s1 + $0x4c88] sm:$0xff] }
 0x969   :  { %26245 = vmatpush.bf16.msrb.mxu3 %v39972_v8  ;;  %v40002_v8 = vld [vmem:[%s49651_s1 + $0x4ce0] sm:$0xff]  ;;  %v39999_v27 = vld [vmem:[%s49651_s1 + $0x4cc8] sm:$0xff]  ;;  %v327_v32 = vld [vmem:[%s49652_s0 + $0x990] sm:$0xff] }
 0x96a   :  { %26207 = vmatpush.bf16.msrb.mxu0 %v39947_v9  ;;  %v39977_v9 = vld [vmem:[%s49651_s1 + $0x4c18] sm:$0xff] }
 0x96b   :  { %26233 = vmatpush.bf16.msrb.mxu2 %v39963_v10  ;;  %v39993_v10 = vld [vmem:[%s49651_s1 + $0x4c98] sm:$0xff] }
 0x96c   :  { %26220 = vmatpush.bf16.msrb.mxu1 %v39955_v11 }
 0x96d   :  { %26246 = vmatpush.bf16.msrb.mxu3 %v39971_v12  ;;  %v25982_v37 = vpop.f32.mrf.mxu2 }
 0x96e   :  { %26208 = vmatpush.bf16.msrb.mxu0 %v39946_v15  ;;  %v326_v37 = vld [vmem:[%s49652_s0 + $0x988] sm:$0xff] }
 0x96f   :  { %26234 = vmatpush.bf16.msrb.mxu2 %v39962_v16  ;;  %v25995_v40 = vpop.f32.mrf.mxu3  ;;  %v664_v43 = vpack.c.bf16 %v326_v37, %v326_v37  ;;  %v40043_v37 = vld [vmem:[%s49651_s1 + $0x4e28] sm:$0xff] }
 0x970   :  { %26221 = vmatpush.bf16.msrb.mxu1 %v39954_v19  ;;  %v39992_v19 = vld [vmem:[%s49651_s1 + $0x4c90] sm:$0xff]  ;;  %v665_v40 = vpack.c.bf16 %v327_v32, %v327_v32 }
 0x971   :  { %26247 = vmatpush.bf16.msrb.mxu3 %v39970_v20 }
 0x972   :  { %26209 = vmatpush.bf16.msrb.mxu0 %v39945_v21  ;;  %v39984_v21 = vld [vmem:[%s49651_s1 + $0x4c50] sm:$0xff] }
 0x973   :  { %26235 = vmatpush.bf16.msrb.mxu2 %v39961_v22  ;;  %v40000_v22 = vld [vmem:[%s49651_s1 + $0x4cd0] sm:$0xff] }
 0x974   :  { %26222 = vmatpush.bf16.msrb.mxu1 %v39953_v25 }
 0x975   :  { %26248 = vmatpush.bf16.msrb.mxu3 %v39969_v26  ;;  %v39983_v26 = vld [vmem:[%s49651_s1 + $0x4c48] sm:$0xff] }
 0x976   :  { %26210 = vmatpush.bf16.msrb.mxu0 %v39944_v30  ;;  %v39990_v30 = vld [vmem:[%s49651_s1 + $0x4c80] sm:$0xff] }
 0x977   :  { %26236 = vmatpush.bf16.msrb.mxu2 %v39960_v31  ;;  %v325_v31 = vld [vmem:[%s49652_s0 + $0x980] sm:$0xff] }
 0x978   :  { %26223 = vmatpush.bf16.msrb.mxu1 %v39952_v33  ;;  %v40013_v33 = vld [vmem:[%s49651_s1 + $0x4d38] sm:$0xff] }
 0x979   :  { %26249 = vmatpush.bf16.msrb.mxu3 %v39968_v34  ;;  %v40029_v34 = vld [vmem:[%s49651_s1 + $0x4db8] sm:$0xff] }
 0x97a   :  { %26211 = vmatpush.bf16.msrb.mxu0 %v39943_v35  ;;  %v39982_v35 = vld [vmem:[%s49651_s1 + $0x4c40] sm:$0xff] }
 0x97b   :  { %26237 = vmatpush.bf16.msrb.mxu2 %v39959_v36  ;;  %v39998_v36 = vld [vmem:[%s49651_s1 + $0x4cc0] sm:$0xff] }
 0x97c   :  { %26224 = vmatpush.bf16.msrb.mxu1 %v39951_v38  ;;  %v328_v38 = vld [vmem:[%s49652_s0 + $0x998] sm:$0xff] }
 0x97d   :  { %26250 = vmatpush.bf16.msrb.mxu3 %v39967_v39  ;;  %v663_v39 = vpack.c.bf16 %v325_v31, %v325_v31  ;;  %v666_v44 = vpack.c.bf16 %v328_v38, %v328_v38  ;;  %v40059_v38 = vld [vmem:[%s49651_s1 + $0x4ea8] sm:$0xff] }
 0x97e   :  { %26212 = vmatpush.bf16.msrb.mxu0 %v39942_v41  ;;  %v26006_v1 = vpop.f32.mrf.mxu0  ;;  %v40021_v41 = vld [vmem:[%s49651_s1 + $0x4d78] sm:$0xff] }
 0x97f   :  { %26238 = vmatpush.bf16.msrb.mxu2 %v39958_v42  ;;  %v26007_v2 = vadd.f32 %v26006_v1, %v48641_v29  ;;  %v39974_v29 = vld [vmem:[%s49651_s1 + $0x4c00] sm:$0xff]  ;;  %v40037_v42 = vld [vmem:[%s49651_s1 + $0x4df8] sm:$0xff] }
 0x980   :  { %26225 = vmatpush.bf16.msrb.mxu1 %v39950_v47  ;;  %v26019_v5 = vpop.f32.mrf.mxu1  ;;  %v40020_v47 = vld [vmem:[%s49651_s1 + $0x4d70] sm:$0xff]  ;;  %v40017_v1 = vld [vmem:[%s49651_s1 + $0x4d58] sm:$0xff] }
 0x981   :  { %26251 = vmatpush.bf16.msrb.mxu3 %v39966_v48  ;;  %26213 = vmatmul.bf16.vlgmr.msrb.gmra.mxu0 %v659_v51  ;;  %v26020_v6 = vadd.f32 %v26019_v5, %v26007_v2  ;;  %v40036_v48 = vld [vmem:[%s49651_s1 + $0x4df0] sm:$0xff]  ;;  %v40019_v51 = vld [vmem:[%s49651_s1 + $0x4d68] sm:$0xff]  ;;  %v40033_v2 = vld [vmem:[%s49651_s1 + $0x4dd8] sm:$0xff] }
 0x982   :  { %26257 = vmatpush.bf16.msra.mxu0 %v39981_v45  ;;  %26239 = vmatmul.bf16.vlgmr.msrb.gmra.mxu2 %v661_v52  ;;  %v40012_v45 = vld [vmem:[%s49651_s1 + $0x4d30] sm:$0xff]  ;;  %v40035_v52 = vld [vmem:[%s49651_s1 + $0x4de8] sm:$0xff] }
 0x983   :  { %26283 = vmatpush.bf16.msra.mxu2 %v39997_v46  ;;  %26226 = vmatmul.bf16.vlgmr.msrb.gmra.mxu1 %v660_v55  ;;  %v40028_v46 = vld [vmem:[%s49651_s1 + $0x4db0] sm:$0xff]  ;;  %v40010_v55 = vld [vmem:[%s49651_s1 + $0x4d20] sm:$0xff] }
 0x984   :  { %26270 = vmatpush.bf16.msra.mxu1 %v39989_v53  ;;  %26252 = vmatmul.bf16.vlgmr.msrb.gmra.mxu3 %v662_v56  ;;  %v40026_v56 = vld [vmem:[%s49651_s1 + $0x4da0] sm:$0xff] }
 0x985   :  { %26296 = vmatpush.bf16.msra.mxu3 %v40005_v54  ;;  %v26032_v11 = vpop.f32.mrf.mxu2 }
 0x986   :  { %26258 = vmatpush.bf16.msra.mxu0 %v39980_v57  ;;  %v26033_v12 = vadd.f32 %v26032_v11, %v26020_v6  ;;  %v26008_v16 = vpop.f32.mrf.mxu0  ;;  %v40008_v6 = vld [vmem:[%s49651_s1 + $0x4d10] sm:$0xff]  ;;  %v40007_v11 = vld [vmem:[%s49651_s1 + $0x4d08] sm:$0xff] }
 0x987   :  { %26284 = vmatpush.bf16.msra.mxu2 %v39996_v58  ;;  %v26045_v15 = vpop.f32.mrf.mxu3 }
 0x988   :  { %26271 = vmatpush.bf16.msra.mxu1 %v39988_v59  ;;  %v48752_v17 = vadd.f32 %v26045_v15, %v26033_v12  ;;  %v26021_v20 = vpop.f32.mrf.mxu1  ;;  %v40018_v59 = vld [vmem:[%s49651_s1 + $0x4d60] sm:$0xff]  ;;  %v40023_v12 = vld [vmem:[%s49651_s1 + $0x4d88] sm:$0xff] }
 0x989   :  { %26297 = vmatpush.bf16.msra.mxu3 %v40004_v60  ;;  %v40034_v60 = vld [vmem:[%s49651_s1 + $0x4de0] sm:$0xff]  ;;  %v40031_v15 = vld [vmem:[%s49651_s1 + $0x4dc8] sm:$0xff]  ;;  %v331_v20 = vld [vmem:[%s49652_s0 + $0x9b0] sm:$0xff] }
 0x98a   :  { %26259 = vmatpush.bf16.msra.mxu0 %v39979_v61  ;;  %v40009_v61 = vld [vmem:[%s49651_s1 + $0x4d18] sm:$0xff] }
 0x98b   :  { %26285 = vmatpush.bf16.msra.mxu2 %v39995_v62  ;;  %v40025_v62 = vld [vmem:[%s49651_s1 + $0x4d98] sm:$0xff] }
 0x98c   :  { %26272 = vmatpush.bf16.msra.mxu1 %v39987_v63 }
 0x98d   :  { %26298 = vmatpush.bf16.msra.mxu3 %v40003_v0  ;;  %v26034_v25 = vpop.f32.mrf.mxu2 }
 0x98e   :  { %26260 = vmatpush.bf16.msra.mxu0 %v39978_v3  ;;  %v330_v25 = vld [vmem:[%s49652_s0 + $0x9a8] sm:$0xff] }
 0x98f   :  { %26286 = vmatpush.bf16.msra.mxu2 %v39994_v4  ;;  %v26047_v28 = vpop.f32.mrf.mxu3  ;;  %v668_v31 = vpack.c.bf16 %v330_v25, %v330_v25  ;;  %v40075_v25 = vld [vmem:[%s49651_s1 + $0x4f28] sm:$0xff] }
 0x990   :  { %26273 = vmatpush.bf16.msra.mxu1 %v39986_v7  ;;  %v40024_v7 = vld [vmem:[%s49651_s1 + $0x4d90] sm:$0xff]  ;;  %v669_v28 = vpack.c.bf16 %v331_v20, %v331_v20 }
 0x991   :  { %26299 = vmatpush.bf16.msra.mxu3 %v40002_v8 }
 0x992   :  { %26261 = vmatpush.bf16.msra.mxu0 %v39977_v9  ;;  %v40016_v9 = vld [vmem:[%s49651_s1 + $0x4d50] sm:$0xff] }
 0x993   :  { %26287 = vmatpush.bf16.msra.mxu2 %v39993_v10  ;;  %v40032_v10 = vld [vmem:[%s49651_s1 + $0x4dd0] sm:$0xff] }
 0x994   :  { %26274 = vmatpush.bf16.msra.mxu1 %v39985_v13 }
 0x995   :  { %26300 = vmatpush.bf16.msra.mxu3 %v40001_v14  ;;  %v40015_v14 = vld [vmem:[%s49651_s1 + $0x4d48] sm:$0xff] }
 0x996   :  { %26262 = vmatpush.bf16.msra.mxu0 %v39976_v18  ;;  %v40022_v18 = vld [vmem:[%s49651_s1 + $0x4d80] sm:$0xff] }
 0x997   :  { %26288 = vmatpush.bf16.msra.mxu2 %v39992_v19  ;;  %v329_v19 = vld [vmem:[%s49652_s0 + $0x9a0] sm:$0xff] }
 0x998   :  { %26275 = vmatpush.bf16.msra.mxu1 %v39984_v21  ;;  %v40045_v21 = vld [vmem:[%s49651_s1 + $0x4e38] sm:$0xff] }
 0x999   :  { %26301 = vmatpush.bf16.msra.mxu3 %v40000_v22  ;;  %v40061_v22 = vld [vmem:[%s49651_s1 + $0x4eb8] sm:$0xff] }
 0x99a   :  { %26263 = vmatpush.bf16.msra.mxu0 %v39975_v23  ;;  %v40014_v23 = vld [vmem:[%s49651_s1 + $0x4d40] sm:$0xff] }
 0x99b   :  { %26289 = vmatpush.bf16.msra.mxu2 %v39991_v24  ;;  %v40030_v24 = vld [vmem:[%s49651_s1 + $0x4dc0] sm:$0xff] }
 0x99c   :  { %26276 = vmatpush.bf16.msra.mxu1 %v39983_v26  ;;  %v332_v26 = vld [vmem:[%s49652_s0 + $0x9b8] sm:$0xff] }
 0x99d   :  { %26302 = vmatpush.bf16.msra.mxu3 %v39999_v27  ;;  %v667_v27 = vpack.c.bf16 %v329_v19, %v329_v19  ;;  %v670_v32 = vpack.c.bf16 %v332_v26, %v332_v26  ;;  %v40091_v26 = vld [vmem:[%s49651_s1 + $0x4fa8] sm:$0xff] }
 0x99e   :  { %26264 = vmatpush.bf16.msra.mxu0 %v39974_v29  ;;  %v26058_v53 = vpop.f32.mrf.mxu0  ;;  %v40053_v29 = vld [vmem:[%s49651_s1 + $0x4e78] sm:$0xff] }
 0x99f   :  { %26290 = vmatpush.bf16.msra.mxu2 %v39990_v30  ;;  %v26059_v54 = vadd.f32 %v26058_v53, %v48752_v17  ;;  %v40006_v17 = vld [vmem:[%s49651_s1 + $0x4d00] sm:$0xff]  ;;  %v40069_v30 = vld [vmem:[%s49651_s1 + $0x4ef8] sm:$0xff] }
 0x9a0   :  { %26277 = vmatpush.bf16.msra.mxu1 %v39982_v35  ;;  %v26071_v57 = vpop.f32.mrf.mxu1  ;;  %v40052_v35 = vld [vmem:[%s49651_s1 + $0x4e70] sm:$0xff]  ;;  %v40049_v53 = vld [vmem:[%s49651_s1 + $0x4e58] sm:$0xff] }
 0x9a1   :  { %26303 = vmatpush.bf16.msra.mxu3 %v39998_v36  ;;  %26265 = vmatmul.bf16.vlgmr.msra.gmra.mxu0 %v663_v39  ;;  %v26072_v58 = vadd.f32 %v26071_v57, %v26059_v54  ;;  %v40068_v36 = vld [vmem:[%s49651_s1 + $0x4ef0] sm:$0xff]  ;;  %v40051_v39 = vld [vmem:[%s49651_s1 + $0x4e68] sm:$0xff]  ;;  %v40065_v54 = vld [vmem:[%s49651_s1 + $0x4ed8] sm:$0xff] }
 0x9a2   :  { %26309 = vmatpush.bf16.msrb.mxu0 %v40013_v33  ;;  %26291 = vmatmul.bf16.vlgmr.msra.gmra.mxu2 %v665_v40  ;;  %v40044_v33 = vld [vmem:[%s49651_s1 + $0x4e30] sm:$0xff]  ;;  %v40067_v40 = vld [vmem:[%s49651_s1 + $0x4ee8] sm:$0xff] }
 0x9a3   :  { %26335 = vmatpush.bf16.msrb.mxu2 %v40029_v34  ;;  %26278 = vmatmul.bf16.vlgmr.msra.gmra.mxu1 %v664_v43  ;;  %v40060_v34 = vld [vmem:[%s49651_s1 + $0x4eb0] sm:$0xff]  ;;  %v40042_v43 = vld [vmem:[%s49651_s1 + $0x4e20] sm:$0xff] }
 0x9a4   :  { %26322 = vmatpush.bf16.msrb.mxu1 %v40021_v41  ;;  %26304 = vmatmul.bf16.vlgmr.msra.gmra.mxu3 %v666_v44  ;;  %v40058_v44 = vld [vmem:[%s49651_s1 + $0x4ea0] sm:$0xff] }
 0x9a5   :  { %26348 = vmatpush.bf16.msrb.mxu3 %v40037_v42  ;;  %v26084_v63 = vpop.f32.mrf.mxu2 }
 0x9a6   :  { %26310 = vmatpush.bf16.msrb.mxu0 %v40012_v45  ;;  %v26085_v0 = vadd.f32 %v26084_v63, %v26072_v58  ;;  %v26060_v4 = vpop.f32.mrf.mxu0  ;;  %v40040_v58 = vld [vmem:[%s49651_s1 + $0x4e10] sm:$0xff]  ;;  %v40039_v63 = vld [vmem:[%s49651_s1 + $0x4e08] sm:$0xff] }
 0x9a7   :  { %26336 = vmatpush.bf16.msrb.mxu2 %v40028_v46  ;;  %v26097_v3 = vpop.f32.mrf.mxu3 }
 0x9a8   :  { %26323 = vmatpush.bf16.msrb.mxu1 %v40020_v47  ;;  %v48863_v5 = vadd.f32 %v26097_v3, %v26085_v0  ;;  %v26073_v8 = vpop.f32.mrf.mxu1  ;;  %v40050_v47 = vld [vmem:[%s49651_s1 + $0x4e60] sm:$0xff]  ;;  %v40055_v0 = vld [vmem:[%s49651_s1 + $0x4e88] sm:$0xff] }
 0x9a9   :  { %26349 = vmatpush.bf16.msrb.mxu3 %v40036_v48  ;;  %v40066_v48 = vld [vmem:[%s49651_s1 + $0x4ee0] sm:$0xff]  ;;  %v40063_v3 = vld [vmem:[%s49651_s1 + $0x4ec8] sm:$0xff]  ;;  %v335_v8 = vld [vmem:[%s49652_s0 + $0x9d0] sm:$0xff] }
 0x9aa   :  { %26311 = vmatpush.bf16.msrb.mxu0 %v40011_v49  ;;  %v40041_v49 = vld [vmem:[%s49651_s1 + $0x4e18] sm:$0xff] }
 0x9ab   :  { %26337 = vmatpush.bf16.msrb.mxu2 %v40027_v50  ;;  %v40057_v50 = vld [vmem:[%s49651_s1 + $0x4e98] sm:$0xff] }
 0x9ac   :  { %26324 = vmatpush.bf16.msrb.mxu1 %v40019_v51 }
 0x9ad   :  { %26350 = vmatpush.bf16.msrb.mxu3 %v40035_v52  ;;  %v26086_v13 = vpop.f32.mrf.mxu2 }
 0x9ae   :  { %26312 = vmatpush.bf16.msrb.mxu0 %v40010_v55  ;;  %v334_v13 = vld [vmem:[%s49652_s0 + $0x9c8] sm:$0xff] }
 0x9af   :  { %26338 = vmatpush.bf16.msrb.mxu2 %v40026_v56  ;;  %v26099_v16 = vpop.f32.mrf.mxu3  ;;  %v672_v19 = vpack.c.bf16 %v334_v13, %v334_v13  ;;  %v40107_v13 = vld [vmem:[%s49651_s1 + $0x5028] sm:$0xff] }
 0x9b0   :  { %26325 = vmatpush.bf16.msrb.mxu1 %v40018_v59  ;;  %v40056_v59 = vld [vmem:[%s49651_s1 + $0x4e90] sm:$0xff]  ;;  %v673_v16 = vpack.c.bf16 %v335_v8, %v335_v8 }
 0x9b1   :  { %26351 = vmatpush.bf16.msrb.mxu3 %v40034_v60 }
 0x9b2   :  { %26313 = vmatpush.bf16.msrb.mxu0 %v40009_v61  ;;  %v40048_v61 = vld [vmem:[%s49651_s1 + $0x4e50] sm:$0xff] }
 0x9b3   :  { %26339 = vmatpush.bf16.msrb.mxu2 %v40025_v62  ;;  %v40064_v62 = vld [vmem:[%s49651_s1 + $0x4ed0] sm:$0xff] }
 0x9b4   :  { %26326 = vmatpush.bf16.msrb.mxu1 %v40017_v1 }
 0x9b5   :  { %26352 = vmatpush.bf16.msrb.mxu3 %v40033_v2  ;;  %v40047_v2 = vld [vmem:[%s49651_s1 + $0x4e48] sm:$0xff] }
 0x9b6   :  { %26314 = vmatpush.bf16.msrb.mxu0 %v40008_v6  ;;  %v40054_v6 = vld [vmem:[%s49651_s1 + $0x4e80] sm:$0xff] }
 0x9b7   :  { %26340 = vmatpush.bf16.msrb.mxu2 %v40024_v7  ;;  %v333_v7 = vld [vmem:[%s49652_s0 + $0x9c0] sm:$0xff] }
 0x9b8   :  { %26327 = vmatpush.bf16.msrb.mxu1 %v40016_v9  ;;  %v40077_v9 = vld [vmem:[%s49651_s1 + $0x4f38] sm:$0xff] }
 0x9b9   :  { %26353 = vmatpush.bf16.msrb.mxu3 %v40032_v10  ;;  %v40093_v10 = vld [vmem:[%s49651_s1 + $0x4fb8] sm:$0xff] }
 0x9ba   :  { %26315 = vmatpush.bf16.msrb.mxu0 %v40007_v11  ;;  %v40046_v11 = vld [vmem:[%s49651_s1 + $0x4e40] sm:$0xff] }
 0x9bb   :  { %26341 = vmatpush.bf16.msrb.mxu2 %v40023_v12  ;;  %v40062_v12 = vld [vmem:[%s49651_s1 + $0x4ec0] sm:$0xff] }
 0x9bc   :  { %26328 = vmatpush.bf16.msrb.mxu1 %v40015_v14  ;;  %v336_v14 = vld [vmem:[%s49652_s0 + $0x9d8] sm:$0xff] }
 0x9bd   :  { %26354 = vmatpush.bf16.msrb.mxu3 %v40031_v15  ;;  %v671_v15 = vpack.c.bf16 %v333_v7, %v333_v7  ;;  %v674_v20 = vpack.c.bf16 %v336_v14, %v336_v14  ;;  %v40123_v14 = vld [vmem:[%s49651_s1 + $0x50a8] sm:$0xff] }
 0x9be   :  { %26316 = vmatpush.bf16.msrb.mxu0 %v40006_v17  ;;  %v26110_v41 = vpop.f32.mrf.mxu0  ;;  %v40085_v17 = vld [vmem:[%s49651_s1 + $0x4f78] sm:$0xff] }
 0x9bf   :  { %26342 = vmatpush.bf16.msrb.mxu2 %v40022_v18  ;;  %v26111_v42 = vadd.f32 %v26110_v41, %v48863_v5  ;;  %v40038_v5 = vld [vmem:[%s49651_s1 + $0x4e00] sm:$0xff]  ;;  %v40101_v18 = vld [vmem:[%s49651_s1 + $0x4ff8] sm:$0xff] }
 0x9c0   :  { %26329 = vmatpush.bf16.msrb.mxu1 %v40014_v23  ;;  %v26123_v45 = vpop.f32.mrf.mxu1  ;;  %v40084_v23 = vld [vmem:[%s49651_s1 + $0x4f70] sm:$0xff]  ;;  %v40081_v41 = vld [vmem:[%s49651_s1 + $0x4f58] sm:$0xff] }
 0x9c1   :  { %26355 = vmatpush.bf16.msrb.mxu3 %v40030_v24  ;;  %26317 = vmatmul.bf16.vlgmr.msrb.gmra.mxu0 %v667_v27  ;;  %v26124_v46 = vadd.f32 %v26123_v45, %v26111_v42  ;;  %v40100_v24 = vld [vmem:[%s49651_s1 + $0x4ff0] sm:$0xff]  ;;  %v40083_v27 = vld [vmem:[%s49651_s1 + $0x4f68] sm:$0xff]  ;;  %v40097_v42 = vld [vmem:[%s49651_s1 + $0x4fd8] sm:$0xff] }
 0x9c2   :  { %26361 = vmatpush.bf16.msra.mxu0 %v40045_v21  ;;  %26343 = vmatmul.bf16.vlgmr.msrb.gmra.mxu2 %v669_v28  ;;  %v40076_v21 = vld [vmem:[%s49651_s1 + $0x4f30] sm:$0xff]  ;;  %v40099_v28 = vld [vmem:[%s49651_s1 + $0x4fe8] sm:$0xff] }
 0x9c3   :  { %26387 = vmatpush.bf16.msra.mxu2 %v40061_v22  ;;  %26330 = vmatmul.bf16.vlgmr.msrb.gmra.mxu1 %v668_v31  ;;  %v40092_v22 = vld [vmem:[%s49651_s1 + $0x4fb0] sm:$0xff]  ;;  %v40074_v31 = vld [vmem:[%s49651_s1 + $0x4f20] sm:$0xff] }
 0x9c4   :  { %26374 = vmatpush.bf16.msra.mxu1 %v40053_v29  ;;  %26356 = vmatmul.bf16.vlgmr.msrb.gmra.mxu3 %v670_v32  ;;  %v40090_v32 = vld [vmem:[%s49651_s1 + $0x4fa0] sm:$0xff] }
 0x9c5   :  { %26400 = vmatpush.bf16.msra.mxu3 %v40069_v30  ;;  %v26136_v51 = vpop.f32.mrf.mxu2 }
 0x9c6   :  { %26362 = vmatpush.bf16.msra.mxu0 %v40044_v33  ;;  %v26137_v52 = vadd.f32 %v26136_v51, %v26124_v46  ;;  %v26112_v56 = vpop.f32.mrf.mxu0  ;;  %v40072_v46 = vld [vmem:[%s49651_s1 + $0x4f10] sm:$0xff]  ;;  %v40071_v51 = vld [vmem:[%s49651_s1 + $0x4f08] sm:$0xff] }
 0x9c7   :  { %26388 = vmatpush.bf16.msra.mxu2 %v40060_v34  ;;  %v26149_v55 = vpop.f32.mrf.mxu3 }
 0x9c8   :  { %26375 = vmatpush.bf16.msra.mxu1 %v40052_v35  ;;  %v48974_v57 = vadd.f32 %v26149_v55, %v26137_v52  ;;  %v26125_v60 = vpop.f32.mrf.mxu1  ;;  %v40082_v35 = vld [vmem:[%s49651_s1 + $0x4f60] sm:$0xff]  ;;  %v40087_v52 = vld [vmem:[%s49651_s1 + $0x4f88] sm:$0xff] }
 0x9c9   :  { %26401 = vmatpush.bf16.msra.mxu3 %v40068_v36  ;;  %v40098_v36 = vld [vmem:[%s49651_s1 + $0x4fe0] sm:$0xff]  ;;  %v40095_v55 = vld [vmem:[%s49651_s1 + $0x4fc8] sm:$0xff]  ;;  %v339_v60 = vld [vmem:[%s49652_s0 + $0x9f0] sm:$0xff] }
 0x9ca   :  { %26363 = vmatpush.bf16.msra.mxu0 %v40043_v37  ;;  %v40073_v37 = vld [vmem:[%s49651_s1 + $0x4f18] sm:$0xff] }
 0x9cb   :  { %26389 = vmatpush.bf16.msra.mxu2 %v40059_v38  ;;  %v40089_v38 = vld [vmem:[%s49651_s1 + $0x4f98] sm:$0xff] }
 0x9cc   :  { %26376 = vmatpush.bf16.msra.mxu1 %v40051_v39 }
 0x9cd   :  { %26402 = vmatpush.bf16.msra.mxu3 %v40067_v40  ;;  %v26138_v1 = vpop.f32.mrf.mxu2 }
 0x9ce   :  { %26364 = vmatpush.bf16.msra.mxu0 %v40042_v43  ;;  %v338_v1 = vld [vmem:[%s49652_s0 + $0x9e8] sm:$0xff] }
 0x9cf   :  { %26390 = vmatpush.bf16.msra.mxu2 %v40058_v44  ;;  %v26151_v4 = vpop.f32.mrf.mxu3  ;;  %v676_v7 = vpack.c.bf16 %v338_v1, %v338_v1  ;;  %v40139_v1 = vld [vmem:[%s49651_s1 + $0x5128] sm:$0xff] }
 0x9d0   :  { %26377 = vmatpush.bf16.msra.mxu1 %v40050_v47  ;;  %v40088_v47 = vld [vmem:[%s49651_s1 + $0x4f90] sm:$0xff]  ;;  %v677_v4 = vpack.c.bf16 %v339_v60, %v339_v60 }
 0x9d1   :  { %26403 = vmatpush.bf16.msra.mxu3 %v40066_v48 }
 0x9d2   :  { %26365 = vmatpush.bf16.msra.mxu0 %v40041_v49  ;;  %v40080_v49 = vld [vmem:[%s49651_s1 + $0x4f50] sm:$0xff] }
 0x9d3   :  { %26391 = vmatpush.bf16.msra.mxu2 %v40057_v50  ;;  %v40096_v50 = vld [vmem:[%s49651_s1 + $0x4fd0] sm:$0xff] }
 0x9d4   :  { %26378 = vmatpush.bf16.msra.mxu1 %v40049_v53 }
 0x9d5   :  { %26404 = vmatpush.bf16.msra.mxu3 %v40065_v54  ;;  %v40079_v54 = vld [vmem:[%s49651_s1 + $0x4f48] sm:$0xff] }
 0x9d6   :  { %26366 = vmatpush.bf16.msra.mxu0 %v40040_v58  ;;  %v40086_v58 = vld [vmem:[%s49651_s1 + $0x4f80] sm:$0xff] }
 0x9d7   :  { %26392 = vmatpush.bf16.msra.mxu2 %v40056_v59  ;;  %v337_v59 = vld [vmem:[%s49652_s0 + $0x9e0] sm:$0xff] }
 0x9d8   :  { %26379 = vmatpush.bf16.msra.mxu1 %v40048_v61  ;;  %v40109_v61 = vld [vmem:[%s49651_s1 + $0x5038] sm:$0xff] }
 0x9d9   :  { %26405 = vmatpush.bf16.msra.mxu3 %v40064_v62  ;;  %v40125_v62 = vld [vmem:[%s49651_s1 + $0x50b8] sm:$0xff] }
 0x9da   :  { %26367 = vmatpush.bf16.msra.mxu0 %v40039_v63  ;;  %v40078_v63 = vld [vmem:[%s49651_s1 + $0x4f40] sm:$0xff] }
 0x9db   :  { %26393 = vmatpush.bf16.msra.mxu2 %v40055_v0  ;;  %v40094_v0 = vld [vmem:[%s49651_s1 + $0x4fc0] sm:$0xff] }
 0x9dc   :  { %26380 = vmatpush.bf16.msra.mxu1 %v40047_v2  ;;  %v340_v2 = vld [vmem:[%s49652_s0 + $0x9f8] sm:$0xff] }
 0x9dd   :  { %26406 = vmatpush.bf16.msra.mxu3 %v40063_v3  ;;  %v675_v3 = vpack.c.bf16 %v337_v59, %v337_v59  ;;  %v678_v8 = vpack.c.bf16 %v340_v2, %v340_v2  ;;  %v40155_v2 = vld [vmem:[%s49651_s1 + $0x51a8] sm:$0xff] }
 0x9de   :  { %26368 = vmatpush.bf16.msra.mxu0 %v40038_v5  ;;  %v26162_v29 = vpop.f32.mrf.mxu0  ;;  %v40117_v5 = vld [vmem:[%s49651_s1 + $0x5078] sm:$0xff] }
 0x9df   :  { %26394 = vmatpush.bf16.msra.mxu2 %v40054_v6  ;;  %v26163_v30 = vadd.f32 %v26162_v29, %v48974_v57  ;;  %v40070_v57 = vld [vmem:[%s49651_s1 + $0x4f00] sm:$0xff]  ;;  %v40133_v6 = vld [vmem:[%s49651_s1 + $0x50f8] sm:$0xff] }
 0x9e0   :  { %26381 = vmatpush.bf16.msra.mxu1 %v40046_v11  ;;  %v26175_v33 = vpop.f32.mrf.mxu1  ;;  %v40116_v11 = vld [vmem:[%s49651_s1 + $0x5070] sm:$0xff]  ;;  %v40113_v29 = vld [vmem:[%s49651_s1 + $0x5058] sm:$0xff] }
 0x9e1   :  { %26407 = vmatpush.bf16.msra.mxu3 %v40062_v12  ;;  %26369 = vmatmul.bf16.vlgmr.msra.gmra.mxu0 %v671_v15  ;;  %v26176_v34 = vadd.f32 %v26175_v33, %v26163_v30  ;;  %v40132_v12 = vld [vmem:[%s49651_s1 + $0x50f0] sm:$0xff]  ;;  %v40115_v15 = vld [vmem:[%s49651_s1 + $0x5068] sm:$0xff]  ;;  %v40129_v30 = vld [vmem:[%s49651_s1 + $0x50d8] sm:$0xff] }
 0x9e2   :  { %26413 = vmatpush.bf16.msrb.mxu0 %v40077_v9  ;;  %26395 = vmatmul.bf16.vlgmr.msra.gmra.mxu2 %v673_v16  ;;  %v40108_v9 = vld [vmem:[%s49651_s1 + $0x5030] sm:$0xff]  ;;  %v40131_v16 = vld [vmem:[%s49651_s1 + $0x50e8] sm:$0xff] }
 0x9e3   :  { %26439 = vmatpush.bf16.msrb.mxu2 %v40093_v10  ;;  %26382 = vmatmul.bf16.vlgmr.msra.gmra.mxu1 %v672_v19  ;;  %v40124_v10 = vld [vmem:[%s49651_s1 + $0x50b0] sm:$0xff]  ;;  %v40106_v19 = vld [vmem:[%s49651_s1 + $0x5020] sm:$0xff] }
 0x9e4   :  { %26426 = vmatpush.bf16.msrb.mxu1 %v40085_v17  ;;  %26408 = vmatmul.bf16.vlgmr.msra.gmra.mxu3 %v674_v20  ;;  %v40122_v20 = vld [vmem:[%s49651_s1 + $0x50a0] sm:$0xff] }
 0x9e5   :  { %26452 = vmatpush.bf16.msrb.mxu3 %v40101_v18  ;;  %v26188_v39 = vpop.f32.mrf.mxu2 }
 0x9e6   :  { %26414 = vmatpush.bf16.msrb.mxu0 %v40076_v21  ;;  %v26189_v40 = vadd.f32 %v26188_v39, %v26176_v34  ;;  %v26164_v44 = vpop.f32.mrf.mxu0  ;;  %v40104_v34 = vld [vmem:[%s49651_s1 + $0x5010] sm:$0xff]  ;;  %v40103_v39 = vld [vmem:[%s49651_s1 + $0x5008] sm:$0xff] }
 0x9e7   :  { %26440 = vmatpush.bf16.msrb.mxu2 %v40092_v22  ;;  %v26201_v43 = vpop.f32.mrf.mxu3 }
 0x9e8   :  { %26427 = vmatpush.bf16.msrb.mxu1 %v40084_v23  ;;  %v49085_v45 = vadd.f32 %v26201_v43, %v26189_v40  ;;  %v26177_v48 = vpop.f32.mrf.mxu1  ;;  %v40114_v23 = vld [vmem:[%s49651_s1 + $0x5060] sm:$0xff]  ;;  %v40119_v40 = vld [vmem:[%s49651_s1 + $0x5088] sm:$0xff] }
 0x9e9   :  { %26453 = vmatpush.bf16.msrb.mxu3 %v40100_v24  ;;  %v40130_v24 = vld [vmem:[%s49651_s1 + $0x50e0] sm:$0xff]  ;;  %v40127_v43 = vld [vmem:[%s49651_s1 + $0x50c8] sm:$0xff]  ;;  %v343_v48 = vld [vmem:[%s49652_s0 + $0xa10] sm:$0xff] }
 0x9ea   :  { %26415 = vmatpush.bf16.msrb.mxu0 %v40075_v25  ;;  %v40105_v25 = vld [vmem:[%s49651_s1 + $0x5018] sm:$0xff] }
 0x9eb   :  { %26441 = vmatpush.bf16.msrb.mxu2 %v40091_v26  ;;  %v40121_v26 = vld [vmem:[%s49651_s1 + $0x5098] sm:$0xff] }
 0x9ec   :  { %26428 = vmatpush.bf16.msrb.mxu1 %v40083_v27 }
 0x9ed   :  { %26454 = vmatpush.bf16.msrb.mxu3 %v40099_v28  ;;  %v26190_v53 = vpop.f32.mrf.mxu2 }
 0x9ee   :  { %26416 = vmatpush.bf16.msrb.mxu0 %v40074_v31  ;;  %v342_v53 = vld [vmem:[%s49652_s0 + $0xa08] sm:$0xff] }
 0x9ef   :  { %26442 = vmatpush.bf16.msrb.mxu2 %v40090_v32  ;;  %v26203_v56 = vpop.f32.mrf.mxu3  ;;  %v680_v59 = vpack.c.bf16 %v342_v53, %v342_v53  ;;  %v40171_v53 = vld [vmem:[%s49651_s1 + $0x5228] sm:$0xff] }
 0x9f0   :  { %26429 = vmatpush.bf16.msrb.mxu1 %v40082_v35  ;;  %v40120_v35 = vld [vmem:[%s49651_s1 + $0x5090] sm:$0xff]  ;;  %v681_v56 = vpack.c.bf16 %v343_v48, %v343_v48 }
 0x9f1   :  { %26455 = vmatpush.bf16.msrb.mxu3 %v40098_v36 }
 0x9f2   :  { %26417 = vmatpush.bf16.msrb.mxu0 %v40073_v37  ;;  %v40112_v37 = vld [vmem:[%s49651_s1 + $0x5050] sm:$0xff] }
 0x9f3   :  { %26443 = vmatpush.bf16.msrb.mxu2 %v40089_v38  ;;  %v40128_v38 = vld [vmem:[%s49651_s1 + $0x50d0] sm:$0xff] }
 0x9f4   :  { %26430 = vmatpush.bf16.msrb.mxu1 %v40081_v41 }
 0x9f5   :  { %26456 = vmatpush.bf16.msrb.mxu3 %v40097_v42  ;;  %v40111_v42 = vld [vmem:[%s49651_s1 + $0x5048] sm:$0xff] }
 0x9f6   :  { %26418 = vmatpush.bf16.msrb.mxu0 %v40072_v46  ;;  %v40118_v46 = vld [vmem:[%s49651_s1 + $0x5080] sm:$0xff] }
 0x9f7   :  { %26444 = vmatpush.bf16.msrb.mxu2 %v40088_v47  ;;  %v341_v47 = vld [vmem:[%s49652_s0 + $0xa00] sm:$0xff] }
 0x9f8   :  { %26431 = vmatpush.bf16.msrb.mxu1 %v40080_v49  ;;  %v40141_v49 = vld [vmem:[%s49651_s1 + $0x5138] sm:$0xff] }
 0x9f9   :  { %26457 = vmatpush.bf16.msrb.mxu3 %v40096_v50  ;;  %v40157_v50 = vld [vmem:[%s49651_s1 + $0x51b8] sm:$0xff] }
 0x9fa   :  { %26419 = vmatpush.bf16.msrb.mxu0 %v40071_v51  ;;  %v40110_v51 = vld [vmem:[%s49651_s1 + $0x5040] sm:$0xff] }
 0x9fb   :  { %26445 = vmatpush.bf16.msrb.mxu2 %v40087_v52  ;;  %v40126_v52 = vld [vmem:[%s49651_s1 + $0x50c0] sm:$0xff] }
 0x9fc   :  { %26432 = vmatpush.bf16.msrb.mxu1 %v40079_v54  ;;  %v344_v54 = vld [vmem:[%s49652_s0 + $0xa18] sm:$0xff] }
 0x9fd   :  { %26458 = vmatpush.bf16.msrb.mxu3 %v40095_v55  ;;  %v679_v55 = vpack.c.bf16 %v341_v47, %v341_v47  ;;  %v682_v60 = vpack.c.bf16 %v344_v54, %v344_v54  ;;  %v40187_v54 = vld [vmem:[%s49651_s1 + $0x52a8] sm:$0xff] }
 0x9fe   :  { %26420 = vmatpush.bf16.msrb.mxu0 %v40070_v57  ;;  %v26214_v17 = vpop.f32.mrf.mxu0  ;;  %v40149_v57 = vld [vmem:[%s49651_s1 + $0x5178] sm:$0xff] }
 0x9ff   :  { %26446 = vmatpush.bf16.msrb.mxu2 %v40086_v58  ;;  %v26215_v18 = vadd.f32 %v26214_v17, %v49085_v45  ;;  %v40102_v45 = vld [vmem:[%s49651_s1 + $0x5000] sm:$0xff]  ;;  %v40165_v58 = vld [vmem:[%s49651_s1 + $0x51f8] sm:$0xff] }
 0xa00   :  { %26433 = vmatpush.bf16.msrb.mxu1 %v40078_v63  ;;  %v26227_v21 = vpop.f32.mrf.mxu1  ;;  %v40148_v63 = vld [vmem:[%s49651_s1 + $0x5170] sm:$0xff]  ;;  %v40145_v17 = vld [vmem:[%s49651_s1 + $0x5158] sm:$0xff] }
 0xa01   :  { %26459 = vmatpush.bf16.msrb.mxu3 %v40094_v0  ;;  %26421 = vmatmul.bf16.vlgmr.msrb.gmra.mxu0 %v675_v3  ;;  %v26228_v22 = vadd.f32 %v26227_v21, %v26215_v18  ;;  %v40164_v0 = vld [vmem:[%s49651_s1 + $0x51f0] sm:$0xff]  ;;  %v40147_v3 = vld [vmem:[%s49651_s1 + $0x5168] sm:$0xff]  ;;  %v40161_v18 = vld [vmem:[%s49651_s1 + $0x51d8] sm:$0xff] }
 0xa02   :  { %26465 = vmatpush.bf16.msra.mxu0 %v40109_v61  ;;  %26447 = vmatmul.bf16.vlgmr.msrb.gmra.mxu2 %v677_v4  ;;  %v40140_v61 = vld [vmem:[%s49651_s1 + $0x5130] sm:$0xff]  ;;  %v40163_v4 = vld [vmem:[%s49651_s1 + $0x51e8] sm:$0xff] }
 0xa03   :  { %26491 = vmatpush.bf16.msra.mxu2 %v40125_v62  ;;  %26434 = vmatmul.bf16.vlgmr.msrb.gmra.mxu1 %v676_v7  ;;  %v40156_v62 = vld [vmem:[%s49651_s1 + $0x51b0] sm:$0xff]  ;;  %v40138_v7 = vld [vmem:[%s49651_s1 + $0x5120] sm:$0xff] }
 0xa04   :  { %26478 = vmatpush.bf16.msra.mxu1 %v40117_v5  ;;  %26460 = vmatmul.bf16.vlgmr.msrb.gmra.mxu3 %v678_v8  ;;  %v40154_v8 = vld [vmem:[%s49651_s1 + $0x51a0] sm:$0xff] }
 0xa05   :  { %26504 = vmatpush.bf16.msra.mxu3 %v40133_v6  ;;  %v26240_v27 = vpop.f32.mrf.mxu2 }
 0xa06   :  { %26466 = vmatpush.bf16.msra.mxu0 %v40108_v9  ;;  %v26241_v28 = vadd.f32 %v26240_v27, %v26228_v22  ;;  %v26216_v32 = vpop.f32.mrf.mxu0  ;;  %v40136_v22 = vld [vmem:[%s49651_s1 + $0x5110] sm:$0xff]  ;;  %v40135_v27 = vld [vmem:[%s49651_s1 + $0x5108] sm:$0xff] }
 0xa07   :  { %26492 = vmatpush.bf16.msra.mxu2 %v40124_v10  ;;  %v26253_v31 = vpop.f32.mrf.mxu3 }
 0xa08   :  { %26479 = vmatpush.bf16.msra.mxu1 %v40116_v11  ;;  %v49196_v33 = vadd.f32 %v26253_v31, %v26241_v28  ;;  %v26229_v36 = vpop.f32.mrf.mxu1  ;;  %v40146_v11 = vld [vmem:[%s49651_s1 + $0x5160] sm:$0xff]  ;;  %v40151_v28 = vld [vmem:[%s49651_s1 + $0x5188] sm:$0xff] }
 0xa09   :  { %26505 = vmatpush.bf16.msra.mxu3 %v40132_v12  ;;  %v40162_v12 = vld [vmem:[%s49651_s1 + $0x51e0] sm:$0xff]  ;;  %v40159_v31 = vld [vmem:[%s49651_s1 + $0x51c8] sm:$0xff]  ;;  %v347_v36 = vld [vmem:[%s49652_s0 + $0xa30] sm:$0xff] }
 0xa0a   :  { %26467 = vmatpush.bf16.msra.mxu0 %v40107_v13  ;;  %v40137_v13 = vld [vmem:[%s49651_s1 + $0x5118] sm:$0xff] }
 0xa0b   :  { %26493 = vmatpush.bf16.msra.mxu2 %v40123_v14  ;;  %v40153_v14 = vld [vmem:[%s49651_s1 + $0x5198] sm:$0xff] }
 0xa0c   :  { %26480 = vmatpush.bf16.msra.mxu1 %v40115_v15 }
 0xa0d   :  { %26506 = vmatpush.bf16.msra.mxu3 %v40131_v16  ;;  %v26242_v41 = vpop.f32.mrf.mxu2 }
 0xa0e   :  { %26468 = vmatpush.bf16.msra.mxu0 %v40106_v19  ;;  %v346_v41 = vld [vmem:[%s49652_s0 + $0xa28] sm:$0xff] }
 0xa0f   :  { %26494 = vmatpush.bf16.msra.mxu2 %v40122_v20  ;;  %v26255_v44 = vpop.f32.mrf.mxu3  ;;  %v684_v47 = vpack.c.bf16 %v346_v41, %v346_v41  ;;  %v40203_v41 = vld [vmem:[%s49651_s1 + $0x5328] sm:$0xff] }
 0xa10   :  { %26481 = vmatpush.bf16.msra.mxu1 %v40114_v23  ;;  %v40152_v23 = vld [vmem:[%s49651_s1 + $0x5190] sm:$0xff]  ;;  %v685_v44 = vpack.c.bf16 %v347_v36, %v347_v36 }
 0xa11   :  { %26507 = vmatpush.bf16.msra.mxu3 %v40130_v24 }
 0xa12   :  { %26469 = vmatpush.bf16.msra.mxu0 %v40105_v25  ;;  %v40144_v25 = vld [vmem:[%s49651_s1 + $0x5150] sm:$0xff] }
 0xa13   :  { %26495 = vmatpush.bf16.msra.mxu2 %v40121_v26  ;;  %v40160_v26 = vld [vmem:[%s49651_s1 + $0x51d0] sm:$0xff] }
 0xa14   :  { %26482 = vmatpush.bf16.msra.mxu1 %v40113_v29 }
 0xa15   :  { %26508 = vmatpush.bf16.msra.mxu3 %v40129_v30  ;;  %v40143_v30 = vld [vmem:[%s49651_s1 + $0x5148] sm:$0xff] }
 0xa16   :  { %26470 = vmatpush.bf16.msra.mxu0 %v40104_v34  ;;  %v40150_v34 = vld [vmem:[%s49651_s1 + $0x5180] sm:$0xff] }
 0xa17   :  { %26496 = vmatpush.bf16.msra.mxu2 %v40120_v35  ;;  %v345_v35 = vld [vmem:[%s49652_s0 + $0xa20] sm:$0xff] }
 0xa18   :  { %26483 = vmatpush.bf16.msra.mxu1 %v40112_v37  ;;  %v40173_v37 = vld [vmem:[%s49651_s1 + $0x5238] sm:$0xff] }
 0xa19   :  { %26509 = vmatpush.bf16.msra.mxu3 %v40128_v38  ;;  %v40189_v38 = vld [vmem:[%s49651_s1 + $0x52b8] sm:$0xff] }
 0xa1a   :  { %26471 = vmatpush.bf16.msra.mxu0 %v40103_v39  ;;  %v40142_v39 = vld [vmem:[%s49651_s1 + $0x5140] sm:$0xff] }
 0xa1b   :  { %26497 = vmatpush.bf16.msra.mxu2 %v40119_v40  ;;  %v40158_v40 = vld [vmem:[%s49651_s1 + $0x51c0] sm:$0xff] }
 0xa1c   :  { %26484 = vmatpush.bf16.msra.mxu1 %v40111_v42  ;;  %v348_v42 = vld [vmem:[%s49652_s0 + $0xa38] sm:$0xff] }
 0xa1d   :  { %26510 = vmatpush.bf16.msra.mxu3 %v40127_v43  ;;  %v683_v43 = vpack.c.bf16 %v345_v35, %v345_v35  ;;  %v686_v48 = vpack.c.bf16 %v348_v42, %v348_v42  ;;  %v40219_v42 = vld [vmem:[%s49651_s1 + $0x53a8] sm:$0xff] }
 0xa1e   :  { %26472 = vmatpush.bf16.msra.mxu0 %v40102_v45  ;;  %v26266_v5 = vpop.f32.mrf.mxu0  ;;  %v40181_v45 = vld [vmem:[%s49651_s1 + $0x5278] sm:$0xff] }
 0xa1f   :  { %26498 = vmatpush.bf16.msra.mxu2 %v40118_v46  ;;  %v26267_v6 = vadd.f32 %v26266_v5, %v49196_v33  ;;  %v40134_v33 = vld [vmem:[%s49651_s1 + $0x5100] sm:$0xff]  ;;  %v40197_v46 = vld [vmem:[%s49651_s1 + $0x52f8] sm:$0xff] }
 0xa20   :  { %26485 = vmatpush.bf16.msra.mxu1 %v40110_v51  ;;  %v26279_v9 = vpop.f32.mrf.mxu1  ;;  %v40180_v51 = vld [vmem:[%s49651_s1 + $0x5270] sm:$0xff]  ;;  %v40177_v5 = vld [vmem:[%s49651_s1 + $0x5258] sm:$0xff] }
 0xa21   :  { %26511 = vmatpush.bf16.msra.mxu3 %v40126_v52  ;;  %26473 = vmatmul.bf16.vlgmr.msra.gmra.mxu0 %v679_v55  ;;  %v26280_v10 = vadd.f32 %v26279_v9, %v26267_v6  ;;  %v40196_v52 = vld [vmem:[%s49651_s1 + $0x52f0] sm:$0xff]  ;;  %v40179_v55 = vld [vmem:[%s49651_s1 + $0x5268] sm:$0xff]  ;;  %v40193_v6 = vld [vmem:[%s49651_s1 + $0x52d8] sm:$0xff] }
 0xa22   :  { %26517 = vmatpush.bf16.msrb.mxu0 %v40141_v49  ;;  %26499 = vmatmul.bf16.vlgmr.msra.gmra.mxu2 %v681_v56  ;;  %v40172_v49 = vld [vmem:[%s49651_s1 + $0x5230] sm:$0xff]  ;;  %v40195_v56 = vld [vmem:[%s49651_s1 + $0x52e8] sm:$0xff] }
 0xa23   :  { %26543 = vmatpush.bf16.msrb.mxu2 %v40157_v50  ;;  %26486 = vmatmul.bf16.vlgmr.msra.gmra.mxu1 %v680_v59  ;;  %v40188_v50 = vld [vmem:[%s49651_s1 + $0x52b0] sm:$0xff]  ;;  %v40170_v59 = vld [vmem:[%s49651_s1 + $0x5220] sm:$0xff] }
 0xa24   :  { %26530 = vmatpush.bf16.msrb.mxu1 %v40149_v57  ;;  %26512 = vmatmul.bf16.vlgmr.msra.gmra.mxu3 %v682_v60  ;;  %v40186_v60 = vld [vmem:[%s49651_s1 + $0x52a0] sm:$0xff] }
 0xa25   :  { %26556 = vmatpush.bf16.msrb.mxu3 %v40165_v58  ;;  %v26292_v15 = vpop.f32.mrf.mxu2 }
 0xa26   :  { %26518 = vmatpush.bf16.msrb.mxu0 %v40140_v61  ;;  %v26293_v16 = vadd.f32 %v26292_v15, %v26280_v10  ;;  %v26268_v20 = vpop.f32.mrf.mxu0  ;;  %v40168_v10 = vld [vmem:[%s49651_s1 + $0x5210] sm:$0xff]  ;;  %v40167_v15 = vld [vmem:[%s49651_s1 + $0x5208] sm:$0xff] }
 0xa27   :  { %26544 = vmatpush.bf16.msrb.mxu2 %v40156_v62  ;;  %v26305_v19 = vpop.f32.mrf.mxu3 }
 0xa28   :  { %26531 = vmatpush.bf16.msrb.mxu1 %v40148_v63  ;;  %v49307_v21 = vadd.f32 %v26305_v19, %v26293_v16  ;;  %v26281_v24 = vpop.f32.mrf.mxu1  ;;  %v40178_v63 = vld [vmem:[%s49651_s1 + $0x5260] sm:$0xff]  ;;  %v40183_v16 = vld [vmem:[%s49651_s1 + $0x5288] sm:$0xff] }
 0xa29   :  { %26557 = vmatpush.bf16.msrb.mxu3 %v40164_v0  ;;  %v40194_v0 = vld [vmem:[%s49651_s1 + $0x52e0] sm:$0xff]  ;;  %v40191_v19 = vld [vmem:[%s49651_s1 + $0x52c8] sm:$0xff]  ;;  %v351_v24 = vld [vmem:[%s49652_s0 + $0xa50] sm:$0xff] }
 0xa2a   :  { %26519 = vmatpush.bf16.msrb.mxu0 %v40139_v1  ;;  %v40169_v1 = vld [vmem:[%s49651_s1 + $0x5218] sm:$0xff] }
 0xa2b   :  { %26545 = vmatpush.bf16.msrb.mxu2 %v40155_v2  ;;  %v40185_v2 = vld [vmem:[%s49651_s1 + $0x5298] sm:$0xff] }
 0xa2c   :  { %26532 = vmatpush.bf16.msrb.mxu1 %v40147_v3 }
 0xa2d   :  { %26558 = vmatpush.bf16.msrb.mxu3 %v40163_v4  ;;  %v26294_v29 = vpop.f32.mrf.mxu2 }
 0xa2e   :  { %26520 = vmatpush.bf16.msrb.mxu0 %v40138_v7  ;;  %v350_v29 = vld [vmem:[%s49652_s0 + $0xa48] sm:$0xff] }
 0xa2f   :  { %26546 = vmatpush.bf16.msrb.mxu2 %v40154_v8  ;;  %v26307_v32 = vpop.f32.mrf.mxu3  ;;  %v688_v35 = vpack.c.bf16 %v350_v29, %v350_v29  ;;  %v40234_v29 = vld [vmem:[%s49651_s1 + $0x5420] sm:$0xff] }
 0xa30   :  { %26533 = vmatpush.bf16.msrb.mxu1 %v40146_v11  ;;  %v40184_v11 = vld [vmem:[%s49651_s1 + $0x5290] sm:$0xff]  ;;  %v689_v32 = vpack.c.bf16 %v351_v24, %v351_v24 }
 0xa31   :  { %26559 = vmatpush.bf16.msrb.mxu3 %v40162_v12  ;;  %v40240_v24 = vld [vmem:[%s49651_s1 + $0x5450] sm:$0xff] }
 0xa32   :  { %26521 = vmatpush.bf16.msrb.mxu0 %v40137_v13  ;;  %v40176_v13 = vld [vmem:[%s49651_s1 + $0x5250] sm:$0xff] }
 0xa33   :  { %26547 = vmatpush.bf16.msrb.mxu2 %v40153_v14  ;;  %v40192_v14 = vld [vmem:[%s49651_s1 + $0x52d0] sm:$0xff] }
 0xa34   :  { %26534 = vmatpush.bf16.msrb.mxu1 %v40145_v17 }
 0xa35   :  { %26560 = vmatpush.bf16.msrb.mxu3 %v40161_v18  ;;  %v40175_v18 = vld [vmem:[%s49651_s1 + $0x5248] sm:$0xff] }
 0xa36   :  { %26522 = vmatpush.bf16.msrb.mxu0 %v40136_v22  ;;  %v40182_v22 = vld [vmem:[%s49651_s1 + $0x5280] sm:$0xff] }
 0xa37   :  { %26548 = vmatpush.bf16.msrb.mxu2 %v40152_v23  ;;  %v349_v23 = vld [vmem:[%s49652_s0 + $0xa40] sm:$0xff] }
 0xa38   :  { %26535 = vmatpush.bf16.msrb.mxu1 %v40144_v25  ;;  %v40205_v25 = vld [vmem:[%s49651_s1 + $0x5338] sm:$0xff] }
 0xa39   :  { %26561 = vmatpush.bf16.msrb.mxu3 %v40160_v26  ;;  %v40221_v26 = vld [vmem:[%s49651_s1 + $0x53b8] sm:$0xff] }
 0xa3a   :  { %26523 = vmatpush.bf16.msrb.mxu0 %v40135_v27  ;;  %v40174_v27 = vld [vmem:[%s49651_s1 + $0x5240] sm:$0xff] }
 0xa3b   :  { %26549 = vmatpush.bf16.msrb.mxu2 %v40151_v28  ;;  %v40190_v28 = vld [vmem:[%s49651_s1 + $0x52c0] sm:$0xff] }
 0xa3c   :  { %26536 = vmatpush.bf16.msrb.mxu1 %v40143_v30  ;;  %v352_v30 = vld [vmem:[%s49652_s0 + $0xa58] sm:$0xff] }
 0xa3d   :  { %26562 = vmatpush.bf16.msrb.mxu3 %v40159_v31  ;;  %v687_v31 = vpack.c.bf16 %v349_v23, %v349_v23  ;;  %v690_v36 = vpack.c.bf16 %v352_v30, %v352_v30  ;;  %v40236_v23 = vld [vmem:[%s49651_s1 + $0x5430] sm:$0xff] }
 0xa3e   :  { %26524 = vmatpush.bf16.msrb.mxu0 %v40134_v33  ;;  %v26318_v57 = vpop.f32.mrf.mxu0  ;;  %v40213_v33 = vld [vmem:[%s49651_s1 + $0x5378] sm:$0xff] }
 0xa3f   :  { %26550 = vmatpush.bf16.msrb.mxu2 %v40150_v34  ;;  %v26319_v58 = vadd.f32 %v26318_v57, %v49307_v21  ;;  %v40166_v21 = vld [vmem:[%s49651_s1 + $0x5200] sm:$0xff]  ;;  %v40229_v34 = vld [vmem:[%s49651_s1 + $0x53f8] sm:$0xff] }
 0xa40   :  { %26537 = vmatpush.bf16.msrb.mxu1 %v40142_v39  ;;  %v26331_v61 = vpop.f32.mrf.mxu1  ;;  %v40212_v39 = vld [vmem:[%s49651_s1 + $0x5370] sm:$0xff]  ;;  %v40209_v57 = vld [vmem:[%s49651_s1 + $0x5358] sm:$0xff] }
 0xa41   :  { %26563 = vmatpush.bf16.msrb.mxu3 %v40158_v40  ;;  %26525 = vmatmul.bf16.vlgmr.msrb.gmra.mxu0 %v683_v43  ;;  %v26332_v62 = vadd.f32 %v26331_v61, %v26319_v58  ;;  %v40228_v40 = vld [vmem:[%s49651_s1 + $0x53f0] sm:$0xff]  ;;  %v40211_v43 = vld [vmem:[%s49651_s1 + $0x5368] sm:$0xff]  ;;  %v40225_v58 = vld [vmem:[%s49651_s1 + $0x53d8] sm:$0xff] }
 0xa42   :  { %26569 = vmatpush.bf16.msra.mxu0 %v40173_v37  ;;  %26551 = vmatmul.bf16.vlgmr.msrb.gmra.mxu2 %v685_v44  ;;  %v40204_v37 = vld [vmem:[%s49651_s1 + $0x5330] sm:$0xff]  ;;  %v40227_v44 = vld [vmem:[%s49651_s1 + $0x53e8] sm:$0xff] }
 0xa43   :  { %26595 = vmatpush.bf16.msra.mxu2 %v40189_v38  ;;  %26538 = vmatmul.bf16.vlgmr.msrb.gmra.mxu1 %v684_v47  ;;  %v40220_v38 = vld [vmem:[%s49651_s1 + $0x53b0] sm:$0xff]  ;;  %v40202_v47 = vld [vmem:[%s49651_s1 + $0x5320] sm:$0xff] }
 0xa44   :  { %26582 = vmatpush.bf16.msra.mxu1 %v40181_v45  ;;  %26564 = vmatmul.bf16.vlgmr.msrb.gmra.mxu3 %v686_v48  ;;  %v40218_v48 = vld [vmem:[%s49651_s1 + $0x53a0] sm:$0xff] }
 0xa45   :  { %26608 = vmatpush.bf16.msra.mxu3 %v40197_v46  ;;  %v26344_v3 = vpop.f32.mrf.mxu2 }
 0xa46   :  { %26570 = vmatpush.bf16.msra.mxu0 %v40172_v49  ;;  %v26345_v4 = vadd.f32 %v26344_v3, %v26332_v62  ;;  %v26320_v8 = vpop.f32.mrf.mxu0  ;;  %v40200_v62 = vld [vmem:[%s49651_s1 + $0x5310] sm:$0xff]  ;;  %v40199_v3 = vld [vmem:[%s49651_s1 + $0x5308] sm:$0xff] }
 0xa47   :  { %26596 = vmatpush.bf16.msra.mxu2 %v40188_v50  ;;  %v26357_v7 = vpop.f32.mrf.mxu3 }
 0xa48   :  { %26583 = vmatpush.bf16.msra.mxu1 %v40180_v51  ;;  %v49418_v9 = vadd.f32 %v26357_v7, %v26345_v4  ;;  %v26333_v12 = vpop.f32.mrf.mxu1  ;;  %v40210_v51 = vld [vmem:[%s49651_s1 + $0x5360] sm:$0xff]  ;;  %v40215_v4 = vld [vmem:[%s49651_s1 + $0x5388] sm:$0xff] }
 0xa49   :  { %26609 = vmatpush.bf16.msra.mxu3 %v40196_v52  ;;  %v40226_v52 = vld [vmem:[%s49651_s1 + $0x53e0] sm:$0xff]  ;;  %v40223_v7 = vld [vmem:[%s49651_s1 + $0x53c8] sm:$0xff]  ;;  %v355_v12 = vld [vmem:[%s49652_s0 + $0xa70] sm:$0xff] }
 0xa4a   :  { %26571 = vmatpush.bf16.msra.mxu0 %v40171_v53  ;;  %v40201_v53 = vld [vmem:[%s49651_s1 + $0x5318] sm:$0xff] }
 0xa4b   :  { %26597 = vmatpush.bf16.msra.mxu2 %v40187_v54  ;;  %v40217_v54 = vld [vmem:[%s49651_s1 + $0x5398] sm:$0xff] }
 0xa4c   :  { %26584 = vmatpush.bf16.msra.mxu1 %v40179_v55 }
 0xa4d   :  { %26610 = vmatpush.bf16.msra.mxu3 %v40195_v56  ;;  %v26346_v17 = vpop.f32.mrf.mxu2 }
 0xa4e   :  { %26572 = vmatpush.bf16.msra.mxu0 %v40170_v59  ;;  %v356_v17 = vld [vmem:[%s49652_s0 + $0xa78] sm:$0xff] }
 0xa4f   :  { %26598 = vmatpush.bf16.msra.mxu2 %v40186_v60  ;;  %v26359_v20 = vpop.f32.mrf.mxu3 }
 0xa50   :  { %26585 = vmatpush.bf16.msra.mxu1 %v40178_v63  ;;  %v40216_v63 = vld [vmem:[%s49651_s1 + $0x5390] sm:$0xff]  ;;  %v40241_v20 = vld [vmem:[%s49651_s1 + $0x5458] sm:$0xff] }
 0xa51   :  { %26611 = vmatpush.bf16.msra.mxu3 %v40194_v0 }
 0xa52   :  { %26573 = vmatpush.bf16.msra.mxu0 %v40169_v1  ;;  %v40208_v1 = vld [vmem:[%s49651_s1 + $0x5350] sm:$0xff] }
 0xa53   :  { %26599 = vmatpush.bf16.msra.mxu2 %v40185_v2  ;;  %v40224_v2 = vld [vmem:[%s49651_s1 + $0x53d0] sm:$0xff] }
 0xa54   :  { %26586 = vmatpush.bf16.msra.mxu1 %v40177_v5 }
 0xa55   :  { %26612 = vmatpush.bf16.msra.mxu3 %v40193_v6  ;;  %v40207_v6 = vld [vmem:[%s49651_s1 + $0x5348] sm:$0xff] }
 0xa56   :  { %26574 = vmatpush.bf16.msra.mxu0 %v40168_v10  ;;  %v40214_v10 = vld [vmem:[%s49651_s1 + $0x5380] sm:$0xff] }
 0xa57   :  { %26600 = vmatpush.bf16.msra.mxu2 %v40184_v11  ;;  %v353_v11 = vld [vmem:[%s49652_s0 + $0xa60] sm:$0xff] }
 0xa58   :  { %26587 = vmatpush.bf16.msra.mxu1 %v40176_v13  ;;  %v40237_v13 = vld [vmem:[%s49651_s1 + $0x5438] sm:$0xff] }
 0xa59   :  { %26613 = vmatpush.bf16.msra.mxu3 %v40192_v14  ;;  %v40206_v14 = vld [vmem:[%s49651_s1 + $0x5340] sm:$0xff] }
 0xa5a   :  { %26575 = vmatpush.bf16.msra.mxu0 %v40167_v15  ;;  %v40222_v15 = vld [vmem:[%s49651_s1 + $0x53c0] sm:$0xff] }
 0xa5b   :  { %26601 = vmatpush.bf16.msra.mxu2 %v40183_v16  ;;  %v354_v16 = vld [vmem:[%s49652_s0 + $0xa68] sm:$0xff] }
 0xa5c   :  { %26588 = vmatpush.bf16.msra.mxu1 %v40175_v18  ;;  %v691_v18 = vpack.c.bf16 %v353_v11, %v353_v11 }
 0xa5d   :  { %26614 = vmatpush.bf16.msra.mxu3 %v40191_v19  ;;  %v693_v19 = vpack.c.bf16 %v355_v12, %v355_v12 }
 0xa5e   :  { %26576 = vmatpush.bf16.msra.mxu0 %v40166_v21  ;;  %v26370_v45 = vpop.f32.mrf.mxu0  ;;  %v692_v21 = vpack.c.bf16 %v354_v16, %v354_v16 }
 0xa5f   :  { %26602 = vmatpush.bf16.msra.mxu2 %v40182_v22  ;;  %v26371_v46 = vadd.f32 %v26370_v45, %v49418_v9  ;;  %v40198_v9 = vld [vmem:[%s49651_s1 + $0x5300] sm:$0xff]  ;;  %v694_v22 = vpack.c.bf16 %v356_v17, %v356_v17 }
 0xa60   :  { %26589 = vmatpush.bf16.msra.mxu1 %v40174_v27  ;;  %v26383_v49 = vpop.f32.mrf.mxu1  ;;  %v40239_v27 = vld [vmem:[%s49651_s1 + $0x5448] sm:$0xff] }
 0xa61   :  { %26615 = vmatpush.bf16.msra.mxu3 %v40190_v28  ;;  %26577 = vmatmul.bf16.vlgmr.msra.gmra.mxu0 %v687_v31  ;;  %v26384_v50 = vadd.f32 %v26383_v49, %v26371_v46  ;;  %v40230_v46 = vld [vmem:[%s49651_s1 + $0x5400] sm:$0xff] }
 0xa62   :  { %26621 = vmatpush.bf16.msrb.mxu0 %v40205_v25  ;;  %26603 = vmatmul.bf16.vlgmr.msra.gmra.mxu2 %v689_v32  ;;  %v40235_v25 = vld [vmem:[%s49651_s1 + $0x5428] sm:$0xff]  ;;  %v40238_v32 = vld [vmem:[%s49651_s1 + $0x5440] sm:$0xff] }
 0xa63   :  { %26647 = vmatpush.bf16.msrb.mxu2 %v40221_v26  ;;  %26590 = vmatmul.bf16.vlgmr.msra.gmra.mxu1 %v688_v35  ;;  %v358_v35 = vld [vmem:[%s49652_s0 + $0xa88] sm:$0xff] }
 0xa64   :  { %26634 = vmatpush.bf16.msrb.mxu1 %v40213_v33  ;;  %26616 = vmatmul.bf16.vlgmr.msra.gmra.mxu3 %v690_v36  ;;  %v40233_v33 = vld [vmem:[%s49651_s1 + $0x5418] sm:$0xff] }
 0xa65   :  { %26660 = vmatpush.bf16.msrb.mxu3 %v40229_v34  ;;  %v26396_v55 = vpop.f32.mrf.mxu2 }
 0xa66   :  { %26622 = vmatpush.bf16.msrb.mxu0 %v40204_v37  ;;  %v26397_v56 = vadd.f32 %v26396_v55, %v26384_v50  ;;  %v26372_v60 = vpop.f32.mrf.mxu0 }
 0xa67   :  { %26648 = vmatpush.bf16.msrb.mxu2 %v40220_v38  ;;  %v26409_v59 = vpop.f32.mrf.mxu3 }
 0xa68   :  { %26635 = vmatpush.bf16.msrb.mxu1 %v40212_v39  ;;  %v26410_v61 = vadd.f32 %v26409_v59, %v26397_v56  ;;  %v26385_v0 = vpop.f32.mrf.mxu1 }
 0xa69   :  { %26661 = vmatpush.bf16.msrb.mxu3 %v40228_v40  ;;  %v696_v40 = vpack.c.bf16 %v358_v35, %v358_v35 }
 0xa6a   :  { %26623 = vmatpush.bf16.msrb.mxu0 %v40203_v41  ;;  %v40232_v41 = vld [vmem:[%s49651_s1 + $0x5410] sm:$0xff] }
 0xa6b   :  { %26649 = vmatpush.bf16.msrb.mxu2 %v40219_v42 }
 0xa6c   :  { %26636 = vmatpush.bf16.msrb.mxu1 %v40211_v43  ;;  %v40231_v43 = vld [vmem:[%s49651_s1 + $0x5408] sm:$0xff] }
 0xa6d   :  { %26662 = vmatpush.bf16.msrb.mxu3 %v40227_v44  ;;  %v26398_v5 = vpop.f32.mrf.mxu2 }
 0xa6e   :  { %26624 = vmatpush.bf16.msrb.mxu0 %v40202_v47  ;;  %v357_v47 = vld [vmem:[%s49652_s0 + $0xa80] sm:$0xff] }
 0xa6f   :  { %26650 = vmatpush.bf16.msrb.mxu2 %v40218_v48  ;;  %v26411_v8 = vpop.f32.mrf.mxu3  ;;  %v695_v48 = vpack.c.bf16 %v357_v47, %v357_v47 }
 0xa70   :  { %26637 = vmatpush.bf16.msrb.mxu1 %v40210_v51 }
 0xa71   :  { %26663 = vmatpush.bf16.msrb.mxu3 %v40226_v52 }
 0xa72   :  { %26625 = vmatpush.bf16.msrb.mxu0 %v40201_v53 }
 0xa73   :  { %26651 = vmatpush.bf16.msrb.mxu2 %v40217_v54 }
 0xa74   :  { %26638 = vmatpush.bf16.msrb.mxu1 %v40209_v57 }
 0xa75   :  { %26664 = vmatpush.bf16.msrb.mxu3 %v40225_v58 }
 0xa76   :  { %26626 = vmatpush.bf16.msrb.mxu0 %v40200_v62 }
 0xa77   :  { %26652 = vmatpush.bf16.msrb.mxu2 %v40216_v63 }
 0xa78   :  { %26639 = vmatpush.bf16.msrb.mxu1 %v40208_v1 }
 0xa79   :  { %26665 = vmatpush.bf16.msrb.mxu3 %v40224_v2 }
 0xa7a   :  { %26627 = vmatpush.bf16.msrb.mxu0 %v40199_v3 }
 0xa7b   :  { %26653 = vmatpush.bf16.msrb.mxu2 %v40215_v4 }
 0xa7c   :  { %26640 = vmatpush.bf16.msrb.mxu1 %v40207_v6 }
 0xa7d   :  { %26666 = vmatpush.bf16.msrb.mxu3 %v40223_v7 }
 0xa7e   :  { %26628 = vmatpush.bf16.msrb.mxu0 %v40198_v9  ;;  %v26422_v26 = vpop.f32.mrf.mxu0 }
 0xa7f   :  { %26654 = vmatpush.bf16.msrb.mxu2 %v40214_v10  ;;  %v26423_v28 = vadd.f32 %v26422_v26, %v26410_v61  ;;  %v26700_v26 = vld [vmem:[%s49655_s3] sm:$0xff] }
 0xa80   :  { %26641 = vmatpush.bf16.msrb.mxu1 %v40206_v14  ;;  %v26435_v30 = vpop.f32.mrf.mxu1  ;;  %v26707_v14 = vld [vmem:[%s49655_s3 + $0x38] sm:$0xff] }
 0xa81   :  { %26667 = vmatpush.bf16.msrb.mxu3 %v40222_v15  ;;  %26629 = vmatmul.bf16.vlgmr.msrb.gmra.mxu0 %v691_v18  ;;  %v26436_v31 = vadd.f32 %v26435_v30, %v26423_v28  ;;  %v26706_v15 = vld [vmem:[%s49655_s3 + $0x30] sm:$0xff] }
 0xa82   :  { %26673 = vmatpush.bf16.msra.mxu0 %v40237_v13  ;;  %26655 = vmatmul.bf16.vlgmr.msrb.gmra.mxu2 %v693_v19  ;;  %v26705_v19 = vld [vmem:[%s49655_s3 + $0x28] sm:$0xff] }
 0xa83   :  { %26642 = vmatmul.bf16.vlgmr.msrb.gmra.mxu1 %v692_v21  ;;  %26723 = vmatpush.msra.mxu2 %v26707_v14  ;;  %v26703_v21 = vld [vmem:[%s49655_s3 + $0x18] sm:$0xff] }
 0xa84   :  { %26690 = vmatpush.bf16.msra.mxu1 %v40241_v20  ;;  %26668 = vmatmul.bf16.vlgmr.msrb.gmra.mxu3 %v694_v22  ;;  %v26704_v20 = vld [vmem:[%s49655_s3 + $0x20] sm:$0xff]  ;;  %v26702_v22 = vld [vmem:[%s49655_s3 + $0x10] sm:$0xff] }
 0xa85   :  { %v26448_v34 = vpop.f32.mrf.mxu2  ;;  %26724 = vmatpush.msra.mxu2 %v26706_v15 }
 0xa86   :  { %26674 = vmatpush.bf16.msra.mxu0 %v40236_v23  ;;  %v26449_v36 = vadd.f32 %v26448_v34, %v26436_v31  ;;  %v26424_v38 = vpop.f32.mrf.mxu0 }
 0xa87   :  { %v26461_v37 = vpop.f32.mrf.mxu3  ;;  %26725 = vmatpush.msra.mxu2 %v26705_v19 }
 0xa88   :  { %26691 = vmatpush.bf16.msra.mxu1 %v40240_v24  ;;  %v26462_v39 = vadd.f32 %v26461_v37, %v26449_v36  ;;  %v26437_v42 = vpop.f32.mrf.mxu1  ;;  %v26701_v24 = vld [vmem:[%s49655_s3 + $0x8] sm:$0xff] }
 0xa89   :  { %26726 = vmatpush.msra.mxu2 %v26704_v20 }
 0xa8a   :  { %26675 = vmatpush.bf16.msra.mxu0 %v40235_v25 }
 0xa8b   :  { %26727 = vmatpush.msra.mxu2 %v26703_v21 }
 0xa8c   :  { %26692 = vmatpush.bf16.msra.mxu1 %v40239_v27 }
 0xa8d   :  { %v26450_v44 = vpop.f32.mrf.mxu2  ;;  %26728 = vmatpush.msra.mxu2 %v26702_v22 }
 0xa8e   :  { %26676 = vmatpush.bf16.msra.mxu0 %v40234_v29 }
 0xa8f   :  { %v26463_v45 = vpop.f32.mrf.mxu3  ;;  %26729 = vmatpush.msra.mxu2 %v26701_v24 }
 0xa90   :  { %26693 = vmatpush.bf16.msra.mxu1 %v40238_v32 }
 0xa91   :  { %26730 = vmatpush.msra.mxu2 %v26700_v26 }
 0xa92   :  { %26677 = vmatpush.bf16.msra.mxu0 %v40233_v33 }
 0xa93   :  { %37540 = vmatmul.msk.bf16.vlgmr.msra.gmra.mxu1 %vm22301_vm0, %v696_v40 }
 0xa96   :  { %26678 = vmatpush.bf16.msra.mxu0 %v40232_v41 }
 0xa9a   :  { %26679 = vmatpush.bf16.msra.mxu0 %v40231_v43 }
 0xa9e   :  { %26680 = vmatpush.bf16.msra.mxu0 %v40230_v46  ;;  %v26474_v49 = vpop.f32.mrf.mxu0 }
 0xa9f   :  { %v26475_v50 = vadd.f32 %v26474_v49, %v26462_v39 }
 0xaa0   :  { %v26487_v51 = vpop.f32.mrf.mxu1 }
 0xaa1   :  { %26681 = vmatmul.bf16.vlgmr.msra.gmra.mxu0 %v695_v48  ;;  %v26488_v52 = vadd.f32 %v26487_v51, %v26475_v50  ;;  %v40243_v48 = vld [vmem:[%s49654_s4] ss:$0 sm:$0xff] }
 0xaa5   :  { %v26500_v53 = vpop.f32.mrf.mxu2 }
 0xaa6   :  { %v26501_v54 = vadd.f32 %v26500_v53, %v26488_v52  ;;  %v26476_v56 = vpop.f32.mrf.mxu0 }
 0xaa7   :  { %v26513_v55 = vpop.f32.mrf.mxu3 }
 0xaa8   :  { %v26514_v57 = vadd.f32 %v26513_v55, %v26501_v54  ;;  %v26489_v58 = vpop.f32.mrf.mxu1 }
 0xaad   :  { %v26502_v59 = vpop.f32.mrf.mxu2 }
 0xaaf   :  { %v26515_v60 = vpop.f32.mrf.mxu3 }
 0xabe   :  { %v26526_v61 = vpop.f32.mrf.mxu0 }
 0xabf   :  { %v26527_v62 = vadd.f32 %v26526_v61, %v26514_v57 }
 0xac0   :  { %v26539_v63 = vpop.f32.mrf.mxu1 }
 0xac1   :  { %v26540_v0 = vadd.f32 %v26539_v63, %v26527_v62 }
 0xac5   :  { %v26552_v1 = vpop.f32.mrf.mxu2 }
 0xac6   :  { %v26553_v2 = vadd.f32 %v26552_v1, %v26540_v0  ;;  %v26528_v4 = vpop.f32.mrf.mxu0 }
 0xac7   :  { %v26565_v3 = vpop.f32.mrf.mxu3 }
 0xac8   :  { %v26566_v5 = vadd.f32 %v26565_v3, %v26553_v2  ;;  %v26541_v6 = vpop.f32.mrf.mxu1 }
 0xacd   :  { %v26554_v7 = vpop.f32.mrf.mxu2 }
 0xacf   :  { %v26567_v8 = vpop.f32.mrf.mxu3 }
 0xade   :  { %v26578_v9 = vpop.f32.mrf.mxu0 }
 0xadf   :  { %v26579_v28 = vadd.f32 %v26578_v9, %v26566_v5 }
 0xae0   :  { %v26591_v10 = vpop.f32.mrf.mxu1 }
 0xae1   :  { %v26592_v32 = vadd.f32 %v26591_v10, %v26579_v28 }
 0xae5   :  { %v26604_v11 = vpop.f32.mrf.mxu2 }
 0xae6   :  { %v26580_v13 = vpop.f32.mrf.mxu0  ;;  %v26605_v33 = vadd.f32 %v26604_v11, %v26592_v32 }
 0xae7   :  { %v26617_v12 = vpop.f32.mrf.mxu3 }
 0xae8   :  { %v26593_v16 = vpop.f32.mrf.mxu1  ;;  %v26618_v36 = vadd.f32 %v26617_v12, %v26605_v33 }
 0xaed   :  { %v26606_v17 = vpop.f32.mrf.mxu2 }
 0xaef   :  { %v26619_v18 = vpop.f32.mrf.mxu3 }
 0xafe   :  { %v26630_v23 = vpop.f32.mrf.mxu0 }
 0xaff   :  { %v26631_v38 = vadd.f32 %v26630_v23, %v26618_v36 }
 0xb00   :  { %v26643_v25 = vpop.f32.mrf.mxu1 }
 0xb01   :  { %v26644_v39 = vadd.f32 %v26643_v25, %v26631_v38 }
 0xb05   :  { %v26656_v27 = vpop.f32.mrf.mxu2 }
 0xb06   :  { %v26632_v30 = vpop.f32.mrf.mxu0  ;;  %v26657_v40 = vadd.f32 %v26656_v27, %v26644_v39 }
 0xb07   :  { %v26669_v29 = vpop.f32.mrf.mxu3 }
 0xb08   :  { %v26645_v31 = vpop.f32.mrf.mxu1  ;;  %v26670_v42 = vadd.f32 %v26669_v29, %v26657_v40 }
 0xb0d   :  { %v26658_v34 = vpop.f32.mrf.mxu2 }
 0xb0f   :  { %v26671_v35 = vpop.f32.mrf.mxu3 }
 0xb10   :  { %v26695_v37 = vpop.f32.mrf.mxu1 }
 0xb18   :  { %v26697_v41 = vpop.f32.mrf.mxu1 }
 0xb1e   :  { %v26682_v43 = vpop.f32.mrf.mxu0 }
 0xb1f   :  { %v26683_v44 = vadd.f32 %v26682_v43, %v26670_v42 }
 0xb21   :  { %v26696_v45 = vadd.f32 %v26695_v37, %v26683_v44 }
 0xb23   :  { %v26699_v46 = vmax.f32 %v26696_v45, 0.0 }
 0xb25   :  { %37541 = vmatmul.msk.f32.vlgmr.msra.gmra.mxu2 %vm22301_vm0, %v26699_v46 }
 0xb26   :  { %v26684_v47 = vpop.f32.mrf.mxu0 }
 0xba8   :  { %v26732_v49 = vpop.f32.mrf.mxu2 }
 0xba9   :  { %v26733_v50 = vadd.f32 %v40243_v48, %v26732_v49 }
 0xbab   :  { %26735 = vst [vmem:[%s49656_s5] sm:$0xff] %v26733_v50 }

</bundles_post_ra>
